<compile_context>
chip_gen: v7x
topology: tpu7x:2x2x1
jax: 0.10.0
libtpu: 0.0.40
codegen_flags: <defaults>
</compile_context>

<pallas_src>
import functools

import jax
import jax.numpy as jnp
import numpy as np
from jax.experimental import pallas as pl
from jax.experimental.pallas import tpu as pltpu

SAMPLE_RATE = 48000
N_FFT = 3840
HOP = 960
N_MELS = 80
EPS = 1e-5
N_FREQS = N_FFT // 2 + 1  # 1921 (onesided)
NM_PAD = 128              # lane-dense mel width (>= N_MELS, multiple of 128)
TF = 512                  # frequency tile (lane dim of the power block)


def _round_up(x, m):
    return -(-x // m) * m


# --------------------------------------------------------------------------
# Parameter construction (matches torchaudio defaults: periodic hann window,
# power=2.0, center=True, pad_mode=reflect, mel_scale="htk", norm=None,
# f_min=0, f_max=sr/2).  All host-side numpy, done once.
# --------------------------------------------------------------------------
def _hz_to_mel(f):
    return 2595.0 * np.log10(1.0 + f / 700.0)


def _mel_to_hz(m):
    return 700.0 * (10.0 ** (m / 2595.0) - 1.0)


def make_mel_filterbank(n_freqs, n_mels, sample_rate):
    f_min, f_max = 0.0, sample_rate / 2.0
    all_freqs = np.linspace(0.0, sample_rate / 2.0, n_freqs)
    m_pts = np.linspace(_hz_to_mel(f_min), _hz_to_mel(f_max), n_mels + 2)
    f_pts = _mel_to_hz(m_pts)
    f_diff = f_pts[1:] - f_pts[:-1]
    slopes = f_pts[None, :] - all_freqs[:, None]          # (n_freqs, n_mels+2)
    down = -slopes[:, :-2] / f_diff[:-1]
    up = slopes[:, 2:] / f_diff[1:]
    fb = np.maximum(0.0, np.minimum(down, up))            # (n_freqs, n_mels)
    return fb.astype(np.float32)


def make_windowed_dft(n_fft, n_freqs):
    n = np.arange(n_fft)
    window = 0.5 - 0.5 * np.cos(2.0 * np.pi * n / n_fft)  # periodic hann
    # (k*f) mod n_fft stays small -> accurate float32 angles.
    kf = (n[:, None].astype(np.int64) * np.arange(n_freqs)[None, :]) % n_fft
    ang = 2.0 * np.pi * kf / n_fft
    cosm = (window[:, None] * np.cos(ang)).astype(np.float32)  # (n_fft, n_freqs)
    sinm = (window[:, None] * np.sin(ang)).astype(np.float32)
    return cosm, sinm


def make_logmel_constants(tf=TF):
    """One-time host-side construction of the packed DFT and mel filterbank.

    Returns (dft, fb) device constants:
      dft: (N_FFT, 2*F_pad) bf16; per frequency tile f the columns
           [f*2*tf : (f+1)*2*tf] are [cos tile f | sin tile f].
      fb : (F_pad, NM_PAD) bf16 mel filterbank, zero-padded.
    """
    cosm, sinm = make_windowed_dft(N_FFT, N_FREQS)
    fb = make_mel_filterbank(N_FREQS, N_MELS, SAMPLE_RATE)
    f_pad = _round_up(N_FREQS, tf)
    nf_tiles = f_pad // tf
    cos_p = np.pad(cosm, ((0, 0), (0, f_pad - N_FREQS)))
    sin_p = np.pad(sinm, ((0, 0), (0, f_pad - N_FREQS)))
    dft = np.concatenate(
        [cos_p.reshape(N_FFT, nf_tiles, tf),
         sin_p.reshape(N_FFT, nf_tiles, tf)], axis=-1,
    ).reshape(N_FFT, 2 * f_pad)
    fb_p = np.pad(fb, ((0, f_pad - N_FREQS), (0, NM_PAD - N_MELS)))
    dft_dev = jnp.asarray(dft, dtype=jnp.bfloat16)   # one-time device constants
    fb_dev = jnp.asarray(fb_p, dtype=jnp.bfloat16)
    return dft_dev, fb_dev


def _tile_config():
    """(tm_max, vmem_limit_bytes) sized for this TPU generation's VMEM."""
    kind = ""
    try:
        kind = jax.devices()[0].device_kind.lower()
    except Exception:
        pass
    if ("v5" in kind) or ("v6" in kind):       # 128 MiB physical VMEM
        return 2048, 96 * 1024 * 1024
    return 1024, 48 * 1024 * 1024              # v7x-safe (64 MiB physical per TC)


# --------------------------------------------------------------------------
# Pallas kernel
# grid = (m_tiles, f_tiles); the output block is resident across the f axis
# and used directly as the mel accumulator.
# --------------------------------------------------------------------------
def logmel_kernel(frames_ref, dft_ref, fb_ref, out_ref, *, tf):
    f = pl.program_id(1)

    @pl.when(f == 0)
    def _():
        out_ref[...] = jnp.zeros_like(out_ref)

    # (tm, n_fft) bf16 @ (n_fft, 2*tf) bf16 -> f32 [re | im] for tf freq bins.
    acc = jnp.dot(frames_ref[...], dft_ref[...],
                  preferred_element_type=jnp.float32)
    re = acc[:, :tf]
    im = acc[:, tf:]
    power = (re * re + im * im).astype(jnp.bfloat16)       # (tm, tf)
    # bf16 x bf16 mel dot (full-rate MXU), f32 accumulate into out_ref.
    out_ref[...] += jnp.dot(power, fb_ref[...],
                            preferred_element_type=jnp.float32)

    @pl.when(f == pl.num_programs(1) - 1)
    def _():
        out_ref[...] = jnp.log(out_ref[...] + EPS)


def log_mel_spectrogram(x, dft, fb, *, tf=TF, tm_max=None, vmem_limit_bytes=None):
    """x: (B, T) float32 -> (B, n_mels, T // HOP) float32 (frame 0 dropped)."""
    B, T = x.shape
    pad = N_FFT // 2
    if tm_max is None or vmem_limit_bytes is None:
        auto_tm, auto_vmem = _tile_config()
        tm_max = tm_max or auto_tm
        vmem_limit_bytes = vmem_limit_bytes or auto_vmem

    # Framing glue in plain JAX (reflect pad + strided gather), in bf16 so the
    # materialized frame matrix is half the HBM traffic and no extra cast pass.
    # TODO(synk): exploit N_FFT == 4*HOP and DMA non-duplicated hop chunks
    # in-kernel (4 shifted sub-dots) to remove the 4x frame duplication.
    xp = jnp.pad(x, ((0, 0), (pad, pad)), mode="reflect").astype(jnp.bfloat16)
    n_frames = 1 + (T + 2 * pad - N_FFT) // HOP
    idx = jnp.arange(n_frames)[:, None] * HOP + jnp.arange(N_FFT)[None, :]
    frames = xp[:, idx].reshape(B * n_frames, N_FFT)       # (M, n_fft) bf16

    M = B * n_frames
    tm = min(tm_max, _round_up(M, 8))
    if M > 8:                                  # >=2 row tiles -> megacore on v7x
        tm = min(tm, _round_up(-(-M // 2), 8))
    M_pad = _round_up(M, tm)
    frames = jnp.pad(frames, ((0, M_pad - M), (0, 0)))

    nf_tiles = dft.shape[1] // (2 * tf)
    m_tiles = M_pad // tm

    out = pl.pallas_call(
        functools.partial(logmel_kernel, tf=tf),
        out_shape=jax.ShapeDtypeStruct((M_pad, NM_PAD), jnp.float32),
        grid_spec=pltpu.PrefetchScalarGridSpec(
            num_scalar_prefetch=0,
            grid=(m_tiles, nf_tiles),
            in_specs=[
                # Frame tile: block index constant over f -> DMA'd once per m.
                pl.BlockSpec((tm, N_FFT), lambda m, f: (m, 0)),
                # Fused [cos | sin] DFT tile, streamed over the f axis.
                pl.BlockSpec((N_FFT, 2 * tf), lambda m, f: (0, f)),
                # Mel filterbank slice for this frequency tile.
                pl.BlockSpec((tf, NM_PAD), lambda m, f: (f, 0)),
            ],
            # Output block constant over f -> resident accumulator.
            out_specs=pl.BlockSpec((tm, NM_PAD), lambda m, f: (m, 0)),
        ),
        compiler_params=pltpu.CompilerParams(
            dimension_semantics=("parallel", "arbitrary"),
            vmem_limit_bytes=vmem_limit_bytes),
    )(frames, dft, fb)

    mel = out[:M, :N_MELS].reshape(B, n_frames, N_MELS)
    mel = jnp.transpose(mel, (0, 2, 1))                    # (B, n_mels, n_frames)
    return mel[:, :, 1:]                                   # log already applied in-kernel


# --------------------------------------------------------------------------
# Pure-JAX f32 reference (same host-built matrices) for a correctness check.
# NOTE: parity with torchaudio itself (periodic Hann, HTK mel, norm=None,
# reflect pad) is by construction of make_windowed_dft / make_mel_filterbank.
# --------------------------------------------------------------------------
def log_mel_reference(x, cosm, sinm, fb):
    B, T = x.shape
    pad = N_FFT // 2
    xp = jnp.pad(x, ((0, 0), (pad, pad)), mode="reflect")
    n_frames = 1 + (T + 2 * pad - N_FFT) // HOP
    idx = jnp.arange(n_frames)[:, None] * HOP + jnp.arange(N_FFT)[None, :]
    frames = xp[:, idx]                                    # (B, n_frames, n_fft)
    hp = jax.lax.Precision.HIGHEST
    re = jnp.einsum("bfk,kn->bfn", frames, cosm, precision=hp)
    im = jnp.einsum("bfk,kn->bfn", frames, sinm, precision=hp)
    power = re * re + im * im                              # (B, n_frames, n_freqs)
    mel = jnp.einsum("bfn,nm->bfm", power, fb, precision=hp)
    mel = jnp.transpose(mel, (0, 2, 1))                    # (B, n_mels, n_frames)
    return jnp.log(mel[:, :, 1:] + EPS)


if __name__ == "__main__":
    B, T = 2, 4800  # 0.1 s of 48 kHz audio -> 6 STFT frames -> output (2, 80, 5)

    key = jax.random.PRNGKey(0)
    x = jax.random.normal(key, (B, T), dtype=jnp.float32)

    # One-time (module-init style) constants for the kernel.
    dft, fb_packed = make_logmel_constants()

    out = jax.block_until_ready(log_mel_spectrogram(x, dft, fb_packed))

    # f32 reference with the identical host-built window/DFT/filterbank.
    cosm, sinm = make_windowed_dft(N_FFT, N_FREQS)
    fb = make_mel_filterbank(N_FREQS, N_MELS, SAMPLE_RATE)
    ref = jax.block_until_ready(
        log_mel_reference(x, jnp.asarray(cosm), jnp.asarray(sinm), jnp.asarray(fb)))

    assert out.shape == (B, N_MELS, T // HOP), out.shape
    assert bool(jnp.all(jnp.isfinite(out)))
    np.testing.assert_allclose(np.asarray(out), np.asarray(ref),
                               rtol=5e-2, atol=5e-2)
    print("KERNEL_OK")
</pallas_src>

<mosaic_0001>
module attributes {stable_mosaic.version = 11 : i64} {
  func.func @logmel_kernel(%arg0: i32, %arg1: i32, %arg2: memref<8x3840xbf16, #tpu.memory_space<vmem>>, %arg3: memref<3840x1024xbf16, #tpu.memory_space<vmem>>, %arg4: memref<512x128xbf16, #tpu.memory_space<vmem>>, %arg5: memref<8x128xf32, #tpu.memory_space<vmem>>) attributes {dimension_semantics = [#tpu.dimension_semantics<parallel>, #tpu.dimension_semantics<arbitrary>], iteration_bounds = array<i64: 2, 4>, scalar_prefetch = 0 : i64, scratch_operands = 0 : i64, tpu.core_type = #tpu.core_type<tc>, window_params = [{transform_indices = @transform_0, window_bounds = array<i64: 8, 3840>}, {transform_indices = @transform_1, window_bounds = array<i64: 3840, 1024>}, {transform_indices = @transform_2, window_bounds = array<i64: 512, 128>}, {transform_indices = @transform_3, window_bounds = array<i64: 8, 128>}]} {
    %c0_i32 = arith.constant 0 : i32
    %0 = arith.cmpi eq, %arg1, %c0_i32 : i32
    %1 = arith.extui %0 : i1 to i32
    %c0_i32_0 = arith.constant 0 : i32
    %2 = arith.cmpi ne, %1, %c0_i32_0 : i32
    scf.if %2 {
      %cst_12 = arith.constant 0.000000e+00 : f32
      %20 = vector.broadcast %cst_12 : f32 to vector<8x128xf32>
      %c0_13 = arith.constant 0 : index
      %c0_14 = arith.constant 0 : index
      %21 = vector.load %arg5[%c0_13, %c0_14] : memref<8x128xf32, #tpu.memory_space<vmem>>, vector<8x128xf32>
      tpu.vector_store %arg5[%c0_13, %c0_14], %20 {strides = array<i32>} : memref<8x128xf32, #tpu.memory_space<vmem>>, vector<8x128xf32>,
    } else {
    }
    %c0 = arith.constant 0 : index
    %c0_1 = arith.constant 0 : index
    %3 = vector.load %arg2[%c0, %c0_1] : memref<8x3840xbf16, #tpu.memory_space<vmem>>, vector<8x3840xbf16>
    %c0_2 = arith.constant 0 : index
    %c0_3 = arith.constant 0 : index
    %4 = vector.load %arg3[%c0_2, %c0_3] : memref<3840x1024xbf16, #tpu.memory_space<vmem>>, vector<3840x1024xbf16>
    %cst = arith.constant dense<0.000000e+00> : vector<8x1024xf32>
    %5 = tpu.matmul %3, %4, %cst {dimension_numbers = #tpu.dot_dimension_numbers<[1], [0], [0], [1], [0, 0, 1, 1], [], []>} : vector<8x3840xbf16>, vector<3840x1024xbf16>, vector<8x1024xf32> -> vector<8x1024xf32>
    %6 = vector.extract_strided_slice %5 {offsets = [0, 0], sizes = [8, 512], strides = [1, 1]} : vector<8x1024xf32> to vector<8x512xf32>
    %7 = vector.extract_strided_slice %5 {offsets = [0, 512], sizes = [8, 512], strides = [1, 1]} : vector<8x1024xf32> to vector<8x512xf32>
    %8 = arith.mulf %6, %6 : vector<8x512xf32>
    %9 = arith.mulf %7, %7 : vector<8x512xf32>
    %10 = arith.addf %8, %9 : vector<8x512xf32>
    %11 = arith.truncf %10 : vector<8x512xf32> to vector<8x512xbf16>
    %c0_4 = arith.constant 0 : index
    %c0_5 = arith.constant 0 : index
    %12 = vector.load %arg5[%c0_4, %c0_5] : memref<8x128xf32, #tpu.memory_space<vmem>>, vector<8x128xf32>
    %c0_6 = arith.constant 0 : index
    %c0_7 = arith.constant 0 : index
    %13 = vector.load %arg4[%c0_6, %c0_7] : memref<512x128xbf16, #tpu.memory_space<vmem>>, vector<512x128xbf16>
    %cst_8 = arith.constant dense<0.000000e+00> : vector<8x128xf32>
    %14 = tpu.matmul %11, %13, %cst_8 {dimension_numbers = #tpu.dot_dimension_numbers<[1], [0], [0], [1], [0, 0, 1, 1], [], []>} : vector<8x512xbf16>, vector<512x128xbf16>, vector<8x128xf32> -> vector<8x128xf32>
    %15 = arith.addf %12, %14 : vector<8x128xf32>
    %c0_9 = arith.constant 0 : index
    %c0_10 = arith.constant 0 : index
    %16 = vector.load %arg5[%c0_9, %c0_10] : memref<8x128xf32, #tpu.memory_space<vmem>>, vector<8x128xf32>
    tpu.vector_store %arg5[%c0_9, %c0_10], %15 {strides = array<i32>} : memref<8x128xf32, #tpu.memory_space<vmem>>, vector<8x128xf32>,
    %c3_i32 = arith.constant 3 : i32
    %17 = arith.cmpi eq, %arg1, %c3_i32 : i32
    %18 = arith.extui %17 : i1 to i32
    %c0_i32_11 = arith.constant 0 : i32
    %19 = arith.cmpi ne, %18, %c0_i32_11 : i32
    scf.if %19 {
      %c0_12 = arith.constant 0 : index
      %c0_13 = arith.constant 0 : index
      %20 = vector.load %arg5[%c0_12, %c0_13] : memref<8x128xf32, #tpu.memory_space<vmem>>, vector<8x128xf32>
      %cst_14 = arith.constant 9.99999974E-6 : f32
      %21 = vector.broadcast %cst_14 : f32 to vector<8x128xf32>
      %22 = arith.addf %20, %21 : vector<8x128xf32>
      %23 = math.log %22 : vector<8x128xf32>
      %c0_15 = arith.constant 0 : index
      %c0_16 = arith.constant 0 : index
      %24 = vector.load %arg5[%c0_15, %c0_16] : memref<8x128xf32, #tpu.memory_space<vmem>>, vector<8x128xf32>
      tpu.vector_store %arg5[%c0_15, %c0_16], %23 {strides = array<i32>} : memref<8x128xf32, #tpu.memory_space<vmem>>, vector<8x128xf32>,
    } else {
    }
    return
  }
  func.func @transform_0(%arg0: i32, %arg1: i32) -> (i32, i32) {
    %c0_i32 = arith.constant 0 : i32
    %c0_i32_0 = arith.constant 0 : i32
    return %arg0, %c0_i32 : i32, i32
  }
  func.func @transform_1(%arg0: i32, %arg1: i32) -> (i32, i32) {
    %c0_i32 = arith.constant 0 : i32
    %c0_i32_0 = arith.constant 0 : i32
    return %c0_i32, %arg1 : i32, i32
  }
  func.func @transform_2(%arg0: i32, %arg1: i32) -> (i32, i32) {
    %c0_i32 = arith.constant 0 : i32
    %c0_i32_0 = arith.constant 0 : i32
    return %arg1, %c0_i32 : i32, i32
  }
  func.func @transform_3(%arg0: i32, %arg1: i32) -> (i32, i32) {
    %c0_i32 = arith.constant 0 : i32
    %c0_i32_0 = arith.constant 0 : i32
    return %arg0, %c0_i32 : i32, i32
  }
}

</mosaic_0001>

<bundles_post_ra>
// kernel: tpu_custom_call.1
= control target key start
LH: loop header
LB: loop body
LE: loop exit
PB: predicated region body
PF: predicated region fallthrough
CT: control target
= control target key end

     0   :  { %s20201_s0 = inlined_call_operand.hbm [shape: bf16[16,3840], index: 0, kind: input, shape index: {}]   ;;  %s20202_s1 = inlined_call_operand.hbm [shape: bf16[3840,4096], index: 1, kind: input, shape index: {}]   ;;  %s20203_s2 = inlined_call_operand.hbm [shape: bf16[2048,128], index: 2, kind: input, shape index: {}]   ;;  %s20204_s3 = inlined_call_operand.hbm [shape: f32[16,128], index: 3, kind: output, shape index: {}]  }
   0x1   :  { %20218 = sst [smem:[#allocation20_spill]] %s20202_s1 }
   0x2   :  { %20219 = sst [smem:[#allocation21_spill]] %s20204_s3 }
   0x3   :  { %8 = vsyncpa [#allocation3], 0 }
   0x4   :  { %10 = vsyncpa [#allocation3 + $0x1], 0 }
   0x5   :  { %11 = vsyncpa [#allocation6], 0 }
   0x6   :  { %13 = vsyncpa [#allocation6 + $0x1], 0 }
   0x7   :  { %14 = vsyncpa [#allocation4], 0 }
   0x8   :  { %16 = vsyncpa [#allocation4 + $0x1], 0  ;;  %s17592_s12 = smov 0   ;;  %s17594_s13 = smov 0  }
   0x9   :  { %s17596_s14 = smov 0   ;;  %s17598_s15 = smov 0  }
   0xa   :  { %s17600_s16 = smov 0   ;;  %s17602_s17 = smov 0  }
   0xb   :  { %s17604_s18 = smov 0   ;;  %s17606_s19 = smov 0  }
   0xc   :  { %s17608_s20 = smov 0   ;;  %s17610_s21 = smov 0  }
   0xd   :  { %s17612_s22 = smov 0  }
   0xe LB: > { %20220 = sst [smem:[#allocation12_spill]] %s17528_s14  ;;  %p49_p0 = scmp.eq.s32.totalorder %s17560_s22, 0  ;;  %s17560_s22 = sphi %s17612_s22, %s22_s22   ;;  %s17556_s21 = sphi %s17610_s21, %s20255_s21   ;;  %s17552_s20 = sphi %s17608_s20, %s20261_s20   ;;  %s17548_s19 = sphi %s17606_s19, %s20253_s19   ;;  %s17544_s18 = sphi %s17604_s18, %s20260_s18   ;;  %s17540_s17 = sphi %s17602_s17, %s20252_s17   ;;  %s17536_s16 = sphi %s17600_s16, %s20259_s16   ;;  %s17532_s15 = sphi %s17598_s15, %s20258_s15   ;;  %s17528_s14 = sphi %s17596_s14, %s20250_s14   ;;  %s17524_s13 = sphi %s17594_s13, %s20257_s13   ;;  %s17520_s12 = sphi %s17592_s12, %s20256_s12  }
   0xf   : > { %20221 = sst [smem:[#allocation13_spill]] %s17540_s17  ;;  %s67_s23 = sadd.s32 1, %s17528_s14 }
  0x10   : > { %20222 = sst [smem:[#allocation14_spill]] %s17556_s21  ;;  %p74_p1 = scmp.ne.s32.totalorder %s17528_s14, %s17524_s13 }
  0x11   : > { %p20205_p2 = scmp.lt.s32.totalorder %s17560_s22, 8  ;;  %s175_s24 = sand.u32 1, %s17560_s22  }
  0x12   : > { %p76_p3 = por %p74_p1, %p49_p0  ;;  %s20206_s25 = sand.u32 1, %s17528_s14  }
  0x13   : > { %s16887_s26 = sshll.u32 %s17552_s20, 9  ;;  %s17159_s27 = smul.u32 15360, %s20206_s25 }
  0x14   : > { %s20223_s1 = sld [smem:[#allocation20_spill]]  ;;  %p17666_p4 = pnand %p20205_p2, %p76_p3 }
  0x15   : > { %s179_s5 = scalar_lea.vmem [#allocation5], %s17159_s27  ;;  %s17672_s7 = scalar_lea.sflag [#allocation6], %s175_s24 }
  0x16   : > { %s186_s6 = sshll.u32 %s179_s5, 4  ;;  %p20207_p6 = pneg %p17666_p4  ;;  %s17670_s6 = int_to_ptr.vmem [resolvable:$true] %s186_s6 }
  0x1a   : > { %s17662_s30 = scalar_lea.hbm %s20223_s1, %s16887_s26  ;;  %s17349_s11 = scalar_lea.hbm %s20223_s1, 983040 }
  0x1b   : > { %s17344_s8 = scalar_lea.hbm %s17662_s30, 245760  ;;  %p17350_p9 = scmp.lt.u32.totalorder %s17662_s30, %s20223_s1 }
  0x1c   : > { %p17345_p5 = scmp.ne.s32.totalorder %s17662_s30, %s17344_s8  ;;  %p17351_p10 = scmp.lt.u32.totalorder %s17349_s11, %s17344_s8 }
  0x1d   : > { %p17353_p12 = scmp.lt.u32.totalorder %s17344_s8, %s17662_s30 }
  0x1e   : > { %p17347_p7 = pnand %p20207_p6, %p17345_p5  ;;  %p17352_p11 = por %p17351_p10, %p17350_p9 }
  0x20   : > { %p17348_p8 = pneg %p17347_p7  ;;  %p17354_p13 = por %p17353_p12, %p17352_p11 }
  0x22   : > { %p17355_p1 = pnand %p17354_p13, %p17348_p8 }
  0x24   : > { %17358 = shalt.err (!%p17355_p1)
}
  0x25   : > { %s17359_s24 = scalar_lea.vmem %s17670_s6, 245760  ;;  %s17562_s27 = smov [#allocation5]  }
  0x26   : > { %p17360_p3 = scmp.ne.s32.totalorder %s17670_s6, %s17359_s24  ;;  %s17364_s29 = sshll.u32 %s17562_s27, 4  ;;  %s17365_s29 = int_to_ptr.vmem [resolvable:$false] %s17364_s29 }
  0x27   : > { %s17366_s5 = scalar_lea.vmem %s17365_s29, 491520  ;;  %p17367_p2 = scmp.lt.s32.totalorder %s17670_s6, %s17365_s29 }
  0x28   : > { %p17362_p5 = pnand %p17360_p3, %p20207_p6  ;;  %p17368_p9 = scmp.lt.s32.totalorder %s17366_s5, %s17359_s24 }
  0x2a   : > { %p17363_p7 = pneg %p17362_p5  ;;  %p17369_p10 = por %p17368_p9, %p17367_p2 }
  0x2c   : > { %p17370_p11 = pnand %p17369_p10, %p17363_p7 }
  0x2e   : > { %17373 = shalt.err (!%p17370_p11)
}
  0x2f   : > { %s17563_s8 = smov 2048   ;;  %s17564_s9 = smov 512  }
  0x30   : > { %s17565_s10 = smov 32   ;;  %p14896_p2 = scmp.ge.s32.totalorder %s17560_s22, 1 }
  0x31   : > { %17176 = dma.hbm_to_vmem [thread:$0]  (!%p17666_p4), %s17662_s30, 245760, %s17670_s6, %s17672_s7, %s17563_s8, %s17564_s9, %s17565_s10  }
  0x32   : > { %p215_p8 = scmp.lt.s32.totalorder %s17560_s22, 9  ;;  %s17707_s26 = sadd.s32 4294967295, %s17560_s22  }
  0x33   : > { %s14887_s28 = sadd.s32 4294967294, %s17560_s22   ;;  %s31_s24 = sadd.s32 1, %s17552_s20 }
  0x34   : > { %p17702_p12 = pnand %p14896_p2, %p215_p8  ;;  %p32_p13 = scmp.ge.s32.totalorder %s31_s24, 4 }
  0x35   : > { %s34_s27 = sadd.s32 1, %s17556_s21  ;;  %s41_s30 = sadd.s32 1, %s17540_s17 }
  0x36   : > { %s20225_s11 = scalar_select %p17702_p12, 1, 0 }
  0x37   : > { %p48_p1 = scmp.ne.s32.totalorder %s17540_s17, %s17536_s16  ;;  %s20263_s24 = smov (%p32_p13, %s31_s24), 0 }
  0x38   : > { %20226 = sst [smem:[#allocation15_spill]] %s20263_s24  ;;  %s20265_s27 = smov (!%p32_p13, %s34_s27), %s17556_s21 }
  0x39   : > { %p17723_p3 = por %p49_p0, %p48_p1  ;;  %p54_p5 = scmp.ne.s32.totalorder %s17536_s16, %s17532_s15 }
  0x3a   : > { %p36_p7 = scmp.ge.s32.totalorder %s20265_s27, 2  ;;  %p55_p9 = scmp.eq.s32.totalorder %s17707_s26, 0 }
  0x3b   : > { %s64_s29 = ssub.s32 %s17552_s20, %s20263_s24  ;;  %p80_p10 = scmp.ne.s32.totalorder %s17524_s13, %s17520_s12 }
  0x3c   : > { %s20267_s27 = smov (%p36_p7, %s20265_s27), 0  ;;  %p17739_p11 = por %p55_p9, %p54_p5 }
  0x3d   : > { %20228 = sst [smem:[#allocation16_spill]] %s20267_s27  ;;  %p65_p0 = scmp.eq.s32.totalorder %s64_s29, 0 }
  0x3e   : > { %s20229_s5 = scalar_select %p17739_p11, 1, 0 }
  0x3f   : > { %s38_s8 = ssub.s32 %s17556_s21, %s20267_s27  ;;  %p17745_p2 = por %p80_p10, %p55_p9 }
  0x40   : > { %p39_p8 = scmp.eq.s32.totalorder %s38_s8, 0  ;;  %p130_p13 = scmp.eq.s32.totalorder %s17707_s26, 7 }
  0x41   : > { %s20230_s9 = scalar_select %p17745_p2, 1, 0 }
  0x42   : > { %s17753_s12 = scalar_select %p65_p0, %s17528_s14, %s67_s23  }
  0x43   : > { %s17756_s10 = scalar_select %p39_p8, %s17540_s17, %s41_s30  }
  0x44   : > { %20231 = sst [smem:[#allocation17_spill]] %s17753_s12  ;;  %p17761_p7 = por %p130_p13, %p48_p1 }
  0x45   : > { %20232 = sst [smem:[#allocation18_spill]] %s17756_s10  ;;  %p136_p6 = scmp.eq.s32.totalorder %s14887_s28, 7 }
  0x46   : > { %s20233_s25 = scalar_select %p17761_p7, 1, 0 }
  0x47   : > { %s156_s29 = sand.u32 1, %s17540_s17   ;;  %s17158_s1 = smul.u32 1920, %s17556_s21 }
  0x48   : > { %p17770_p9 = por %p136_p6, %p54_p5  ;;  %s17157_s8 = smul.u32 120, %s156_s29 }
  0x49   : > { %s17777_s23 = scalar_lea.hbm %s20201_s0, %s17158_s1  ;;  %p20236_p10 = scmp.lt.s32.totalorder %s17560_s22, 8 }
  0x4a   : > { %s20234_s27 = scalar_select %p17770_p9, 1, 0 }
  0x4b   : > { %p17783_p1 = pnand %p20236_p10, %p17723_p3  ;;  %s20238_s30 = sand.u32 1, %s17528_s14  }
  0x4c   : > { %20235 = sst [smem:[#allocation19_spill]] %s20234_s27  ;;  %s17789_s21 = sshll.u32 %s20238_s30, 8 }
  0x4d   : > { %s160_s10 = scalar_lea.vmem [#allocation2], %s17157_s8  ;;  %s16888_s1 = sshll.u32 %s17552_s20, 12 }
  0x4e   : > { %s168_s17 = sshll.u32 %s160_s10, 4  ;;  %s157_s3 = scalar_lea.sflag [#allocation3], %s156_s29  ;;  %s17791_s17 = int_to_ptr.vmem [resolvable:$true] %s168_s17 }
  0x4f   : > { %s17374_s24 = scalar_lea.hbm %s17777_s23, 1920  ;;  %p17376_p5 = pneg %p17783_p1 }
  0x50   : > { %p17375_p6 = scmp.ne.s32.totalorder %s17777_s23, %s17374_s24  ;;  %s17379_s14 = scalar_lea.hbm %s20201_s0, 3840 }
  0x51   : > { %p17380_p8 = scmp.lt.u32.totalorder %s17777_s23, %s20201_s0  ;;  %p17381_p13 = scmp.lt.u32.totalorder %s17379_s14, %s17374_s24 }
  0x52   : > { %p17377_p3 = pnand %p17376_p5, %p17375_p6  ;;  %p17383_p9 = scmp.lt.u32.totalorder %s17374_s24, %s17777_s23 }
  0x53   : > { %p17382_p10 = por %p17381_p13, %p17380_p8 }
  0x54   : > { %p17378_p0 = pneg %p17377_p3 }
  0x55   : > { %p17384_p7 = por %p17383_p9, %p17382_p10 }
  0x57   : > { %p17385_p2 = pnand %p17384_p7, %p17378_p0 }
  0x59   : > { %17388 = shalt.err (!%p17385_p2)
}
  0x5a   : > { %s17389_s10 = scalar_lea.vmem %s17791_s17, 1920  ;;  %s17566_s12 = smov [#allocation2]  }
  0x5b   : > { %p17390_p6 = scmp.ne.s32.totalorder %s17791_s17, %s17389_s10  ;;  %s17394_s29 = sshll.u32 %s17566_s12, 4  ;;  %s17395_s29 = int_to_ptr.vmem [resolvable:$false] %s17394_s29 }
  0x5c   : > { %s17396_s27 = scalar_lea.vmem %s17395_s29, 3840  ;;  %p17397_p12 = scmp.lt.s32.totalorder %s17791_s17, %s17395_s29 }
  0x5d   : > { %p17392_p3 = pnand %p17390_p6, %p17376_p5  ;;  %p17398_p8 = scmp.lt.s32.totalorder %s17396_s27, %s17389_s10 }
  0x5f   : > { %p17393_p11 = pneg %p17392_p3  ;;  %p17399_p13 = por %p17398_p8, %p17397_p12 }
  0x61   : > { %p17400_p9 = pnand %p17399_p13, %p17393_p11 }
  0x63   : > { %17403 = shalt.err (!%p17400_p9)
}
  0x64   : > { %17173 = dma.hbm_to_vmem [thread:$0]  (!%p17783_p1), %s17777_s23, 1920, %s17791_s17, %s157_s3  }
  0x65   : > { %s17824_s24 = scalar_lea.hbm %s20203_s2, %s16888_s1  ;;  %s200_s6 = scalar_lea.vmem [#allocation7], %s17789_s21 }
  0x66   : > { %s207_s30 = sshll.u32 %s200_s6, 4  ;;  %s17404_s28 = scalar_lea.hbm %s17824_s24, 4096  ;;  %s17827_s30 = int_to_ptr.vmem [resolvable:$true] %s207_s30 }
  0x67   : > { %p17405_p12 = scmp.ne.s32.totalorder %s17824_s24, %s17404_s28  ;;  %p20239_p11 = pneg %p17666_p4 }
  0x68   : > { %s17409_s3 = scalar_lea.hbm %s20203_s2, 16384  ;;  %p17410_p1 = scmp.lt.u32.totalorder %s17824_s24, %s20203_s2 }
  0x69   : > { %p17407_p2 = pnand %p17405_p12, %p20239_p11  ;;  %p17411_p5 = scmp.lt.u32.totalorder %s17409_s3, %s17404_s28 }
  0x6a   : > { %p17413_p10 = scmp.lt.u32.totalorder %s17404_s28, %s17824_s24 }
  0x6b   : > { %p17408_p7 = pneg %p17407_p2  ;;  %p17412_p0 = por %p17411_p5, %p17410_p1 }
  0x6d   : > { %p17414_p6 = por %p17413_p10, %p17412_p0 }
  0x6f   : > { %p17415_p3 = pnand %p17414_p6, %p17408_p7 }
  0x71   : > { %17418 = shalt.err (!%p17415_p3)
}
  0x72   : > { %s17419_s21 = scalar_lea.vmem %s17827_s30, 4096  ;;  %p20240_p13 = pmov %p20239_p11 }
  0x73   : > { %p17420_p8 = scmp.ne.s32.totalorder %s17827_s30, %s17419_s21  ;;  %s17567_s12 = smov [#allocation7]  }
  0x74   : > { %s17424_s29 = sshll.u32 %s17567_s12, 4  ;;  %s17425_s29 = int_to_ptr.vmem [resolvable:$false] %s17424_s29 }
  0x75   : > { %p17422_p9 = pnand %p17420_p8, %p20240_p13  ;;  %s17426_s27 = scalar_lea.vmem %s17425_s29, 8192 }
  0x76   : > { %p17427_p11 = scmp.lt.s32.totalorder %s17827_s30, %s17425_s29  ;;  %p17428_p2 = scmp.lt.s32.totalorder %s17426_s27, %s17419_s21 }
  0x77   : > { %p17423_p12 = pneg %p17422_p9 }
  0x78   : > { %p17429_p1 = por %p17428_p2, %p17427_p11 }
  0x7a   : > { %p17430_p5 = pnand %p17429_p1, %p17423_p12 }
  0x7c   : > { %17433 = shalt.err (!%p17430_p5)
}
  0x7d   : > { %s17568_s14 = smov 64   ;;  %s17569_s8 = smov 4  }
  0x7e   : > { %17179 = dma.hbm_to_vmem [thread:$0]  (!%p17666_p4), %s17824_s24, 4096, %s17827_s30, %s17672_s7, %s17568_s14, %s17568_s14, %s17569_s8  }
  0x7f   : > { %p20241_p7 = scmp.ne.s32.totalorder %s20225_s11, 0 }
  0x80   : > { %s17856_s6 = sand.u32 (!%p20241_p7), 1, %s17536_s16   ;;  %p20242_p0 = scmp.ne.s32.totalorder (!%p20241_p7), %s20229_s5, 0 }
  0x81   : > { %219 = sbr.rel (%p20241_p7) target bundleno = 2567 (0xa07), region = 32  ;;  %s222_s17 = scalar_lea.sflag (!%p20241_p7), [#allocation3], %s17856_s6 }
  0x82   : > { %s17160_s28 = smul.u32 (!%p20241_p7), 120, %s17856_s6 }
  0x84   : > { %s17860_s23 = scalar_lea.vmem (!%p20241_p7), [#allocation2], %s17160_s28 }
  0x88   : > { %17507 = dma.done.wait (%p20242_p0), %s222_s17, 1920  }
  0x89   : > { %17509 = vsyncadd (%p20242_p0), %s222_s17, 4294965376  ;;  %s230_s4 = sand.u32 1, %s17707_s26   ;;  %s232_s7 = sand.u32 1, %s17524_s13  }
  0x8a   : > { %s17161_s11 = smul.u32 15360, %s232_s7  ;;  %s231_s24 = scalar_lea.sflag [#allocation6], %s230_s4 }
  0x8b   : > { %p20243_p4 = scmp.ne.s32.totalorder %s20230_s9, 0 }
  0x8c   : > { %s17868_s30 = scalar_lea.vmem [#allocation5], %s17161_s11 }
  0x8d   : > { %17511 = dma.done.wait (%p20243_p4), %s231_s24, 249856  }
  0x8e   : > { %17513 = vsyncadd (%p20243_p4), %s231_s24, 4294717440  ;;  %s14897_s3 = sshll.u32 %s232_s7, 8  ;;  %s14898_s1 = sshll.u32 %s17856_s6, 3 }
  0x8f   : > { %s17875_s10 = scalar_lea.vmem [#allocation7], %s14897_s3  ;;  %s17877_s5 = scalar_lea.vmem [#allocation8], %s14898_s1 }
  0x90   : > { %p14899_p10 = scmp.ne.s32.totalorder %s17544_s18, 0 }
  0x91   : > { %v17570_v0 = vmov (!%p14899_p10), 0.0  }
  0x92   : > { %282 = sbr.rel (%p14899_p10) target bundleno = 153 (0x99), region = 48  ;;  %283 = vst [vmem:[%s17877_s5] sm:$0xff] (!%p14899_p10), %v17570_v0 }
  0x99 PF: > { %v299_v1 = vld [vmem:[%s17868_s30] sm:$0xff]  ;;  %v300_v3 = vld [vmem:[%s17868_s30 + $0x8] sm:$0xff]  ;;  %p16882_p6 = scmp.ne.s32.totalorder %s17544_s18, 3 }
  0x9a   : > { %v303_v2 = vld [vmem:[%s17868_s30 + $0x20] sm:$0xff]  ;;  %v304_v5 = vld [vmem:[%s17868_s30 + $0x28] sm:$0xff] }
  0x9b   : > { %v14931_v4 = vcombine.high %v299_v1, %v303_v2  ;;  %v14930_v6 = vcombine.low %v299_v1, %v303_v2  ;;  %v307_v7 = vld [vmem:[%s17868_s30 + $0x40] sm:$0xff]  ;;  %v14933_v9 = vcombine.high %v300_v3, %v304_v5  ;;  %v14932_v10 = vcombine.low %v300_v3, %v304_v5  ;;  %v308_v12 = vld [vmem:[%s17868_s30 + $0x48] sm:$0xff] }
  0x9c   : > { %v311_v8 = vld [vmem:[%s17868_s30 + $0x60] sm:$0xff]  ;;  %v312_v13 = vld [vmem:[%s17868_s30 + $0x68] sm:$0xff] }
  0x9d   : > { %v14939_v11 = vcombine.high %v307_v7, %v311_v8  ;;  %v315_v14 = vld [vmem:[%s17868_s30 + $0x80] sm:$0xff]  ;;  %11924 = vmatprep.subr.bf16.mxu0 %v14931_v4  ;;  %v14941_v15 = vcombine.high %v308_v12, %v312_v13  ;;  %v316_v17 = vld [vmem:[%s17868_s30 + $0x88] sm:$0xff]  ;;  %12539 = vmatprep.subr.bf16.mxu1 %v14933_v9  ;;  %v14938_v19 = vcombine.low %v307_v7, %v311_v8 }
  0x9e   : > { %v319_v16 = vld [vmem:[%s17868_s30 + $0xa0] sm:$0xff]  ;;  %v320_v18 = vld [vmem:[%s17868_s30 + $0xa8] sm:$0xff]  ;;  %11925 = vmatpush1.bf16.msra.mxu0 %v14930_v6  ;;  %12540 = vmatpush1.bf16.msra.mxu1 %v14932_v10  ;;  %v14940_v20 = vcombine.low %v308_v12, %v312_v13 }
  0x9f   : > { %11926 = vmatprep.subr.bf16.mxu0 %v14939_v11  ;;  %v14947_v21 = vcombine.high %v315_v14, %v319_v16  ;;  %12541 = vmatprep.subr.bf16.mxu1 %v14941_v15  ;;  %v14949_v22 = vcombine.high %v316_v17, %v320_v18  ;;  %v323_v23 = vld [vmem:[%s17868_s30 + $0xc0] sm:$0xff]  ;;  %v324_v25 = vld [vmem:[%s17868_s30 + $0xc8] sm:$0xff]  ;;  %v14946_v27 = vcombine.low %v315_v14, %v319_v16 }
  0xa0   : > { %v327_v24 = vld [vmem:[%s17868_s30 + $0xe0] sm:$0xff]  ;;  %v328_v26 = vld [vmem:[%s17868_s30 + $0xe8] sm:$0xff]  ;;  %v14948_v28 = vcombine.low %v316_v17, %v320_v18 }
  0xa1   : > { %v14955_v29 = vcombine.high %v323_v23, %v327_v24  ;;  %v14957_v30 = vcombine.high %v324_v25, %v328_v26  ;;  %v331_v31 = vld [vmem:[%s17868_s30 + $0x100] sm:$0xff]  ;;  %v332_v33 = vld [vmem:[%s17868_s30 + $0x108] sm:$0xff]  ;;  %v14954_v35 = vcombine.low %v323_v23, %v327_v24  ;;  %v14956_v36 = vcombine.low %v324_v25, %v328_v26 }
  0xa2   : > { %11927 = vmatpush1.bf16.msra.mxu0 %v14938_v19  ;;  %12542 = vmatpush1.bf16.msra.mxu1 %v14940_v20  ;;  %v335_v32 = vld [vmem:[%s17868_s30 + $0x120] sm:$0xff]  ;;  %v336_v34 = vld [vmem:[%s17868_s30 + $0x128] sm:$0xff] }
  0xa3   : > { %11928 = vmatprep.subr.bf16.mxu0 %v14947_v21  ;;  %12543 = vmatprep.subr.bf16.mxu1 %v14949_v22  ;;  %v14963_v37 = vcombine.high %v331_v31, %v335_v32  ;;  %v14965_v38 = vcombine.high %v332_v33, %v336_v34  ;;  %v339_v39 = vld [vmem:[%s17868_s30 + $0x140] sm:$0xff]  ;;  %v340_v41 = vld [vmem:[%s17868_s30 + $0x148] sm:$0xff]  ;;  %v14962_v43 = vcombine.low %v331_v31, %v335_v32 }
  0xa4   : > { %v343_v40 = vld [vmem:[%s17868_s30 + $0x160] sm:$0xff]  ;;  %v344_v42 = vld [vmem:[%s17868_s30 + $0x168] sm:$0xff]  ;;  %v14964_v44 = vcombine.low %v332_v33, %v336_v34 }
  0xa5   : > { %v14971_v45 = vcombine.high %v339_v39, %v343_v40  ;;  %v14973_v46 = vcombine.high %v340_v41, %v344_v42  ;;  %v347_v47 = vld [vmem:[%s17868_s30 + $0x180] sm:$0xff]  ;;  %v348_v49 = vld [vmem:[%s17868_s30 + $0x188] sm:$0xff]  ;;  %v14970_v51 = vcombine.low %v339_v39, %v343_v40  ;;  %v14972_v52 = vcombine.low %v340_v41, %v344_v42 }
  0xa6   : > { %11929 = vmatpush1.bf16.msra.mxu0 %v14946_v27  ;;  %12544 = vmatpush1.bf16.msra.mxu1 %v14948_v28  ;;  %v351_v48 = vld [vmem:[%s17868_s30 + $0x1a0] sm:$0xff]  ;;  %v352_v50 = vld [vmem:[%s17868_s30 + $0x1a8] sm:$0xff] }
  0xa7   : > { %11930 = vmatprep.subr.bf16.mxu0 %v14955_v29  ;;  %12545 = vmatprep.subr.bf16.mxu1 %v14957_v30  ;;  %v14979_v53 = vcombine.high %v347_v47, %v351_v48  ;;  %v17910_v54 = vld [vmem:[%s17860_s23] sm:$0xff]  ;;  %v14981_v55 = vcombine.high %v348_v49, %v352_v50  ;;  %v355_v56 = vld [vmem:[%s17868_s30 + $0x1c0] sm:$0xff]  ;;  %v14978_v61 = vcombine.low %v347_v47, %v351_v48 }
  0xa8   : > { %v359_v57 = vld [vmem:[%s17868_s30 + $0x1e0] sm:$0xff]  ;;  %v17916_v58 = vcombine.high %v17910_v54, %v17910_v54  ;;  %v356_v59 = vld [vmem:[%s17868_s30 + $0x1c8] sm:$0xff]  ;;  %v14980_v62 = vcombine.low %v348_v49, %v352_v50 }
  0xa9   : > { %v360_v60 = vld [vmem:[%s17868_s30 + $0x1e8] sm:$0xff]  ;;  %v14987_v63 = vcombine.high %v355_v56, %v359_v57  ;;  %v363_v1 = vld [vmem:[%s17868_s30 + $0x200] sm:$0xff]  ;;  %v14986_v5 = vcombine.low %v355_v56, %v359_v57 }
  0xaa   : > { %11931 = vmatpush1.bf16.msra.mxu0 %v14954_v35  ;;  %12546 = vmatpush1.bf16.msra.mxu1 %v14956_v36  ;;  %v14989_v0 = vcombine.high %v356_v59, %v360_v60  ;;  %v367_v2 = vld [vmem:[%s17868_s30 + $0x220] sm:$0xff]  ;;  %v364_v3 = vld [vmem:[%s17868_s30 + $0x208] sm:$0xff]  ;;  %v14988_v6 = vcombine.low %v356_v59, %v360_v60 }
  0xab   : > { %11932 = vmatprep.subr.bf16.mxu0 %v14963_v37  ;;  %12547 = vmatprep.subr.bf16.mxu1 %v14965_v38  ;;  %v368_v4 = vld [vmem:[%s17868_s30 + $0x228] sm:$0xff]  ;;  %v14995_v7 = vcombine.high %v363_v1, %v367_v2  ;;  %v371_v9 = vld [vmem:[%s17868_s30 + $0x240] sm:$0xff]  ;;  %v14994_v13 = vcombine.low %v363_v1, %v367_v2 }
  0xac   : > { %11956 = vmatprep.mubr.bf16.mxu0 %v17916_v58  ;;  %12571 = vmatprep.mubr.bf16.mxu1 %v17916_v58  ;;  %v14997_v8 = vcombine.high %v364_v3, %v368_v4  ;;  %v375_v10 = vld [vmem:[%s17868_s30 + $0x260] sm:$0xff]  ;;  %v372_v11 = vld [vmem:[%s17868_s30 + $0x248] sm:$0xff]  ;;  %v14996_v14 = vcombine.low %v364_v3, %v368_v4 }
  0xad   : > { %v376_v12 = vld [vmem:[%s17868_s30 + $0x268] sm:$0xff]  ;;  %v15003_v15 = vcombine.high %v371_v9, %v375_v10  ;;  %v379_v17 = vld [vmem:[%s17868_s30 + $0x280] sm:$0xff]  ;;  %v15002_v21 = vcombine.low %v371_v9, %v375_v10 }
  0xae   : > { %11933 = vmatpush1.bf16.msra.mxu0 %v14962_v43  ;;  %12548 = vmatpush1.bf16.msra.mxu1 %v14964_v44  ;;  %v15005_v16 = vcombine.high %v372_v11, %v376_v12  ;;  %v383_v18 = vld [vmem:[%s17868_s30 + $0x2a0] sm:$0xff]  ;;  %v380_v19 = vld [vmem:[%s17868_s30 + $0x288] sm:$0xff]  ;;  %v15004_v22 = vcombine.low %v372_v11, %v376_v12 }
  0xaf   : > { %11934 = vmatprep.subr.bf16.mxu0 %v14971_v45  ;;  %12549 = vmatprep.subr.bf16.mxu1 %v14973_v46  ;;  %v384_v20 = vld [vmem:[%s17868_s30 + $0x2a8] sm:$0xff]  ;;  %v15011_v23 = vcombine.high %v379_v17, %v383_v18  ;;  %v387_v25 = vld [vmem:[%s17868_s30 + $0x2c0] sm:$0xff]  ;;  %v15010_v29 = vcombine.low %v379_v17, %v383_v18 }
  0xb0   : > { %v15013_v24 = vcombine.high %v380_v19, %v384_v20  ;;  %v391_v26 = vld [vmem:[%s17868_s30 + $0x2e0] sm:$0xff]  ;;  %v388_v27 = vld [vmem:[%s17868_s30 + $0x2c8] sm:$0xff]  ;;  %v15012_v30 = vcombine.low %v380_v19, %v384_v20 }
  0xb1   : > { %v392_v28 = vld [vmem:[%s17868_s30 + $0x2e8] sm:$0xff]  ;;  %v15019_v31 = vcombine.high %v387_v25, %v391_v26  ;;  %v395_v33 = vld [vmem:[%s17868_s30 + $0x300] sm:$0xff]  ;;  %v15018_v37 = vcombine.low %v387_v25, %v391_v26 }
  0xb2   : > { %11935 = vmatpush1.bf16.msra.mxu0 %v14970_v51  ;;  %12550 = vmatpush1.bf16.msra.mxu1 %v14972_v52  ;;  %v15021_v32 = vcombine.high %v388_v27, %v392_v28  ;;  %v399_v34 = vld [vmem:[%s17868_s30 + $0x320] sm:$0xff]  ;;  %v396_v35 = vld [vmem:[%s17868_s30 + $0x308] sm:$0xff]  ;;  %v15020_v38 = vcombine.low %v388_v27, %v392_v28 }
  0xb3   : > { %11936 = vmatprep.subr.bf16.mxu0 %v14979_v53  ;;  %12551 = vmatprep.subr.bf16.mxu1 %v14981_v55  ;;  %v400_v36 = vld [vmem:[%s17868_s30 + $0x328] sm:$0xff]  ;;  %v15027_v39 = vcombine.high %v395_v33, %v399_v34  ;;  %v403_v41 = vld [vmem:[%s17868_s30 + $0x340] sm:$0xff]  ;;  %v15026_v45 = vcombine.low %v395_v33, %v399_v34 }
  0xb4   : > { %v15029_v40 = vcombine.high %v396_v35, %v400_v36  ;;  %v407_v42 = vld [vmem:[%s17868_s30 + $0x360] sm:$0xff]  ;;  %v404_v43 = vld [vmem:[%s17868_s30 + $0x348] sm:$0xff]  ;;  %v15028_v46 = vcombine.low %v396_v35, %v400_v36 }
  0xb5   : > { %v408_v44 = vld [vmem:[%s17868_s30 + $0x368] sm:$0xff]  ;;  %v15035_v47 = vcombine.high %v403_v41, %v407_v42  ;;  %v411_v49 = vld [vmem:[%s17868_s30 + $0x380] sm:$0xff]  ;;  %v15034_v53 = vcombine.low %v403_v41, %v407_v42 }
  0xb6   : > { %11937 = vmatpush1.bf16.msra.mxu0 %v14978_v61  ;;  %12552 = vmatpush1.bf16.msra.mxu1 %v14980_v62  ;;  %v15037_v48 = vcombine.high %v404_v43, %v408_v44  ;;  %v415_v50 = vld [vmem:[%s17868_s30 + $0x3a0] sm:$0xff]  ;;  %v412_v51 = vld [vmem:[%s17868_s30 + $0x388] sm:$0xff]  ;;  %v15036_v55 = vcombine.low %v404_v43, %v408_v44 }
  0xb7   : > { %11938 = vmatprep.subr.bf16.mxu0 %v14987_v63  ;;  %12553 = vmatprep.subr.bf16.mxu1 %v14989_v0  ;;  %v416_v52 = vld [vmem:[%s17868_s30 + $0x3a8] sm:$0xff]  ;;  %v15043_v56 = vcombine.high %v411_v49, %v415_v50  ;;  %v419_v59 = vld [vmem:[%s17868_s30 + $0x3c0] sm:$0xff]  ;;  %v15042_v63 = vcombine.low %v411_v49, %v415_v50 }
  0xb8   : > { %v15045_v57 = vcombine.high %v412_v51, %v416_v52  ;;  %v423_v60 = vld [vmem:[%s17868_s30 + $0x3e0] sm:$0xff]  ;;  %v420_v61 = vld [vmem:[%s17868_s30 + $0x3c8] sm:$0xff]  ;;  %v15044_v0 = vcombine.low %v412_v51, %v416_v52 }
  0xb9   : > { %v424_v62 = vld [vmem:[%s17868_s30 + $0x3e8] sm:$0xff]  ;;  %v15051_v1 = vcombine.high %v419_v59, %v423_v60  ;;  %v427_v3 = vld [vmem:[%s17868_s30 + $0x400] sm:$0xff] }
  0xba   : > { %11939 = vmatpush1.bf16.msra.mxu0 %v14986_v5  ;;  %12554 = vmatpush1.bf16.msra.mxu1 %v14988_v6  ;;  %v15053_v2 = vcombine.high %v420_v61, %v424_v62  ;;  %v431_v4 = vld [vmem:[%s17868_s30 + $0x420] sm:$0xff]  ;;  %v428_v5 = vld [vmem:[%s17868_s30 + $0x408] sm:$0xff] }
  0xbb   : > { %11940 = vmatprep.subr.bf16.mxu0 %v14995_v7  ;;  %12555 = vmatprep.subr.bf16.mxu1 %v14997_v8  ;;  %v432_v6 = vld [vmem:[%s17868_s30 + $0x428] sm:$0xff]  ;;  %v15050_v7 = vcombine.low %v419_v59, %v423_v60  ;;  %v15052_v8 = vcombine.low %v420_v61, %v424_v62  ;;  %v15059_v9 = vcombine.high %v427_v3, %v431_v4  ;;  %v435_v11 = vld [vmem:[%s17868_s30 + $0x440] sm:$0xff] }
  0xbc   : > { %v15061_v10 = vcombine.high %v428_v5, %v432_v6  ;;  %v439_v12 = vld [vmem:[%s17868_s30 + $0x460] sm:$0xff]  ;;  %v15058_v17 = vcombine.low %v427_v3, %v431_v4  ;;  %v15060_v18 = vcombine.low %v428_v5, %v432_v6 }
  0xbd   : > { %v15067_v19 = vcombine.high %v435_v11, %v439_v12  ;;  %v443_v20 = vld [vmem:[%s17868_s30 + $0x480] sm:$0xff]  ;;  %v15066_v25 = vcombine.low %v435_v11, %v439_v12 }
  0xbe   : > { %11941 = vmatpush1.bf16.msra.mxu0 %v14994_v13  ;;  %12556 = vmatpush1.bf16.msra.mxu1 %v14996_v14  ;;  %v17962_v13 = vcombine.low %v17910_v54, %v17910_v54  ;;  %v436_v14 = vld [vmem:[%s17868_s30 + $0x448] sm:$0xff]  ;;  %v451_v28 = vld [vmem:[%s17868_s30 + $0x4c0] sm:$0xff] }
  0xbf   : > { %11942 = vmatprep.subr.bf16.mxu0 %v15003_v15  ;;  %12557 = vmatprep.subr.bf16.mxu1 %v15005_v16  ;;  %v440_v15 = vld [vmem:[%s17868_s30 + $0x468] sm:$0xff]  ;;  %v17967_v16 = vld [vmem:[%s17860_s23 + $0x8] sm:$0xff]  ;;  %v459_v36 = vld [vmem:[%s17868_s30 + $0x500] sm:$0xff] }
  0xc0   : > { %v448_v54 = vld [vmem:[%s17868_s30 + $0x4a8] sm:$0xff]  ;;  %v15068_v26 = vcombine.low %v436_v14, %v440_v15  ;;  %v467_v44 = vld [vmem:[%s17868_s30 + $0x540] sm:$0xff] }
  0xc1   : > { %v475_v52 = vld [vmem:[%s17868_s30 + $0x580] sm:$0xff] }
  0xc2   : > { %11943 = vmatpush1.bf16.msra.mxu0 %v15002_v21  ;;  %12558 = vmatpush1.bf16.msra.mxu1 %v15004_v22  ;;  %v447_v21 = vld [vmem:[%s17868_s30 + $0x4a0] sm:$0xff]  ;;  %v15069_v22 = vcombine.high %v436_v14, %v440_v15 }
  0xc3   : > { %11944 = vmatprep.subr.bf16.mxu0 %v15011_v23  ;;  %12559 = vmatprep.subr.bf16.mxu1 %v15013_v24  ;;  %v444_v23 = vld [vmem:[%s17868_s30 + $0x488] sm:$0xff]  ;;  %v17975_v24 = vcombine.high %v17967_v16, %v17967_v16  ;;  %v15075_v27 = vcombine.high %v443_v20, %v447_v21  ;;  %v15074_v33 = vcombine.low %v443_v20, %v447_v21  ;;  %v483_v62 = vld [vmem:[%s17868_s30 + $0x5c0] sm:$0xff] }
  0xc4   : > { %v15076_v34 = vcombine.low %v444_v23, %v448_v54  ;;  %v491_v6 = vld [vmem:[%s17868_s30 + $0x600] sm:$0xff]  ;;  %v504_v20 = vld [vmem:[%s17868_s30 + $0x668] sm:$0xff] }
  0xc5   : > { %v499_v15 = vld [vmem:[%s17868_s30 + $0x640] sm:$0xff] }
  0xc6   : > { %11945 = vmatpush1.bf16.msra.mxu0 %v15010_v29  ;;  %12560 = vmatpush1.bf16.msra.mxu1 %v15012_v30  ;;  %v455_v29 = vld [vmem:[%s17868_s30 + $0x4e0] sm:$0xff]  ;;  %v452_v30 = vld [vmem:[%s17868_s30 + $0x4c8] sm:$0xff] }
  0xc7   : > { %11946 = vmatprep.subr.bf16.mxu0 %v15019_v31  ;;  %12561 = vmatprep.subr.bf16.mxu1 %v15021_v32  ;;  %v15077_v31 = vcombine.high %v444_v23, %v448_v54  ;;  %v456_v32 = vld [vmem:[%s17868_s30 + $0x4e8] sm:$0xff]  ;;  %v15083_v35 = vcombine.high %v451_v28, %v455_v29  ;;  %v15082_v41 = vcombine.low %v451_v28, %v455_v29 }
  0xc8   : > { %v15084_v42 = vcombine.low %v452_v30, %v456_v32  ;;  %v512_v28 = vld [vmem:[%s17868_s30 + $0x6a8] sm:$0xff] }
  0xca   : > { %11947 = vmatpush1.bf16.msra.mxu0 %v15018_v37  ;;  %12562 = vmatpush1.bf16.msra.mxu1 %v15020_v38  ;;  %v463_v37 = vld [vmem:[%s17868_s30 + $0x520] sm:$0xff]  ;;  %v460_v38 = vld [vmem:[%s17868_s30 + $0x508] sm:$0xff] }
  0xcb   : > { %11948 = vmatprep.subr.bf16.mxu0 %v15027_v39  ;;  %12563 = vmatprep.subr.bf16.mxu1 %v15029_v40  ;;  %v15085_v39 = vcombine.high %v452_v30, %v456_v32  ;;  %v464_v40 = vld [vmem:[%s17868_s30 + $0x528] sm:$0xff]  ;;  %v15091_v43 = vcombine.high %v459_v36, %v463_v37  ;;  %v15090_v49 = vcombine.low %v459_v36, %v463_v37 }
  0xcc   : > { %v15092_v50 = vcombine.low %v460_v38, %v464_v40  ;;  %v520_v36 = vld [vmem:[%s17868_s30 + $0x6e8] sm:$0xff] }
  0xce   : > { %11949 = vmatpush1.bf16.msra.mxu0 %v15026_v45  ;;  %12564 = vmatpush1.bf16.msra.mxu1 %v15028_v46  ;;  %v471_v45 = vld [vmem:[%s17868_s30 + $0x560] sm:$0xff]  ;;  %v468_v46 = vld [vmem:[%s17868_s30 + $0x548] sm:$0xff] }
  0xcf   : > { %11950 = vmatprep.subr.bf16.mxu0 %v15035_v47  ;;  %12565 = vmatprep.subr.bf16.mxu1 %v15037_v48  ;;  %v15093_v47 = vcombine.high %v460_v38, %v464_v40  ;;  %v472_v48 = vld [vmem:[%s17868_s30 + $0x568] sm:$0xff]  ;;  %v15099_v51 = vcombine.high %v467_v44, %v471_v45  ;;  %v15098_v59 = vcombine.low %v467_v44, %v471_v45 }
  0xd0   : > { %v15100_v60 = vcombine.low %v468_v46, %v472_v48  ;;  %v528_v44 = vld [vmem:[%s17868_s30 + $0x728] sm:$0xff] }
  0xd2   : > { %11951 = vmatpush1.bf16.msra.mxu0 %v15034_v53  ;;  %12566 = vmatpush1.bf16.msra.mxu1 %v15036_v55  ;;  %v479_v53 = vld [vmem:[%s17868_s30 + $0x5a0] sm:$0xff]  ;;  %v476_v55 = vld [vmem:[%s17868_s30 + $0x588] sm:$0xff] }
  0xd3   : > { %11952 = vmatprep.subr.bf16.mxu0 %v15043_v56  ;;  %12567 = vmatprep.subr.bf16.mxu1 %v15045_v57  ;;  %v15101_v56 = vcombine.high %v468_v46, %v472_v48  ;;  %v480_v57 = vld [vmem:[%s17868_s30 + $0x5a8] sm:$0xff]  ;;  %v15107_v61 = vcombine.high %v475_v52, %v479_v53  ;;  %v15106_v3 = vcombine.low %v475_v52, %v479_v53 }
  0xd4   : > { %v15108_v4 = vcombine.low %v476_v55, %v480_v57  ;;  %v536_v52 = vld [vmem:[%s17868_s30 + $0x768] sm:$0xff] }
  0xd6   : > { %11953 = vmatpush1.bf16.msra.mxu0 %v15042_v63  ;;  %12568 = vmatpush1.bf16.msra.mxu1 %v15044_v0  ;;  %v487_v63 = vld [vmem:[%s17868_s30 + $0x5e0] sm:$0xff]  ;;  %v484_v0 = vld [vmem:[%s17868_s30 + $0x5c8] sm:$0xff] }
  0xd7   : > { %11954 = vmatprep.subr.bf16.mxu0 %v15051_v1  ;;  %12569 = vmatprep.subr.bf16.mxu1 %v15053_v2  ;;  %v15109_v1 = vcombine.high %v476_v55, %v480_v57  ;;  %v488_v2 = vld [vmem:[%s17868_s30 + $0x5e8] sm:$0xff]  ;;  %v15115_v5 = vcombine.high %v483_v62, %v487_v63  ;;  %v15114_v11 = vcombine.low %v483_v62, %v487_v63 }
  0xd8   : > { %v15116_v12 = vcombine.low %v484_v0, %v488_v2  ;;  %v544_v62 = vld [vmem:[%s17868_s30 + $0x7a8] sm:$0xff] }
  0xda   : > { %11955 = vmatpush1.bf16.msra.mxu0 %v15050_v7  ;;  %12570 = vmatpush1.bf16.msra.mxu1 %v15052_v8  ;;  %v495_v7 = vld [vmem:[%s17868_s30 + $0x620] sm:$0xff]  ;;  %v492_v8 = vld [vmem:[%s17868_s30 + $0x608] sm:$0xff] }
  0xdb   : > { %11965 = vmatprep.subr.bf16.mxu0 %v15059_v9  ;;  %12580 = vmatprep.subr.bf16.mxu1 %v15061_v10  ;;  %v15117_v9 = vcombine.high %v484_v0, %v488_v2  ;;  %v496_v10 = vld [vmem:[%s17868_s30 + $0x628] sm:$0xff]  ;;  %v15123_v14 = vcombine.high %v491_v6, %v495_v7  ;;  %v15122_v21 = vcombine.low %v491_v6, %v495_v7 }
  0xdc   : > { %v552_v6 = vld [vmem:[%s17868_s30 + $0x7e8] sm:$0xff] }
  0xdd   : > { %11957 = vmatmul.mubr.bf16.vlgmr.msra.gmra.mrb[0].mxu0 %v17962_v13  ;;  %12572 = vmatmul.mubr.bf16.vlgmr.msra.gmra.mrb[0].mxu1 %v17962_v13 }
  0xde   : > { %11966 = vmatpush1.bf16.msra.mxu0 %v15058_v17  ;;  %12581 = vmatpush1.bf16.msra.mxu1 %v15060_v18  ;;  %v503_v17 = vld [vmem:[%s17868_s30 + $0x660] sm:$0xff]  ;;  %v500_v18 = vld [vmem:[%s17868_s30 + $0x648] sm:$0xff] }
  0xdf   : > { %11967 = vmatprep.subr.bf16.mxu0 %v15067_v19  ;;  %12582 = vmatprep.subr.bf16.mxu1 %v15069_v22  ;;  %v15125_v19 = vcombine.high %v492_v8, %v496_v10  ;;  %v15124_v22 = vcombine.low %v492_v8, %v496_v10  ;;  %v15131_v23 = vcombine.high %v499_v15, %v503_v17 }
  0xe0   : > { %11997 = vmatprep.mubr.bf16.mxu0 %v17975_v24  ;;  %12612 = vmatprep.mubr.bf16.mxu1 %v17975_v24  ;;  %v15133_v54 = vcombine.high %v500_v18, %v504_v20  ;;  %v15130_v29 = vcombine.low %v499_v15, %v503_v17  ;;  %v15132_v30 = vcombine.low %v500_v18, %v504_v20  ;;  %v560_v15 = vld [vmem:[%s17868_s30 + $0x828] sm:$0xff] }
  0xe2   : > { %11968 = vmatpush1.bf16.msra.mxu0 %v15066_v25  ;;  %12583 = vmatpush1.bf16.msra.mxu1 %v15068_v26  ;;  %v507_v25 = vld [vmem:[%s17868_s30 + $0x680] sm:$0xff] }
  0xe3   : > { %11969 = vmatprep.subr.bf16.mxu0 %v15075_v27  ;;  %12584 = vmatprep.subr.bf16.mxu1 %v15077_v31  ;;  %v511_v26 = vld [vmem:[%s17868_s30 + $0x6a0] sm:$0xff]  ;;  %v508_v27 = vld [vmem:[%s17868_s30 + $0x688] sm:$0xff] }
  0xe4   : > { %v15139_v31 = vcombine.high %v507_v25, %v511_v26  ;;  %v15141_v32 = vcombine.high %v508_v27, %v512_v28  ;;  %v15138_v37 = vcombine.low %v507_v25, %v511_v26  ;;  %v15140_v38 = vcombine.low %v508_v27, %v512_v28  ;;  %v568_v25 = vld [vmem:[%s17868_s30 + $0x868] sm:$0xff]  ;;  %v18046_v26 = vld [vmem:[%s17860_s23 + $0x10] sm:$0xff] }
  0xe6   : > { %11970 = vmatpush1.bf16.msra.mxu0 %v15074_v33  ;;  %12585 = vmatpush1.bf16.msra.mxu1 %v15076_v34  ;;  %v515_v33 = vld [vmem:[%s17868_s30 + $0x6c0] sm:$0xff] }
  0xe7   : > { %11971 = vmatprep.subr.bf16.mxu0 %v15083_v35  ;;  %12586 = vmatprep.subr.bf16.mxu1 %v15085_v39  ;;  %v519_v34 = vld [vmem:[%s17868_s30 + $0x6e0] sm:$0xff]  ;;  %v516_v35 = vld [vmem:[%s17868_s30 + $0x6c8] sm:$0xff] }
  0xe8   : > { %v15147_v39 = vcombine.high %v515_v33, %v519_v34  ;;  %v15149_v40 = vcombine.high %v516_v35, %v520_v36  ;;  %v15146_v45 = vcombine.low %v515_v33, %v519_v34  ;;  %v15148_v46 = vcombine.low %v516_v35, %v520_v36  ;;  %v572_v33 = vld [vmem:[%s17868_s30 + $0x888] sm:$0xff] }
  0xe9   : > { %v576_v34 = vld [vmem:[%s17868_s30 + $0x8a8] sm:$0xff] }
  0xea   : > { %11972 = vmatpush1.bf16.msra.mxu0 %v15082_v41  ;;  %12587 = vmatpush1.bf16.msra.mxu1 %v15084_v42  ;;  %v523_v41 = vld [vmem:[%s17868_s30 + $0x700] sm:$0xff] }
  0xeb   : > { %11973 = vmatprep.subr.bf16.mxu0 %v15091_v43  ;;  %12588 = vmatprep.subr.bf16.mxu1 %v15093_v47  ;;  %v527_v42 = vld [vmem:[%s17868_s30 + $0x720] sm:$0xff]  ;;  %v524_v43 = vld [vmem:[%s17868_s30 + $0x708] sm:$0xff] }
  0xec   : > { %v15155_v47 = vcombine.high %v523_v41, %v527_v42  ;;  %v15157_v48 = vcombine.high %v524_v43, %v528_v44  ;;  %v15154_v53 = vcombine.low %v523_v41, %v527_v42  ;;  %v15156_v55 = vcombine.low %v524_v43, %v528_v44  ;;  %v580_v41 = vld [vmem:[%s17868_s30 + $0x8c8] sm:$0xff] }
  0xed   : > { %v584_v42 = vld [vmem:[%s17868_s30 + $0x8e8] sm:$0xff]  ;;  %v15204_v44 = vcombine.low %v572_v33, %v576_v34 }
  0xee   : > { %11974 = vmatpush1.bf16.msra.mxu0 %v15090_v49  ;;  %12589 = vmatpush1.bf16.msra.mxu1 %v15092_v50  ;;  %v531_v49 = vld [vmem:[%s17868_s30 + $0x740] sm:$0xff] }
  0xef   : > { %11975 = vmatprep.subr.bf16.mxu0 %v15099_v51  ;;  %12590 = vmatprep.subr.bf16.mxu1 %v15101_v56  ;;  %v535_v50 = vld [vmem:[%s17868_s30 + $0x760] sm:$0xff]  ;;  %v532_v51 = vld [vmem:[%s17868_s30 + $0x748] sm:$0xff] }
  0xf0   : > { %v15163_v56 = vcombine.high %v531_v49, %v535_v50  ;;  %v15165_v57 = vcombine.high %v532_v51, %v536_v52  ;;  %v15162_v63 = vcombine.low %v531_v49, %v535_v50  ;;  %v15164_v0 = vcombine.low %v532_v51, %v536_v52  ;;  %v588_v49 = vld [vmem:[%s17868_s30 + $0x908] sm:$0xff] }
  0xf1   : > { %v592_v50 = vld [vmem:[%s17868_s30 + $0x928] sm:$0xff]  ;;  %v15212_v52 = vcombine.low %v580_v41, %v584_v42 }
  0xf2   : > { %11976 = vmatpush1.bf16.msra.mxu0 %v15098_v59  ;;  %12591 = vmatpush1.bf16.msra.mxu1 %v15100_v60  ;;  %v539_v59 = vld [vmem:[%s17868_s30 + $0x780] sm:$0xff] }
  0xf3   : > { %11977 = vmatprep.subr.bf16.mxu0 %v15107_v61  ;;  %12592 = vmatprep.subr.bf16.mxu1 %v15109_v1  ;;  %v543_v60 = vld [vmem:[%s17868_s30 + $0x7a0] sm:$0xff]  ;;  %v540_v61 = vld [vmem:[%s17868_s30 + $0x788] sm:$0xff] }
  0xf4   : > { %v15171_v1 = vcombine.high %v539_v59, %v543_v60  ;;  %v15173_v2 = vcombine.high %v540_v61, %v544_v62  ;;  %v15170_v7 = vcombine.low %v539_v59, %v543_v60  ;;  %v15172_v8 = vcombine.low %v540_v61, %v544_v62  ;;  %v596_v59 = vld [vmem:[%s17868_s30 + $0x948] sm:$0xff] }
  0xf5   : > { %v600_v60 = vld [vmem:[%s17868_s30 + $0x968] sm:$0xff]  ;;  %v15220_v62 = vcombine.low %v588_v49, %v592_v50 }
  0xf6   : > { %11978 = vmatpush1.bf16.msra.mxu0 %v15106_v3  ;;  %12593 = vmatpush1.bf16.msra.mxu1 %v15108_v4  ;;  %v547_v3 = vld [vmem:[%s17868_s30 + $0x7c0] sm:$0xff] }
  0xf7   : > { %11979 = vmatprep.subr.bf16.mxu0 %v15115_v5  ;;  %12594 = vmatprep.subr.bf16.mxu1 %v15117_v9  ;;  %v551_v4 = vld [vmem:[%s17868_s30 + $0x7e0] sm:$0xff]  ;;  %v548_v5 = vld [vmem:[%s17868_s30 + $0x7c8] sm:$0xff] }
  0xf8   : > { %v15179_v9 = vcombine.high %v547_v3, %v551_v4  ;;  %v15181_v10 = vcombine.high %v548_v5, %v552_v6  ;;  %v15178_v17 = vcombine.low %v547_v3, %v551_v4  ;;  %v15180_v18 = vcombine.low %v548_v5, %v552_v6  ;;  %v604_v3 = vld [vmem:[%s17868_s30 + $0x988] sm:$0xff] }
  0xf9   : > { %v608_v4 = vld [vmem:[%s17868_s30 + $0x9a8] sm:$0xff]  ;;  %v15228_v6 = vcombine.low %v596_v59, %v600_v60 }
  0xfa   : > { %11980 = vmatpush1.bf16.msra.mxu0 %v15114_v11  ;;  %12595 = vmatpush1.bf16.msra.mxu1 %v15116_v12  ;;  %v555_v11 = vld [vmem:[%s17868_s30 + $0x800] sm:$0xff] }
  0xfb   : > { %11981 = vmatprep.subr.bf16.mxu0 %v15123_v14  ;;  %12596 = vmatprep.subr.bf16.mxu1 %v15125_v19  ;;  %v559_v12 = vld [vmem:[%s17868_s30 + $0x820] sm:$0xff]  ;;  %v556_v14 = vld [vmem:[%s17868_s30 + $0x808] sm:$0xff] }
  0xfc   : > { %v15187_v19 = vcombine.high %v555_v11, %v559_v12  ;;  %v15189_v20 = vcombine.high %v556_v14, %v560_v15  ;;  %v15186_v27 = vcombine.low %v555_v11, %v559_v12  ;;  %v15188_v28 = vcombine.low %v556_v14, %v560_v15  ;;  %v612_v11 = vld [vmem:[%s17868_s30 + $0x9c8] sm:$0xff] }
  0xfd   : > { %v616_v12 = vld [vmem:[%s17868_s30 + $0x9e8] sm:$0xff]  ;;  %v15236_v15 = vcombine.low %v604_v3, %v608_v4 }
  0xfe   : > { %11982 = vmatpush1.bf16.msra.mxu0 %v15122_v21  ;;  %12597 = vmatpush1.bf16.msra.mxu1 %v15124_v22  ;;  %v563_v21 = vld [vmem:[%s17868_s30 + $0x840] sm:$0xff] }
  0xff   : > { %11983 = vmatprep.subr.bf16.mxu0 %v15131_v23  ;;  %12598 = vmatprep.subr.bf16.mxu1 %v15133_v54  ;;  %v567_v22 = vld [vmem:[%s17868_s30 + $0x860] sm:$0xff]  ;;  %v18041_v23 = vcombine.low %v17967_v16, %v17967_v16  ;;  %v564_v54 = vld [vmem:[%s17868_s30 + $0x848] sm:$0xff]  ;;  %v18052_v16 = vcombine.high %v18046_v26, %v18046_v26 }
 0x100   : > { %v15194_v35 = vcombine.low %v563_v21, %v567_v22  ;;  %v15196_v36 = vcombine.low %v564_v54, %v568_v25 }
 0x102   : > { %11984 = vmatpush1.bf16.msra.mxu0 %v15130_v29  ;;  %12599 = vmatpush1.bf16.msra.mxu1 %v15132_v30  ;;  %v15195_v29 = vcombine.high %v563_v21, %v567_v22  ;;  %v15197_v30 = vcombine.high %v564_v54, %v568_v25  ;;  %v620_v21 = vld [vmem:[%s17868_s30 + $0xa08] sm:$0xff]  ;;  %v15244_v25 = vcombine.low %v612_v11, %v616_v12 }
 0x103   : > { %11985 = vmatprep.subr.bf16.mxu0 %v15139_v31  ;;  %12600 = vmatprep.subr.bf16.mxu1 %v15141_v32  ;;  %v571_v31 = vld [vmem:[%s17868_s30 + $0x880] sm:$0xff]  ;;  %v624_v22 = vld [vmem:[%s17868_s30 + $0xa28] sm:$0xff] }
 0x104   : > { %v575_v32 = vld [vmem:[%s17868_s30 + $0x8a0] sm:$0xff] }
 0x105   : > { %v15202_v43 = vcombine.low %v571_v31, %v575_v32 }
 0x106   : > { %11986 = vmatpush1.bf16.msra.mxu0 %v15138_v37  ;;  %12601 = vmatpush1.bf16.msra.mxu1 %v15140_v38  ;;  %v15203_v37 = vcombine.high %v571_v31, %v575_v32  ;;  %v15205_v38 = vcombine.high %v572_v33, %v576_v34  ;;  %v628_v31 = vld [vmem:[%s17868_s30 + $0xa48] sm:$0xff]  ;;  %v15252_v34 = vcombine.low %v620_v21, %v624_v22 }
 0x107   : > { %11987 = vmatprep.subr.bf16.mxu0 %v15147_v39  ;;  %12602 = vmatprep.subr.bf16.mxu1 %v15149_v40  ;;  %v579_v39 = vld [vmem:[%s17868_s30 + $0x8c0] sm:$0xff]  ;;  %v632_v32 = vld [vmem:[%s17868_s30 + $0xa68] sm:$0xff] }
 0x108   : > { %v583_v40 = vld [vmem:[%s17868_s30 + $0x8e0] sm:$0xff] }
 0x109   : > { %v15210_v51 = vcombine.low %v579_v39, %v583_v40 }
 0x10a   : > { %11988 = vmatpush1.bf16.msra.mxu0 %v15146_v45  ;;  %12603 = vmatpush1.bf16.msra.mxu1 %v15148_v46  ;;  %v15211_v45 = vcombine.high %v579_v39, %v583_v40  ;;  %v15213_v46 = vcombine.high %v580_v41, %v584_v42  ;;  %v636_v39 = vld [vmem:[%s17868_s30 + $0xa88] sm:$0xff]  ;;  %v15260_v42 = vcombine.low %v628_v31, %v632_v32 }
 0x10b   : > { %11989 = vmatprep.subr.bf16.mxu0 %v15155_v47  ;;  %12604 = vmatprep.subr.bf16.mxu1 %v15157_v48  ;;  %v587_v47 = vld [vmem:[%s17868_s30 + $0x900] sm:$0xff]  ;;  %v640_v40 = vld [vmem:[%s17868_s30 + $0xaa8] sm:$0xff] }
 0x10c   : > { %v591_v48 = vld [vmem:[%s17868_s30 + $0x920] sm:$0xff] }
 0x10d   : > { %v15218_v61 = vcombine.low %v587_v47, %v591_v48 }
 0x10e   : > { %11990 = vmatpush1.bf16.msra.mxu0 %v15154_v53  ;;  %12605 = vmatpush1.bf16.msra.mxu1 %v15156_v55  ;;  %v15219_v53 = vcombine.high %v587_v47, %v591_v48  ;;  %v15221_v55 = vcombine.high %v588_v49, %v592_v50  ;;  %v644_v47 = vld [vmem:[%s17868_s30 + $0xac8] sm:$0xff]  ;;  %v15268_v50 = vcombine.low %v636_v39, %v640_v40 }
 0x10f   : > { %11991 = vmatprep.subr.bf16.mxu0 %v15163_v56  ;;  %12606 = vmatprep.subr.bf16.mxu1 %v15165_v57  ;;  %v595_v56 = vld [vmem:[%s17868_s30 + $0x940] sm:$0xff]  ;;  %v648_v48 = vld [vmem:[%s17868_s30 + $0xae8] sm:$0xff] }
 0x110   : > { %v599_v57 = vld [vmem:[%s17868_s30 + $0x960] sm:$0xff] }
 0x111   : > { %v15226_v5 = vcombine.low %v595_v56, %v599_v57 }
 0x112   : > { %11992 = vmatpush1.bf16.msra.mxu0 %v15162_v63  ;;  %12607 = vmatpush1.bf16.msra.mxu1 %v15164_v0  ;;  %v15227_v63 = vcombine.high %v595_v56, %v599_v57  ;;  %v15229_v0 = vcombine.high %v596_v59, %v600_v60  ;;  %v652_v56 = vld [vmem:[%s17868_s30 + $0xb08] sm:$0xff]  ;;  %v15276_v60 = vcombine.low %v644_v47, %v648_v48 }
 0x113   : > { %11993 = vmatprep.subr.bf16.mxu0 %v15171_v1  ;;  %12608 = vmatprep.subr.bf16.mxu1 %v15173_v2  ;;  %v603_v1 = vld [vmem:[%s17868_s30 + $0x980] sm:$0xff]  ;;  %v656_v57 = vld [vmem:[%s17868_s30 + $0xb28] sm:$0xff] }
 0x114   : > { %v607_v2 = vld [vmem:[%s17868_s30 + $0x9a0] sm:$0xff] }
 0x115   : > { %v15234_v14 = vcombine.low %v603_v1, %v607_v2 }
 0x116   : > { %11994 = vmatpush1.bf16.msra.mxu0 %v15170_v7  ;;  %12609 = vmatpush1.bf16.msra.mxu1 %v15172_v8  ;;  %v15235_v7 = vcombine.high %v603_v1, %v607_v2  ;;  %v15237_v8 = vcombine.high %v604_v3, %v608_v4  ;;  %v660_v1 = vld [vmem:[%s17868_s30 + $0xb48] sm:$0xff]  ;;  %v15284_v4 = vcombine.low %v652_v56, %v656_v57 }
 0x117   : > { %11995 = vmatprep.subr.bf16.mxu0 %v15179_v9  ;;  %12610 = vmatprep.subr.bf16.mxu1 %v15181_v10  ;;  %v611_v9 = vld [vmem:[%s17868_s30 + $0x9c0] sm:$0xff]  ;;  %v664_v2 = vld [vmem:[%s17868_s30 + $0xb68] sm:$0xff] }
 0x118   : > { %v615_v10 = vld [vmem:[%s17868_s30 + $0x9e0] sm:$0xff] }
 0x119   : > { %v15242_v54 = vcombine.low %v611_v9, %v615_v10 }
 0x11a   : > { %11996 = vmatpush1.bf16.msra.mxu0 %v15178_v17  ;;  %12611 = vmatpush1.bf16.msra.mxu1 %v15180_v18  ;;  %v15243_v17 = vcombine.high %v611_v9, %v615_v10  ;;  %v15245_v18 = vcombine.high %v612_v11, %v616_v12  ;;  %v668_v9 = vld [vmem:[%s17868_s30 + $0xb88] sm:$0xff]  ;;  %v15292_v12 = vcombine.low %v660_v1, %v664_v2 }
 0x11b   : > { %12006 = vmatprep.subr.bf16.mxu0 %v15187_v19  ;;  %12621 = vmatprep.subr.bf16.mxu1 %v15189_v20  ;;  %v619_v19 = vld [vmem:[%s17868_s30 + $0xa00] sm:$0xff]  ;;  %v672_v10 = vld [vmem:[%s17868_s30 + $0xba8] sm:$0xff] }
 0x11c   : > { %v623_v20 = vld [vmem:[%s17868_s30 + $0xa20] sm:$0xff] }
 0x11d   : > { %11998 = vmatmul.mubr.bf16.vlgmr.msra.gmra.mrb[0].mxu0 %v18041_v23  ;;  %12613 = vmatmul.mubr.bf16.vlgmr.msra.gmra.mrb[0].mxu1 %v18041_v23  ;;  %v15250_v33 = vcombine.low %v619_v19, %v623_v20 }
 0x11e   : > { %12007 = vmatpush1.bf16.msra.mxu0 %v15186_v27  ;;  %12622 = vmatpush1.bf16.msra.mxu1 %v15188_v28  ;;  %v15251_v27 = vcombine.high %v619_v19, %v623_v20  ;;  %v15253_v28 = vcombine.high %v620_v21, %v624_v22  ;;  %v676_v19 = vld [vmem:[%s17868_s30 + $0xbc8] sm:$0xff]  ;;  %v15300_v22 = vcombine.low %v668_v9, %v672_v10 }
 0x11f   : > { %12008 = vmatprep.subr.bf16.mxu0 %v15195_v29  ;;  %12623 = vmatprep.subr.bf16.mxu1 %v15197_v30  ;;  %v627_v29 = vld [vmem:[%s17868_s30 + $0xa40] sm:$0xff]  ;;  %v680_v20 = vld [vmem:[%s17868_s30 + $0xbe8] sm:$0xff] }
 0x120   : > { %12038 = vmatprep.mubr.bf16.mxu0 %v18052_v16  ;;  %12653 = vmatprep.mubr.bf16.mxu1 %v18052_v16  ;;  %v631_v30 = vld [vmem:[%s17868_s30 + $0xa60] sm:$0xff] }
 0x121   : > { %v15258_v41 = vcombine.low %v627_v29, %v631_v30 }
 0x122   : > { %12009 = vmatpush1.bf16.msra.mxu0 %v15194_v35  ;;  %12624 = vmatpush1.bf16.msra.mxu1 %v15196_v36  ;;  %v15259_v35 = vcombine.high %v627_v29, %v631_v30  ;;  %v15261_v36 = vcombine.high %v628_v31, %v632_v32  ;;  %v684_v29 = vld [vmem:[%s17868_s30 + $0xc08] sm:$0xff]  ;;  %v15308_v32 = vcombine.low %v676_v19, %v680_v20 }
 0x123   : > { %12010 = vmatprep.subr.bf16.mxu0 %v15203_v37  ;;  %12625 = vmatprep.subr.bf16.mxu1 %v15205_v38  ;;  %v635_v37 = vld [vmem:[%s17868_s30 + $0xa80] sm:$0xff]  ;;  %v688_v30 = vld [vmem:[%s17868_s30 + $0xc28] sm:$0xff] }
 0x124   : > { %v639_v38 = vld [vmem:[%s17868_s30 + $0xaa0] sm:$0xff] }
 0x125   : > { %v15266_v49 = vcombine.low %v635_v37, %v639_v38 }
 0x126   : > { %12011 = vmatpush1.bf16.msra.mxu0 %v15202_v43  ;;  %12626 = vmatpush1.bf16.msra.mxu1 %v15204_v44  ;;  %v15267_v43 = vcombine.high %v635_v37, %v639_v38  ;;  %v15269_v44 = vcombine.high %v636_v39, %v640_v40  ;;  %v18120_v37 = vcombine.low %v18046_v26, %v18046_v26  ;;  %v692_v38 = vld [vmem:[%s17868_s30 + $0xc48] sm:$0xff] }
 0x127   : > { %12012 = vmatprep.subr.bf16.mxu0 %v15211_v45  ;;  %12627 = vmatprep.subr.bf16.mxu1 %v15213_v46  ;;  %v643_v45 = vld [vmem:[%s17868_s30 + $0xac0] sm:$0xff]  ;;  %v696_v39 = vld [vmem:[%s17868_s30 + $0xc68] sm:$0xff] }
 0x128   : > { %v647_v46 = vld [vmem:[%s17868_s30 + $0xae0] sm:$0xff] }
 0x129   : > { %v15274_v59 = vcombine.low %v643_v45, %v647_v46  ;;  %v18125_v40 = vld [vmem:[%s17860_s23 + $0x18] sm:$0xff] }
 0x12a   : > { %12013 = vmatpush1.bf16.msra.mxu0 %v15210_v51  ;;  %12628 = vmatpush1.bf16.msra.mxu1 %v15212_v52  ;;  %v15275_v51 = vcombine.high %v643_v45, %v647_v46  ;;  %v15277_v52 = vcombine.high %v644_v47, %v648_v48  ;;  %v699_v45 = vld [vmem:[%s17868_s30 + $0xc80] sm:$0xff]  ;;  %v18131_v26 = vcombine.high %v18125_v40, %v18125_v40  ;;  %v700_v47 = vld [vmem:[%s17868_s30 + $0xc88] sm:$0xff] }
 0x12b   : > { %12014 = vmatprep.subr.bf16.mxu0 %v15219_v53  ;;  %12629 = vmatprep.subr.bf16.mxu1 %v15221_v55  ;;  %v651_v53 = vld [vmem:[%s17868_s30 + $0xb00] sm:$0xff]  ;;  %v704_v48 = vld [vmem:[%s17868_s30 + $0xca8] sm:$0xff] }
 0x12c   : > { %v655_v55 = vld [vmem:[%s17868_s30 + $0xb20] sm:$0xff] }
 0x12d   : > { %v15282_v3 = vcombine.low %v651_v53, %v655_v55  ;;  %v703_v46 = vld [vmem:[%s17868_s30 + $0xca0] sm:$0xff] }
 0x12e   : > { %12015 = vmatpush1.bf16.msra.mxu0 %v15218_v61  ;;  %12630 = vmatpush1.bf16.msra.mxu1 %v15220_v62  ;;  %v15283_v61 = vcombine.high %v651_v53, %v655_v55  ;;  %v15285_v62 = vcombine.high %v652_v56, %v656_v57  ;;  %v707_v53 = vld [vmem:[%s17868_s30 + $0xcc0] sm:$0xff]  ;;  %v708_v56 = vld [vmem:[%s17868_s30 + $0xcc8] sm:$0xff] }
 0x12f   : > { %12016 = vmatprep.subr.bf16.mxu0 %v15227_v63  ;;  %12631 = vmatprep.subr.bf16.mxu1 %v15229_v0  ;;  %v659_v63 = vld [vmem:[%s17868_s30 + $0xb40] sm:$0xff]  ;;  %v712_v57 = vld [vmem:[%s17868_s30 + $0xce8] sm:$0xff] }
 0x130   : > { %v663_v0 = vld [vmem:[%s17868_s30 + $0xb60] sm:$0xff] }
 0x131   : > { %v15290_v11 = vcombine.low %v659_v63, %v663_v0  ;;  %v711_v55 = vld [vmem:[%s17868_s30 + $0xce0] sm:$0xff] }
 0x132   : > { %12017 = vmatpush1.bf16.msra.mxu0 %v15226_v5  ;;  %12632 = vmatpush1.bf16.msra.mxu1 %v15228_v6  ;;  %v15291_v5 = vcombine.high %v659_v63, %v663_v0  ;;  %v15293_v6 = vcombine.high %v660_v1, %v664_v2  ;;  %v715_v63 = vld [vmem:[%s17868_s30 + $0xd00] sm:$0xff]  ;;  %v716_v1 = vld [vmem:[%s17868_s30 + $0xd08] sm:$0xff] }
 0x133   : > { %12018 = vmatprep.subr.bf16.mxu0 %v15235_v7  ;;  %12633 = vmatprep.subr.bf16.mxu1 %v15237_v8  ;;  %v667_v7 = vld [vmem:[%s17868_s30 + $0xb80] sm:$0xff]  ;;  %v720_v2 = vld [vmem:[%s17868_s30 + $0xd28] sm:$0xff] }
 0x134   : > { %v671_v8 = vld [vmem:[%s17868_s30 + $0xba0] sm:$0xff] }
 0x135   : > { %v15298_v21 = vcombine.low %v667_v7, %v671_v8  ;;  %v719_v0 = vld [vmem:[%s17868_s30 + $0xd20] sm:$0xff] }
 0x136   : > { %12019 = vmatpush1.bf16.msra.mxu0 %v15234_v14  ;;  %12634 = vmatpush1.bf16.msra.mxu1 %v15236_v15  ;;  %v15299_v14 = vcombine.high %v667_v7, %v671_v8  ;;  %v15301_v15 = vcombine.high %v668_v9, %v672_v10  ;;  %v723_v7 = vld [vmem:[%s17868_s30 + $0xd40] sm:$0xff]  ;;  %v724_v9 = vld [vmem:[%s17868_s30 + $0xd48] sm:$0xff] }
 0x137   : > { %12020 = vmatprep.subr.bf16.mxu0 %v15243_v17  ;;  %12635 = vmatprep.subr.bf16.mxu1 %v15245_v18  ;;  %v675_v17 = vld [vmem:[%s17868_s30 + $0xbc0] sm:$0xff]  ;;  %v728_v10 = vld [vmem:[%s17868_s30 + $0xd68] sm:$0xff] }
 0x138   : > { %v679_v18 = vld [vmem:[%s17868_s30 + $0xbe0] sm:$0xff] }
 0x139   : > { %v15306_v31 = vcombine.low %v675_v17, %v679_v18  ;;  %v727_v8 = vld [vmem:[%s17868_s30 + $0xd60] sm:$0xff] }
 0x13a   : > { %12021 = vmatpush1.bf16.msra.mxu0 %v15242_v54  ;;  %12636 = vmatpush1.bf16.msra.mxu1 %v15244_v25  ;;  %v15307_v54 = vcombine.high %v675_v17, %v679_v18  ;;  %v15309_v25 = vcombine.high %v676_v19, %v680_v20  ;;  %v731_v17 = vld [vmem:[%s17868_s30 + $0xd80] sm:$0xff]  ;;  %v732_v19 = vld [vmem:[%s17868_s30 + $0xd88] sm:$0xff] }
 0x13b   : > { %12022 = vmatprep.subr.bf16.mxu0 %v15251_v27  ;;  %12637 = vmatprep.subr.bf16.mxu1 %v15253_v28  ;;  %v683_v27 = vld [vmem:[%s17868_s30 + $0xc00] sm:$0xff]  ;;  %v736_v20 = vld [vmem:[%s17868_s30 + $0xda8] sm:$0xff] }
 0x13c   : > { %v687_v28 = vld [vmem:[%s17868_s30 + $0xc20] sm:$0xff] }
 0x13d   : > { %v735_v18 = vld [vmem:[%s17868_s30 + $0xda0] sm:$0xff] }
 0x13e   : > { %12023 = vmatpush1.bf16.msra.mxu0 %v15250_v33  ;;  %12638 = vmatpush1.bf16.msra.mxu1 %v15252_v34  ;;  %v15315_v33 = vcombine.high %v683_v27, %v687_v28  ;;  %v15317_v34 = vcombine.high %v684_v29, %v688_v30 }
 0x13f   : > { %12024 = vmatprep.subr.bf16.mxu0 %v15259_v35  ;;  %12639 = vmatprep.subr.bf16.mxu1 %v15261_v36  ;;  %v691_v35 = vld [vmem:[%s17868_s30 + $0xc40] sm:$0xff] }
 0x140   : > { %v695_v36 = vld [vmem:[%s17868_s30 + $0xc60] sm:$0xff] }
 0x142   : > { %12025 = vmatpush1.bf16.msra.mxu0 %v15258_v41  ;;  %12640 = vmatpush1.bf16.msra.mxu1 %v15260_v42  ;;  %v15314_v41 = vcombine.low %v683_v27, %v687_v28  ;;  %v15316_v42 = vcombine.low %v684_v29, %v688_v30  ;;  %v739_v27 = vld [vmem:[%s17868_s30 + $0xdc0] sm:$0xff]  ;;  %v740_v29 = vld [vmem:[%s17868_s30 + $0xdc8] sm:$0xff] }
 0x143   : > { %12026 = vmatprep.subr.bf16.mxu0 %v15267_v43  ;;  %12641 = vmatprep.subr.bf16.mxu1 %v15269_v44  ;;  %v15323_v43 = vcombine.high %v691_v35, %v695_v36  ;;  %v15325_v44 = vcombine.high %v692_v38, %v696_v39  ;;  %v743_v28 = vld [vmem:[%s17868_s30 + $0xde0] sm:$0xff]  ;;  %v744_v30 = vld [vmem:[%s17868_s30 + $0xde8] sm:$0xff] }
 0x146   : > { %12027 = vmatpush1.bf16.msra.mxu0 %v15266_v49  ;;  %12642 = vmatpush1.bf16.msra.mxu1 %v15268_v50  ;;  %v15322_v49 = vcombine.low %v691_v35, %v695_v36  ;;  %v15324_v50 = vcombine.low %v692_v38, %v696_v39  ;;  %v747_v35 = vld [vmem:[%s17868_s30 + $0xe00] sm:$0xff]  ;;  %v748_v38 = vld [vmem:[%s17868_s30 + $0xe08] sm:$0xff] }
 0x147   : > { %12028 = vmatprep.subr.bf16.mxu0 %v15275_v51  ;;  %12643 = vmatprep.subr.bf16.mxu1 %v15277_v52  ;;  %v15331_v51 = vcombine.high %v699_v45, %v703_v46  ;;  %v15333_v52 = vcombine.high %v700_v47, %v704_v48  ;;  %v751_v36 = vld [vmem:[%s17868_s30 + $0xe20] sm:$0xff]  ;;  %v752_v39 = vld [vmem:[%s17868_s30 + $0xe28] sm:$0xff] }
 0x14a   : > { %12029 = vmatpush1.bf16.msra.mxu0 %v15274_v59  ;;  %12644 = vmatpush1.bf16.msra.mxu1 %v15276_v60  ;;  %v15330_v59 = vcombine.low %v699_v45, %v703_v46  ;;  %v15332_v60 = vcombine.low %v700_v47, %v704_v48  ;;  %v755_v45 = vld [vmem:[%s17868_s30 + $0xe40] sm:$0xff]  ;;  %v756_v47 = vld [vmem:[%s17868_s30 + $0xe48] sm:$0xff] }
 0x14b   : > { %12030 = vmatprep.subr.bf16.mxu0 %v15283_v61  ;;  %12645 = vmatprep.subr.bf16.mxu1 %v15285_v62  ;;  %v15339_v61 = vcombine.high %v707_v53, %v711_v55  ;;  %v15341_v62 = vcombine.high %v708_v56, %v712_v57  ;;  %v759_v46 = vld [vmem:[%s17868_s30 + $0xe60] sm:$0xff]  ;;  %v760_v48 = vld [vmem:[%s17868_s30 + $0xe68] sm:$0xff] }
 0x14e   : > { %12031 = vmatpush1.bf16.msra.mxu0 %v15282_v3  ;;  %12646 = vmatpush1.bf16.msra.mxu1 %v15284_v4  ;;  %v15338_v3 = vcombine.low %v707_v53, %v711_v55  ;;  %v15340_v4 = vcombine.low %v708_v56, %v712_v57  ;;  %v763_v53 = vld [vmem:[%s17868_s30 + $0xe80] sm:$0xff]  ;;  %v764_v56 = vld [vmem:[%s17868_s30 + $0xe88] sm:$0xff] }
 0x14f   : > { %12032 = vmatprep.subr.bf16.mxu0 %v15291_v5  ;;  %12647 = vmatprep.subr.bf16.mxu1 %v15293_v6  ;;  %v15347_v5 = vcombine.high %v715_v63, %v719_v0  ;;  %v15349_v6 = vcombine.high %v716_v1, %v720_v2  ;;  %v767_v55 = vld [vmem:[%s17868_s30 + $0xea0] sm:$0xff]  ;;  %v768_v57 = vld [vmem:[%s17868_s30 + $0xea8] sm:$0xff] }
 0x152   : > { %12033 = vmatpush1.bf16.msra.mxu0 %v15290_v11  ;;  %12648 = vmatpush1.bf16.msra.mxu1 %v15292_v12  ;;  %v15346_v11 = vcombine.low %v715_v63, %v719_v0  ;;  %v15348_v12 = vcombine.low %v716_v1, %v720_v2  ;;  %v771_v63 = vld [vmem:[%s17868_s30 + $0xec0] sm:$0xff]  ;;  %v772_v1 = vld [vmem:[%s17868_s30 + $0xec8] sm:$0xff] }
 0x153   : > { %12034 = vmatprep.subr.bf16.mxu0 %v15299_v14  ;;  %12649 = vmatprep.subr.bf16.mxu1 %v15301_v15  ;;  %v15355_v14 = vcombine.high %v723_v7, %v727_v8  ;;  %v15357_v15 = vcombine.high %v724_v9, %v728_v10  ;;  %v775_v0 = vld [vmem:[%s17868_s30 + $0xee0] sm:$0xff]  ;;  %v776_v2 = vld [vmem:[%s17868_s30 + $0xee8] sm:$0xff] }
 0x156   : > { %12035 = vmatpush1.bf16.msra.mxu0 %v15298_v21  ;;  %12650 = vmatpush1.bf16.msra.mxu1 %v15300_v22  ;;  %v15354_v21 = vcombine.low %v723_v7, %v727_v8  ;;  %v15356_v22 = vcombine.low %v724_v9, %v728_v10  ;;  %v779_v7 = vld [vmem:[%s17868_s30 + $0xf00] sm:$0xff]  ;;  %v780_v9 = vld [vmem:[%s17868_s30 + $0xf08] sm:$0xff] }
 0x157   : > { %12036 = vmatprep.subr.bf16.mxu0 %v15307_v54  ;;  %12651 = vmatprep.subr.bf16.mxu1 %v15309_v25  ;;  %v15363_v54 = vcombine.high %v731_v17, %v735_v18  ;;  %v15365_v25 = vcombine.high %v732_v19, %v736_v20  ;;  %v783_v8 = vld [vmem:[%s17868_s30 + $0xf20] sm:$0xff]  ;;  %v784_v10 = vld [vmem:[%s17868_s30 + $0xf28] sm:$0xff] }
 0x15a   : > { %12037 = vmatpush1.bf16.msra.mxu0 %v15306_v31  ;;  %12652 = vmatpush1.bf16.msra.mxu1 %v15308_v32  ;;  %v15362_v31 = vcombine.low %v731_v17, %v735_v18  ;;  %v15364_v32 = vcombine.low %v732_v19, %v736_v20  ;;  %v787_v17 = vld [vmem:[%s17868_s30 + $0xf40] sm:$0xff]  ;;  %v788_v19 = vld [vmem:[%s17868_s30 + $0xf48] sm:$0xff] }
 0x15b   : > { %12047 = vmatprep.subr.bf16.mxu0 %v15315_v33  ;;  %12662 = vmatprep.subr.bf16.mxu1 %v15317_v34  ;;  %v15371_v33 = vcombine.high %v739_v27, %v743_v28  ;;  %v15373_v34 = vcombine.high %v740_v29, %v744_v30  ;;  %v791_v18 = vld [vmem:[%s17868_s30 + $0xf60] sm:$0xff]  ;;  %v792_v20 = vld [vmem:[%s17868_s30 + $0xf68] sm:$0xff] }
 0x15d   : > { %12039 = vmatmul.mubr.bf16.vlgmr.msra.gmra.mrb[0].mxu0 %v18120_v37  ;;  %12654 = vmatmul.mubr.bf16.vlgmr.msra.gmra.mrb[0].mxu1 %v18120_v37 }
 0x15e   : > { %12048 = vmatpush1.bf16.msra.mxu0 %v15314_v41  ;;  %12663 = vmatpush1.bf16.msra.mxu1 %v15316_v42  ;;  %v15370_v41 = vcombine.low %v739_v27, %v743_v28  ;;  %v15372_v42 = vcombine.low %v740_v29, %v744_v30  ;;  %v795_v27 = vld [vmem:[%s17868_s30 + $0xf80] sm:$0xff]  ;;  %v796_v29 = vld [vmem:[%s17868_s30 + $0xf88] sm:$0xff] }
 0x15f   : > { %12049 = vmatprep.subr.bf16.mxu0 %v15323_v43  ;;  %12664 = vmatprep.subr.bf16.mxu1 %v15325_v44  ;;  %v15379_v43 = vcombine.high %v747_v35, %v751_v36  ;;  %v15381_v44 = vcombine.high %v748_v38, %v752_v39  ;;  %v799_v28 = vld [vmem:[%s17868_s30 + $0xfa0] sm:$0xff]  ;;  %v800_v30 = vld [vmem:[%s17868_s30 + $0xfa8] sm:$0xff] }
 0x160   : > { %12079 = vmatprep.mubr.bf16.mxu0 %v18131_v26  ;;  %12694 = vmatprep.mubr.bf16.mxu1 %v18131_v26 }
 0x162   : > { %12050 = vmatpush1.bf16.msra.mxu0 %v15322_v49  ;;  %12665 = vmatpush1.bf16.msra.mxu1 %v15324_v50  ;;  %v15378_v49 = vcombine.low %v747_v35, %v751_v36  ;;  %v15380_v50 = vcombine.low %v748_v38, %v752_v39  ;;  %v803_v35 = vld [vmem:[%s17868_s30 + $0xfc0] sm:$0xff]  ;;  %v804_v38 = vld [vmem:[%s17868_s30 + $0xfc8] sm:$0xff] }
 0x163   : > { %12051 = vmatprep.subr.bf16.mxu0 %v15331_v51  ;;  %12666 = vmatprep.subr.bf16.mxu1 %v15333_v52  ;;  %v15387_v51 = vcombine.high %v755_v45, %v759_v46  ;;  %v15389_v52 = vcombine.high %v756_v47, %v760_v48  ;;  %v807_v36 = vld [vmem:[%s17868_s30 + $0xfe0] sm:$0xff]  ;;  %v808_v39 = vld [vmem:[%s17868_s30 + $0xfe8] sm:$0xff] }
 0x166   : > { %12052 = vmatpush1.bf16.msra.mxu0 %v15330_v59  ;;  %12667 = vmatpush1.bf16.msra.mxu1 %v15332_v60  ;;  %v15386_v59 = vcombine.low %v755_v45, %v759_v46  ;;  %v15388_v60 = vcombine.low %v756_v47, %v760_v48  ;;  %v811_v45 = vld [vmem:[%s17868_s30 + $0x1000] sm:$0xff]  ;;  %v812_v47 = vld [vmem:[%s17868_s30 + $0x1008] sm:$0xff] }
 0x167   : > { %12053 = vmatprep.subr.bf16.mxu0 %v15339_v61  ;;  %12668 = vmatprep.subr.bf16.mxu1 %v15341_v62  ;;  %v15395_v61 = vcombine.high %v763_v53, %v767_v55  ;;  %v15397_v62 = vcombine.high %v764_v56, %v768_v57  ;;  %v815_v46 = vld [vmem:[%s17868_s30 + $0x1020] sm:$0xff]  ;;  %v816_v48 = vld [vmem:[%s17868_s30 + $0x1028] sm:$0xff] }
 0x16a   : > { %12054 = vmatpush1.bf16.msra.mxu0 %v15338_v3  ;;  %12669 = vmatpush1.bf16.msra.mxu1 %v15340_v4  ;;  %v15394_v3 = vcombine.low %v763_v53, %v767_v55  ;;  %v15396_v4 = vcombine.low %v764_v56, %v768_v57  ;;  %v819_v53 = vld [vmem:[%s17868_s30 + $0x1040] sm:$0xff]  ;;  %v18199_v56 = vcombine.low %v18125_v40, %v18125_v40  ;;  %v820_v57 = vld [vmem:[%s17868_s30 + $0x1048] sm:$0xff] }
 0x16b   : > { %12055 = vmatprep.subr.bf16.mxu0 %v15347_v5  ;;  %12670 = vmatprep.subr.bf16.mxu1 %v15349_v6  ;;  %v15403_v5 = vcombine.high %v771_v63, %v775_v0  ;;  %v15405_v6 = vcombine.high %v772_v1, %v776_v2  ;;  %v823_v55 = vld [vmem:[%s17868_s30 + $0x1060] sm:$0xff] }
 0x16e   : > { %12056 = vmatpush1.bf16.msra.mxu0 %v15346_v11  ;;  %12671 = vmatpush1.bf16.msra.mxu1 %v15348_v12  ;;  %v15402_v11 = vcombine.low %v771_v63, %v775_v0  ;;  %v15404_v12 = vcombine.low %v772_v1, %v776_v2  ;;  %v15451_v63 = vcombine.high %v819_v53, %v823_v55  ;;  %v827_v1 = vld [vmem:[%s17868_s30 + $0x1080] sm:$0xff] }
 0x16f   : > { %12057 = vmatprep.subr.bf16.mxu0 %v15355_v14  ;;  %12672 = vmatprep.subr.bf16.mxu1 %v15357_v15  ;;  %v15411_v14 = vcombine.high %v779_v7, %v783_v8  ;;  %v15413_v15 = vcombine.high %v780_v9, %v784_v10  ;;  %v831_v2 = vld [vmem:[%s17868_s30 + $0x10a0] sm:$0xff] }
 0x172   : > { %12058 = vmatpush1.bf16.msra.mxu0 %v15354_v21  ;;  %12673 = vmatpush1.bf16.msra.mxu1 %v15356_v22  ;;  %v15410_v21 = vcombine.low %v779_v7, %v783_v8  ;;  %v15412_v22 = vcombine.low %v780_v9, %v784_v10  ;;  %v15459_v7 = vcombine.high %v827_v1, %v831_v2  ;;  %v835_v9 = vld [vmem:[%s17868_s30 + $0x10c0] sm:$0xff] }
 0x173   : > { %12059 = vmatprep.subr.bf16.mxu0 %v15363_v54  ;;  %12674 = vmatprep.subr.bf16.mxu1 %v15365_v25  ;;  %v15419_v54 = vcombine.high %v787_v17, %v791_v18  ;;  %v15421_v25 = vcombine.high %v788_v19, %v792_v20  ;;  %v839_v10 = vld [vmem:[%s17868_s30 + $0x10e0] sm:$0xff] }
 0x176   : > { %12060 = vmatpush1.bf16.msra.mxu0 %v15362_v31  ;;  %12675 = vmatpush1.bf16.msra.mxu1 %v15364_v32  ;;  %v15418_v31 = vcombine.low %v787_v17, %v791_v18  ;;  %v15420_v32 = vcombine.low %v788_v19, %v792_v20  ;;  %v15467_v17 = vcombine.high %v835_v9, %v839_v10  ;;  %v843_v19 = vld [vmem:[%s17868_s30 + $0x1100] sm:$0xff] }
 0x177   : > { %12061 = vmatprep.subr.bf16.mxu0 %v15371_v33  ;;  %12676 = vmatprep.subr.bf16.mxu1 %v15373_v34  ;;  %v15427_v33 = vcombine.high %v795_v27, %v799_v28  ;;  %v15429_v34 = vcombine.high %v796_v29, %v800_v30  ;;  %v847_v20 = vld [vmem:[%s17868_s30 + $0x1120] sm:$0xff] }
 0x17a   : > { %12062 = vmatpush1.bf16.msra.mxu0 %v15370_v41  ;;  %12677 = vmatpush1.bf16.msra.mxu1 %v15372_v42  ;;  %v15426_v41 = vcombine.low %v795_v27, %v799_v28  ;;  %v15428_v42 = vcombine.low %v796_v29, %v800_v30  ;;  %v15475_v27 = vcombine.high %v843_v19, %v847_v20  ;;  %v851_v29 = vld [vmem:[%s17868_s30 + $0x1140] sm:$0xff] }
 0x17b   : > { %12063 = vmatprep.subr.bf16.mxu0 %v15379_v43  ;;  %12678 = vmatprep.subr.bf16.mxu1 %v15381_v44  ;;  %v15435_v43 = vcombine.high %v803_v35, %v807_v36  ;;  %v15437_v44 = vcombine.high %v804_v38, %v808_v39  ;;  %v855_v30 = vld [vmem:[%s17868_s30 + $0x1160] sm:$0xff] }
 0x17e   : > { %12064 = vmatpush1.bf16.msra.mxu0 %v15378_v49  ;;  %12679 = vmatpush1.bf16.msra.mxu1 %v15380_v50  ;;  %v15434_v49 = vcombine.low %v803_v35, %v807_v36  ;;  %v15436_v50 = vcombine.low %v804_v38, %v808_v39  ;;  %v15483_v35 = vcombine.high %v851_v29, %v855_v30  ;;  %v859_v38 = vld [vmem:[%s17868_s30 + $0x1180] sm:$0xff] }
 0x17f   : > { %12065 = vmatprep.subr.bf16.mxu0 %v15387_v51  ;;  %12680 = vmatprep.subr.bf16.mxu1 %v15389_v52  ;;  %v15443_v51 = vcombine.high %v811_v45, %v815_v46  ;;  %v15445_v52 = vcombine.high %v812_v47, %v816_v48  ;;  %v863_v39 = vld [vmem:[%s17868_s30 + $0x11a0] sm:$0xff] }
 0x182   : > { %12066 = vmatpush1.bf16.msra.mxu0 %v15386_v59  ;;  %12681 = vmatpush1.bf16.msra.mxu1 %v15388_v60  ;;  %v824_v59 = vld [vmem:[%s17868_s30 + $0x1068] sm:$0xff] }
 0x183   : > { %12067 = vmatprep.subr.bf16.mxu0 %v15395_v61  ;;  %12682 = vmatprep.subr.bf16.mxu1 %v15397_v62  ;;  %v18204_v60 = vld [vmem:[%s17860_s23 + $0x20] sm:$0xff]  ;;  %v15442_v61 = vcombine.low %v811_v45, %v815_v46  ;;  %v15444_v62 = vcombine.low %v812_v47, %v816_v48  ;;  %v15453_v0 = vcombine.high %v820_v57, %v824_v59  ;;  %v867_v47 = vld [vmem:[%s17868_s30 + $0x11c0] sm:$0xff] }
 0x184   : > { %v18210_v40 = vcombine.high %v18204_v60, %v18204_v60  ;;  %v15491_v45 = vcombine.high %v859_v38, %v863_v39  ;;  %v871_v48 = vld [vmem:[%s17868_s30 + $0x11e0] sm:$0xff] }
 0x186   : > { %12068 = vmatpush1.bf16.msra.mxu0 %v15394_v3  ;;  %12683 = vmatpush1.bf16.msra.mxu1 %v15396_v4  ;;  %v828_v3 = vld [vmem:[%s17868_s30 + $0x1088] sm:$0xff] }
 0x187   : > { %12069 = vmatprep.subr.bf16.mxu0 %v15403_v5  ;;  %12684 = vmatprep.subr.bf16.mxu1 %v15405_v6  ;;  %v832_v4 = vld [vmem:[%s17868_s30 + $0x10a8] sm:$0xff]  ;;  %v15450_v5 = vcombine.low %v819_v53, %v823_v55  ;;  %v15452_v6 = vcombine.low %v820_v57, %v824_v59  ;;  %v15499_v53 = vcombine.high %v867_v47, %v871_v48  ;;  %v875_v57 = vld [vmem:[%s17868_s30 + $0x1200] sm:$0xff] }
 0x188   : > { %v15461_v8 = vcombine.high %v828_v3, %v832_v4  ;;  %v879_v59 = vld [vmem:[%s17868_s30 + $0x1220] sm:$0xff] }
 0x18a   : > { %12070 = vmatpush1.bf16.msra.mxu0 %v15402_v11  ;;  %12685 = vmatpush1.bf16.msra.mxu1 %v15404_v12  ;;  %v836_v11 = vld [vmem:[%s17868_s30 + $0x10c8] sm:$0xff] }
 0x18b   : > { %12071 = vmatprep.subr.bf16.mxu0 %v15411_v14  ;;  %12686 = vmatprep.subr.bf16.mxu1 %v15413_v15  ;;  %v840_v12 = vld [vmem:[%s17868_s30 + $0x10e8] sm:$0xff]  ;;  %v15458_v14 = vcombine.low %v827_v1, %v831_v2  ;;  %v15460_v15 = vcombine.low %v828_v3, %v832_v4  ;;  %v15507_v1 = vcombine.high %v875_v57, %v879_v59  ;;  %v883_v3 = vld [vmem:[%s17868_s30 + $0x1240] sm:$0xff] }
 0x18c   : > { %v15469_v18 = vcombine.high %v836_v11, %v840_v12  ;;  %v887_v4 = vld [vmem:[%s17868_s30 + $0x1260] sm:$0xff] }
 0x18e   : > { %12072 = vmatpush1.bf16.msra.mxu0 %v15410_v21  ;;  %12687 = vmatpush1.bf16.msra.mxu1 %v15412_v22  ;;  %v844_v21 = vld [vmem:[%s17868_s30 + $0x1108] sm:$0xff] }
 0x18f   : > { %12073 = vmatprep.subr.bf16.mxu0 %v15419_v54  ;;  %12688 = vmatprep.subr.bf16.mxu1 %v15421_v25  ;;  %v848_v22 = vld [vmem:[%s17868_s30 + $0x1128] sm:$0xff]  ;;  %v15466_v54 = vcombine.low %v835_v9, %v839_v10  ;;  %v15468_v25 = vcombine.low %v836_v11, %v840_v12  ;;  %v15515_v9 = vcombine.high %v883_v3, %v887_v4  ;;  %v891_v11 = vld [vmem:[%s17868_s30 + $0x1280] sm:$0xff] }
 0x190   : > { %v15477_v28 = vcombine.high %v844_v21, %v848_v22  ;;  %v895_v12 = vld [vmem:[%s17868_s30 + $0x12a0] sm:$0xff] }
 0x192   : > { %12074 = vmatpush1.bf16.msra.mxu0 %v15418_v31  ;;  %12689 = vmatpush1.bf16.msra.mxu1 %v15420_v32  ;;  %v852_v31 = vld [vmem:[%s17868_s30 + $0x1148] sm:$0xff] }
 0x193   : > { %12075 = vmatprep.subr.bf16.mxu0 %v15427_v33  ;;  %12690 = vmatprep.subr.bf16.mxu1 %v15429_v34  ;;  %v856_v32 = vld [vmem:[%s17868_s30 + $0x1168] sm:$0xff]  ;;  %v15474_v33 = vcombine.low %v843_v19, %v847_v20  ;;  %v15476_v34 = vcombine.low %v844_v21, %v848_v22  ;;  %v15523_v19 = vcombine.high %v891_v11, %v895_v12  ;;  %v899_v21 = vld [vmem:[%s17868_s30 + $0x12c0] sm:$0xff] }
 0x194   : > { %v15485_v36 = vcombine.high %v852_v31, %v856_v32  ;;  %v903_v22 = vld [vmem:[%s17868_s30 + $0x12e0] sm:$0xff] }
 0x196   : > { %12076 = vmatpush1.bf16.msra.mxu0 %v15426_v41  ;;  %12691 = vmatpush1.bf16.msra.mxu1 %v15428_v42  ;;  %v860_v41 = vld [vmem:[%s17868_s30 + $0x1188] sm:$0xff] }
 0x197   : > { %12077 = vmatprep.subr.bf16.mxu0 %v15435_v43  ;;  %12692 = vmatprep.subr.bf16.mxu1 %v15437_v44  ;;  %v864_v42 = vld [vmem:[%s17868_s30 + $0x11a8] sm:$0xff]  ;;  %v15482_v43 = vcombine.low %v851_v29, %v855_v30  ;;  %v15484_v44 = vcombine.low %v852_v31, %v856_v32  ;;  %v15531_v29 = vcombine.high %v899_v21, %v903_v22  ;;  %v907_v31 = vld [vmem:[%s17868_s30 + $0x1300] sm:$0xff] }
 0x198   : > { %v15493_v46 = vcombine.high %v860_v41, %v864_v42  ;;  %v911_v32 = vld [vmem:[%s17868_s30 + $0x1320] sm:$0xff] }
 0x19a   : > { %12078 = vmatpush1.bf16.msra.mxu0 %v15434_v49  ;;  %12693 = vmatpush1.bf16.msra.mxu1 %v15436_v50  ;;  %v868_v49 = vld [vmem:[%s17868_s30 + $0x11c8] sm:$0xff] }
 0x19b   : > { %12088 = vmatprep.subr.bf16.mxu0 %v15443_v51  ;;  %12703 = vmatprep.subr.bf16.mxu1 %v15445_v52  ;;  %v872_v50 = vld [vmem:[%s17868_s30 + $0x11e8] sm:$0xff]  ;;  %v15490_v51 = vcombine.low %v859_v38, %v863_v39  ;;  %v15492_v52 = vcombine.low %v860_v41, %v864_v42  ;;  %v15539_v38 = vcombine.high %v907_v31, %v911_v32  ;;  %v915_v41 = vld [vmem:[%s17868_s30 + $0x1340] sm:$0xff] }
 0x19c   : > { %v15501_v55 = vcombine.high %v868_v49, %v872_v50  ;;  %v919_v42 = vld [vmem:[%s17868_s30 + $0x1360] sm:$0xff] }
 0x19d   : > { %12080 = vmatmul.mubr.bf16.vlgmr.msra.gmra.mrb[0].mxu0 %v18199_v56  ;;  %12695 = vmatmul.mubr.bf16.vlgmr.msra.gmra.mrb[0].mxu1 %v18199_v56 }
 0x19e   : > { %12089 = vmatpush1.bf16.msra.mxu0 %v15442_v61  ;;  %12704 = vmatpush1.bf16.msra.mxu1 %v15444_v62  ;;  %v876_v61 = vld [vmem:[%s17868_s30 + $0x1208] sm:$0xff] }
 0x19f   : > { %12090 = vmatprep.subr.bf16.mxu0 %v15451_v63  ;;  %12705 = vmatprep.subr.bf16.mxu1 %v15453_v0  ;;  %v880_v62 = vld [vmem:[%s17868_s30 + $0x1228] sm:$0xff]  ;;  %v15498_v63 = vcombine.low %v867_v47, %v871_v48  ;;  %v15500_v0 = vcombine.low %v868_v49, %v872_v50  ;;  %v15547_v47 = vcombine.high %v915_v41, %v919_v42  ;;  %v923_v49 = vld [vmem:[%s17868_s30 + $0x1380] sm:$0xff] }
 0x1a0   : > { %12120 = vmatprep.mubr.bf16.mxu0 %v18210_v40  ;;  %12735 = vmatprep.mubr.bf16.mxu1 %v18210_v40  ;;  %v15509_v2 = vcombine.high %v876_v61, %v880_v62  ;;  %v927_v50 = vld [vmem:[%s17868_s30 + $0x13a0] sm:$0xff] }
 0x1a2   : > { %12091 = vmatpush1.bf16.msra.mxu0 %v15450_v5  ;;  %12706 = vmatpush1.bf16.msra.mxu1 %v15452_v6  ;;  %v884_v5 = vld [vmem:[%s17868_s30 + $0x1248] sm:$0xff] }
 0x1a3   : > { %12092 = vmatprep.subr.bf16.mxu0 %v15459_v7  ;;  %12707 = vmatprep.subr.bf16.mxu1 %v15461_v8  ;;  %v888_v6 = vld [vmem:[%s17868_s30 + $0x1268] sm:$0xff]  ;;  %v15506_v7 = vcombine.low %v875_v57, %v879_v59  ;;  %v15508_v8 = vcombine.low %v876_v61, %v880_v62  ;;  %v15555_v57 = vcombine.high %v923_v49, %v927_v50  ;;  %v931_v61 = vld [vmem:[%s17868_s30 + $0x13c0] sm:$0xff] }
 0x1a4   : > { %v15517_v10 = vcombine.high %v884_v5, %v888_v6  ;;  %v935_v62 = vld [vmem:[%s17868_s30 + $0x13e0] sm:$0xff] }
 0x1a6   : > { %12093 = vmatpush1.bf16.msra.mxu0 %v15458_v14  ;;  %12708 = vmatpush1.bf16.msra.mxu1 %v15460_v15  ;;  %v892_v14 = vld [vmem:[%s17868_s30 + $0x1288] sm:$0xff] }
 0x1a7   : > { %12094 = vmatprep.subr.bf16.mxu0 %v15467_v17  ;;  %12709 = vmatprep.subr.bf16.mxu1 %v15469_v18  ;;  %v896_v15 = vld [vmem:[%s17868_s30 + $0x12a8] sm:$0xff]  ;;  %v15514_v17 = vcombine.low %v883_v3, %v887_v4  ;;  %v15516_v18 = vcombine.low %v884_v5, %v888_v6  ;;  %v15563_v3 = vcombine.high %v931_v61, %v935_v62  ;;  %v939_v5 = vld [vmem:[%s17868_s30 + $0x1400] sm:$0xff] }
 0x1a8   : > { %v15525_v20 = vcombine.high %v892_v14, %v896_v15  ;;  %v943_v6 = vld [vmem:[%s17868_s30 + $0x1420] sm:$0xff] }
 0x1aa   : > { %12095 = vmatpush1.bf16.msra.mxu0 %v15466_v54  ;;  %12710 = vmatpush1.bf16.msra.mxu1 %v15468_v25  ;;  %v900_v54 = vld [vmem:[%s17868_s30 + $0x12c8] sm:$0xff] }
 0x1ab   : > { %12096 = vmatprep.subr.bf16.mxu0 %v15475_v27  ;;  %12711 = vmatprep.subr.bf16.mxu1 %v15477_v28  ;;  %v904_v25 = vld [vmem:[%s17868_s30 + $0x12e8] sm:$0xff]  ;;  %v15522_v27 = vcombine.low %v891_v11, %v895_v12  ;;  %v15524_v28 = vcombine.low %v892_v14, %v896_v15  ;;  %v15571_v11 = vcombine.high %v939_v5, %v943_v6  ;;  %v947_v14 = vld [vmem:[%s17868_s30 + $0x1440] sm:$0xff] }
 0x1ac   : > { %v15533_v30 = vcombine.high %v900_v54, %v904_v25  ;;  %v951_v15 = vld [vmem:[%s17868_s30 + $0x1460] sm:$0xff] }
 0x1ae   : > { %12097 = vmatpush1.bf16.msra.mxu0 %v15474_v33  ;;  %12712 = vmatpush1.bf16.msra.mxu1 %v15476_v34  ;;  %v908_v33 = vld [vmem:[%s17868_s30 + $0x1308] sm:$0xff] }
 0x1af   : > { %12098 = vmatprep.subr.bf16.mxu0 %v15483_v35  ;;  %12713 = vmatprep.subr.bf16.mxu1 %v15485_v36  ;;  %v912_v34 = vld [vmem:[%s17868_s30 + $0x1328] sm:$0xff]  ;;  %v15530_v35 = vcombine.low %v899_v21, %v903_v22  ;;  %v15532_v36 = vcombine.low %v900_v54, %v904_v25  ;;  %v15570_v21 = vcombine.low %v939_v5, %v943_v6 }
 0x1b0   : > { %v15541_v39 = vcombine.high %v908_v33, %v912_v34  ;;  %v15579_v54 = vcombine.high %v947_v14, %v951_v15 }
 0x1b2   : > { %12099 = vmatpush1.bf16.msra.mxu0 %v15482_v43  ;;  %12714 = vmatpush1.bf16.msra.mxu1 %v15484_v44  ;;  %v916_v43 = vld [vmem:[%s17868_s30 + $0x1348] sm:$0xff] }
 0x1b3   : > { %12100 = vmatprep.subr.bf16.mxu0 %v15491_v45  ;;  %12715 = vmatprep.subr.bf16.mxu1 %v15493_v46  ;;  %v920_v44 = vld [vmem:[%s17868_s30 + $0x1368] sm:$0xff]  ;;  %v15538_v45 = vcombine.low %v907_v31, %v911_v32  ;;  %v15540_v46 = vcombine.low %v908_v33, %v912_v34  ;;  %v15578_v31 = vcombine.low %v947_v14, %v951_v15 }
 0x1b4   : > { %v15549_v48 = vcombine.high %v916_v43, %v920_v44 }
 0x1b6   : > { %12101 = vmatpush1.bf16.msra.mxu0 %v15490_v51  ;;  %12716 = vmatpush1.bf16.msra.mxu1 %v15492_v52  ;;  %v924_v51 = vld [vmem:[%s17868_s30 + $0x1388] sm:$0xff] }
 0x1b7   : > { %12102 = vmatprep.subr.bf16.mxu0 %v15499_v53  ;;  %12717 = vmatprep.subr.bf16.mxu1 %v15501_v55  ;;  %v928_v52 = vld [vmem:[%s17868_s30 + $0x13a8] sm:$0xff]  ;;  %v15546_v53 = vcombine.low %v915_v41, %v919_v42  ;;  %v15548_v55 = vcombine.low %v916_v43, %v920_v44 }
 0x1b8   : > { %v15557_v59 = vcombine.high %v924_v51, %v928_v52 }
 0x1ba   : > { %12103 = vmatpush1.bf16.msra.mxu0 %v15498_v63  ;;  %12718 = vmatpush1.bf16.msra.mxu1 %v15500_v0  ;;  %v932_v63 = vld [vmem:[%s17868_s30 + $0x13c8] sm:$0xff] }
 0x1bb   : > { %12104 = vmatprep.subr.bf16.mxu0 %v15507_v1  ;;  %12719 = vmatprep.subr.bf16.mxu1 %v15509_v2  ;;  %v936_v0 = vld [vmem:[%s17868_s30 + $0x13e8] sm:$0xff]  ;;  %v15554_v1 = vcombine.low %v923_v49, %v927_v50  ;;  %v15556_v2 = vcombine.low %v924_v51, %v928_v52 }
 0x1bc   : > { %v15565_v4 = vcombine.high %v932_v63, %v936_v0 }
 0x1be   : > { %12105 = vmatpush1.bf16.msra.mxu0 %v15506_v7  ;;  %12720 = vmatpush1.bf16.msra.mxu1 %v15508_v8  ;;  %v940_v7 = vld [vmem:[%s17868_s30 + $0x1408] sm:$0xff] }
 0x1bf   : > { %12106 = vmatprep.subr.bf16.mxu0 %v15515_v9  ;;  %12721 = vmatprep.subr.bf16.mxu1 %v15517_v10  ;;  %v944_v8 = vld [vmem:[%s17868_s30 + $0x1428] sm:$0xff]  ;;  %v15562_v9 = vcombine.low %v931_v61, %v935_v62  ;;  %v15564_v10 = vcombine.low %v932_v63, %v936_v0 }
 0x1c0   : > { %v15573_v12 = vcombine.high %v940_v7, %v944_v8  ;;  %v15572_v22 = vcombine.low %v940_v7, %v944_v8 }
 0x1c2   : > { %12107 = vmatpush1.bf16.msra.mxu0 %v15514_v17  ;;  %12722 = vmatpush1.bf16.msra.mxu1 %v15516_v18  ;;  %v18278_v17 = vcombine.low %v18204_v60, %v18204_v60  ;;  %v948_v18 = vld [vmem:[%s17868_s30 + $0x1448] sm:$0xff] }
 0x1c3   : > { %12108 = vmatprep.subr.bf16.mxu0 %v15523_v19  ;;  %12723 = vmatprep.subr.bf16.mxu1 %v15525_v20  ;;  %v952_v19 = vld [vmem:[%s17868_s30 + $0x1468] sm:$0xff]  ;;  %v18283_v20 = vld [vmem:[%s17860_s23 + $0x28] sm:$0xff] }
 0x1c4   : > { %v15581_v25 = vcombine.high %v948_v18, %v952_v19  ;;  %v18289_v60 = vcombine.high %v18283_v20, %v18283_v20  ;;  %v15580_v32 = vcombine.low %v948_v18, %v952_v19 }
 0x1c6   : > { %12109 = vmatpush1.bf16.msra.mxu0 %v15522_v27  ;;  %12724 = vmatpush1.bf16.msra.mxu1 %v15524_v28  ;;  %v955_v27 = vld [vmem:[%s17868_s30 + $0x1480] sm:$0xff] }
 0x1c7   : > { %12110 = vmatprep.subr.bf16.mxu0 %v15531_v29  ;;  %12725 = vmatprep.subr.bf16.mxu1 %v15533_v30  ;;  %v959_v28 = vld [vmem:[%s17868_s30 + $0x14a0] sm:$0xff]  ;;  %v956_v29 = vld [vmem:[%s17868_s30 + $0x1488] sm:$0xff] }
 0x1c8   : > { %v960_v30 = vld [vmem:[%s17868_s30 + $0x14a8] sm:$0xff]  ;;  %v15587_v33 = vcombine.high %v955_v27, %v959_v28  ;;  %v15586_v41 = vcombine.low %v955_v27, %v959_v28 }
 0x1c9   : > { %v15589_v34 = vcombine.high %v956_v29, %v960_v30  ;;  %v15588_v42 = vcombine.low %v956_v29, %v960_v30 }
 0x1ca   : > { %12111 = vmatpush1.bf16.msra.mxu0 %v15530_v35  ;;  %12726 = vmatpush1.bf16.msra.mxu1 %v15532_v36  ;;  %v963_v35 = vld [vmem:[%s17868_s30 + $0x14c0] sm:$0xff] }
 0x1cb   : > { %12112 = vmatprep.subr.bf16.mxu0 %v15539_v38  ;;  %12727 = vmatprep.subr.bf16.mxu1 %v15541_v39  ;;  %v967_v36 = vld [vmem:[%s17868_s30 + $0x14e0] sm:$0xff]  ;;  %v964_v38 = vld [vmem:[%s17868_s30 + $0x14c8] sm:$0xff] }
 0x1cc   : > { %v968_v39 = vld [vmem:[%s17868_s30 + $0x14e8] sm:$0xff]  ;;  %v15595_v43 = vcombine.high %v963_v35, %v967_v36  ;;  %v15594_v49 = vcombine.low %v963_v35, %v967_v36 }
 0x1cd   : > { %v15597_v44 = vcombine.high %v964_v38, %v968_v39  ;;  %v15596_v50 = vcombine.low %v964_v38, %v968_v39 }
 0x1ce   : > { %12113 = vmatpush1.bf16.msra.mxu0 %v15538_v45  ;;  %12728 = vmatpush1.bf16.msra.mxu1 %v15540_v46  ;;  %v971_v45 = vld [vmem:[%s17868_s30 + $0x1500] sm:$0xff] }
 0x1cf   : > { %12114 = vmatprep.subr.bf16.mxu0 %v15547_v47  ;;  %12729 = vmatprep.subr.bf16.mxu1 %v15549_v48  ;;  %v975_v46 = vld [vmem:[%s17868_s30 + $0x1520] sm:$0xff]  ;;  %v972_v47 = vld [vmem:[%s17868_s30 + $0x1508] sm:$0xff] }
 0x1d0   : > { %v976_v48 = vld [vmem:[%s17868_s30 + $0x1528] sm:$0xff]  ;;  %v15603_v51 = vcombine.high %v971_v45, %v975_v46  ;;  %v15602_v61 = vcombine.low %v971_v45, %v975_v46 }
 0x1d1   : > { %v15605_v52 = vcombine.high %v972_v47, %v976_v48  ;;  %v15604_v62 = vcombine.low %v972_v47, %v976_v48 }
 0x1d2   : > { %12115 = vmatpush1.bf16.msra.mxu0 %v15546_v53  ;;  %12730 = vmatpush1.bf16.msra.mxu1 %v15548_v55  ;;  %v979_v53 = vld [vmem:[%s17868_s30 + $0x1540] sm:$0xff] }
 0x1d3   : > { %12116 = vmatprep.subr.bf16.mxu0 %v15555_v57  ;;  %12731 = vmatprep.subr.bf16.mxu1 %v15557_v59  ;;  %v983_v55 = vld [vmem:[%s17868_s30 + $0x1560] sm:$0xff]  ;;  %v980_v57 = vld [vmem:[%s17868_s30 + $0x1548] sm:$0xff] }
 0x1d4   : > { %v984_v59 = vld [vmem:[%s17868_s30 + $0x1568] sm:$0xff]  ;;  %v15611_v63 = vcombine.high %v979_v53, %v983_v55  ;;  %v15610_v5 = vcombine.low %v979_v53, %v983_v55 }
 0x1d5   : > { %v15613_v0 = vcombine.high %v980_v57, %v984_v59  ;;  %v15612_v6 = vcombine.low %v980_v57, %v984_v59 }
 0x1d6   : > { %12117 = vmatpush1.bf16.msra.mxu0 %v15554_v1  ;;  %12732 = vmatpush1.bf16.msra.mxu1 %v15556_v2  ;;  %v987_v1 = vld [vmem:[%s17868_s30 + $0x1580] sm:$0xff] }
 0x1d7   : > { %12118 = vmatprep.subr.bf16.mxu0 %v15563_v3  ;;  %12733 = vmatprep.subr.bf16.mxu1 %v15565_v4  ;;  %v991_v2 = vld [vmem:[%s17868_s30 + $0x15a0] sm:$0xff]  ;;  %v988_v3 = vld [vmem:[%s17868_s30 + $0x1588] sm:$0xff] }
 0x1d8   : > { %v992_v4 = vld [vmem:[%s17868_s30 + $0x15a8] sm:$0xff]  ;;  %v15619_v7 = vcombine.high %v987_v1, %v991_v2  ;;  %v15618_v14 = vcombine.low %v987_v1, %v991_v2 }
 0x1d9   : > { %v15621_v8 = vcombine.high %v988_v3, %v992_v4  ;;  %v15620_v15 = vcombine.low %v988_v3, %v992_v4 }
 0x1da   : > { %12119 = vmatpush1.bf16.msra.mxu0 %v15562_v9  ;;  %12734 = vmatpush1.bf16.msra.mxu1 %v15564_v10  ;;  %v995_v9 = vld [vmem:[%s17868_s30 + $0x15c0] sm:$0xff] }
 0x1db   : > { %12129 = vmatprep.subr.bf16.mxu0 %v15571_v11  ;;  %12744 = vmatprep.subr.bf16.mxu1 %v15573_v12  ;;  %v999_v10 = vld [vmem:[%s17868_s30 + $0x15e0] sm:$0xff]  ;;  %v996_v11 = vld [vmem:[%s17868_s30 + $0x15c8] sm:$0xff] }
 0x1dc   : > { %v1000_v12 = vld [vmem:[%s17868_s30 + $0x15e8] sm:$0xff]  ;;  %v15627_v18 = vcombine.high %v995_v9, %v999_v10  ;;  %v15626_v27 = vcombine.low %v995_v9, %v999_v10 }
 0x1dd   : > { %12121 = vmatmul.mubr.bf16.vlgmr.msra.gmra.mrb[0].mxu0 %v18278_v17  ;;  %12736 = vmatmul.mubr.bf16.vlgmr.msra.gmra.mrb[0].mxu1 %v18278_v17  ;;  %v15629_v19 = vcombine.high %v996_v11, %v1000_v12  ;;  %v15628_v28 = vcombine.low %v996_v11, %v1000_v12 }
 0x1de   : > { %12130 = vmatpush1.bf16.msra.mxu0 %v15570_v21  ;;  %12745 = vmatpush1.bf16.msra.mxu1 %v15572_v22  ;;  %v1003_v21 = vld [vmem:[%s17868_s30 + $0x1600] sm:$0xff] }
 0x1df   : > { %12131 = vmatprep.subr.bf16.mxu0 %v15579_v54  ;;  %12746 = vmatprep.subr.bf16.mxu1 %v15581_v25  ;;  %v1007_v22 = vld [vmem:[%s17868_s30 + $0x1620] sm:$0xff]  ;;  %v1004_v54 = vld [vmem:[%s17868_s30 + $0x1608] sm:$0xff] }
 0x1e0   : > { %12161 = vmatprep.mubr.bf16.mxu0 %v18289_v60  ;;  %12776 = vmatprep.mubr.bf16.mxu1 %v18289_v60  ;;  %v1008_v25 = vld [vmem:[%s17868_s30 + $0x1628] sm:$0xff]  ;;  %v15635_v29 = vcombine.high %v1003_v21, %v1007_v22  ;;  %v15634_v35 = vcombine.low %v1003_v21, %v1007_v22 }
 0x1e1   : > { %v15637_v30 = vcombine.high %v1004_v54, %v1008_v25  ;;  %v15636_v36 = vcombine.low %v1004_v54, %v1008_v25 }
 0x1e2   : > { %12132 = vmatpush1.bf16.msra.mxu0 %v15578_v31  ;;  %12747 = vmatpush1.bf16.msra.mxu1 %v15580_v32  ;;  %v1011_v31 = vld [vmem:[%s17868_s30 + $0x1640] sm:$0xff] }
 0x1e3   : > { %12133 = vmatprep.subr.bf16.mxu0 %v15587_v33  ;;  %12748 = vmatprep.subr.bf16.mxu1 %v15589_v34  ;;  %v1015_v32 = vld [vmem:[%s17868_s30 + $0x1660] sm:$0xff]  ;;  %v1012_v33 = vld [vmem:[%s17868_s30 + $0x1648] sm:$0xff] }
 0x1e4   : > { %v1016_v34 = vld [vmem:[%s17868_s30 + $0x1668] sm:$0xff]  ;;  %v15643_v38 = vcombine.high %v1011_v31, %v1015_v32  ;;  %v15642_v45 = vcombine.low %v1011_v31, %v1015_v32 }
 0x1e5   : > { %v15645_v39 = vcombine.high %v1012_v33, %v1016_v34  ;;  %v15644_v46 = vcombine.low %v1012_v33, %v1016_v34 }
 0x1e6   : > { %12134 = vmatpush1.bf16.msra.mxu0 %v15586_v41  ;;  %12749 = vmatpush1.bf16.msra.mxu1 %v15588_v42  ;;  %v1019_v41 = vld [vmem:[%s17868_s30 + $0x1680] sm:$0xff] }
 0x1e7   : > { %12135 = vmatprep.subr.bf16.mxu0 %v15595_v43  ;;  %12750 = vmatprep.subr.bf16.mxu1 %v15597_v44  ;;  %v1023_v42 = vld [vmem:[%s17868_s30 + $0x16a0] sm:$0xff]  ;;  %v1020_v43 = vld [vmem:[%s17868_s30 + $0x1688] sm:$0xff] }
 0x1e8   : > { %v1024_v44 = vld [vmem:[%s17868_s30 + $0x16a8] sm:$0xff]  ;;  %v15651_v47 = vcombine.high %v1019_v41, %v1023_v42  ;;  %v15650_v53 = vcombine.low %v1019_v41, %v1023_v42 }
 0x1e9   : > { %v15653_v48 = vcombine.high %v1020_v43, %v1024_v44  ;;  %v15652_v55 = vcombine.low %v1020_v43, %v1024_v44 }
 0x1ea   : > { %12136 = vmatpush1.bf16.msra.mxu0 %v15594_v49  ;;  %12751 = vmatpush1.bf16.msra.mxu1 %v15596_v50  ;;  %v1027_v49 = vld [vmem:[%s17868_s30 + $0x16c0] sm:$0xff] }
 0x1eb   : > { %12137 = vmatprep.subr.bf16.mxu0 %v15603_v51  ;;  %12752 = vmatprep.subr.bf16.mxu1 %v15605_v52  ;;  %v1031_v50 = vld [vmem:[%s17868_s30 + $0x16e0] sm:$0xff]  ;;  %v1028_v51 = vld [vmem:[%s17868_s30 + $0x16c8] sm:$0xff] }
 0x1ec   : > { %v1032_v52 = vld [vmem:[%s17868_s30 + $0x16e8] sm:$0xff]  ;;  %v15659_v57 = vcombine.high %v1027_v49, %v1031_v50  ;;  %v15658_v1 = vcombine.low %v1027_v49, %v1031_v50  ;;  %v18362_v50 = vld [vmem:[%s17860_s23 + $0x30] sm:$0xff] }
 0x1ed   : > { %v15661_v59 = vcombine.high %v1028_v51, %v1032_v52  ;;  %v15660_v2 = vcombine.low %v1028_v51, %v1032_v52  ;;  %v1080_v49 = vld [vmem:[%s17868_s30 + $0x1868] sm:$0xff] }
 0x1ee   : > { %12138 = vmatpush1.bf16.msra.mxu0 %v15602_v61  ;;  %12753 = vmatpush1.bf16.msra.mxu1 %v15604_v62  ;;  %v1035_v61 = vld [vmem:[%s17868_s30 + $0x1700] sm:$0xff] }
 0x1ef   : > { %12139 = vmatprep.subr.bf16.mxu0 %v15611_v63  ;;  %12754 = vmatprep.subr.bf16.mxu1 %v15613_v0  ;;  %v1039_v62 = vld [vmem:[%s17868_s30 + $0x1720] sm:$0xff]  ;;  %v1036_v63 = vld [vmem:[%s17868_s30 + $0x1708] sm:$0xff] }
 0x1f0   : > { %v1040_v0 = vld [vmem:[%s17868_s30 + $0x1728] sm:$0xff]  ;;  %v15667_v3 = vcombine.high %v1035_v61, %v1039_v62  ;;  %v15666_v9 = vcombine.low %v1035_v61, %v1039_v62 }
 0x1f1   : > { %v15669_v4 = vcombine.high %v1036_v63, %v1040_v0  ;;  %v15668_v10 = vcombine.low %v1036_v63, %v1040_v0  ;;  %v1084_v61 = vld [vmem:[%s17868_s30 + $0x1888] sm:$0xff] }
 0x1f2   : > { %12140 = vmatpush1.bf16.msra.mxu0 %v15610_v5  ;;  %12755 = vmatpush1.bf16.msra.mxu1 %v15612_v6  ;;  %v1043_v5 = vld [vmem:[%s17868_s30 + $0x1740] sm:$0xff]  ;;  %v1088_v62 = vld [vmem:[%s17868_s30 + $0x18a8] sm:$0xff] }
 0x1f3   : > { %12141 = vmatprep.subr.bf16.mxu0 %v15619_v7  ;;  %12756 = vmatprep.subr.bf16.mxu1 %v15621_v8  ;;  %v1047_v6 = vld [vmem:[%s17868_s30 + $0x1760] sm:$0xff]  ;;  %v1044_v7 = vld [vmem:[%s17868_s30 + $0x1748] sm:$0xff] }
 0x1f4   : > { %v1048_v8 = vld [vmem:[%s17868_s30 + $0x1768] sm:$0xff]  ;;  %v15675_v11 = vcombine.high %v1043_v5, %v1047_v6  ;;  %v15674_v21 = vcombine.low %v1043_v5, %v1047_v6 }
 0x1f5   : > { %v15677_v12 = vcombine.high %v1044_v7, %v1048_v8  ;;  %v15676_v22 = vcombine.low %v1044_v7, %v1048_v8  ;;  %v1092_v5 = vld [vmem:[%s17868_s30 + $0x18c8] sm:$0xff]  ;;  %v15716_v8 = vcombine.low %v1084_v61, %v1088_v62 }
 0x1f6   : > { %12142 = vmatpush1.bf16.msra.mxu0 %v15618_v14  ;;  %12757 = vmatpush1.bf16.msra.mxu1 %v15620_v15  ;;  %v1051_v14 = vld [vmem:[%s17868_s30 + $0x1780] sm:$0xff]  ;;  %v1096_v6 = vld [vmem:[%s17868_s30 + $0x18e8] sm:$0xff] }
 0x1f7   : > { %12143 = vmatprep.subr.bf16.mxu0 %v15627_v18  ;;  %12758 = vmatprep.subr.bf16.mxu1 %v15629_v19  ;;  %v1055_v15 = vld [vmem:[%s17868_s30 + $0x17a0] sm:$0xff]  ;;  %v1052_v18 = vld [vmem:[%s17868_s30 + $0x1788] sm:$0xff] }
 0x1f8   : > { %v1056_v19 = vld [vmem:[%s17868_s30 + $0x17a8] sm:$0xff]  ;;  %v15683_v54 = vcombine.high %v1051_v14, %v1055_v15  ;;  %v15682_v31 = vcombine.low %v1051_v14, %v1055_v15 }
 0x1f9   : > { %v15685_v25 = vcombine.high %v1052_v18, %v1056_v19  ;;  %v15684_v32 = vcombine.low %v1052_v18, %v1056_v19  ;;  %v1100_v14 = vld [vmem:[%s17868_s30 + $0x1908] sm:$0xff]  ;;  %v15724_v19 = vcombine.low %v1092_v5, %v1096_v6 }
 0x1fa   : > { %12144 = vmatpush1.bf16.msra.mxu0 %v15626_v27  ;;  %12759 = vmatpush1.bf16.msra.mxu1 %v15628_v28  ;;  %v1059_v27 = vld [vmem:[%s17868_s30 + $0x17c0] sm:$0xff]  ;;  %v1104_v15 = vld [vmem:[%s17868_s30 + $0x1928] sm:$0xff] }
 0x1fb   : > { %12145 = vmatprep.subr.bf16.mxu0 %v15635_v29  ;;  %12760 = vmatprep.subr.bf16.mxu1 %v15637_v30  ;;  %v1063_v28 = vld [vmem:[%s17868_s30 + $0x17e0] sm:$0xff]  ;;  %v1060_v29 = vld [vmem:[%s17868_s30 + $0x17c8] sm:$0xff] }
 0x1fc   : > { %v1064_v30 = vld [vmem:[%s17868_s30 + $0x17e8] sm:$0xff]  ;;  %v15691_v33 = vcombine.high %v1059_v27, %v1063_v28  ;;  %v15690_v41 = vcombine.low %v1059_v27, %v1063_v28 }
 0x1fd   : > { %v15693_v34 = vcombine.high %v1060_v29, %v1064_v30  ;;  %v15692_v42 = vcombine.low %v1060_v29, %v1064_v30  ;;  %v1108_v27 = vld [vmem:[%s17868_s30 + $0x1948] sm:$0xff]  ;;  %v15732_v30 = vcombine.low %v1100_v14, %v1104_v15 }
 0x1fe   : > { %12146 = vmatpush1.bf16.msra.mxu0 %v15634_v35  ;;  %12761 = vmatpush1.bf16.msra.mxu1 %v15636_v36  ;;  %v1067_v35 = vld [vmem:[%s17868_s30 + $0x1800] sm:$0xff]  ;;  %v1112_v28 = vld [vmem:[%s17868_s30 + $0x1968] sm:$0xff] }
 0x1ff   : > { %12147 = vmatprep.subr.bf16.mxu0 %v15643_v38  ;;  %12762 = vmatprep.subr.bf16.mxu1 %v15645_v39  ;;  %v1071_v36 = vld [vmem:[%s17868_s30 + $0x1820] sm:$0xff]  ;;  %v1068_v38 = vld [vmem:[%s17868_s30 + $0x1808] sm:$0xff] }
 0x200   : > { %v1072_v39 = vld [vmem:[%s17868_s30 + $0x1828] sm:$0xff]  ;;  %v15699_v43 = vcombine.high %v1067_v35, %v1071_v36  ;;  %v15698_v51 = vcombine.low %v1067_v35, %v1071_v36 }
 0x201   : > { %v15701_v44 = vcombine.high %v1068_v38, %v1072_v39  ;;  %v15700_v52 = vcombine.low %v1068_v38, %v1072_v39  ;;  %v1116_v35 = vld [vmem:[%s17868_s30 + $0x1988] sm:$0xff]  ;;  %v15740_v39 = vcombine.low %v1108_v27, %v1112_v28 }
 0x202   : > { %12148 = vmatpush1.bf16.msra.mxu0 %v15642_v45  ;;  %12763 = vmatpush1.bf16.msra.mxu1 %v15644_v46  ;;  %v1075_v45 = vld [vmem:[%s17868_s30 + $0x1840] sm:$0xff]  ;;  %v1120_v36 = vld [vmem:[%s17868_s30 + $0x19a8] sm:$0xff] }
 0x203   : > { %12149 = vmatprep.subr.bf16.mxu0 %v15651_v47  ;;  %12764 = vmatprep.subr.bf16.mxu1 %v15653_v48  ;;  %v1079_v46 = vld [vmem:[%s17868_s30 + $0x1860] sm:$0xff]  ;;  %v18357_v47 = vcombine.low %v18283_v20, %v18283_v20  ;;  %v1076_v48 = vld [vmem:[%s17868_s30 + $0x1848] sm:$0xff]  ;;  %v18368_v20 = vcombine.high %v18362_v50, %v18362_v50 }
 0x204   : > { %v15706_v63 = vcombine.low %v1075_v45, %v1079_v46  ;;  %v15708_v0 = vcombine.low %v1076_v48, %v1080_v49 }
 0x206   : > { %12150 = vmatpush1.bf16.msra.mxu0 %v15650_v53  ;;  %12765 = vmatpush1.bf16.msra.mxu1 %v15652_v55  ;;  %v15707_v53 = vcombine.high %v1075_v45, %v1079_v46  ;;  %v15709_v55 = vcombine.high %v1076_v48, %v1080_v49  ;;  %v1124_v45 = vld [vmem:[%s17868_s30 + $0x19c8] sm:$0xff]  ;;  %v15748_v49 = vcombine.low %v1116_v35, %v1120_v36 }
 0x207   : > { %12151 = vmatprep.subr.bf16.mxu0 %v15659_v57  ;;  %12766 = vmatprep.subr.bf16.mxu1 %v15661_v59  ;;  %v1083_v57 = vld [vmem:[%s17868_s30 + $0x1880] sm:$0xff]  ;;  %v1128_v46 = vld [vmem:[%s17868_s30 + $0x19e8] sm:$0xff] }
 0x208   : > { %v1087_v59 = vld [vmem:[%s17868_s30 + $0x18a0] sm:$0xff] }
 0x209   : > { %v15714_v7 = vcombine.low %v1083_v57, %v1087_v59 }
 0x20a   : > { %12152 = vmatpush1.bf16.msra.mxu0 %v15658_v1  ;;  %12767 = vmatpush1.bf16.msra.mxu1 %v15660_v2  ;;  %v15715_v1 = vcombine.high %v1083_v57, %v1087_v59  ;;  %v15717_v2 = vcombine.high %v1084_v61, %v1088_v62  ;;  %v1132_v57 = vld [vmem:[%s17868_s30 + $0x1a08] sm:$0xff]  ;;  %v15756_v62 = vcombine.low %v1124_v45, %v1128_v46 }
 0x20b   : > { %12153 = vmatprep.subr.bf16.mxu0 %v15667_v3  ;;  %12768 = vmatprep.subr.bf16.mxu1 %v15669_v4  ;;  %v1091_v3 = vld [vmem:[%s17868_s30 + $0x18c0] sm:$0xff]  ;;  %v1136_v59 = vld [vmem:[%s17868_s30 + $0x1a28] sm:$0xff] }
 0x20c   : > { %v1095_v4 = vld [vmem:[%s17868_s30 + $0x18e0] sm:$0xff] }
 0x20d   : > { %v15722_v18 = vcombine.low %v1091_v3, %v1095_v4 }
 0x20e   : > { %12154 = vmatpush1.bf16.msra.mxu0 %v15666_v9  ;;  %12769 = vmatpush1.bf16.msra.mxu1 %v15668_v10  ;;  %v15723_v9 = vcombine.high %v1091_v3, %v1095_v4  ;;  %v15725_v10 = vcombine.high %v1092_v5, %v1096_v6  ;;  %v1140_v3 = vld [vmem:[%s17868_s30 + $0x1a48] sm:$0xff]  ;;  %v15764_v6 = vcombine.low %v1132_v57, %v1136_v59 }
 0x20f   : > { %12155 = vmatprep.subr.bf16.mxu0 %v15675_v11  ;;  %12770 = vmatprep.subr.bf16.mxu1 %v15677_v12  ;;  %v1099_v11 = vld [vmem:[%s17868_s30 + $0x1900] sm:$0xff]  ;;  %v1144_v4 = vld [vmem:[%s17868_s30 + $0x1a68] sm:$0xff] }
 0x210   : > { %v1103_v12 = vld [vmem:[%s17868_s30 + $0x1920] sm:$0xff] }
 0x211   : > { %v15730_v29 = vcombine.low %v1099_v11, %v1103_v12 }
 0x212   : > { %12156 = vmatpush1.bf16.msra.mxu0 %v15674_v21  ;;  %12771 = vmatpush1.bf16.msra.mxu1 %v15676_v22  ;;  %v15731_v21 = vcombine.high %v1099_v11, %v1103_v12  ;;  %v15733_v22 = vcombine.high %v1100_v14, %v1104_v15  ;;  %v1148_v11 = vld [vmem:[%s17868_s30 + $0x1a88] sm:$0xff]  ;;  %v15772_v15 = vcombine.low %v1140_v3, %v1144_v4 }
 0x213   : > { %12157 = vmatprep.subr.bf16.mxu0 %v15683_v54  ;;  %12772 = vmatprep.subr.bf16.mxu1 %v15685_v25  ;;  %v1107_v54 = vld [vmem:[%s17868_s30 + $0x1940] sm:$0xff]  ;;  %v1152_v12 = vld [vmem:[%s17868_s30 + $0x1aa8] sm:$0xff] }
 0x214   : > { %v1111_v25 = vld [vmem:[%s17868_s30 + $0x1960] sm:$0xff] }
 0x215   : > { %v15738_v38 = vcombine.low %v1107_v54, %v1111_v25 }
 0x216   : > { %12158 = vmatpush1.bf16.msra.mxu0 %v15682_v31  ;;  %12773 = vmatpush1.bf16.msra.mxu1 %v15684_v32  ;;  %v15739_v31 = vcombine.high %v1107_v54, %v1111_v25  ;;  %v15741_v32 = vcombine.high %v1108_v27, %v1112_v28  ;;  %v1156_v54 = vld [vmem:[%s17868_s30 + $0x1ac8] sm:$0xff]  ;;  %v15780_v28 = vcombine.low %v1148_v11, %v1152_v12 }
 0x217   : > { %12159 = vmatprep.subr.bf16.mxu0 %v15691_v33  ;;  %12774 = vmatprep.subr.bf16.mxu1 %v15693_v34  ;;  %v1115_v33 = vld [vmem:[%s17868_s30 + $0x1980] sm:$0xff]  ;;  %v1160_v25 = vld [vmem:[%s17868_s30 + $0x1ae8] sm:$0xff] }
 0x218   : > { %v1119_v34 = vld [vmem:[%s17868_s30 + $0x19a0] sm:$0xff] }
 0x219   : > { %v15746_v48 = vcombine.low %v1115_v33, %v1119_v34 }
 0x21a   : > { %12160 = vmatpush1.bf16.msra.mxu0 %v15690_v41  ;;  %12775 = vmatpush1.bf16.msra.mxu1 %v15692_v42  ;;  %v15747_v41 = vcombine.high %v1115_v33, %v1119_v34  ;;  %v15749_v42 = vcombine.high %v1116_v35, %v1120_v36  ;;  %v1164_v33 = vld [vmem:[%s17868_s30 + $0x1b08] sm:$0xff]  ;;  %v15788_v36 = vcombine.low %v1156_v54, %v1160_v25 }
 0x21b   : > { %12170 = vmatprep.subr.bf16.mxu0 %v15699_v43  ;;  %12785 = vmatprep.subr.bf16.mxu1 %v15701_v44  ;;  %v1123_v43 = vld [vmem:[%s17868_s30 + $0x19c0] sm:$0xff]  ;;  %v1168_v34 = vld [vmem:[%s17868_s30 + $0x1b28] sm:$0xff] }
 0x21c   : > { %v1127_v44 = vld [vmem:[%s17868_s30 + $0x19e0] sm:$0xff] }
 0x21d   : > { %12162 = vmatmul.mubr.bf16.vlgmr.msra.gmra.mrb[0].mxu0 %v18357_v47  ;;  %12777 = vmatmul.mubr.bf16.vlgmr.msra.gmra.mrb[0].mxu1 %v18357_v47  ;;  %v15754_v61 = vcombine.low %v1123_v43, %v1127_v44 }
 0x21e   : > { %12171 = vmatpush1.bf16.msra.mxu0 %v15698_v51  ;;  %12786 = vmatpush1.bf16.msra.mxu1 %v15700_v52  ;;  %v15755_v51 = vcombine.high %v1123_v43, %v1127_v44  ;;  %v15757_v52 = vcombine.high %v1124_v45, %v1128_v46  ;;  %v1172_v43 = vld [vmem:[%s17868_s30 + $0x1b48] sm:$0xff]  ;;  %v15796_v46 = vcombine.low %v1164_v33, %v1168_v34 }
 0x21f   : > { %12172 = vmatprep.subr.bf16.mxu0 %v15707_v53  ;;  %12787 = vmatprep.subr.bf16.mxu1 %v15709_v55  ;;  %v1131_v53 = vld [vmem:[%s17868_s30 + $0x1a00] sm:$0xff]  ;;  %v1176_v44 = vld [vmem:[%s17868_s30 + $0x1b68] sm:$0xff] }
 0x220   : > { %12202 = vmatprep.mubr.bf16.mxu0 %v18368_v20  ;;  %12817 = vmatprep.mubr.bf16.mxu1 %v18368_v20  ;;  %v1135_v55 = vld [vmem:[%s17868_s30 + $0x1a20] sm:$0xff] }
 0x221   : > { %v15762_v5 = vcombine.low %v1131_v53, %v1135_v55 }
 0x222   : > { %12173 = vmatpush1.bf16.msra.mxu0 %v15706_v63  ;;  %12788 = vmatpush1.bf16.msra.mxu1 %v15708_v0  ;;  %v15763_v63 = vcombine.high %v1131_v53, %v1135_v55  ;;  %v15765_v0 = vcombine.high %v1132_v57, %v1136_v59  ;;  %v1180_v53 = vld [vmem:[%s17868_s30 + $0x1b88] sm:$0xff]  ;;  %v15804_v59 = vcombine.low %v1172_v43, %v1176_v44 }
 0x223   : > { %12174 = vmatprep.subr.bf16.mxu0 %v15715_v1  ;;  %12789 = vmatprep.subr.bf16.mxu1 %v15717_v2  ;;  %v1139_v1 = vld [vmem:[%s17868_s30 + $0x1a40] sm:$0xff]  ;;  %v1184_v55 = vld [vmem:[%s17868_s30 + $0x1ba8] sm:$0xff] }
 0x224   : > { %v1143_v2 = vld [vmem:[%s17868_s30 + $0x1a60] sm:$0xff] }
 0x225   : > { %v15770_v14 = vcombine.low %v1139_v1, %v1143_v2 }
 0x226   : > { %12175 = vmatpush1.bf16.msra.mxu0 %v15714_v7  ;;  %12790 = vmatpush1.bf16.msra.mxu1 %v15716_v8  ;;  %v15771_v7 = vcombine.high %v1139_v1, %v1143_v2  ;;  %v15773_v8 = vcombine.high %v1140_v3, %v1144_v4  ;;  %v1188_v1 = vld [vmem:[%s17868_s30 + $0x1bc8] sm:$0xff]  ;;  %v15812_v4 = vcombine.low %v1180_v53, %v1184_v55 }
 0x227   : > { %12176 = vmatprep.subr.bf16.mxu0 %v15723_v9  ;;  %12791 = vmatprep.subr.bf16.mxu1 %v15725_v10  ;;  %v1147_v9 = vld [vmem:[%s17868_s30 + $0x1a80] sm:$0xff]  ;;  %v1192_v2 = vld [vmem:[%s17868_s30 + $0x1be8] sm:$0xff] }
 0x228   : > { %v1151_v10 = vld [vmem:[%s17868_s30 + $0x1aa0] sm:$0xff] }
 0x229   : > { %v15778_v27 = vcombine.low %v1147_v9, %v1151_v10 }
 0x22a   : > { %12177 = vmatpush1.bf16.msra.mxu0 %v15722_v18  ;;  %12792 = vmatpush1.bf16.msra.mxu1 %v15724_v19  ;;  %v15779_v18 = vcombine.high %v1147_v9, %v1151_v10  ;;  %v15781_v19 = vcombine.high %v1148_v11, %v1152_v12  ;;  %v1196_v9 = vld [vmem:[%s17868_s30 + $0x1c08] sm:$0xff]  ;;  %v15820_v12 = vcombine.low %v1188_v1, %v1192_v2 }
 0x22b   : > { %12178 = vmatprep.subr.bf16.mxu0 %v15731_v21  ;;  %12793 = vmatprep.subr.bf16.mxu1 %v15733_v22  ;;  %v1155_v21 = vld [vmem:[%s17868_s30 + $0x1ac0] sm:$0xff]  ;;  %v1200_v10 = vld [vmem:[%s17868_s30 + $0x1c28] sm:$0xff] }
 0x22c   : > { %v1159_v22 = vld [vmem:[%s17868_s30 + $0x1ae0] sm:$0xff] }
 0x22d   : > { %v15786_v35 = vcombine.low %v1155_v21, %v1159_v22 }
 0x22e   : > { %12179 = vmatpush1.bf16.msra.mxu0 %v15730_v29  ;;  %12794 = vmatpush1.bf16.msra.mxu1 %v15732_v30  ;;  %v15787_v29 = vcombine.high %v1155_v21, %v1159_v22  ;;  %v15789_v30 = vcombine.high %v1156_v54, %v1160_v25  ;;  %v18436_v21 = vcombine.low %v18362_v50, %v18362_v50  ;;  %v1204_v22 = vld [vmem:[%s17868_s30 + $0x1c48] sm:$0xff] }
 0x22f   : > { %12180 = vmatprep.subr.bf16.mxu0 %v15739_v31  ;;  %12795 = vmatprep.subr.bf16.mxu1 %v15741_v32  ;;  %v1163_v31 = vld [vmem:[%s17868_s30 + $0x1b00] sm:$0xff]  ;;  %v1208_v54 = vld [vmem:[%s17868_s30 + $0x1c68] sm:$0xff] }
 0x230   : > { %v1167_v32 = vld [vmem:[%s17868_s30 + $0x1b20] sm:$0xff] }
 0x231   : > { %v15794_v45 = vcombine.low %v1163_v31, %v1167_v32  ;;  %v18441_v25 = vld [vmem:[%s17860_s23 + $0x38] sm:$0xff] }
 0x232   : > { %12181 = vmatpush1.bf16.msra.mxu0 %v15738_v38  ;;  %12796 = vmatpush1.bf16.msra.mxu1 %v15740_v39  ;;  %v15795_v38 = vcombine.high %v1163_v31, %v1167_v32  ;;  %v15797_v39 = vcombine.high %v1164_v33, %v1168_v34  ;;  %v1211_v31 = vld [vmem:[%s17868_s30 + $0x1c80] sm:$0xff]  ;;  %v18447_v50 = vcombine.high %v18441_v25, %v18441_v25  ;;  %v1212_v33 = vld [vmem:[%s17868_s30 + $0x1c88] sm:$0xff] }
 0x233   : > { %12182 = vmatprep.subr.bf16.mxu0 %v15747_v41  ;;  %12797 = vmatprep.subr.bf16.mxu1 %v15749_v42  ;;  %v1171_v41 = vld [vmem:[%s17868_s30 + $0x1b40] sm:$0xff]  ;;  %v1216_v34 = vld [vmem:[%s17868_s30 + $0x1ca8] sm:$0xff] }
 0x234   : > { %v1175_v42 = vld [vmem:[%s17868_s30 + $0x1b60] sm:$0xff] }
 0x235   : > { %v15802_v57 = vcombine.low %v1171_v41, %v1175_v42  ;;  %v1215_v32 = vld [vmem:[%s17868_s30 + $0x1ca0] sm:$0xff] }
 0x236   : > { %12183 = vmatpush1.bf16.msra.mxu0 %v15746_v48  ;;  %12798 = vmatpush1.bf16.msra.mxu1 %v15748_v49  ;;  %v15803_v48 = vcombine.high %v1171_v41, %v1175_v42  ;;  %v15805_v49 = vcombine.high %v1172_v43, %v1176_v44  ;;  %v1219_v41 = vld [vmem:[%s17868_s30 + $0x1cc0] sm:$0xff]  ;;  %v1220_v43 = vld [vmem:[%s17868_s30 + $0x1cc8] sm:$0xff] }
 0x237   : > { %12184 = vmatprep.subr.bf16.mxu0 %v15755_v51  ;;  %12799 = vmatprep.subr.bf16.mxu1 %v15757_v52  ;;  %v1179_v51 = vld [vmem:[%s17868_s30 + $0x1b80] sm:$0xff]  ;;  %v1224_v44 = vld [vmem:[%s17868_s30 + $0x1ce8] sm:$0xff] }
 0x238   : > { %v1183_v52 = vld [vmem:[%s17868_s30 + $0x1ba0] sm:$0xff] }
 0x239   : > { %v15810_v3 = vcombine.low %v1179_v51, %v1183_v52  ;;  %v1223_v42 = vld [vmem:[%s17868_s30 + $0x1ce0] sm:$0xff] }
 0x23a   : > { %12185 = vmatpush1.bf16.msra.mxu0 %v15754_v61  ;;  %12800 = vmatpush1.bf16.msra.mxu1 %v15756_v62  ;;  %v15811_v61 = vcombine.high %v1179_v51, %v1183_v52  ;;  %v15813_v62 = vcombine.high %v1180_v53, %v1184_v55  ;;  %v1227_v51 = vld [vmem:[%s17868_s30 + $0x1d00] sm:$0xff]  ;;  %v1228_v53 = vld [vmem:[%s17868_s30 + $0x1d08] sm:$0xff] }
 0x23b   : > { %12186 = vmatprep.subr.bf16.mxu0 %v15763_v63  ;;  %12801 = vmatprep.subr.bf16.mxu1 %v15765_v0  ;;  %v1187_v63 = vld [vmem:[%s17868_s30 + $0x1bc0] sm:$0xff]  ;;  %v1232_v55 = vld [vmem:[%s17868_s30 + $0x1d28] sm:$0xff] }
 0x23c   : > { %v1191_v0 = vld [vmem:[%s17868_s30 + $0x1be0] sm:$0xff] }
 0x23d   : > { %v15818_v11 = vcombine.low %v1187_v63, %v1191_v0  ;;  %v1231_v52 = vld [vmem:[%s17868_s30 + $0x1d20] sm:$0xff] }
 0x23e   : > { %12187 = vmatpush1.bf16.msra.mxu0 %v15762_v5  ;;  %12802 = vmatpush1.bf16.msra.mxu1 %v15764_v6  ;;  %v15819_v5 = vcombine.high %v1187_v63, %v1191_v0  ;;  %v15821_v6 = vcombine.high %v1188_v1, %v1192_v2  ;;  %v1235_v63 = vld [vmem:[%s17868_s30 + $0x1d40] sm:$0xff]  ;;  %v1236_v1 = vld [vmem:[%s17868_s30 + $0x1d48] sm:$0xff] }
 0x23f   : > { %12188 = vmatprep.subr.bf16.mxu0 %v15771_v7  ;;  %12803 = vmatprep.subr.bf16.mxu1 %v15773_v8  ;;  %v1195_v7 = vld [vmem:[%s17868_s30 + $0x1c00] sm:$0xff]  ;;  %v1240_v2 = vld [vmem:[%s17868_s30 + $0x1d68] sm:$0xff] }
 0x240   : > { %v1199_v8 = vld [vmem:[%s17868_s30 + $0x1c20] sm:$0xff] }
 0x241   : > { %v1239_v0 = vld [vmem:[%s17868_s30 + $0x1d60] sm:$0xff] }
 0x242   : > { %12189 = vmatpush1.bf16.msra.mxu0 %v15770_v14  ;;  %12804 = vmatpush1.bf16.msra.mxu1 %v15772_v15  ;;  %v15827_v14 = vcombine.high %v1195_v7, %v1199_v8  ;;  %v15829_v15 = vcombine.high %v1196_v9, %v1200_v10 }
 0x243   : > { %12190 = vmatprep.subr.bf16.mxu0 %v15779_v18  ;;  %12805 = vmatprep.subr.bf16.mxu1 %v15781_v19  ;;  %v1203_v18 = vld [vmem:[%s17868_s30 + $0x1c40] sm:$0xff] }
 0x244   : > { %v1207_v19 = vld [vmem:[%s17868_s30 + $0x1c60] sm:$0xff] }
 0x246   : > { %12191 = vmatpush1.bf16.msra.mxu0 %v15778_v27  ;;  %12806 = vmatpush1.bf16.msra.mxu1 %v15780_v28  ;;  %v15826_v27 = vcombine.low %v1195_v7, %v1199_v8  ;;  %v15828_v28 = vcombine.low %v1196_v9, %v1200_v10  ;;  %v1243_v7 = vld [vmem:[%s17868_s30 + $0x1d80] sm:$0xff]  ;;  %v1244_v9 = vld [vmem:[%s17868_s30 + $0x1d88] sm:$0xff] }
 0x247   : > { %12192 = vmatprep.subr.bf16.mxu0 %v15787_v29  ;;  %12807 = vmatprep.subr.bf16.mxu1 %v15789_v30  ;;  %v15835_v29 = vcombine.high %v1203_v18, %v1207_v19  ;;  %v15837_v30 = vcombine.high %v1204_v22, %v1208_v54  ;;  %v1247_v8 = vld [vmem:[%s17868_s30 + $0x1da0] sm:$0xff]  ;;  %v1248_v10 = vld [vmem:[%s17868_s30 + $0x1da8] sm:$0xff] }
 0x24a   : > { %12193 = vmatpush1.bf16.msra.mxu0 %v15786_v35  ;;  %12808 = vmatpush1.bf16.msra.mxu1 %v15788_v36  ;;  %v15834_v35 = vcombine.low %v1203_v18, %v1207_v19  ;;  %v15836_v36 = vcombine.low %v1204_v22, %v1208_v54  ;;  %v1251_v18 = vld [vmem:[%s17868_s30 + $0x1dc0] sm:$0xff]  ;;  %v1252_v22 = vld [vmem:[%s17868_s30 + $0x1dc8] sm:$0xff] }
 0x24b   : > { %12194 = vmatprep.subr.bf16.mxu0 %v15795_v38  ;;  %12809 = vmatprep.subr.bf16.mxu1 %v15797_v39  ;;  %v15843_v38 = vcombine.high %v1211_v31, %v1215_v32  ;;  %v15845_v39 = vcombine.high %v1212_v33, %v1216_v34  ;;  %v1255_v19 = vld [vmem:[%s17868_s30 + $0x1de0] sm:$0xff]  ;;  %v1256_v54 = vld [vmem:[%s17868_s30 + $0x1de8] sm:$0xff] }
 0x24e   : > { %12195 = vmatpush1.bf16.msra.mxu0 %v15794_v45  ;;  %12810 = vmatpush1.bf16.msra.mxu1 %v15796_v46  ;;  %v15842_v45 = vcombine.low %v1211_v31, %v1215_v32  ;;  %v15844_v46 = vcombine.low %v1212_v33, %v1216_v34  ;;  %v1259_v31 = vld [vmem:[%s17868_s30 + $0x1e00] sm:$0xff]  ;;  %v1260_v33 = vld [vmem:[%s17868_s30 + $0x1e08] sm:$0xff] }
 0x24f   : > { %12196 = vmatprep.subr.bf16.mxu0 %v15803_v48  ;;  %12811 = vmatprep.subr.bf16.mxu1 %v15805_v49  ;;  %v15851_v48 = vcombine.high %v1219_v41, %v1223_v42  ;;  %v15853_v49 = vcombine.high %v1220_v43, %v1224_v44  ;;  %v1263_v32 = vld [vmem:[%s17868_s30 + $0x1e20] sm:$0xff]  ;;  %v1264_v34 = vld [vmem:[%s17868_s30 + $0x1e28] sm:$0xff] }
 0x252   : > { %12197 = vmatpush1.bf16.msra.mxu0 %v15802_v57  ;;  %12812 = vmatpush1.bf16.msra.mxu1 %v15804_v59  ;;  %v15850_v57 = vcombine.low %v1219_v41, %v1223_v42  ;;  %v15852_v59 = vcombine.low %v1220_v43, %v1224_v44  ;;  %v1267_v41 = vld [vmem:[%s17868_s30 + $0x1e40] sm:$0xff]  ;;  %v1268_v43 = vld [vmem:[%s17868_s30 + $0x1e48] sm:$0xff] }
 0x253   : > { %12198 = vmatprep.subr.bf16.mxu0 %v15811_v61  ;;  %12813 = vmatprep.subr.bf16.mxu1 %v15813_v62  ;;  %v15859_v61 = vcombine.high %v1227_v51, %v1231_v52  ;;  %v15861_v62 = vcombine.high %v1228_v53, %v1232_v55  ;;  %v1271_v42 = vld [vmem:[%s17868_s30 + $0x1e60] sm:$0xff]  ;;  %v1272_v44 = vld [vmem:[%s17868_s30 + $0x1e68] sm:$0xff] }
 0x256   : > { %12199 = vmatpush1.bf16.msra.mxu0 %v15810_v3  ;;  %12814 = vmatpush1.bf16.msra.mxu1 %v15812_v4  ;;  %v15858_v3 = vcombine.low %v1227_v51, %v1231_v52  ;;  %v15860_v4 = vcombine.low %v1228_v53, %v1232_v55  ;;  %v1275_v51 = vld [vmem:[%s17868_s30 + $0x1e80] sm:$0xff]  ;;  %v1276_v53 = vld [vmem:[%s17868_s30 + $0x1e88] sm:$0xff] }
 0x257   : > { %12200 = vmatprep.subr.bf16.mxu0 %v15819_v5  ;;  %12815 = vmatprep.subr.bf16.mxu1 %v15821_v6  ;;  %v15867_v5 = vcombine.high %v1235_v63, %v1239_v0  ;;  %v15869_v6 = vcombine.high %v1236_v1, %v1240_v2  ;;  %v1279_v52 = vld [vmem:[%s17868_s30 + $0x1ea0] sm:$0xff]  ;;  %v1280_v55 = vld [vmem:[%s17868_s30 + $0x1ea8] sm:$0xff] }
 0x25a   : > { %12201 = vmatpush1.bf16.msra.mxu0 %v15818_v11  ;;  %12816 = vmatpush1.bf16.msra.mxu1 %v15820_v12  ;;  %v15866_v11 = vcombine.low %v1235_v63, %v1239_v0  ;;  %v15868_v12 = vcombine.low %v1236_v1, %v1240_v2  ;;  %v1283_v63 = vld [vmem:[%s17868_s30 + $0x1ec0] sm:$0xff]  ;;  %v1284_v1 = vld [vmem:[%s17868_s30 + $0x1ec8] sm:$0xff] }
 0x25b   : > { %12211 = vmatprep.subr.bf16.mxu0 %v15827_v14  ;;  %12826 = vmatprep.subr.bf16.mxu1 %v15829_v15  ;;  %v15875_v14 = vcombine.high %v1243_v7, %v1247_v8  ;;  %v15877_v15 = vcombine.high %v1244_v9, %v1248_v10  ;;  %v1287_v0 = vld [vmem:[%s17868_s30 + $0x1ee0] sm:$0xff]  ;;  %v1288_v2 = vld [vmem:[%s17868_s30 + $0x1ee8] sm:$0xff] }
 0x25d   : > { %12203 = vmatmul.mubr.bf16.vlgmr.msra.gmra.mrb[0].mxu0 %v18436_v21  ;;  %12818 = vmatmul.mubr.bf16.vlgmr.msra.gmra.mrb[0].mxu1 %v18436_v21 }
 0x25e   : > { %12212 = vmatpush1.bf16.msra.mxu0 %v15826_v27  ;;  %12827 = vmatpush1.bf16.msra.mxu1 %v15828_v28  ;;  %v15874_v27 = vcombine.low %v1243_v7, %v1247_v8  ;;  %v15876_v28 = vcombine.low %v1244_v9, %v1248_v10  ;;  %v1291_v7 = vld [vmem:[%s17868_s30 + $0x1f00] sm:$0xff]  ;;  %v1292_v9 = vld [vmem:[%s17868_s30 + $0x1f08] sm:$0xff] }
 0x25f   : > { %12213 = vmatprep.subr.bf16.mxu0 %v15835_v29  ;;  %12828 = vmatprep.subr.bf16.mxu1 %v15837_v30  ;;  %v15883_v29 = vcombine.high %v1251_v18, %v1255_v19  ;;  %v15885_v30 = vcombine.high %v1252_v22, %v1256_v54  ;;  %v1295_v8 = vld [vmem:[%s17868_s30 + $0x1f20] sm:$0xff]  ;;  %v1296_v10 = vld [vmem:[%s17868_s30 + $0x1f28] sm:$0xff] }
 0x260   : > { %12243 = vmatprep.mubr.bf16.mxu0 %v18447_v50  ;;  %12858 = vmatprep.mubr.bf16.mxu1 %v18447_v50 }
 0x262   : > { %12214 = vmatpush1.bf16.msra.mxu0 %v15834_v35  ;;  %12829 = vmatpush1.bf16.msra.mxu1 %v15836_v36  ;;  %v15882_v35 = vcombine.low %v1251_v18, %v1255_v19  ;;  %v15884_v36 = vcombine.low %v1252_v22, %v1256_v54  ;;  %v1299_v18 = vld [vmem:[%s17868_s30 + $0x1f40] sm:$0xff]  ;;  %v1300_v22 = vld [vmem:[%s17868_s30 + $0x1f48] sm:$0xff] }
 0x263   : > { %12215 = vmatprep.subr.bf16.mxu0 %v15843_v38  ;;  %12830 = vmatprep.subr.bf16.mxu1 %v15845_v39  ;;  %v15891_v38 = vcombine.high %v1259_v31, %v1263_v32  ;;  %v15893_v39 = vcombine.high %v1260_v33, %v1264_v34  ;;  %v1303_v19 = vld [vmem:[%s17868_s30 + $0x1f60] sm:$0xff]  ;;  %v1304_v54 = vld [vmem:[%s17868_s30 + $0x1f68] sm:$0xff] }
 0x266   : > { %12216 = vmatpush1.bf16.msra.mxu0 %v15842_v45  ;;  %12831 = vmatpush1.bf16.msra.mxu1 %v15844_v46  ;;  %v15890_v45 = vcombine.low %v1259_v31, %v1263_v32  ;;  %v15892_v46 = vcombine.low %v1260_v33, %v1264_v34  ;;  %v1307_v31 = vld [vmem:[%s17868_s30 + $0x1f80] sm:$0xff]  ;;  %v1308_v33 = vld [vmem:[%s17868_s30 + $0x1f88] sm:$0xff] }
 0x267   : > { %12217 = vmatprep.subr.bf16.mxu0 %v15851_v48  ;;  %12832 = vmatprep.subr.bf16.mxu1 %v15853_v49  ;;  %v15899_v48 = vcombine.high %v1267_v41, %v1271_v42  ;;  %v15901_v49 = vcombine.high %v1268_v43, %v1272_v44  ;;  %v1311_v32 = vld [vmem:[%s17868_s30 + $0x1fa0] sm:$0xff]  ;;  %v1312_v34 = vld [vmem:[%s17868_s30 + $0x1fa8] sm:$0xff] }
 0x26a   : > { %12218 = vmatpush1.bf16.msra.mxu0 %v15850_v57  ;;  %12833 = vmatpush1.bf16.msra.mxu1 %v15852_v59  ;;  %v15898_v57 = vcombine.low %v1267_v41, %v1271_v42  ;;  %v15900_v59 = vcombine.low %v1268_v43, %v1272_v44  ;;  %v1315_v41 = vld [vmem:[%s17868_s30 + $0x1fc0] sm:$0xff]  ;;  %v1316_v43 = vld [vmem:[%s17868_s30 + $0x1fc8] sm:$0xff] }
 0x26b   : > { %12219 = vmatprep.subr.bf16.mxu0 %v15859_v61  ;;  %12834 = vmatprep.subr.bf16.mxu1 %v15861_v62  ;;  %v15907_v61 = vcombine.high %v1275_v51, %v1279_v52  ;;  %v15909_v62 = vcombine.high %v1276_v53, %v1280_v55  ;;  %v1319_v42 = vld [vmem:[%s17868_s30 + $0x1fe0] sm:$0xff]  ;;  %v1320_v44 = vld [vmem:[%s17868_s30 + $0x1fe8] sm:$0xff] }
 0x26e   : > { %12220 = vmatpush1.bf16.msra.mxu0 %v15858_v3  ;;  %12835 = vmatpush1.bf16.msra.mxu1 %v15860_v4  ;;  %v15906_v3 = vcombine.low %v1275_v51, %v1279_v52  ;;  %v15908_v4 = vcombine.low %v1276_v53, %v1280_v55  ;;  %v1323_v51 = vld [vmem:[%s17868_s30 + $0x2000] sm:$0xff]  ;;  %v1324_v53 = vld [vmem:[%s17868_s30 + $0x2008] sm:$0xff] }
 0x26f   : > { %12221 = vmatprep.subr.bf16.mxu0 %v15867_v5  ;;  %12836 = vmatprep.subr.bf16.mxu1 %v15869_v6  ;;  %v15915_v5 = vcombine.high %v1283_v63, %v1287_v0  ;;  %v15917_v6 = vcombine.high %v1284_v1, %v1288_v2  ;;  %v1327_v52 = vld [vmem:[%s17868_s30 + $0x2020] sm:$0xff]  ;;  %v1328_v55 = vld [vmem:[%s17868_s30 + $0x2028] sm:$0xff] }
 0x272   : > { %12222 = vmatpush1.bf16.msra.mxu0 %v15866_v11  ;;  %12837 = vmatpush1.bf16.msra.mxu1 %v15868_v12  ;;  %v15914_v11 = vcombine.low %v1283_v63, %v1287_v0  ;;  %v15916_v12 = vcombine.low %v1284_v1, %v1288_v2  ;;  %v1331_v63 = vld [vmem:[%s17868_s30 + $0x2040] sm:$0xff]  ;;  %v18515_v1 = vcombine.low %v18441_v25, %v18441_v25  ;;  %v1332_v2 = vld [vmem:[%s17868_s30 + $0x2048] sm:$0xff] }
 0x273   : > { %12223 = vmatprep.subr.bf16.mxu0 %v15875_v14  ;;  %12838 = vmatprep.subr.bf16.mxu1 %v15877_v15  ;;  %v15923_v14 = vcombine.high %v1291_v7, %v1295_v8  ;;  %v15925_v15 = vcombine.high %v1292_v9, %v1296_v10  ;;  %v1335_v0 = vld [vmem:[%s17868_s30 + $0x2060] sm:$0xff] }
 0x276   : > { %12224 = vmatpush1.bf16.msra.mxu0 %v15874_v27  ;;  %12839 = vmatpush1.bf16.msra.mxu1 %v15876_v28  ;;  %v15922_v27 = vcombine.low %v1291_v7, %v1295_v8  ;;  %v15924_v28 = vcombine.low %v1292_v9, %v1296_v10  ;;  %v15963_v7 = vcombine.high %v1331_v63, %v1335_v0  ;;  %v1339_v9 = vld [vmem:[%s17868_s30 + $0x2080] sm:$0xff] }
 0x277   : > { %12225 = vmatprep.subr.bf16.mxu0 %v15883_v29  ;;  %12840 = vmatprep.subr.bf16.mxu1 %v15885_v30  ;;  %v15931_v29 = vcombine.high %v1299_v18, %v1303_v19  ;;  %v15933_v30 = vcombine.high %v1300_v22, %v1304_v54  ;;  %v1343_v10 = vld [vmem:[%s17868_s30 + $0x20a0] sm:$0xff] }
 0x27a   : > { %12226 = vmatpush1.bf16.msra.mxu0 %v15882_v35  ;;  %12841 = vmatpush1.bf16.msra.mxu1 %v15884_v36  ;;  %v15930_v35 = vcombine.low %v1299_v18, %v1303_v19  ;;  %v15932_v36 = vcombine.low %v1300_v22, %v1304_v54  ;;  %v15971_v18 = vcombine.high %v1339_v9, %v1343_v10  ;;  %v1347_v22 = vld [vmem:[%s17868_s30 + $0x20c0] sm:$0xff] }
 0x27b   : > { %12227 = vmatprep.subr.bf16.mxu0 %v15891_v38  ;;  %12842 = vmatprep.subr.bf16.mxu1 %v15893_v39  ;;  %v15939_v38 = vcombine.high %v1307_v31, %v1311_v32  ;;  %v15941_v39 = vcombine.high %v1308_v33, %v1312_v34  ;;  %v1351_v54 = vld [vmem:[%s17868_s30 + $0x20e0] sm:$0xff] }
 0x27e   : > { %12228 = vmatpush1.bf16.msra.mxu0 %v15890_v45  ;;  %12843 = vmatpush1.bf16.msra.mxu1 %v15892_v46  ;;  %v15938_v45 = vcombine.low %v1307_v31, %v1311_v32  ;;  %v15940_v46 = vcombine.low %v1308_v33, %v1312_v34  ;;  %v15979_v31 = vcombine.high %v1347_v22, %v1351_v54  ;;  %v1355_v33 = vld [vmem:[%s17868_s30 + $0x2100] sm:$0xff] }
 0x27f   : > { %12229 = vmatprep.subr.bf16.mxu0 %v15899_v48  ;;  %12844 = vmatprep.subr.bf16.mxu1 %v15901_v49  ;;  %v15947_v48 = vcombine.high %v1315_v41, %v1319_v42  ;;  %v15949_v49 = vcombine.high %v1316_v43, %v1320_v44  ;;  %v1359_v34 = vld [vmem:[%s17868_s30 + $0x2120] sm:$0xff] }
 0x282   : > { %12230 = vmatpush1.bf16.msra.mxu0 %v15898_v57  ;;  %12845 = vmatpush1.bf16.msra.mxu1 %v15900_v59  ;;  %v15946_v57 = vcombine.low %v1315_v41, %v1319_v42  ;;  %v15948_v59 = vcombine.low %v1316_v43, %v1320_v44  ;;  %v15987_v41 = vcombine.high %v1355_v33, %v1359_v34  ;;  %v1363_v43 = vld [vmem:[%s17868_s30 + $0x2140] sm:$0xff] }
 0x283   : > { %12231 = vmatprep.subr.bf16.mxu0 %v15907_v61  ;;  %12846 = vmatprep.subr.bf16.mxu1 %v15909_v62  ;;  %v15955_v61 = vcombine.high %v1323_v51, %v1327_v52  ;;  %v15957_v62 = vcombine.high %v1324_v53, %v1328_v55  ;;  %v1367_v44 = vld [vmem:[%s17868_s30 + $0x2160] sm:$0xff] }
 0x286   : > { %12232 = vmatpush1.bf16.msra.mxu0 %v15906_v3  ;;  %12847 = vmatpush1.bf16.msra.mxu1 %v15908_v4  ;;  %v1336_v3 = vld [vmem:[%s17868_s30 + $0x2068] sm:$0xff] }
 0x287   : > { %12233 = vmatprep.subr.bf16.mxu0 %v15915_v5  ;;  %12848 = vmatprep.subr.bf16.mxu1 %v15917_v6  ;;  %v18520_v4 = vld [vmem:[%s17860_s23 + $0x40] sm:$0xff]  ;;  %v15954_v5 = vcombine.low %v1323_v51, %v1327_v52  ;;  %v15956_v6 = vcombine.low %v1324_v53, %v1328_v55  ;;  %v15965_v8 = vcombine.high %v1332_v2, %v1336_v3  ;;  %v1371_v53 = vld [vmem:[%s17868_s30 + $0x2180] sm:$0xff] }
 0x288   : > { %v18526_v25 = vcombine.high %v18520_v4, %v18520_v4  ;;  %v15995_v51 = vcombine.high %v1363_v43, %v1367_v44  ;;  %v1375_v55 = vld [vmem:[%s17868_s30 + $0x21a0] sm:$0xff] }
 0x28a   : > { %12234 = vmatpush1.bf16.msra.mxu0 %v15914_v11  ;;  %12849 = vmatpush1.bf16.msra.mxu1 %v15916_v12  ;;  %v1340_v11 = vld [vmem:[%s17868_s30 + $0x2088] sm:$0xff] }
 0x28b   : > { %12235 = vmatprep.subr.bf16.mxu0 %v15923_v14  ;;  %12850 = vmatprep.subr.bf16.mxu1 %v15925_v15  ;;  %v1344_v12 = vld [vmem:[%s17868_s30 + $0x20a8] sm:$0xff]  ;;  %v15962_v14 = vcombine.low %v1331_v63, %v1335_v0  ;;  %v15964_v15 = vcombine.low %v1332_v2, %v1336_v3  ;;  %v16003_v63 = vcombine.high %v1371_v53, %v1375_v55  ;;  %v1379_v2 = vld [vmem:[%s17868_s30 + $0x21c0] sm:$0xff] }
 0x28c   : > { %v15973_v19 = vcombine.high %v1340_v11, %v1344_v12  ;;  %v1383_v3 = vld [vmem:[%s17868_s30 + $0x21e0] sm:$0xff] }
 0x28e   : > { %12236 = vmatpush1.bf16.msra.mxu0 %v15922_v27  ;;  %12851 = vmatpush1.bf16.msra.mxu1 %v15924_v28  ;;  %v1348_v27 = vld [vmem:[%s17868_s30 + $0x20c8] sm:$0xff] }
 0x28f   : > { %12237 = vmatprep.subr.bf16.mxu0 %v15931_v29  ;;  %12852 = vmatprep.subr.bf16.mxu1 %v15933_v30  ;;  %v1352_v28 = vld [vmem:[%s17868_s30 + $0x20e8] sm:$0xff]  ;;  %v15970_v29 = vcombine.low %v1339_v9, %v1343_v10  ;;  %v15972_v30 = vcombine.low %v1340_v11, %v1344_v12  ;;  %v16011_v9 = vcombine.high %v1379_v2, %v1383_v3  ;;  %v1387_v11 = vld [vmem:[%s17868_s30 + $0x2200] sm:$0xff] }
 0x290   : > { %v15981_v32 = vcombine.high %v1348_v27, %v1352_v28  ;;  %v1391_v12 = vld [vmem:[%s17868_s30 + $0x2220] sm:$0xff] }
 0x292   : > { %12238 = vmatpush1.bf16.msra.mxu0 %v15930_v35  ;;  %12853 = vmatpush1.bf16.msra.mxu1 %v15932_v36  ;;  %v1356_v35 = vld [vmem:[%s17868_s30 + $0x2108] sm:$0xff] }
 0x293   : > { %12239 = vmatprep.subr.bf16.mxu0 %v15939_v38  ;;  %12854 = vmatprep.subr.bf16.mxu1 %v15941_v39  ;;  %v1360_v36 = vld [vmem:[%s17868_s30 + $0x2128] sm:$0xff]  ;;  %v15978_v38 = vcombine.low %v1347_v22, %v1351_v54  ;;  %v15980_v39 = vcombine.low %v1348_v27, %v1352_v28  ;;  %v16019_v22 = vcombine.high %v1387_v11, %v1391_v12  ;;  %v1395_v27 = vld [vmem:[%s17868_s30 + $0x2240] sm:$0xff] }
 0x294   : > { %v15989_v42 = vcombine.high %v1356_v35, %v1360_v36  ;;  %v1399_v28 = vld [vmem:[%s17868_s30 + $0x2260] sm:$0xff] }
 0x296   : > { %12240 = vmatpush1.bf16.msra.mxu0 %v15938_v45  ;;  %12855 = vmatpush1.bf16.msra.mxu1 %v15940_v46  ;;  %v1364_v45 = vld [vmem:[%s17868_s30 + $0x2148] sm:$0xff] }
 0x297   : > { %12241 = vmatprep.subr.bf16.mxu0 %v15947_v48  ;;  %12856 = vmatprep.subr.bf16.mxu1 %v15949_v49  ;;  %v1368_v46 = vld [vmem:[%s17868_s30 + $0x2168] sm:$0xff]  ;;  %v15986_v48 = vcombine.low %v1355_v33, %v1359_v34  ;;  %v15988_v49 = vcombine.low %v1356_v35, %v1360_v36  ;;  %v16027_v33 = vcombine.high %v1395_v27, %v1399_v28  ;;  %v1403_v35 = vld [vmem:[%s17868_s30 + $0x2280] sm:$0xff] }
 0x298   : > { %v15997_v52 = vcombine.high %v1364_v45, %v1368_v46  ;;  %v1407_v36 = vld [vmem:[%s17868_s30 + $0x22a0] sm:$0xff] }
 0x29a   : > { %12242 = vmatpush1.bf16.msra.mxu0 %v15946_v57  ;;  %12857 = vmatpush1.bf16.msra.mxu1 %v15948_v59  ;;  %v1372_v57 = vld [vmem:[%s17868_s30 + $0x2188] sm:$0xff] }
 0x29b   : > { %12252 = vmatprep.subr.bf16.mxu0 %v15955_v61  ;;  %12867 = vmatprep.subr.bf16.mxu1 %v15957_v62  ;;  %v1376_v59 = vld [vmem:[%s17868_s30 + $0x21a8] sm:$0xff]  ;;  %v15994_v61 = vcombine.low %v1363_v43, %v1367_v44  ;;  %v15996_v62 = vcombine.low %v1364_v45, %v1368_v46  ;;  %v16035_v43 = vcombine.high %v1403_v35, %v1407_v36  ;;  %v1411_v45 = vld [vmem:[%s17868_s30 + $0x22c0] sm:$0xff] }
 0x29c   : > { %v16005_v0 = vcombine.high %v1372_v57, %v1376_v59  ;;  %v1415_v46 = vld [vmem:[%s17868_s30 + $0x22e0] sm:$0xff] }
 0x29d   : > { %12244 = vmatmul.mubr.bf16.vlgmr.msra.gmra.mrb[0].mxu0 %v18515_v1  ;;  %12859 = vmatmul.mubr.bf16.vlgmr.msra.gmra.mrb[0].mxu1 %v18515_v1 }
 0x29e   : > { %12253 = vmatpush1.bf16.msra.mxu0 %v15954_v5  ;;  %12868 = vmatpush1.bf16.msra.mxu1 %v15956_v6  ;;  %v1380_v5 = vld [vmem:[%s17868_s30 + $0x21c8] sm:$0xff] }
 0x29f   : > { %12254 = vmatprep.subr.bf16.mxu0 %v15963_v7  ;;  %12869 = vmatprep.subr.bf16.mxu1 %v15965_v8  ;;  %v1384_v6 = vld [vmem:[%s17868_s30 + $0x21e8] sm:$0xff]  ;;  %v16002_v7 = vcombine.low %v1371_v53, %v1375_v55  ;;  %v16004_v8 = vcombine.low %v1372_v57, %v1376_v59  ;;  %v16043_v53 = vcombine.high %v1411_v45, %v1415_v46  ;;  %v1419_v57 = vld [vmem:[%s17868_s30 + $0x2300] sm:$0xff] }
 0x2a0   : > { %12284 = vmatprep.mubr.bf16.mxu0 %v18526_v25  ;;  %12899 = vmatprep.mubr.bf16.mxu1 %v18526_v25  ;;  %v16013_v10 = vcombine.high %v1380_v5, %v1384_v6  ;;  %v1423_v59 = vld [vmem:[%s17868_s30 + $0x2320] sm:$0xff] }
 0x2a2   : > { %12255 = vmatpush1.bf16.msra.mxu0 %v15962_v14  ;;  %12870 = vmatpush1.bf16.msra.mxu1 %v15964_v15  ;;  %v1388_v14 = vld [vmem:[%s17868_s30 + $0x2208] sm:$0xff] }
 0x2a3   : > { %12256 = vmatprep.subr.bf16.mxu0 %v15971_v18  ;;  %12871 = vmatprep.subr.bf16.mxu1 %v15973_v19  ;;  %v1392_v15 = vld [vmem:[%s17868_s30 + $0x2228] sm:$0xff]  ;;  %v16010_v18 = vcombine.low %v1379_v2, %v1383_v3  ;;  %v16012_v19 = vcombine.low %v1380_v5, %v1384_v6  ;;  %v16051_v2 = vcombine.high %v1419_v57, %v1423_v59  ;;  %v1427_v5 = vld [vmem:[%s17868_s30 + $0x2340] sm:$0xff] }
 0x2a4   : > { %v16021_v54 = vcombine.high %v1388_v14, %v1392_v15  ;;  %v1431_v6 = vld [vmem:[%s17868_s30 + $0x2360] sm:$0xff] }
 0x2a6   : > { %12257 = vmatpush1.bf16.msra.mxu0 %v15970_v29  ;;  %12872 = vmatpush1.bf16.msra.mxu1 %v15972_v30  ;;  %v1396_v29 = vld [vmem:[%s17868_s30 + $0x2248] sm:$0xff] }
 0x2a7   : > { %12258 = vmatprep.subr.bf16.mxu0 %v15979_v31  ;;  %12873 = vmatprep.subr.bf16.mxu1 %v15981_v32  ;;  %v1400_v30 = vld [vmem:[%s17868_s30 + $0x2268] sm:$0xff]  ;;  %v16018_v31 = vcombine.low %v1387_v11, %v1391_v12  ;;  %v16020_v32 = vcombine.low %v1388_v14, %v1392_v15  ;;  %v16059_v11 = vcombine.high %v1427_v5, %v1431_v6  ;;  %v1435_v14 = vld [vmem:[%s17868_s30 + $0x2380] sm:$0xff] }
 0x2a8   : > { %v16029_v34 = vcombine.high %v1396_v29, %v1400_v30  ;;  %v1439_v15 = vld [vmem:[%s17868_s30 + $0x23a0] sm:$0xff] }
 0x2aa   : > { %12259 = vmatpush1.bf16.msra.mxu0 %v15978_v38  ;;  %12874 = vmatpush1.bf16.msra.mxu1 %v15980_v39  ;;  %v1404_v38 = vld [vmem:[%s17868_s30 + $0x2288] sm:$0xff] }
 0x2ab   : > { %12260 = vmatprep.subr.bf16.mxu0 %v15987_v41  ;;  %12875 = vmatprep.subr.bf16.mxu1 %v15989_v42  ;;  %v1408_v39 = vld [vmem:[%s17868_s30 + $0x22a8] sm:$0xff]  ;;  %v16026_v41 = vcombine.low %v1395_v27, %v1399_v28  ;;  %v16028_v42 = vcombine.low %v1396_v29, %v1400_v30  ;;  %v16067_v27 = vcombine.high %v1435_v14, %v1439_v15  ;;  %v1443_v29 = vld [vmem:[%s17868_s30 + $0x23c0] sm:$0xff] }
 0x2ac   : > { %v16037_v44 = vcombine.high %v1404_v38, %v1408_v39  ;;  %v1447_v30 = vld [vmem:[%s17868_s30 + $0x23e0] sm:$0xff] }
 0x2ae   : > { %12261 = vmatpush1.bf16.msra.mxu0 %v15986_v48  ;;  %12876 = vmatpush1.bf16.msra.mxu1 %v15988_v49  ;;  %v1412_v48 = vld [vmem:[%s17868_s30 + $0x22c8] sm:$0xff] }
 0x2af   : > { %12262 = vmatprep.subr.bf16.mxu0 %v15995_v51  ;;  %12877 = vmatprep.subr.bf16.mxu1 %v15997_v52  ;;  %v1416_v49 = vld [vmem:[%s17868_s30 + $0x22e8] sm:$0xff]  ;;  %v16034_v51 = vcombine.low %v1403_v35, %v1407_v36  ;;  %v16036_v52 = vcombine.low %v1404_v38, %v1408_v39  ;;  %v16075_v35 = vcombine.high %v1443_v29, %v1447_v30  ;;  %v1451_v38 = vld [vmem:[%s17868_s30 + $0x2400] sm:$0xff] }
 0x2b0   : > { %v16045_v55 = vcombine.high %v1412_v48, %v1416_v49  ;;  %v1455_v39 = vld [vmem:[%s17868_s30 + $0x2420] sm:$0xff] }
 0x2b2   : > { %12263 = vmatpush1.bf16.msra.mxu0 %v15994_v61  ;;  %12878 = vmatpush1.bf16.msra.mxu1 %v15996_v62  ;;  %v1420_v61 = vld [vmem:[%s17868_s30 + $0x2308] sm:$0xff] }
 0x2b3   : > { %12264 = vmatprep.subr.bf16.mxu0 %v16003_v63  ;;  %12879 = vmatprep.subr.bf16.mxu1 %v16005_v0  ;;  %v1424_v62 = vld [vmem:[%s17868_s30 + $0x2328] sm:$0xff]  ;;  %v16042_v63 = vcombine.low %v1411_v45, %v1415_v46  ;;  %v16044_v0 = vcombine.low %v1412_v48, %v1416_v49  ;;  %v16083_v45 = vcombine.high %v1451_v38, %v1455_v39  ;;  %v1459_v48 = vld [vmem:[%s17868_s30 + $0x2440] sm:$0xff] }
 0x2b4   : > { %v16053_v3 = vcombine.high %v1420_v61, %v1424_v62  ;;  %v1463_v49 = vld [vmem:[%s17868_s30 + $0x2460] sm:$0xff] }
 0x2b6   : > { %12265 = vmatpush1.bf16.msra.mxu0 %v16002_v7  ;;  %12880 = vmatpush1.bf16.msra.mxu1 %v16004_v8  ;;  %v1428_v7 = vld [vmem:[%s17868_s30 + $0x2348] sm:$0xff] }
 0x2b7   : > { %12266 = vmatprep.subr.bf16.mxu0 %v16011_v9  ;;  %12881 = vmatprep.subr.bf16.mxu1 %v16013_v10  ;;  %v1432_v8 = vld [vmem:[%s17868_s30 + $0x2368] sm:$0xff]  ;;  %v16050_v9 = vcombine.low %v1419_v57, %v1423_v59  ;;  %v16052_v10 = vcombine.low %v1420_v61, %v1424_v62  ;;  %v16082_v57 = vcombine.low %v1451_v38, %v1455_v39 }
 0x2b8   : > { %v16061_v12 = vcombine.high %v1428_v7, %v1432_v8  ;;  %v16091_v61 = vcombine.high %v1459_v48, %v1463_v49 }
 0x2ba   : > { %12267 = vmatpush1.bf16.msra.mxu0 %v16010_v18  ;;  %12882 = vmatpush1.bf16.msra.mxu1 %v16012_v19  ;;  %v1436_v18 = vld [vmem:[%s17868_s30 + $0x2388] sm:$0xff] }
 0x2bb   : > { %12268 = vmatprep.subr.bf16.mxu0 %v16019_v22  ;;  %12883 = vmatprep.subr.bf16.mxu1 %v16021_v54  ;;  %v1440_v19 = vld [vmem:[%s17868_s30 + $0x23a8] sm:$0xff]  ;;  %v16058_v22 = vcombine.low %v1427_v5, %v1431_v6  ;;  %v16060_v54 = vcombine.low %v1428_v7, %v1432_v8  ;;  %v16090_v5 = vcombine.low %v1459_v48, %v1463_v49 }
 0x2bc   : > { %v16069_v28 = vcombine.high %v1436_v18, %v1440_v19 }
 0x2be   : > { %12269 = vmatpush1.bf16.msra.mxu0 %v16018_v31  ;;  %12884 = vmatpush1.bf16.msra.mxu1 %v16020_v32  ;;  %v1444_v31 = vld [vmem:[%s17868_s30 + $0x23c8] sm:$0xff] }
 0x2bf   : > { %12270 = vmatprep.subr.bf16.mxu0 %v16027_v33  ;;  %12885 = vmatprep.subr.bf16.mxu1 %v16029_v34  ;;  %v1448_v32 = vld [vmem:[%s17868_s30 + $0x23e8] sm:$0xff]  ;;  %v16066_v33 = vcombine.low %v1435_v14, %v1439_v15  ;;  %v16068_v34 = vcombine.low %v1436_v18, %v1440_v19 }
 0x2c0   : > { %v16077_v36 = vcombine.high %v1444_v31, %v1448_v32 }
 0x2c2   : > { %12271 = vmatpush1.bf16.msra.mxu0 %v16026_v41  ;;  %12886 = vmatpush1.bf16.msra.mxu1 %v16028_v42  ;;  %v1452_v41 = vld [vmem:[%s17868_s30 + $0x2408] sm:$0xff] }
 0x2c3   : > { %12272 = vmatprep.subr.bf16.mxu0 %v16035_v43  ;;  %12887 = vmatprep.subr.bf16.mxu1 %v16037_v44  ;;  %v1456_v42 = vld [vmem:[%s17868_s30 + $0x2428] sm:$0xff]  ;;  %v16074_v43 = vcombine.low %v1443_v29, %v1447_v30  ;;  %v16076_v44 = vcombine.low %v1444_v31, %v1448_v32 }
 0x2c4   : > { %v16085_v46 = vcombine.high %v1452_v41, %v1456_v42  ;;  %v16084_v59 = vcombine.low %v1452_v41, %v1456_v42 }
 0x2c6   : > { %12273 = vmatpush1.bf16.msra.mxu0 %v16034_v51  ;;  %12888 = vmatpush1.bf16.msra.mxu1 %v16036_v52  ;;  %v18594_v51 = vcombine.low %v18520_v4, %v18520_v4  ;;  %v1460_v52 = vld [vmem:[%s17868_s30 + $0x2448] sm:$0xff] }
 0x2c7   : > { %12274 = vmatprep.subr.bf16.mxu0 %v16043_v53  ;;  %12889 = vmatprep.subr.bf16.mxu1 %v16045_v55  ;;  %v1464_v53 = vld [vmem:[%s17868_s30 + $0x2468] sm:$0xff]  ;;  %v18599_v55 = vld [vmem:[%s17860_s23 + $0x48] sm:$0xff] }
 0x2c8   : > { %v16093_v62 = vcombine.high %v1460_v52, %v1464_v53  ;;  %v18605_v4 = vcombine.high %v18599_v55, %v18599_v55  ;;  %v16092_v6 = vcombine.low %v1460_v52, %v1464_v53 }
 0x2ca   : > { %12275 = vmatpush1.bf16.msra.mxu0 %v16042_v63  ;;  %12890 = vmatpush1.bf16.msra.mxu1 %v16044_v0  ;;  %v1467_v63 = vld [vmem:[%s17868_s30 + $0x2480] sm:$0xff] }
 0x2cb   : > { %12276 = vmatprep.subr.bf16.mxu0 %v16051_v2  ;;  %12891 = vmatprep.subr.bf16.mxu1 %v16053_v3  ;;  %v1471_v0 = vld [vmem:[%s17868_s30 + $0x24a0] sm:$0xff]  ;;  %v1468_v2 = vld [vmem:[%s17868_s30 + $0x2488] sm:$0xff] }
 0x2cc   : > { %v1472_v3 = vld [vmem:[%s17868_s30 + $0x24a8] sm:$0xff]  ;;  %v16099_v7 = vcombine.high %v1467_v63, %v1471_v0  ;;  %v16098_v14 = vcombine.low %v1467_v63, %v1471_v0 }
 0x2cd   : > { %v16101_v8 = vcombine.high %v1468_v2, %v1472_v3  ;;  %v16100_v15 = vcombine.low %v1468_v2, %v1472_v3 }
 0x2ce   : > { %12277 = vmatpush1.bf16.msra.mxu0 %v16050_v9  ;;  %12892 = vmatpush1.bf16.msra.mxu1 %v16052_v10  ;;  %v1475_v9 = vld [vmem:[%s17868_s30 + $0x24c0] sm:$0xff] }
 0x2cf   : > { %12278 = vmatprep.subr.bf16.mxu0 %v16059_v11  ;;  %12893 = vmatprep.subr.bf16.mxu1 %v16061_v12  ;;  %v1479_v10 = vld [vmem:[%s17868_s30 + $0x24e0] sm:$0xff]  ;;  %v1476_v11 = vld [vmem:[%s17868_s30 + $0x24c8] sm:$0xff] }
 0x2d0   : > { %v1480_v12 = vld [vmem:[%s17868_s30 + $0x24e8] sm:$0xff]  ;;  %v16107_v18 = vcombine.high %v1475_v9, %v1479_v10  ;;  %v16106_v29 = vcombine.low %v1475_v9, %v1479_v10 }
 0x2d1   : > { %v16109_v19 = vcombine.high %v1476_v11, %v1480_v12  ;;  %v16108_v30 = vcombine.low %v1476_v11, %v1480_v12 }
 0x2d2   : > { %12279 = vmatpush1.bf16.msra.mxu0 %v16058_v22  ;;  %12894 = vmatpush1.bf16.msra.mxu1 %v16060_v54  ;;  %v1483_v22 = vld [vmem:[%s17868_s30 + $0x2500] sm:$0xff] }
 0x2d3   : > { %12280 = vmatprep.subr.bf16.mxu0 %v16067_v27  ;;  %12895 = vmatprep.subr.bf16.mxu1 %v16069_v28  ;;  %v1487_v54 = vld [vmem:[%s17868_s30 + $0x2520] sm:$0xff]  ;;  %v1484_v27 = vld [vmem:[%s17868_s30 + $0x2508] sm:$0xff] }
 0x2d4   : > { %v1488_v28 = vld [vmem:[%s17868_s30 + $0x2528] sm:$0xff]  ;;  %v16115_v31 = vcombine.high %v1483_v22, %v1487_v54  ;;  %v16114_v38 = vcombine.low %v1483_v22, %v1487_v54 }
 0x2d5   : > { %v16117_v32 = vcombine.high %v1484_v27, %v1488_v28  ;;  %v16116_v39 = vcombine.low %v1484_v27, %v1488_v28 }
 0x2d6   : > { %12281 = vmatpush1.bf16.msra.mxu0 %v16066_v33  ;;  %12896 = vmatpush1.bf16.msra.mxu1 %v16068_v34  ;;  %v1491_v33 = vld [vmem:[%s17868_s30 + $0x2540] sm:$0xff] }
 0x2d7   : > { %12282 = vmatprep.subr.bf16.mxu0 %v16075_v35  ;;  %12897 = vmatprep.subr.bf16.mxu1 %v16077_v36  ;;  %v1495_v34 = vld [vmem:[%s17868_s30 + $0x2560] sm:$0xff]  ;;  %v1492_v35 = vld [vmem:[%s17868_s30 + $0x2548] sm:$0xff] }
 0x2d8   : > { %v1496_v36 = vld [vmem:[%s17868_s30 + $0x2568] sm:$0xff]  ;;  %v16123_v41 = vcombine.high %v1491_v33, %v1495_v34  ;;  %v16122_v48 = vcombine.low %v1491_v33, %v1495_v34 }
 0x2d9   : > { %v16125_v42 = vcombine.high %v1492_v35, %v1496_v36  ;;  %v16124_v49 = vcombine.low %v1492_v35, %v1496_v36 }
 0x2da   : > { %12283 = vmatpush1.bf16.msra.mxu0 %v16074_v43  ;;  %12898 = vmatpush1.bf16.msra.mxu1 %v16076_v44  ;;  %v1499_v43 = vld [vmem:[%s17868_s30 + $0x2580] sm:$0xff] }
 0x2db   : > { %12293 = vmatprep.subr.bf16.mxu0 %v16083_v45  ;;  %12908 = vmatprep.subr.bf16.mxu1 %v16085_v46  ;;  %v1503_v44 = vld [vmem:[%s17868_s30 + $0x25a0] sm:$0xff]  ;;  %v1500_v45 = vld [vmem:[%s17868_s30 + $0x2588] sm:$0xff] }
 0x2dc   : > { %v1504_v46 = vld [vmem:[%s17868_s30 + $0x25a8] sm:$0xff]  ;;  %v16131_v52 = vcombine.high %v1499_v43, %v1503_v44  ;;  %v16130_v63 = vcombine.low %v1499_v43, %v1503_v44 }
 0x2dd   : > { %12285 = vmatmul.mubr.bf16.vlgmr.msra.gmra.mrb[0].mxu0 %v18594_v51  ;;  %12900 = vmatmul.mubr.bf16.vlgmr.msra.gmra.mrb[0].mxu1 %v18594_v51  ;;  %v16133_v53 = vcombine.high %v1500_v45, %v1504_v46  ;;  %v16132_v0 = vcombine.low %v1500_v45, %v1504_v46 }
 0x2de   : > { %12294 = vmatpush1.bf16.msra.mxu0 %v16082_v57  ;;  %12909 = vmatpush1.bf16.msra.mxu1 %v16084_v59  ;;  %v1507_v57 = vld [vmem:[%s17868_s30 + $0x25c0] sm:$0xff] }
 0x2df   : > { %12295 = vmatprep.subr.bf16.mxu0 %v16091_v61  ;;  %12910 = vmatprep.subr.bf16.mxu1 %v16093_v62  ;;  %v1511_v59 = vld [vmem:[%s17868_s30 + $0x25e0] sm:$0xff]  ;;  %v1508_v61 = vld [vmem:[%s17868_s30 + $0x25c8] sm:$0xff] }
 0x2e0   : > { %12325 = vmatprep.mubr.bf16.mxu0 %v18605_v4  ;;  %12940 = vmatprep.mubr.bf16.mxu1 %v18605_v4  ;;  %v1512_v62 = vld [vmem:[%s17868_s30 + $0x25e8] sm:$0xff]  ;;  %v16139_v2 = vcombine.high %v1507_v57, %v1511_v59  ;;  %v16138_v9 = vcombine.low %v1507_v57, %v1511_v59 }
 0x2e1   : > { %v16141_v3 = vcombine.high %v1508_v61, %v1512_v62  ;;  %v16140_v10 = vcombine.low %v1508_v61, %v1512_v62 }
 0x2e2   : > { %12296 = vmatpush1.bf16.msra.mxu0 %v16090_v5  ;;  %12911 = vmatpush1.bf16.msra.mxu1 %v16092_v6  ;;  %v1515_v5 = vld [vmem:[%s17868_s30 + $0x2600] sm:$0xff] }
 0x2e3   : > { %12297 = vmatprep.subr.bf16.mxu0 %v16099_v7  ;;  %12912 = vmatprep.subr.bf16.mxu1 %v16101_v8  ;;  %v1519_v6 = vld [vmem:[%s17868_s30 + $0x2620] sm:$0xff]  ;;  %v1516_v7 = vld [vmem:[%s17868_s30 + $0x2608] sm:$0xff] }
 0x2e4   : > { %v1520_v8 = vld [vmem:[%s17868_s30 + $0x2628] sm:$0xff]  ;;  %v16147_v11 = vcombine.high %v1515_v5, %v1519_v6  ;;  %v16146_v22 = vcombine.low %v1515_v5, %v1519_v6 }
 0x2e5   : > { %v16149_v12 = vcombine.high %v1516_v7, %v1520_v8  ;;  %v16148_v54 = vcombine.low %v1516_v7, %v1520_v8 }
 0x2e6   : > { %12298 = vmatpush1.bf16.msra.mxu0 %v16098_v14  ;;  %12913 = vmatpush1.bf16.msra.mxu1 %v16100_v15  ;;  %v1523_v14 = vld [vmem:[%s17868_s30 + $0x2640] sm:$0xff] }
 0x2e7   : > { %12299 = vmatprep.subr.bf16.mxu0 %v16107_v18  ;;  %12914 = vmatprep.subr.bf16.mxu1 %v16109_v19  ;;  %v1527_v15 = vld [vmem:[%s17868_s30 + $0x2660] sm:$0xff]  ;;  %v1524_v18 = vld [vmem:[%s17868_s30 + $0x2648] sm:$0xff] }
 0x2e8   : > { %v1528_v19 = vld [vmem:[%s17868_s30 + $0x2668] sm:$0xff]  ;;  %v16155_v27 = vcombine.high %v1523_v14, %v1527_v15  ;;  %v16154_v33 = vcombine.low %v1523_v14, %v1527_v15 }
 0x2e9   : > { %v16157_v28 = vcombine.high %v1524_v18, %v1528_v19  ;;  %v16156_v34 = vcombine.low %v1524_v18, %v1528_v19 }
 0x2ea   : > { %12300 = vmatpush1.bf16.msra.mxu0 %v16106_v29  ;;  %12915 = vmatpush1.bf16.msra.mxu1 %v16108_v30  ;;  %v1531_v29 = vld [vmem:[%s17868_s30 + $0x2680] sm:$0xff] }
 0x2eb   : > { %12301 = vmatprep.subr.bf16.mxu0 %v16115_v31  ;;  %12916 = vmatprep.subr.bf16.mxu1 %v16117_v32  ;;  %v1535_v30 = vld [vmem:[%s17868_s30 + $0x26a0] sm:$0xff]  ;;  %v1532_v31 = vld [vmem:[%s17868_s30 + $0x2688] sm:$0xff] }
 0x2ec   : > { %v1536_v32 = vld [vmem:[%s17868_s30 + $0x26a8] sm:$0xff]  ;;  %v16163_v35 = vcombine.high %v1531_v29, %v1535_v30  ;;  %v16162_v43 = vcombine.low %v1531_v29, %v1535_v30 }
 0x2ed   : > { %v16165_v36 = vcombine.high %v1532_v31, %v1536_v32  ;;  %v16164_v44 = vcombine.low %v1532_v31, %v1536_v32 }
 0x2ee   : > { %12302 = vmatpush1.bf16.msra.mxu0 %v16114_v38  ;;  %12917 = vmatpush1.bf16.msra.mxu1 %v16116_v39  ;;  %v1539_v38 = vld [vmem:[%s17868_s30 + $0x26c0] sm:$0xff] }
 0x2ef   : > { %12303 = vmatprep.subr.bf16.mxu0 %v16123_v41  ;;  %12918 = vmatprep.subr.bf16.mxu1 %v16125_v42  ;;  %v1543_v39 = vld [vmem:[%s17868_s30 + $0x26e0] sm:$0xff]  ;;  %v1540_v41 = vld [vmem:[%s17868_s30 + $0x26c8] sm:$0xff] }
 0x2f0   : > { %v1544_v42 = vld [vmem:[%s17868_s30 + $0x26e8] sm:$0xff]  ;;  %v16171_v45 = vcombine.high %v1539_v38, %v1543_v39  ;;  %v16170_v57 = vcombine.low %v1539_v38, %v1543_v39 }
 0x2f1   : > { %v16173_v46 = vcombine.high %v1540_v41, %v1544_v42  ;;  %v16172_v59 = vcombine.low %v1540_v41, %v1544_v42 }
 0x2f2   : > { %12304 = vmatpush1.bf16.msra.mxu0 %v16122_v48  ;;  %12919 = vmatpush1.bf16.msra.mxu1 %v16124_v49  ;;  %v1547_v48 = vld [vmem:[%s17868_s30 + $0x2700] sm:$0xff] }
 0x2f3   : > { %12305 = vmatprep.subr.bf16.mxu0 %v16131_v52  ;;  %12920 = vmatprep.subr.bf16.mxu1 %v16133_v53  ;;  %v1551_v49 = vld [vmem:[%s17868_s30 + $0x2720] sm:$0xff]  ;;  %v1548_v52 = vld [vmem:[%s17868_s30 + $0x2708] sm:$0xff] }
 0x2f4   : > { %v1552_v53 = vld [vmem:[%s17868_s30 + $0x2728] sm:$0xff]  ;;  %v16179_v61 = vcombine.high %v1547_v48, %v1551_v49  ;;  %v16178_v5 = vcombine.low %v1547_v48, %v1551_v49  ;;  %v18678_v49 = vld [vmem:[%s17860_s23 + $0x50] sm:$0xff] }
 0x2f5   : > { %v16181_v62 = vcombine.high %v1548_v52, %v1552_v53  ;;  %v16180_v6 = vcombine.low %v1548_v52, %v1552_v53  ;;  %v1592_v48 = vld [vmem:[%s17868_s30 + $0x2868] sm:$0xff] }
 0x2f6   : > { %12306 = vmatpush1.bf16.msra.mxu0 %v16130_v63  ;;  %12921 = vmatpush1.bf16.msra.mxu1 %v16132_v0  ;;  %v1555_v63 = vld [vmem:[%s17868_s30 + $0x2740] sm:$0xff] }
 0x2f7   : > { %12307 = vmatprep.subr.bf16.mxu0 %v16139_v2  ;;  %12922 = vmatprep.subr.bf16.mxu1 %v16141_v3  ;;  %v1559_v0 = vld [vmem:[%s17868_s30 + $0x2760] sm:$0xff]  ;;  %v1556_v2 = vld [vmem:[%s17868_s30 + $0x2748] sm:$0xff] }
 0x2f8   : > { %v1560_v3 = vld [vmem:[%s17868_s30 + $0x2768] sm:$0xff]  ;;  %v16187_v7 = vcombine.high %v1555_v63, %v1559_v0  ;;  %v16186_v14 = vcombine.low %v1555_v63, %v1559_v0 }
 0x2f9   : > { %v16189_v8 = vcombine.high %v1556_v2, %v1560_v3  ;;  %v16188_v15 = vcombine.low %v1556_v2, %v1560_v3  ;;  %v1596_v63 = vld [vmem:[%s17868_s30 + $0x2888] sm:$0xff] }
 0x2fa   : > { %12308 = vmatpush1.bf16.msra.mxu0 %v16138_v9  ;;  %12923 = vmatpush1.bf16.msra.mxu1 %v16140_v10  ;;  %v1563_v9 = vld [vmem:[%s17868_s30 + $0x2780] sm:$0xff]  ;;  %v1600_v0 = vld [vmem:[%s17868_s30 + $0x28a8] sm:$0xff] }
 0x2fb   : > { %12309 = vmatprep.subr.bf16.mxu0 %v16147_v11  ;;  %12924 = vmatprep.subr.bf16.mxu1 %v16149_v12  ;;  %v1567_v10 = vld [vmem:[%s17868_s30 + $0x27a0] sm:$0xff]  ;;  %v1564_v11 = vld [vmem:[%s17868_s30 + $0x2788] sm:$0xff] }
 0x2fc   : > { %v1568_v12 = vld [vmem:[%s17868_s30 + $0x27a8] sm:$0xff]  ;;  %v16195_v18 = vcombine.high %v1563_v9, %v1567_v10  ;;  %v16194_v29 = vcombine.low %v1563_v9, %v1567_v10 }
 0x2fd   : > { %v16197_v19 = vcombine.high %v1564_v11, %v1568_v12  ;;  %v16196_v30 = vcombine.low %v1564_v11, %v1568_v12  ;;  %v1604_v9 = vld [vmem:[%s17868_s30 + $0x28c8] sm:$0xff]  ;;  %v16228_v12 = vcombine.low %v1596_v63, %v1600_v0 }
 0x2fe   : > { %12310 = vmatpush1.bf16.msra.mxu0 %v16146_v22  ;;  %12925 = vmatpush1.bf16.msra.mxu1 %v16148_v54  ;;  %v1571_v22 = vld [vmem:[%s17868_s30 + $0x27c0] sm:$0xff]  ;;  %v1608_v10 = vld [vmem:[%s17868_s30 + $0x28e8] sm:$0xff] }
 0x2ff   : > { %12311 = vmatprep.subr.bf16.mxu0 %v16155_v27  ;;  %12926 = vmatprep.subr.bf16.mxu1 %v16157_v28  ;;  %v1575_v54 = vld [vmem:[%s17868_s30 + $0x27e0] sm:$0xff]  ;;  %v1572_v27 = vld [vmem:[%s17868_s30 + $0x27c8] sm:$0xff] }
 0x300   : > { %v1576_v28 = vld [vmem:[%s17868_s30 + $0x27e8] sm:$0xff]  ;;  %v16203_v31 = vcombine.high %v1571_v22, %v1575_v54  ;;  %v16202_v38 = vcombine.low %v1571_v22, %v1575_v54 }
 0x301   : > { %v16205_v32 = vcombine.high %v1572_v27, %v1576_v28  ;;  %v16204_v39 = vcombine.low %v1572_v27, %v1576_v28  ;;  %v1612_v22 = vld [vmem:[%s17868_s30 + $0x2908] sm:$0xff]  ;;  %v16236_v28 = vcombine.low %v1604_v9, %v1608_v10 }
 0x302   : > { %12312 = vmatpush1.bf16.msra.mxu0 %v16154_v33  ;;  %12927 = vmatpush1.bf16.msra.mxu1 %v16156_v34  ;;  %v1579_v33 = vld [vmem:[%s17868_s30 + $0x2800] sm:$0xff]  ;;  %v1616_v54 = vld [vmem:[%s17868_s30 + $0x2928] sm:$0xff] }
 0x303   : > { %12313 = vmatprep.subr.bf16.mxu0 %v16163_v35  ;;  %12928 = vmatprep.subr.bf16.mxu1 %v16165_v36  ;;  %v1583_v34 = vld [vmem:[%s17868_s30 + $0x2820] sm:$0xff]  ;;  %v1580_v35 = vld [vmem:[%s17868_s30 + $0x2808] sm:$0xff] }
 0x304   : > { %v1584_v36 = vld [vmem:[%s17868_s30 + $0x2828] sm:$0xff]  ;;  %v16211_v41 = vcombine.high %v1579_v33, %v1583_v34  ;;  %v16210_v52 = vcombine.low %v1579_v33, %v1583_v34 }
 0x305   : > { %v16213_v42 = vcombine.high %v1580_v35, %v1584_v36  ;;  %v16212_v53 = vcombine.low %v1580_v35, %v1584_v36  ;;  %v1620_v33 = vld [vmem:[%s17868_s30 + $0x2948] sm:$0xff]  ;;  %v16244_v36 = vcombine.low %v1612_v22, %v1616_v54 }
 0x306   : > { %12314 = vmatpush1.bf16.msra.mxu0 %v16162_v43  ;;  %12929 = vmatpush1.bf16.msra.mxu1 %v16164_v44  ;;  %v1587_v43 = vld [vmem:[%s17868_s30 + $0x2840] sm:$0xff]  ;;  %v1624_v34 = vld [vmem:[%s17868_s30 + $0x2968] sm:$0xff] }
 0x307   : > { %12315 = vmatprep.subr.bf16.mxu0 %v16171_v45  ;;  %12930 = vmatprep.subr.bf16.mxu1 %v16173_v46  ;;  %v1591_v44 = vld [vmem:[%s17868_s30 + $0x2860] sm:$0xff]  ;;  %v18673_v45 = vcombine.low %v18599_v55, %v18599_v55  ;;  %v1588_v46 = vld [vmem:[%s17868_s30 + $0x2848] sm:$0xff]  ;;  %v18684_v55 = vcombine.high %v18678_v49, %v18678_v49 }
 0x308   : > { %v16218_v2 = vcombine.low %v1587_v43, %v1591_v44  ;;  %v16220_v3 = vcombine.low %v1588_v46, %v1592_v48 }
 0x30a   : > { %12316 = vmatpush1.bf16.msra.mxu0 %v16170_v57  ;;  %12931 = vmatpush1.bf16.msra.mxu1 %v16172_v59  ;;  %v16219_v57 = vcombine.high %v1587_v43, %v1591_v44  ;;  %v16221_v59 = vcombine.high %v1588_v46, %v1592_v48  ;;  %v1628_v43 = vld [vmem:[%s17868_s30 + $0x2988] sm:$0xff]  ;;  %v16252_v48 = vcombine.low %v1620_v33, %v1624_v34 }
 0x30b   : > { %12317 = vmatprep.subr.bf16.mxu0 %v16179_v61  ;;  %12932 = vmatprep.subr.bf16.mxu1 %v16181_v62  ;;  %v1595_v61 = vld [vmem:[%s17868_s30 + $0x2880] sm:$0xff]  ;;  %v1632_v44 = vld [vmem:[%s17868_s30 + $0x29a8] sm:$0xff] }
 0x30c   : > { %v1599_v62 = vld [vmem:[%s17868_s30 + $0x28a0] sm:$0xff] }
 0x30d   : > { %v16226_v11 = vcombine.low %v1595_v61, %v1599_v62 }
 0x30e   : > { %12318 = vmatpush1.bf16.msra.mxu0 %v16178_v5  ;;  %12933 = vmatpush1.bf16.msra.mxu1 %v16180_v6  ;;  %v16227_v5 = vcombine.high %v1595_v61, %v1599_v62  ;;  %v16229_v6 = vcombine.high %v1596_v63, %v1600_v0  ;;  %v1636_v61 = vld [vmem:[%s17868_s30 + $0x29c8] sm:$0xff]  ;;  %v16260_v0 = vcombine.low %v1628_v43, %v1632_v44 }
 0x30f   : > { %12319 = vmatprep.subr.bf16.mxu0 %v16187_v7  ;;  %12934 = vmatprep.subr.bf16.mxu1 %v16189_v8  ;;  %v1603_v7 = vld [vmem:[%s17868_s30 + $0x28c0] sm:$0xff]  ;;  %v1640_v62 = vld [vmem:[%s17868_s30 + $0x29e8] sm:$0xff] }
 0x310   : > { %v1607_v8 = vld [vmem:[%s17868_s30 + $0x28e0] sm:$0xff] }
 0x311   : > { %v16234_v27 = vcombine.low %v1603_v7, %v1607_v8 }
 0x312   : > { %12320 = vmatpush1.bf16.msra.mxu0 %v16186_v14  ;;  %12935 = vmatpush1.bf16.msra.mxu1 %v16188_v15  ;;  %v16235_v14 = vcombine.high %v1603_v7, %v1607_v8  ;;  %v16237_v15 = vcombine.high %v1604_v9, %v1608_v10  ;;  %v1644_v7 = vld [vmem:[%s17868_s30 + $0x2a08] sm:$0xff]  ;;  %v16268_v10 = vcombine.low %v1636_v61, %v1640_v62 }
 0x313   : > { %12321 = vmatprep.subr.bf16.mxu0 %v16195_v18  ;;  %12936 = vmatprep.subr.bf16.mxu1 %v16197_v19  ;;  %v1611_v18 = vld [vmem:[%s17868_s30 + $0x2900] sm:$0xff]  ;;  %v1648_v8 = vld [vmem:[%s17868_s30 + $0x2a28] sm:$0xff] }
 0x314   : > { %v1615_v19 = vld [vmem:[%s17868_s30 + $0x2920] sm:$0xff] }
 0x315   : > { %v16242_v35 = vcombine.low %v1611_v18, %v1615_v19 }
 0x316   : > { %12322 = vmatpush1.bf16.msra.mxu0 %v16194_v29  ;;  %12937 = vmatpush1.bf16.msra.mxu1 %v16196_v30  ;;  %v16243_v29 = vcombine.high %v1611_v18, %v1615_v19  ;;  %v16245_v30 = vcombine.high %v1612_v22, %v1616_v54  ;;  %v1652_v18 = vld [vmem:[%s17868_s30 + $0x2a48] sm:$0xff]  ;;  %v16276_v54 = vcombine.low %v1644_v7, %v1648_v8 }
 0x317   : > { %12323 = vmatprep.subr.bf16.mxu0 %v16203_v31  ;;  %12938 = vmatprep.subr.bf16.mxu1 %v16205_v32  ;;  %v1619_v31 = vld [vmem:[%s17868_s30 + $0x2940] sm:$0xff]  ;;  %v1656_v19 = vld [vmem:[%s17868_s30 + $0x2a68] sm:$0xff] }
 0x318   : > { %v1623_v32 = vld [vmem:[%s17868_s30 + $0x2960] sm:$0xff] }
 0x319   : > { %v16250_v46 = vcombine.low %v1619_v31, %v1623_v32 }
 0x31a   : > { %12324 = vmatpush1.bf16.msra.mxu0 %v16202_v38  ;;  %12939 = vmatpush1.bf16.msra.mxu1 %v16204_v39  ;;  %v16251_v38 = vcombine.high %v1619_v31, %v1623_v32  ;;  %v16253_v39 = vcombine.high %v1620_v33, %v1624_v34  ;;  %v1660_v31 = vld [vmem:[%s17868_s30 + $0x2a88] sm:$0xff]  ;;  %v16284_v34 = vcombine.low %v1652_v18, %v1656_v19 }
 0x31b   : > { %12334 = vmatprep.subr.bf16.mxu0 %v16211_v41  ;;  %12949 = vmatprep.subr.bf16.mxu1 %v16213_v42  ;;  %v1627_v41 = vld [vmem:[%s17868_s30 + $0x2980] sm:$0xff]  ;;  %v1664_v32 = vld [vmem:[%s17868_s30 + $0x2aa8] sm:$0xff] }
 0x31c   : > { %v1631_v42 = vld [vmem:[%s17868_s30 + $0x29a0] sm:$0xff] }
 0x31d   : > { %12326 = vmatmul.mubr.bf16.vlgmr.msra.gmra.mrb[0].mxu0 %v18673_v45  ;;  %12941 = vmatmul.mubr.bf16.vlgmr.msra.gmra.mrb[0].mxu1 %v18673_v45  ;;  %v16258_v63 = vcombine.low %v1627_v41, %v1631_v42 }
 0x31e   : > { %12335 = vmatpush1.bf16.msra.mxu0 %v16210_v52  ;;  %12950 = vmatpush1.bf16.msra.mxu1 %v16212_v53  ;;  %v16259_v52 = vcombine.high %v1627_v41, %v1631_v42  ;;  %v16261_v53 = vcombine.high %v1628_v43, %v1632_v44  ;;  %v1668_v41 = vld [vmem:[%s17868_s30 + $0x2ac8] sm:$0xff]  ;;  %v16292_v44 = vcombine.low %v1660_v31, %v1664_v32 }
 0x31f   : > { %12336 = vmatprep.subr.bf16.mxu0 %v16219_v57  ;;  %12951 = vmatprep.subr.bf16.mxu1 %v16221_v59  ;;  %v1635_v57 = vld [vmem:[%s17868_s30 + $0x29c0] sm:$0xff]  ;;  %v1672_v42 = vld [vmem:[%s17868_s30 + $0x2ae8] sm:$0xff] }
 0x320   : > { %12366 = vmatprep.mubr.bf16.mxu0 %v18684_v55  ;;  %12981 = vmatprep.mubr.bf16.mxu1 %v18684_v55  ;;  %v1639_v59 = vld [vmem:[%s17868_s30 + $0x29e0] sm:$0xff] }
 0x321   : > { %v16266_v9 = vcombine.low %v1635_v57, %v1639_v59 }
 0x322   : > { %12337 = vmatpush1.bf16.msra.mxu0 %v16218_v2  ;;  %12952 = vmatpush1.bf16.msra.mxu1 %v16220_v3  ;;  %v16267_v2 = vcombine.high %v1635_v57, %v1639_v59  ;;  %v16269_v3 = vcombine.high %v1636_v61, %v1640_v62  ;;  %v1676_v57 = vld [vmem:[%s17868_s30 + $0x2b08] sm:$0xff]  ;;  %v16300_v62 = vcombine.low %v1668_v41, %v1672_v42 }
 0x323   : > { %12338 = vmatprep.subr.bf16.mxu0 %v16227_v5  ;;  %12953 = vmatprep.subr.bf16.mxu1 %v16229_v6  ;;  %v1643_v5 = vld [vmem:[%s17868_s30 + $0x2a00] sm:$0xff]  ;;  %v1680_v59 = vld [vmem:[%s17868_s30 + $0x2b28] sm:$0xff] }
 0x324   : > { %v1647_v6 = vld [vmem:[%s17868_s30 + $0x2a20] sm:$0xff] }
 0x325   : > { %v16274_v22 = vcombine.low %v1643_v5, %v1647_v6 }
 0x326   : > { %12339 = vmatpush1.bf16.msra.mxu0 %v16226_v11  ;;  %12954 = vmatpush1.bf16.msra.mxu1 %v16228_v12  ;;  %v16275_v11 = vcombine.high %v1643_v5, %v1647_v6  ;;  %v16277_v12 = vcombine.high %v1644_v7, %v1648_v8  ;;  %v1684_v5 = vld [vmem:[%s17868_s30 + $0x2b48] sm:$0xff]  ;;  %v16308_v8 = vcombine.low %v1676_v57, %v1680_v59 }
 0x327   : > { %12340 = vmatprep.subr.bf16.mxu0 %v16235_v14  ;;  %12955 = vmatprep.subr.bf16.mxu1 %v16237_v15  ;;  %v1651_v14 = vld [vmem:[%s17868_s30 + $0x2a40] sm:$0xff]  ;;  %v1688_v6 = vld [vmem:[%s17868_s30 + $0x2b68] sm:$0xff] }
 0x328   : > { %v1655_v15 = vld [vmem:[%s17868_s30 + $0x2a60] sm:$0xff] }
 0x329   : > { %v16282_v33 = vcombine.low %v1651_v14, %v1655_v15 }
 0x32a   : > { %12341 = vmatpush1.bf16.msra.mxu0 %v16234_v27  ;;  %12956 = vmatpush1.bf16.msra.mxu1 %v16236_v28  ;;  %v16283_v27 = vcombine.high %v1651_v14, %v1655_v15  ;;  %v16285_v28 = vcombine.high %v1652_v18, %v1656_v19  ;;  %v1692_v14 = vld [vmem:[%s17868_s30 + $0x2b88] sm:$0xff]  ;;  %v16316_v19 = vcombine.low %v1684_v5, %v1688_v6 }
 0x32b   : > { %12342 = vmatprep.subr.bf16.mxu0 %v16243_v29  ;;  %12957 = vmatprep.subr.bf16.mxu1 %v16245_v30  ;;  %v1659_v29 = vld [vmem:[%s17868_s30 + $0x2a80] sm:$0xff]  ;;  %v1696_v15 = vld [vmem:[%s17868_s30 + $0x2ba8] sm:$0xff] }
 0x32c   : > { %v1663_v30 = vld [vmem:[%s17868_s30 + $0x2aa0] sm:$0xff] }
 0x32d   : > { %v16290_v43 = vcombine.low %v1659_v29, %v1663_v30 }
 0x32e   : > { %12343 = vmatpush1.bf16.msra.mxu0 %v16242_v35  ;;  %12958 = vmatpush1.bf16.msra.mxu1 %v16244_v36  ;;  %v16291_v35 = vcombine.high %v1659_v29, %v1663_v30  ;;  %v16293_v36 = vcombine.high %v1660_v31, %v1664_v32  ;;  %v1700_v29 = vld [vmem:[%s17868_s30 + $0x2bc8] sm:$0xff]  ;;  %v16324_v32 = vcombine.low %v1692_v14, %v1696_v15 }
 0x32f   : > { %12344 = vmatprep.subr.bf16.mxu0 %v16251_v38  ;;  %12959 = vmatprep.subr.bf16.mxu1 %v16253_v39  ;;  %v1667_v38 = vld [vmem:[%s17868_s30 + $0x2ac0] sm:$0xff]  ;;  %v1704_v30 = vld [vmem:[%s17868_s30 + $0x2be8] sm:$0xff] }
 0x330   : > { %v1671_v39 = vld [vmem:[%s17868_s30 + $0x2ae0] sm:$0xff] }
 0x331   : > { %v16298_v61 = vcombine.low %v1667_v38, %v1671_v39 }
 0x332   : > { %12345 = vmatpush1.bf16.msra.mxu0 %v16250_v46  ;;  %12960 = vmatpush1.bf16.msra.mxu1 %v16252_v48  ;;  %v16299_v46 = vcombine.high %v1667_v38, %v1671_v39  ;;  %v16301_v48 = vcombine.high %v1668_v41, %v1672_v42  ;;  %v1708_v38 = vld [vmem:[%s17868_s30 + $0x2c08] sm:$0xff]  ;;  %v16332_v42 = vcombine.low %v1700_v29, %v1704_v30 }
 0x333   : > { %12346 = vmatprep.subr.bf16.mxu0 %v16259_v52  ;;  %12961 = vmatprep.subr.bf16.mxu1 %v16261_v53  ;;  %v1675_v52 = vld [vmem:[%s17868_s30 + $0x2b00] sm:$0xff]  ;;  %v1712_v39 = vld [vmem:[%s17868_s30 + $0x2c28] sm:$0xff] }
 0x334   : > { %v1679_v53 = vld [vmem:[%s17868_s30 + $0x2b20] sm:$0xff] }
 0x335   : > { %v16306_v7 = vcombine.low %v1675_v52, %v1679_v53 }
 0x336   : > { %12347 = vmatpush1.bf16.msra.mxu0 %v16258_v63  ;;  %12962 = vmatpush1.bf16.msra.mxu1 %v16260_v0  ;;  %v16307_v63 = vcombine.high %v1675_v52, %v1679_v53  ;;  %v16309_v0 = vcombine.high %v1676_v57, %v1680_v59  ;;  %v18752_v52 = vcombine.low %v18678_v49, %v18678_v49  ;;  %v1716_v53 = vld [vmem:[%s17868_s30 + $0x2c48] sm:$0xff] }
 0x337   : > { %12348 = vmatprep.subr.bf16.mxu0 %v16267_v2  ;;  %12963 = vmatprep.subr.bf16.mxu1 %v16269_v3  ;;  %v1683_v2 = vld [vmem:[%s17868_s30 + $0x2b40] sm:$0xff]  ;;  %v1720_v57 = vld [vmem:[%s17868_s30 + $0x2c68] sm:$0xff] }
 0x338   : > { %v1687_v3 = vld [vmem:[%s17868_s30 + $0x2b60] sm:$0xff] }
 0x339   : > { %v16314_v18 = vcombine.low %v1683_v2, %v1687_v3  ;;  %v18757_v59 = vld [vmem:[%s17860_s23 + $0x58] sm:$0xff] }
 0x33a   : > { %12349 = vmatpush1.bf16.msra.mxu0 %v16266_v9  ;;  %12964 = vmatpush1.bf16.msra.mxu1 %v16268_v10  ;;  %v16315_v9 = vcombine.high %v1683_v2, %v1687_v3  ;;  %v16317_v10 = vcombine.high %v1684_v5, %v1688_v6  ;;  %v1723_v2 = vld [vmem:[%s17868_s30 + $0x2c80] sm:$0xff]  ;;  %v18763_v49 = vcombine.high %v18757_v59, %v18757_v59  ;;  %v1724_v5 = vld [vmem:[%s17868_s30 + $0x2c88] sm:$0xff] }
 0x33b   : > { %12350 = vmatprep.subr.bf16.mxu0 %v16275_v11  ;;  %12965 = vmatprep.subr.bf16.mxu1 %v16277_v12  ;;  %v1691_v11 = vld [vmem:[%s17868_s30 + $0x2b80] sm:$0xff]  ;;  %v1728_v6 = vld [vmem:[%s17868_s30 + $0x2ca8] sm:$0xff] }
 0x33c   : > { %v1695_v12 = vld [vmem:[%s17868_s30 + $0x2ba0] sm:$0xff] }
 0x33d   : > { %v16322_v31 = vcombine.low %v1691_v11, %v1695_v12  ;;  %v1727_v3 = vld [vmem:[%s17868_s30 + $0x2ca0] sm:$0xff] }
 0x33e   : > { %12351 = vmatpush1.bf16.msra.mxu0 %v16274_v22  ;;  %12966 = vmatpush1.bf16.msra.mxu1 %v16276_v54  ;;  %v16323_v22 = vcombine.high %v1691_v11, %v1695_v12  ;;  %v16325_v54 = vcombine.high %v1692_v14, %v1696_v15  ;;  %v1731_v11 = vld [vmem:[%s17868_s30 + $0x2cc0] sm:$0xff]  ;;  %v1732_v14 = vld [vmem:[%s17868_s30 + $0x2cc8] sm:$0xff] }
 0x33f   : > { %12352 = vmatprep.subr.bf16.mxu0 %v16283_v27  ;;  %12967 = vmatprep.subr.bf16.mxu1 %v16285_v28  ;;  %v1699_v27 = vld [vmem:[%s17868_s30 + $0x2bc0] sm:$0xff]  ;;  %v1736_v15 = vld [vmem:[%s17868_s30 + $0x2ce8] sm:$0xff] }
 0x340   : > { %v1703_v28 = vld [vmem:[%s17868_s30 + $0x2be0] sm:$0xff] }
 0x341   : > { %v16330_v41 = vcombine.low %v1699_v27, %v1703_v28  ;;  %v1735_v12 = vld [vmem:[%s17868_s30 + $0x2ce0] sm:$0xff] }
 0x342   : > { %12353 = vmatpush1.bf16.msra.mxu0 %v16282_v33  ;;  %12968 = vmatpush1.bf16.msra.mxu1 %v16284_v34  ;;  %v16331_v33 = vcombine.high %v1699_v27, %v1703_v28  ;;  %v16333_v34 = vcombine.high %v1700_v29, %v1704_v30  ;;  %v1739_v27 = vld [vmem:[%s17868_s30 + $0x2d00] sm:$0xff]  ;;  %v1740_v29 = vld [vmem:[%s17868_s30 + $0x2d08] sm:$0xff] }
 0x343   : > { %12354 = vmatprep.subr.bf16.mxu0 %v16291_v35  ;;  %12969 = vmatprep.subr.bf16.mxu1 %v16293_v36  ;;  %v1707_v35 = vld [vmem:[%s17868_s30 + $0x2c00] sm:$0xff]  ;;  %v1744_v30 = vld [vmem:[%s17868_s30 + $0x2d28] sm:$0xff] }
 0x344   : > { %v1711_v36 = vld [vmem:[%s17868_s30 + $0x2c20] sm:$0xff] }
 0x345   : > { %v1743_v28 = vld [vmem:[%s17868_s30 + $0x2d20] sm:$0xff] }
 0x346   : > { %12355 = vmatpush1.bf16.msra.mxu0 %v16290_v43  ;;  %12970 = vmatpush1.bf16.msra.mxu1 %v16292_v44  ;;  %v16339_v43 = vcombine.high %v1707_v35, %v1711_v36  ;;  %v16341_v44 = vcombine.high %v1708_v38, %v1712_v39 }
 0x347   : > { %12356 = vmatprep.subr.bf16.mxu0 %v16299_v46  ;;  %12971 = vmatprep.subr.bf16.mxu1 %v16301_v48  ;;  %v1715_v46 = vld [vmem:[%s17868_s30 + $0x2c40] sm:$0xff] }
 0x348   : > { %v1719_v48 = vld [vmem:[%s17868_s30 + $0x2c60] sm:$0xff] }
 0x34a   : > { %12357 = vmatpush1.bf16.msra.mxu0 %v16298_v61  ;;  %12972 = vmatpush1.bf16.msra.mxu1 %v16300_v62  ;;  %v16338_v61 = vcombine.low %v1707_v35, %v1711_v36  ;;  %v16340_v62 = vcombine.low %v1708_v38, %v1712_v39  ;;  %v1747_v35 = vld [vmem:[%s17868_s30 + $0x2d40] sm:$0xff]  ;;  %v1748_v38 = vld [vmem:[%s17868_s30 + $0x2d48] sm:$0xff] }
 0x34b   : > { %12358 = vmatprep.subr.bf16.mxu0 %v16307_v63  ;;  %12973 = vmatprep.subr.bf16.mxu1 %v16309_v0  ;;  %v16347_v63 = vcombine.high %v1715_v46, %v1719_v48  ;;  %v16349_v0 = vcombine.high %v1716_v53, %v1720_v57  ;;  %v1751_v36 = vld [vmem:[%s17868_s30 + $0x2d60] sm:$0xff]  ;;  %v1752_v39 = vld [vmem:[%s17868_s30 + $0x2d68] sm:$0xff] }
 0x34e   : > { %12359 = vmatpush1.bf16.msra.mxu0 %v16306_v7  ;;  %12974 = vmatpush1.bf16.msra.mxu1 %v16308_v8  ;;  %v16346_v7 = vcombine.low %v1715_v46, %v1719_v48  ;;  %v16348_v8 = vcombine.low %v1716_v53, %v1720_v57  ;;  %v1755_v46 = vld [vmem:[%s17868_s30 + $0x2d80] sm:$0xff]  ;;  %v1756_v53 = vld [vmem:[%s17868_s30 + $0x2d88] sm:$0xff] }
 0x34f   : > { %12360 = vmatprep.subr.bf16.mxu0 %v16315_v9  ;;  %12975 = vmatprep.subr.bf16.mxu1 %v16317_v10  ;;  %v16355_v9 = vcombine.high %v1723_v2, %v1727_v3  ;;  %v16357_v10 = vcombine.high %v1724_v5, %v1728_v6  ;;  %v1759_v48 = vld [vmem:[%s17868_s30 + $0x2da0] sm:$0xff]  ;;  %v1760_v57 = vld [vmem:[%s17868_s30 + $0x2da8] sm:$0xff] }
 0x352   : > { %12361 = vmatpush1.bf16.msra.mxu0 %v16314_v18  ;;  %12976 = vmatpush1.bf16.msra.mxu1 %v16316_v19  ;;  %v16354_v18 = vcombine.low %v1723_v2, %v1727_v3  ;;  %v16356_v19 = vcombine.low %v1724_v5, %v1728_v6  ;;  %v1763_v2 = vld [vmem:[%s17868_s30 + $0x2dc0] sm:$0xff]  ;;  %v1764_v5 = vld [vmem:[%s17868_s30 + $0x2dc8] sm:$0xff] }
 0x353   : > { %12362 = vmatprep.subr.bf16.mxu0 %v16323_v22  ;;  %12977 = vmatprep.subr.bf16.mxu1 %v16325_v54  ;;  %v16363_v22 = vcombine.high %v1731_v11, %v1735_v12  ;;  %v16365_v54 = vcombine.high %v1732_v14, %v1736_v15  ;;  %v1767_v3 = vld [vmem:[%s17868_s30 + $0x2de0] sm:$0xff]  ;;  %v1768_v6 = vld [vmem:[%s17868_s30 + $0x2de8] sm:$0xff] }
 0x356   : > { %12363 = vmatpush1.bf16.msra.mxu0 %v16322_v31  ;;  %12978 = vmatpush1.bf16.msra.mxu1 %v16324_v32  ;;  %v16362_v31 = vcombine.low %v1731_v11, %v1735_v12  ;;  %v16364_v32 = vcombine.low %v1732_v14, %v1736_v15  ;;  %v1771_v11 = vld [vmem:[%s17868_s30 + $0x2e00] sm:$0xff]  ;;  %v1772_v14 = vld [vmem:[%s17868_s30 + $0x2e08] sm:$0xff] }
 0x357   : > { %12364 = vmatprep.subr.bf16.mxu0 %v16331_v33  ;;  %12979 = vmatprep.subr.bf16.mxu1 %v16333_v34  ;;  %v16371_v33 = vcombine.high %v1739_v27, %v1743_v28  ;;  %v16373_v34 = vcombine.high %v1740_v29, %v1744_v30  ;;  %v1775_v12 = vld [vmem:[%s17868_s30 + $0x2e20] sm:$0xff]  ;;  %v1776_v15 = vld [vmem:[%s17868_s30 + $0x2e28] sm:$0xff] }
 0x35a   : > { %12365 = vmatpush1.bf16.msra.mxu0 %v16330_v41  ;;  %12980 = vmatpush1.bf16.msra.mxu1 %v16332_v42  ;;  %v16370_v41 = vcombine.low %v1739_v27, %v1743_v28  ;;  %v16372_v42 = vcombine.low %v1740_v29, %v1744_v30  ;;  %v1779_v27 = vld [vmem:[%s17868_s30 + $0x2e40] sm:$0xff]  ;;  %v1780_v29 = vld [vmem:[%s17868_s30 + $0x2e48] sm:$0xff] }
 0x35b   : > { %12375 = vmatprep.subr.bf16.mxu0 %v16339_v43  ;;  %12990 = vmatprep.subr.bf16.mxu1 %v16341_v44  ;;  %v16379_v43 = vcombine.high %v1747_v35, %v1751_v36  ;;  %v16381_v44 = vcombine.high %v1748_v38, %v1752_v39  ;;  %v1783_v28 = vld [vmem:[%s17868_s30 + $0x2e60] sm:$0xff]  ;;  %v1784_v30 = vld [vmem:[%s17868_s30 + $0x2e68] sm:$0xff] }
 0x35d   : > { %12367 = vmatmul.mubr.bf16.vlgmr.msra.gmra.mrb[0].mxu0 %v18752_v52  ;;  %12982 = vmatmul.mubr.bf16.vlgmr.msra.gmra.mrb[0].mxu1 %v18752_v52 }
 0x35e   : > { %12376 = vmatpush1.bf16.msra.mxu0 %v16338_v61  ;;  %12991 = vmatpush1.bf16.msra.mxu1 %v16340_v62  ;;  %v16378_v61 = vcombine.low %v1747_v35, %v1751_v36  ;;  %v16380_v62 = vcombine.low %v1748_v38, %v1752_v39  ;;  %v1787_v35 = vld [vmem:[%s17868_s30 + $0x2e80] sm:$0xff]  ;;  %v1788_v38 = vld [vmem:[%s17868_s30 + $0x2e88] sm:$0xff] }
 0x35f   : > { %12377 = vmatprep.subr.bf16.mxu0 %v16347_v63  ;;  %12992 = vmatprep.subr.bf16.mxu1 %v16349_v0  ;;  %v16387_v63 = vcombine.high %v1755_v46, %v1759_v48  ;;  %v16389_v0 = vcombine.high %v1756_v53, %v1760_v57  ;;  %v1791_v36 = vld [vmem:[%s17868_s30 + $0x2ea0] sm:$0xff]  ;;  %v1792_v39 = vld [vmem:[%s17868_s30 + $0x2ea8] sm:$0xff] }
 0x360   : > { %12407 = vmatprep.mubr.bf16.mxu0 %v18763_v49  ;;  %13022 = vmatprep.mubr.bf16.mxu1 %v18763_v49 }
 0x362   : > { %12378 = vmatpush1.bf16.msra.mxu0 %v16346_v7  ;;  %12993 = vmatpush1.bf16.msra.mxu1 %v16348_v8  ;;  %v16386_v7 = vcombine.low %v1755_v46, %v1759_v48  ;;  %v16388_v8 = vcombine.low %v1756_v53, %v1760_v57  ;;  %v1795_v46 = vld [vmem:[%s17868_s30 + $0x2ec0] sm:$0xff]  ;;  %v1796_v53 = vld [vmem:[%s17868_s30 + $0x2ec8] sm:$0xff] }
 0x363   : > { %12379 = vmatprep.subr.bf16.mxu0 %v16355_v9  ;;  %12994 = vmatprep.subr.bf16.mxu1 %v16357_v10  ;;  %v16395_v9 = vcombine.high %v1763_v2, %v1767_v3  ;;  %v16397_v10 = vcombine.high %v1764_v5, %v1768_v6  ;;  %v1799_v48 = vld [vmem:[%s17868_s30 + $0x2ee0] sm:$0xff]  ;;  %v1800_v57 = vld [vmem:[%s17868_s30 + $0x2ee8] sm:$0xff] }
 0x366   : > { %12380 = vmatpush1.bf16.msra.mxu0 %v16354_v18  ;;  %12995 = vmatpush1.bf16.msra.mxu1 %v16356_v19  ;;  %v16394_v18 = vcombine.low %v1763_v2, %v1767_v3  ;;  %v16396_v19 = vcombine.low %v1764_v5, %v1768_v6  ;;  %v1803_v2 = vld [vmem:[%s17868_s30 + $0x2f00] sm:$0xff]  ;;  %v1804_v5 = vld [vmem:[%s17868_s30 + $0x2f08] sm:$0xff] }
 0x367   : > { %12381 = vmatprep.subr.bf16.mxu0 %v16363_v22  ;;  %12996 = vmatprep.subr.bf16.mxu1 %v16365_v54  ;;  %v16403_v22 = vcombine.high %v1771_v11, %v1775_v12  ;;  %v16405_v54 = vcombine.high %v1772_v14, %v1776_v15  ;;  %v1807_v3 = vld [vmem:[%s17868_s30 + $0x2f20] sm:$0xff]  ;;  %v1808_v6 = vld [vmem:[%s17868_s30 + $0x2f28] sm:$0xff] }
 0x36a   : > { %12382 = vmatpush1.bf16.msra.mxu0 %v16362_v31  ;;  %12997 = vmatpush1.bf16.msra.mxu1 %v16364_v32  ;;  %v16402_v31 = vcombine.low %v1771_v11, %v1775_v12  ;;  %v16404_v32 = vcombine.low %v1772_v14, %v1776_v15  ;;  %v1811_v11 = vld [vmem:[%s17868_s30 + $0x2f40] sm:$0xff]  ;;  %v1812_v14 = vld [vmem:[%s17868_s30 + $0x2f48] sm:$0xff] }
 0x36b   : > { %12383 = vmatprep.subr.bf16.mxu0 %v16371_v33  ;;  %12998 = vmatprep.subr.bf16.mxu1 %v16373_v34  ;;  %v16411_v33 = vcombine.high %v1779_v27, %v1783_v28  ;;  %v16413_v34 = vcombine.high %v1780_v29, %v1784_v30  ;;  %v1815_v12 = vld [vmem:[%s17868_s30 + $0x2f60] sm:$0xff]  ;;  %v1816_v15 = vld [vmem:[%s17868_s30 + $0x2f68] sm:$0xff] }
 0x36e   : > { %12384 = vmatpush1.bf16.msra.mxu0 %v16370_v41  ;;  %12999 = vmatpush1.bf16.msra.mxu1 %v16372_v42  ;;  %v16410_v41 = vcombine.low %v1779_v27, %v1783_v28  ;;  %v16412_v42 = vcombine.low %v1780_v29, %v1784_v30  ;;  %v1819_v27 = vld [vmem:[%s17868_s30 + $0x2f80] sm:$0xff]  ;;  %v1820_v29 = vld [vmem:[%s17868_s30 + $0x2f88] sm:$0xff] }
 0x36f   : > { %12385 = vmatprep.subr.bf16.mxu0 %v16379_v43  ;;  %13000 = vmatprep.subr.bf16.mxu1 %v16381_v44  ;;  %v16419_v43 = vcombine.high %v1787_v35, %v1791_v36  ;;  %v16421_v44 = vcombine.high %v1788_v38, %v1792_v39  ;;  %v1823_v28 = vld [vmem:[%s17868_s30 + $0x2fa0] sm:$0xff]  ;;  %v1824_v30 = vld [vmem:[%s17868_s30 + $0x2fa8] sm:$0xff] }
 0x372   : > { %12386 = vmatpush1.bf16.msra.mxu0 %v16378_v61  ;;  %13001 = vmatpush1.bf16.msra.mxu1 %v16380_v62  ;;  %v16418_v61 = vcombine.low %v1787_v35, %v1791_v36  ;;  %v16420_v62 = vcombine.low %v1788_v38, %v1792_v39  ;;  %v1827_v35 = vld [vmem:[%s17868_s30 + $0x2fc0] sm:$0xff]  ;;  %v1828_v38 = vld [vmem:[%s17868_s30 + $0x2fc8] sm:$0xff] }
 0x373   : > { %12387 = vmatprep.subr.bf16.mxu0 %v16387_v63  ;;  %13002 = vmatprep.subr.bf16.mxu1 %v16389_v0  ;;  %v16427_v63 = vcombine.high %v1795_v46, %v1799_v48  ;;  %v16429_v0 = vcombine.high %v1796_v53, %v1800_v57  ;;  %v1831_v36 = vld [vmem:[%s17868_s30 + $0x2fe0] sm:$0xff]  ;;  %v1832_v39 = vld [vmem:[%s17868_s30 + $0x2fe8] sm:$0xff] }
 0x376   : > { %12388 = vmatpush1.bf16.msra.mxu0 %v16386_v7  ;;  %13003 = vmatpush1.bf16.msra.mxu1 %v16388_v8  ;;  %v16426_v7 = vcombine.low %v1795_v46, %v1799_v48  ;;  %v16428_v8 = vcombine.low %v1796_v53, %v1800_v57  ;;  %v1835_v46 = vld [vmem:[%s17868_s30 + $0x3000] sm:$0xff]  ;;  %v1836_v53 = vld [vmem:[%s17868_s30 + $0x3008] sm:$0xff] }
 0x377   : > { %12389 = vmatprep.subr.bf16.mxu0 %v16395_v9  ;;  %13004 = vmatprep.subr.bf16.mxu1 %v16397_v10  ;;  %v16435_v9 = vcombine.high %v1803_v2, %v1807_v3  ;;  %v16437_v10 = vcombine.high %v1804_v5, %v1808_v6  ;;  %v1839_v48 = vld [vmem:[%s17868_s30 + $0x3020] sm:$0xff]  ;;  %v1840_v57 = vld [vmem:[%s17868_s30 + $0x3028] sm:$0xff] }
 0x37a   : > { %12390 = vmatpush1.bf16.msra.mxu0 %v16394_v18  ;;  %13005 = vmatpush1.bf16.msra.mxu1 %v16396_v19  ;;  %v16434_v18 = vcombine.low %v1803_v2, %v1807_v3  ;;  %v16436_v19 = vcombine.low %v1804_v5, %v1808_v6  ;;  %v1843_v2 = vld [vmem:[%s17868_s30 + $0x3040] sm:$0xff]  ;;  %v18831_v5 = vcombine.low %v18757_v59, %v18757_v59  ;;  %v1844_v6 = vld [vmem:[%s17868_s30 + $0x3048] sm:$0xff] }
 0x37b   : > { %12391 = vmatprep.subr.bf16.mxu0 %v16403_v22  ;;  %13006 = vmatprep.subr.bf16.mxu1 %v16405_v54  ;;  %v16443_v22 = vcombine.high %v1811_v11, %v1815_v12  ;;  %v16445_v54 = vcombine.high %v1812_v14, %v1816_v15  ;;  %v1847_v3 = vld [vmem:[%s17868_s30 + $0x3060] sm:$0xff] }
 0x37e   : > { %12392 = vmatpush1.bf16.msra.mxu0 %v16402_v31  ;;  %13007 = vmatpush1.bf16.msra.mxu1 %v16404_v32  ;;  %v16442_v31 = vcombine.low %v1811_v11, %v1815_v12  ;;  %v16444_v32 = vcombine.low %v1812_v14, %v1816_v15  ;;  %v16475_v11 = vcombine.high %v1843_v2, %v1847_v3  ;;  %v1851_v14 = vld [vmem:[%s17868_s30 + $0x3080] sm:$0xff] }
 0x37f   : > { %12393 = vmatprep.subr.bf16.mxu0 %v16411_v33  ;;  %13008 = vmatprep.subr.bf16.mxu1 %v16413_v34  ;;  %v16451_v33 = vcombine.high %v1819_v27, %v1823_v28  ;;  %v16453_v34 = vcombine.high %v1820_v29, %v1824_v30  ;;  %v1855_v15 = vld [vmem:[%s17868_s30 + $0x30a0] sm:$0xff] }
 0x382   : > { %12394 = vmatpush1.bf16.msra.mxu0 %v16410_v41  ;;  %13009 = vmatpush1.bf16.msra.mxu1 %v16412_v42  ;;  %v16450_v41 = vcombine.low %v1819_v27, %v1823_v28  ;;  %v16452_v42 = vcombine.low %v1820_v29, %v1824_v30  ;;  %v16483_v27 = vcombine.high %v1851_v14, %v1855_v15  ;;  %v1859_v29 = vld [vmem:[%s17868_s30 + $0x30c0] sm:$0xff] }
 0x383   : > { %12395 = vmatprep.subr.bf16.mxu0 %v16419_v43  ;;  %13010 = vmatprep.subr.bf16.mxu1 %v16421_v44  ;;  %v16459_v43 = vcombine.high %v1827_v35, %v1831_v36  ;;  %v16461_v44 = vcombine.high %v1828_v38, %v1832_v39  ;;  %v1863_v30 = vld [vmem:[%s17868_s30 + $0x30e0] sm:$0xff] }
 0x386   : > { %12396 = vmatpush1.bf16.msra.mxu0 %v16418_v61  ;;  %13011 = vmatpush1.bf16.msra.mxu1 %v16420_v62  ;;  %v16458_v61 = vcombine.low %v1827_v35, %v1831_v36  ;;  %v16460_v62 = vcombine.low %v1828_v38, %v1832_v39  ;;  %v16491_v35 = vcombine.high %v1859_v29, %v1863_v30  ;;  %v1867_v38 = vld [vmem:[%s17868_s30 + $0x3100] sm:$0xff] }
 0x387   : > { %12397 = vmatprep.subr.bf16.mxu0 %v16427_v63  ;;  %13012 = vmatprep.subr.bf16.mxu1 %v16429_v0  ;;  %v16467_v63 = vcombine.high %v1835_v46, %v1839_v48  ;;  %v16469_v0 = vcombine.high %v1836_v53, %v1840_v57  ;;  %v1871_v39 = vld [vmem:[%s17868_s30 + $0x3120] sm:$0xff] }
 0x38a   : > { %12398 = vmatpush1.bf16.msra.mxu0 %v16426_v7  ;;  %13013 = vmatpush1.bf16.msra.mxu1 %v16428_v8  ;;  %v1848_v7 = vld [vmem:[%s17868_s30 + $0x3068] sm:$0xff] }
 0x38b   : > { %12399 = vmatprep.subr.bf16.mxu0 %v16435_v9  ;;  %13014 = vmatprep.subr.bf16.mxu1 %v16437_v10  ;;  %v18836_v8 = vld [vmem:[%s17860_s23 + $0x60] sm:$0xff]  ;;  %v16466_v9 = vcombine.low %v1835_v46, %v1839_v48  ;;  %v16468_v10 = vcombine.low %v1836_v53, %v1840_v57  ;;  %v16477_v12 = vcombine.high %v1844_v6, %v1848_v7  ;;  %v1875_v53 = vld [vmem:[%s17868_s30 + $0x3140] sm:$0xff] }
 0x38c   : > { %v18842_v59 = vcombine.high %v18836_v8, %v18836_v8  ;;  %v16499_v46 = vcombine.high %v1867_v38, %v1871_v39  ;;  %v1879_v57 = vld [vmem:[%s17868_s30 + $0x3160] sm:$0xff] }
 0x38e   : > { %12400 = vmatpush1.bf16.msra.mxu0 %v16434_v18  ;;  %13015 = vmatpush1.bf16.msra.mxu1 %v16436_v19  ;;  %v1852_v18 = vld [vmem:[%s17868_s30 + $0x3088] sm:$0xff] }
 0x38f   : > { %12401 = vmatprep.subr.bf16.mxu0 %v16443_v22  ;;  %13016 = vmatprep.subr.bf16.mxu1 %v16445_v54  ;;  %v1856_v19 = vld [vmem:[%s17868_s30 + $0x30a8] sm:$0xff]  ;;  %v16474_v22 = vcombine.low %v1843_v2, %v1847_v3  ;;  %v16476_v54 = vcombine.low %v1844_v6, %v1848_v7  ;;  %v16507_v2 = vcombine.high %v1875_v53, %v1879_v57  ;;  %v1883_v6 = vld [vmem:[%s17868_s30 + $0x3180] sm:$0xff] }
 0x390   : > { %v16485_v28 = vcombine.high %v1852_v18, %v1856_v19  ;;  %v1887_v7 = vld [vmem:[%s17868_s30 + $0x31a0] sm:$0xff] }
 0x392   : > { %12402 = vmatpush1.bf16.msra.mxu0 %v16442_v31  ;;  %13017 = vmatpush1.bf16.msra.mxu1 %v16444_v32  ;;  %v1860_v31 = vld [vmem:[%s17868_s30 + $0x30c8] sm:$0xff] }
 0x393   : > { %12403 = vmatprep.subr.bf16.mxu0 %v16451_v33  ;;  %13018 = vmatprep.subr.bf16.mxu1 %v16453_v34  ;;  %v1864_v32 = vld [vmem:[%s17868_s30 + $0x30e8] sm:$0xff]  ;;  %v16482_v33 = vcombine.low %v1851_v14, %v1855_v15  ;;  %v16484_v34 = vcombine.low %v1852_v18, %v1856_v19  ;;  %v16515_v14 = vcombine.high %v1883_v6, %v1887_v7  ;;  %v1891_v18 = vld [vmem:[%s17868_s30 + $0x31c0] sm:$0xff] }
 0x394   : > { %v16493_v36 = vcombine.high %v1860_v31, %v1864_v32  ;;  %v1895_v19 = vld [vmem:[%s17868_s30 + $0x31e0] sm:$0xff] }
 0x396   : > { %12404 = vmatpush1.bf16.msra.mxu0 %v16450_v41  ;;  %13019 = vmatpush1.bf16.msra.mxu1 %v16452_v42  ;;  %v1868_v41 = vld [vmem:[%s17868_s30 + $0x3108] sm:$0xff] }
 0x397   : > { %12405 = vmatprep.subr.bf16.mxu0 %v16459_v43  ;;  %13020 = vmatprep.subr.bf16.mxu1 %v16461_v44  ;;  %v1872_v42 = vld [vmem:[%s17868_s30 + $0x3128] sm:$0xff]  ;;  %v16490_v43 = vcombine.low %v1859_v29, %v1863_v30  ;;  %v16492_v44 = vcombine.low %v1860_v31, %v1864_v32  ;;  %v16523_v29 = vcombine.high %v1891_v18, %v1895_v19  ;;  %v1899_v31 = vld [vmem:[%s17868_s30 + $0x3200] sm:$0xff] }
 0x398   : > { %v16501_v48 = vcombine.high %v1868_v41, %v1872_v42  ;;  %v1903_v32 = vld [vmem:[%s17868_s30 + $0x3220] sm:$0xff] }
 0x39a   : > { %12406 = vmatpush1.bf16.msra.mxu0 %v16458_v61  ;;  %13021 = vmatpush1.bf16.msra.mxu1 %v16460_v62  ;;  %v1876_v61 = vld [vmem:[%s17868_s30 + $0x3148] sm:$0xff] }
 0x39b   : > { %12416 = vmatprep.subr.bf16.mxu0 %v16467_v63  ;;  %13031 = vmatprep.subr.bf16.mxu1 %v16469_v0  ;;  %v1880_v62 = vld [vmem:[%s17868_s30 + $0x3168] sm:$0xff]  ;;  %v16498_v63 = vcombine.low %v1867_v38, %v1871_v39  ;;  %v16500_v0 = vcombine.low %v1868_v41, %v1872_v42  ;;  %v16531_v38 = vcombine.high %v1899_v31, %v1903_v32  ;;  %v1907_v41 = vld [vmem:[%s17868_s30 + $0x3240] sm:$0xff] }
 0x39c   : > { %v16509_v3 = vcombine.high %v1876_v61, %v1880_v62  ;;  %v1911_v42 = vld [vmem:[%s17868_s30 + $0x3260] sm:$0xff] }
 0x39d   : > { %12408 = vmatmul.mubr.bf16.vlgmr.msra.gmra.mrb[0].mxu0 %v18831_v5  ;;  %13023 = vmatmul.mubr.bf16.vlgmr.msra.gmra.mrb[0].mxu1 %v18831_v5 }
 0x39e   : > { %12417 = vmatpush1.bf16.msra.mxu0 %v16466_v9  ;;  %13032 = vmatpush1.bf16.msra.mxu1 %v16468_v10  ;;  %v1884_v9 = vld [vmem:[%s17868_s30 + $0x3188] sm:$0xff] }
 0x39f   : > { %12418 = vmatprep.subr.bf16.mxu0 %v16475_v11  ;;  %13033 = vmatprep.subr.bf16.mxu1 %v16477_v12  ;;  %v1888_v10 = vld [vmem:[%s17868_s30 + $0x31a8] sm:$0xff]  ;;  %v16506_v11 = vcombine.low %v1875_v53, %v1879_v57  ;;  %v16508_v12 = vcombine.low %v1876_v61, %v1880_v62  ;;  %v16539_v53 = vcombine.high %v1907_v41, %v1911_v42  ;;  %v1915_v61 = vld [vmem:[%s17868_s30 + $0x3280] sm:$0xff] }
 0x3a0   : > { %12448 = vmatprep.mubr.bf16.mxu0 %v18842_v59  ;;  %13063 = vmatprep.mubr.bf16.mxu1 %v18842_v59  ;;  %v16517_v15 = vcombine.high %v1884_v9, %v1888_v10  ;;  %v1919_v62 = vld [vmem:[%s17868_s30 + $0x32a0] sm:$0xff] }
 0x3a2   : > { %12419 = vmatpush1.bf16.msra.mxu0 %v16474_v22  ;;  %13034 = vmatpush1.bf16.msra.mxu1 %v16476_v54  ;;  %v1892_v22 = vld [vmem:[%s17868_s30 + $0x31c8] sm:$0xff] }
 0x3a3   : > { %12420 = vmatprep.subr.bf16.mxu0 %v16483_v27  ;;  %13035 = vmatprep.subr.bf16.mxu1 %v16485_v28  ;;  %v1896_v54 = vld [vmem:[%s17868_s30 + $0x31e8] sm:$0xff]  ;;  %v16514_v27 = vcombine.low %v1883_v6, %v1887_v7  ;;  %v16516_v28 = vcombine.low %v1884_v9, %v1888_v10  ;;  %v16547_v6 = vcombine.high %v1915_v61, %v1919_v62  ;;  %v1923_v9 = vld [vmem:[%s17868_s30 + $0x32c0] sm:$0xff] }
 0x3a4   : > { %v16525_v30 = vcombine.high %v1892_v22, %v1896_v54  ;;  %v1927_v10 = vld [vmem:[%s17868_s30 + $0x32e0] sm:$0xff] }
 0x3a6   : > { %12421 = vmatpush1.bf16.msra.mxu0 %v16482_v33  ;;  %13036 = vmatpush1.bf16.msra.mxu1 %v16484_v34  ;;  %v1900_v33 = vld [vmem:[%s17868_s30 + $0x3208] sm:$0xff] }
 0x3a7   : > { %12422 = vmatprep.subr.bf16.mxu0 %v16491_v35  ;;  %13037 = vmatprep.subr.bf16.mxu1 %v16493_v36  ;;  %v1904_v34 = vld [vmem:[%s17868_s30 + $0x3228] sm:$0xff]  ;;  %v16522_v35 = vcombine.low %v1891_v18, %v1895_v19  ;;  %v16524_v36 = vcombine.low %v1892_v22, %v1896_v54  ;;  %v16555_v18 = vcombine.high %v1923_v9, %v1927_v10  ;;  %v1931_v22 = vld [vmem:[%s17868_s30 + $0x3300] sm:$0xff] }
 0x3a8   : > { %v16533_v39 = vcombine.high %v1900_v33, %v1904_v34  ;;  %v1935_v54 = vld [vmem:[%s17868_s30 + $0x3320] sm:$0xff] }
 0x3aa   : > { %12423 = vmatpush1.bf16.msra.mxu0 %v16490_v43  ;;  %13038 = vmatpush1.bf16.msra.mxu1 %v16492_v44  ;;  %v1908_v43 = vld [vmem:[%s17868_s30 + $0x3248] sm:$0xff] }
 0x3ab   : > { %12424 = vmatprep.subr.bf16.mxu0 %v16499_v46  ;;  %13039 = vmatprep.subr.bf16.mxu1 %v16501_v48  ;;  %v1912_v44 = vld [vmem:[%s17868_s30 + $0x3268] sm:$0xff]  ;;  %v16530_v46 = vcombine.low %v1899_v31, %v1903_v32  ;;  %v16532_v48 = vcombine.low %v1900_v33, %v1904_v34  ;;  %v16563_v31 = vcombine.high %v1931_v22, %v1935_v54  ;;  %v1939_v33 = vld [vmem:[%s17868_s30 + $0x3340] sm:$0xff] }
 0x3ac   : > { %v16541_v57 = vcombine.high %v1908_v43, %v1912_v44  ;;  %v1943_v34 = vld [vmem:[%s17868_s30 + $0x3360] sm:$0xff] }
 0x3ae   : > { %12425 = vmatpush1.bf16.msra.mxu0 %v16498_v63  ;;  %13040 = vmatpush1.bf16.msra.mxu1 %v16500_v0  ;;  %v1916_v63 = vld [vmem:[%s17868_s30 + $0x3288] sm:$0xff] }
 0x3af   : > { %12426 = vmatprep.subr.bf16.mxu0 %v16507_v2  ;;  %13041 = vmatprep.subr.bf16.mxu1 %v16509_v3  ;;  %v1920_v0 = vld [vmem:[%s17868_s30 + $0x32a8] sm:$0xff]  ;;  %v16538_v2 = vcombine.low %v1907_v41, %v1911_v42  ;;  %v16540_v3 = vcombine.low %v1908_v43, %v1912_v44  ;;  %v16571_v41 = vcombine.high %v1939_v33, %v1943_v34  ;;  %v1947_v43 = vld [vmem:[%s17868_s30 + $0x3380] sm:$0xff] }
 0x3b0   : > { %v16549_v7 = vcombine.high %v1916_v63, %v1920_v0  ;;  %v1951_v44 = vld [vmem:[%s17868_s30 + $0x33a0] sm:$0xff] }
 0x3b2   : > { %12427 = vmatpush1.bf16.msra.mxu0 %v16506_v11  ;;  %13042 = vmatpush1.bf16.msra.mxu1 %v16508_v12  ;;  %v1924_v11 = vld [vmem:[%s17868_s30 + $0x32c8] sm:$0xff] }
 0x3b3   : > { %12428 = vmatprep.subr.bf16.mxu0 %v16515_v14  ;;  %13043 = vmatprep.subr.bf16.mxu1 %v16517_v15  ;;  %v1928_v12 = vld [vmem:[%s17868_s30 + $0x32e8] sm:$0xff]  ;;  %v16546_v14 = vcombine.low %v1915_v61, %v1919_v62  ;;  %v16548_v15 = vcombine.low %v1916_v63, %v1920_v0  ;;  %v16579_v61 = vcombine.high %v1947_v43, %v1951_v44  ;;  %v1955_v63 = vld [vmem:[%s17868_s30 + $0x33c0] sm:$0xff] }
 0x3b4   : > { %v16557_v19 = vcombine.high %v1924_v11, %v1928_v12  ;;  %v1959_v0 = vld [vmem:[%s17868_s30 + $0x33e0] sm:$0xff] }
 0x3b6   : > { %12429 = vmatpush1.bf16.msra.mxu0 %v16514_v27  ;;  %13044 = vmatpush1.bf16.msra.mxu1 %v16516_v28  ;;  %v1932_v27 = vld [vmem:[%s17868_s30 + $0x3308] sm:$0xff] }
 0x3b7   : > { %12430 = vmatprep.subr.bf16.mxu0 %v16523_v29  ;;  %13045 = vmatprep.subr.bf16.mxu1 %v16525_v30  ;;  %v1936_v28 = vld [vmem:[%s17868_s30 + $0x3328] sm:$0xff]  ;;  %v16554_v29 = vcombine.low %v1923_v9, %v1927_v10  ;;  %v16556_v30 = vcombine.low %v1924_v11, %v1928_v12  ;;  %v16587_v9 = vcombine.high %v1955_v63, %v1959_v0  ;;  %v1963_v11 = vld [vmem:[%s17868_s30 + $0x3400] sm:$0xff] }
 0x3b8   : > { %v16565_v32 = vcombine.high %v1932_v27, %v1936_v28  ;;  %v1967_v12 = vld [vmem:[%s17868_s30 + $0x3420] sm:$0xff] }
 0x3ba   : > { %12431 = vmatpush1.bf16.msra.mxu0 %v16522_v35  ;;  %13046 = vmatpush1.bf16.msra.mxu1 %v16524_v36  ;;  %v1940_v35 = vld [vmem:[%s17868_s30 + $0x3348] sm:$0xff] }
 0x3bb   : > { %12432 = vmatprep.subr.bf16.mxu0 %v16531_v38  ;;  %13047 = vmatprep.subr.bf16.mxu1 %v16533_v39  ;;  %v1944_v36 = vld [vmem:[%s17868_s30 + $0x3368] sm:$0xff]  ;;  %v16562_v38 = vcombine.low %v1931_v22, %v1935_v54  ;;  %v16564_v39 = vcombine.low %v1932_v27, %v1936_v28  ;;  %v16595_v22 = vcombine.high %v1963_v11, %v1967_v12  ;;  %v1971_v27 = vld [vmem:[%s17868_s30 + $0x3440] sm:$0xff] }
 0x3bc   : > { %v16573_v42 = vcombine.high %v1940_v35, %v1944_v36  ;;  %v1975_v28 = vld [vmem:[%s17868_s30 + $0x3460] sm:$0xff] }
 0x3be   : > { %12433 = vmatpush1.bf16.msra.mxu0 %v16530_v46  ;;  %13048 = vmatpush1.bf16.msra.mxu1 %v16532_v48  ;;  %v1948_v46 = vld [vmem:[%s17868_s30 + $0x3388] sm:$0xff] }
 0x3bf   : > { %12434 = vmatprep.subr.bf16.mxu0 %v16539_v53  ;;  %13049 = vmatprep.subr.bf16.mxu1 %v16541_v57  ;;  %v1952_v48 = vld [vmem:[%s17868_s30 + $0x33a8] sm:$0xff]  ;;  %v16570_v53 = vcombine.low %v1939_v33, %v1943_v34  ;;  %v16572_v57 = vcombine.low %v1940_v35, %v1944_v36  ;;  %v16594_v33 = vcombine.low %v1963_v11, %v1967_v12 }
 0x3c0   : > { %v16581_v62 = vcombine.high %v1948_v46, %v1952_v48  ;;  %v16603_v35 = vcombine.high %v1971_v27, %v1975_v28 }
 0x3c2   : > { %12435 = vmatpush1.bf16.msra.mxu0 %v16538_v2  ;;  %13050 = vmatpush1.bf16.msra.mxu1 %v16540_v3  ;;  %v1956_v2 = vld [vmem:[%s17868_s30 + $0x33c8] sm:$0xff] }
 0x3c3   : > { %12436 = vmatprep.subr.bf16.mxu0 %v16547_v6  ;;  %13051 = vmatprep.subr.bf16.mxu1 %v16549_v7  ;;  %v1960_v3 = vld [vmem:[%s17868_s30 + $0x33e8] sm:$0xff]  ;;  %v16578_v6 = vcombine.low %v1947_v43, %v1951_v44  ;;  %v16580_v7 = vcombine.low %v1948_v46, %v1952_v48  ;;  %v16602_v43 = vcombine.low %v1971_v27, %v1975_v28 }
 0x3c4   : > { %v16589_v10 = vcombine.high %v1956_v2, %v1960_v3 }
 0x3c6   : > { %12437 = vmatpush1.bf16.msra.mxu0 %v16546_v14  ;;  %13052 = vmatpush1.bf16.msra.mxu1 %v16548_v15  ;;  %v1964_v14 = vld [vmem:[%s17868_s30 + $0x3408] sm:$0xff] }
 0x3c7   : > { %12438 = vmatprep.subr.bf16.mxu0 %v16555_v18  ;;  %13053 = vmatprep.subr.bf16.mxu1 %v16557_v19  ;;  %v1968_v15 = vld [vmem:[%s17868_s30 + $0x3428] sm:$0xff]  ;;  %v16586_v18 = vcombine.low %v1955_v63, %v1959_v0  ;;  %v16588_v19 = vcombine.low %v1956_v2, %v1960_v3 }
 0x3c8   : > { %v16597_v54 = vcombine.high %v1964_v14, %v1968_v15  ;;  %v16596_v34 = vcombine.low %v1964_v14, %v1968_v15 }
 0x3ca   : > { %12439 = vmatpush1.bf16.msra.mxu0 %v16554_v29  ;;  %13054 = vmatpush1.bf16.msra.mxu1 %v16556_v30  ;;  %v18910_v29 = vcombine.low %v18836_v8, %v18836_v8  ;;  %v1972_v30 = vld [vmem:[%s17868_s30 + $0x3448] sm:$0xff] }
 0x3cb   : > { %12440 = vmatprep.subr.bf16.mxu0 %v16563_v31  ;;  %13055 = vmatprep.subr.bf16.mxu1 %v16565_v32  ;;  %v1976_v31 = vld [vmem:[%s17868_s30 + $0x3468] sm:$0xff]  ;;  %v18915_v32 = vld [vmem:[%s17860_s23 + $0x68] sm:$0xff] }
 0x3cc   : > { %v16605_v36 = vcombine.high %v1972_v30, %v1976_v31  ;;  %v18921_v8 = vcombine.high %v18915_v32, %v18915_v32  ;;  %v16604_v44 = vcombine.low %v1972_v30, %v1976_v31 }
 0x3ce   : > { %12441 = vmatpush1.bf16.msra.mxu0 %v16562_v38  ;;  %13056 = vmatpush1.bf16.msra.mxu1 %v16564_v39  ;;  %v1979_v38 = vld [vmem:[%s17868_s30 + $0x3480] sm:$0xff] }
 0x3cf   : > { %12442 = vmatprep.subr.bf16.mxu0 %v16571_v41  ;;  %13057 = vmatprep.subr.bf16.mxu1 %v16573_v42  ;;  %v1983_v39 = vld [vmem:[%s17868_s30 + $0x34a0] sm:$0xff]  ;;  %v1980_v41 = vld [vmem:[%s17868_s30 + $0x3488] sm:$0xff] }
 0x3d0   : > { %v1984_v42 = vld [vmem:[%s17868_s30 + $0x34a8] sm:$0xff]  ;;  %v16611_v46 = vcombine.high %v1979_v38, %v1983_v39  ;;  %v16610_v63 = vcombine.low %v1979_v38, %v1983_v39 }
 0x3d1   : > { %v16613_v48 = vcombine.high %v1980_v41, %v1984_v42  ;;  %v16612_v0 = vcombine.low %v1980_v41, %v1984_v42 }
 0x3d2   : > { %12443 = vmatpush1.bf16.msra.mxu0 %v16570_v53  ;;  %13058 = vmatpush1.bf16.msra.mxu1 %v16572_v57  ;;  %v1987_v53 = vld [vmem:[%s17868_s30 + $0x34c0] sm:$0xff] }
 0x3d3   : > { %12444 = vmatprep.subr.bf16.mxu0 %v16579_v61  ;;  %13059 = vmatprep.subr.bf16.mxu1 %v16581_v62  ;;  %v1991_v57 = vld [vmem:[%s17868_s30 + $0x34e0] sm:$0xff]  ;;  %v1988_v61 = vld [vmem:[%s17868_s30 + $0x34c8] sm:$0xff] }
 0x3d4   : > { %v1992_v62 = vld [vmem:[%s17868_s30 + $0x34e8] sm:$0xff]  ;;  %v16619_v2 = vcombine.high %v1987_v53, %v1991_v57  ;;  %v16618_v11 = vcombine.low %v1987_v53, %v1991_v57 }
 0x3d5   : > { %v16621_v3 = vcombine.high %v1988_v61, %v1992_v62  ;;  %v16620_v12 = vcombine.low %v1988_v61, %v1992_v62 }
 0x3d6   : > { %12445 = vmatpush1.bf16.msra.mxu0 %v16578_v6  ;;  %13060 = vmatpush1.bf16.msra.mxu1 %v16580_v7  ;;  %v1995_v6 = vld [vmem:[%s17868_s30 + $0x3500] sm:$0xff] }
 0x3d7   : > { %12446 = vmatprep.subr.bf16.mxu0 %v16587_v9  ;;  %13061 = vmatprep.subr.bf16.mxu1 %v16589_v10  ;;  %v1999_v7 = vld [vmem:[%s17868_s30 + $0x3520] sm:$0xff]  ;;  %v1996_v9 = vld [vmem:[%s17868_s30 + $0x3508] sm:$0xff] }
 0x3d8   : > { %v2000_v10 = vld [vmem:[%s17868_s30 + $0x3528] sm:$0xff]  ;;  %v16627_v14 = vcombine.high %v1995_v6, %v1999_v7  ;;  %v16626_v27 = vcombine.low %v1995_v6, %v1999_v7 }
 0x3d9   : > { %v16629_v15 = vcombine.high %v1996_v9, %v2000_v10  ;;  %v16628_v28 = vcombine.low %v1996_v9, %v2000_v10 }
 0x3da   : > { %12447 = vmatpush1.bf16.msra.mxu0 %v16586_v18  ;;  %13062 = vmatpush1.bf16.msra.mxu1 %v16588_v19  ;;  %v2003_v18 = vld [vmem:[%s17868_s30 + $0x3540] sm:$0xff] }
 0x3db   : > { %12457 = vmatprep.subr.bf16.mxu0 %v16595_v22  ;;  %13072 = vmatprep.subr.bf16.mxu1 %v16597_v54  ;;  %v2007_v19 = vld [vmem:[%s17868_s30 + $0x3560] sm:$0xff]  ;;  %v2004_v22 = vld [vmem:[%s17868_s30 + $0x3548] sm:$0xff] }
 0x3dc   : > { %v2008_v54 = vld [vmem:[%s17868_s30 + $0x3568] sm:$0xff]  ;;  %v16635_v30 = vcombine.high %v2003_v18, %v2007_v19  ;;  %v16634_v38 = vcombine.low %v2003_v18, %v2007_v19 }
 0x3dd   : > { %12449 = vmatmul.mubr.bf16.vlgmr.msra.gmra.mrb[0].mxu0 %v18910_v29  ;;  %13064 = vmatmul.mubr.bf16.vlgmr.msra.gmra.mrb[0].mxu1 %v18910_v29  ;;  %v16637_v31 = vcombine.high %v2004_v22, %v2008_v54  ;;  %v16636_v39 = vcombine.low %v2004_v22, %v2008_v54 }
 0x3de   : > { %12458 = vmatpush1.bf16.msra.mxu0 %v16594_v33  ;;  %13073 = vmatpush1.bf16.msra.mxu1 %v16596_v34  ;;  %v2011_v33 = vld [vmem:[%s17868_s30 + $0x3580] sm:$0xff] }
 0x3df   : > { %12459 = vmatprep.subr.bf16.mxu0 %v16603_v35  ;;  %13074 = vmatprep.subr.bf16.mxu1 %v16605_v36  ;;  %v2015_v34 = vld [vmem:[%s17868_s30 + $0x35a0] sm:$0xff]  ;;  %v2012_v35 = vld [vmem:[%s17868_s30 + $0x3588] sm:$0xff] }
 0x3e0   : > { %12489 = vmatprep.mubr.bf16.mxu0 %v18921_v8  ;;  %13104 = vmatprep.mubr.bf16.mxu1 %v18921_v8  ;;  %v2016_v36 = vld [vmem:[%s17868_s30 + $0x35a8] sm:$0xff]  ;;  %v16643_v41 = vcombine.high %v2011_v33, %v2015_v34  ;;  %v16642_v53 = vcombine.low %v2011_v33, %v2015_v34 }
 0x3e1   : > { %v16645_v42 = vcombine.high %v2012_v35, %v2016_v36  ;;  %v16644_v57 = vcombine.low %v2012_v35, %v2016_v36 }
 0x3e2   : > { %12460 = vmatpush1.bf16.msra.mxu0 %v16602_v43  ;;  %13075 = vmatpush1.bf16.msra.mxu1 %v16604_v44  ;;  %v2019_v43 = vld [vmem:[%s17868_s30 + $0x35c0] sm:$0xff] }
 0x3e3   : > { %12461 = vmatprep.subr.bf16.mxu0 %v16611_v46  ;;  %13076 = vmatprep.subr.bf16.mxu1 %v16613_v48  ;;  %v2023_v44 = vld [vmem:[%s17868_s30 + $0x35e0] sm:$0xff]  ;;  %v2020_v46 = vld [vmem:[%s17868_s30 + $0x35c8] sm:$0xff] }
 0x3e4   : > { %v2024_v48 = vld [vmem:[%s17868_s30 + $0x35e8] sm:$0xff]  ;;  %v16651_v61 = vcombine.high %v2019_v43, %v2023_v44  ;;  %v16650_v6 = vcombine.low %v2019_v43, %v2023_v44 }
 0x3e5   : > { %v16653_v62 = vcombine.high %v2020_v46, %v2024_v48  ;;  %v16652_v7 = vcombine.low %v2020_v46, %v2024_v48 }
 0x3e6   : > { %12462 = vmatpush1.bf16.msra.mxu0 %v16610_v63  ;;  %13077 = vmatpush1.bf16.msra.mxu1 %v16612_v0  ;;  %v2027_v63 = vld [vmem:[%s17868_s30 + $0x3600] sm:$0xff] }
 0x3e7   : > { %12463 = vmatprep.subr.bf16.mxu0 %v16619_v2  ;;  %13078 = vmatprep.subr.bf16.mxu1 %v16621_v3  ;;  %v2031_v0 = vld [vmem:[%s17868_s30 + $0x3620] sm:$0xff]  ;;  %v2028_v2 = vld [vmem:[%s17868_s30 + $0x3608] sm:$0xff] }
 0x3e8   : > { %v2032_v3 = vld [vmem:[%s17868_s30 + $0x3628] sm:$0xff]  ;;  %v16659_v9 = vcombine.high %v2027_v63, %v2031_v0  ;;  %v16658_v18 = vcombine.low %v2027_v63, %v2031_v0 }
 0x3e9   : > { %v16661_v10 = vcombine.high %v2028_v2, %v2032_v3  ;;  %v16660_v19 = vcombine.low %v2028_v2, %v2032_v3 }
 0x3ea   : > { %12464 = vmatpush1.bf16.msra.mxu0 %v16618_v11  ;;  %13079 = vmatpush1.bf16.msra.mxu1 %v16620_v12  ;;  %v2035_v11 = vld [vmem:[%s17868_s30 + $0x3640] sm:$0xff] }
 0x3eb   : > { %12465 = vmatprep.subr.bf16.mxu0 %v16627_v14  ;;  %13080 = vmatprep.subr.bf16.mxu1 %v16629_v15  ;;  %v2039_v12 = vld [vmem:[%s17868_s30 + $0x3660] sm:$0xff]  ;;  %v2036_v14 = vld [vmem:[%s17868_s30 + $0x3648] sm:$0xff] }
 0x3ec   : > { %v2040_v15 = vld [vmem:[%s17868_s30 + $0x3668] sm:$0xff]  ;;  %v16667_v22 = vcombine.high %v2035_v11, %v2039_v12  ;;  %v16666_v33 = vcombine.low %v2035_v11, %v2039_v12 }
 0x3ed   : > { %v16669_v54 = vcombine.high %v2036_v14, %v2040_v15  ;;  %v16668_v34 = vcombine.low %v2036_v14, %v2040_v15 }
 0x3ee   : > { %12466 = vmatpush1.bf16.msra.mxu0 %v16626_v27  ;;  %13081 = vmatpush1.bf16.msra.mxu1 %v16628_v28  ;;  %v2043_v27 = vld [vmem:[%s17868_s30 + $0x3680] sm:$0xff] }
 0x3ef   : > { %12467 = vmatprep.subr.bf16.mxu0 %v16635_v30  ;;  %13082 = vmatprep.subr.bf16.mxu1 %v16637_v31  ;;  %v2047_v28 = vld [vmem:[%s17868_s30 + $0x36a0] sm:$0xff]  ;;  %v2044_v30 = vld [vmem:[%s17868_s30 + $0x3688] sm:$0xff] }
 0x3f0   : > { %v2048_v31 = vld [vmem:[%s17868_s30 + $0x36a8] sm:$0xff]  ;;  %v16675_v35 = vcombine.high %v2043_v27, %v2047_v28  ;;  %v16674_v43 = vcombine.low %v2043_v27, %v2047_v28 }
 0x3f1   : > { %v16677_v36 = vcombine.high %v2044_v30, %v2048_v31  ;;  %v16676_v44 = vcombine.low %v2044_v30, %v2048_v31 }
 0x3f2   : > { %12468 = vmatpush1.bf16.msra.mxu0 %v16634_v38  ;;  %13083 = vmatpush1.bf16.msra.mxu1 %v16636_v39  ;;  %v2051_v38 = vld [vmem:[%s17868_s30 + $0x36c0] sm:$0xff] }
 0x3f3   : > { %12469 = vmatprep.subr.bf16.mxu0 %v16643_v41  ;;  %13084 = vmatprep.subr.bf16.mxu1 %v16645_v42  ;;  %v2055_v39 = vld [vmem:[%s17868_s30 + $0x36e0] sm:$0xff]  ;;  %v2052_v41 = vld [vmem:[%s17868_s30 + $0x36c8] sm:$0xff] }
 0x3f4   : > { %v2056_v42 = vld [vmem:[%s17868_s30 + $0x36e8] sm:$0xff]  ;;  %v16683_v46 = vcombine.high %v2051_v38, %v2055_v39  ;;  %v16682_v63 = vcombine.low %v2051_v38, %v2055_v39 }
 0x3f5   : > { %v16685_v48 = vcombine.high %v2052_v41, %v2056_v42  ;;  %v16684_v0 = vcombine.low %v2052_v41, %v2056_v42 }
 0x3f6   : > { %12470 = vmatpush1.bf16.msra.mxu0 %v16642_v53  ;;  %13085 = vmatpush1.bf16.msra.mxu1 %v16644_v57  ;;  %v2059_v53 = vld [vmem:[%s17868_s30 + $0x3700] sm:$0xff] }
 0x3f7   : > { %12471 = vmatprep.subr.bf16.mxu0 %v16651_v61  ;;  %13086 = vmatprep.subr.bf16.mxu1 %v16653_v62  ;;  %v2063_v57 = vld [vmem:[%s17868_s30 + $0x3720] sm:$0xff]  ;;  %v2060_v61 = vld [vmem:[%s17868_s30 + $0x3708] sm:$0xff] }
 0x3f8   : > { %v2064_v62 = vld [vmem:[%s17868_s30 + $0x3728] sm:$0xff]  ;;  %v16691_v2 = vcombine.high %v2059_v53, %v2063_v57  ;;  %v16690_v11 = vcombine.low %v2059_v53, %v2063_v57 }
 0x3f9   : > { %v16693_v3 = vcombine.high %v2060_v61, %v2064_v62  ;;  %v16692_v12 = vcombine.low %v2060_v61, %v2064_v62 }
 0x3fa   : > { %12472 = vmatpush1.bf16.msra.mxu0 %v16650_v6  ;;  %13087 = vmatpush1.bf16.msra.mxu1 %v16652_v7  ;;  %v2067_v6 = vld [vmem:[%s17868_s30 + $0x3740] sm:$0xff] }
 0x3fb   : > { %12473 = vmatprep.subr.bf16.mxu0 %v16659_v9  ;;  %13088 = vmatprep.subr.bf16.mxu1 %v16661_v10  ;;  %v2071_v7 = vld [vmem:[%s17868_s30 + $0x3760] sm:$0xff]  ;;  %v2068_v9 = vld [vmem:[%s17868_s30 + $0x3748] sm:$0xff] }
 0x3fc   : > { %v2072_v10 = vld [vmem:[%s17868_s30 + $0x3768] sm:$0xff]  ;;  %v16699_v14 = vcombine.high %v2067_v6, %v2071_v7  ;;  %v16698_v27 = vcombine.low %v2067_v6, %v2071_v7  ;;  %v18994_v7 = vld [vmem:[%s17860_s23 + $0x70] sm:$0xff] }
 0x3fd   : > { %v16701_v15 = vcombine.high %v2068_v9, %v2072_v10  ;;  %v16700_v28 = vcombine.low %v2068_v9, %v2072_v10  ;;  %v2104_v6 = vld [vmem:[%s17868_s30 + $0x3868] sm:$0xff] }
 0x3fe   : > { %12474 = vmatpush1.bf16.msra.mxu0 %v16658_v18  ;;  %13089 = vmatpush1.bf16.msra.mxu1 %v16660_v19  ;;  %v2075_v18 = vld [vmem:[%s17868_s30 + $0x3780] sm:$0xff] }
 0x3ff   : > { %12475 = vmatprep.subr.bf16.mxu0 %v16667_v22  ;;  %13090 = vmatprep.subr.bf16.mxu1 %v16669_v54  ;;  %v2079_v19 = vld [vmem:[%s17868_s30 + $0x37a0] sm:$0xff]  ;;  %v2076_v22 = vld [vmem:[%s17868_s30 + $0x3788] sm:$0xff] }
 0x400   : > { %v2080_v54 = vld [vmem:[%s17868_s30 + $0x37a8] sm:$0xff]  ;;  %v16707_v30 = vcombine.high %v2075_v18, %v2079_v19  ;;  %v16706_v38 = vcombine.low %v2075_v18, %v2079_v19 }
 0x401   : > { %v16709_v31 = vcombine.high %v2076_v22, %v2080_v54  ;;  %v16708_v39 = vcombine.low %v2076_v22, %v2080_v54  ;;  %v2108_v18 = vld [vmem:[%s17868_s30 + $0x3888] sm:$0xff] }
 0x402   : > { %12476 = vmatpush1.bf16.msra.mxu0 %v16666_v33  ;;  %13091 = vmatpush1.bf16.msra.mxu1 %v16668_v34  ;;  %v2083_v33 = vld [vmem:[%s17868_s30 + $0x37c0] sm:$0xff]  ;;  %v2112_v19 = vld [vmem:[%s17868_s30 + $0x38a8] sm:$0xff] }
 0x403   : > { %12477 = vmatprep.subr.bf16.mxu0 %v16675_v35  ;;  %13092 = vmatprep.subr.bf16.mxu1 %v16677_v36  ;;  %v2087_v34 = vld [vmem:[%s17868_s30 + $0x37e0] sm:$0xff]  ;;  %v2084_v35 = vld [vmem:[%s17868_s30 + $0x37c8] sm:$0xff] }
 0x404   : > { %v2088_v36 = vld [vmem:[%s17868_s30 + $0x37e8] sm:$0xff]  ;;  %v16715_v41 = vcombine.high %v2083_v33, %v2087_v34  ;;  %v16714_v53 = vcombine.low %v2083_v33, %v2087_v34 }
 0x405   : > { %v16717_v42 = vcombine.high %v2084_v35, %v2088_v36  ;;  %v16716_v57 = vcombine.low %v2084_v35, %v2088_v36  ;;  %v2116_v33 = vld [vmem:[%s17868_s30 + $0x38c8] sm:$0xff]  ;;  %v16740_v36 = vcombine.low %v2108_v18, %v2112_v19 }
 0x406   : > { %12478 = vmatpush1.bf16.msra.mxu0 %v16674_v43  ;;  %13093 = vmatpush1.bf16.msra.mxu1 %v16676_v44  ;;  %v2091_v43 = vld [vmem:[%s17868_s30 + $0x3800] sm:$0xff]  ;;  %v2120_v34 = vld [vmem:[%s17868_s30 + $0x38e8] sm:$0xff] }
 0x407   : > { %12479 = vmatprep.subr.bf16.mxu0 %v16683_v46  ;;  %13094 = vmatprep.subr.bf16.mxu1 %v16685_v48  ;;  %v2095_v44 = vld [vmem:[%s17868_s30 + $0x3820] sm:$0xff]  ;;  %v2092_v46 = vld [vmem:[%s17868_s30 + $0x3808] sm:$0xff] }
 0x408   : > { %v2096_v48 = vld [vmem:[%s17868_s30 + $0x3828] sm:$0xff]  ;;  %v16723_v61 = vcombine.high %v2091_v43, %v2095_v44  ;;  %v16722_v9 = vcombine.low %v2091_v43, %v2095_v44 }
 0x409   : > { %v16725_v62 = vcombine.high %v2092_v46, %v2096_v48  ;;  %v16724_v10 = vcombine.low %v2092_v46, %v2096_v48  ;;  %v2124_v43 = vld [vmem:[%s17868_s30 + $0x3908] sm:$0xff]  ;;  %v16748_v48 = vcombine.low %v2116_v33, %v2120_v34 }
 0x40a   : > { %12480 = vmatpush1.bf16.msra.mxu0 %v16682_v63  ;;  %13095 = vmatpush1.bf16.msra.mxu1 %v16684_v0  ;;  %v2099_v63 = vld [vmem:[%s17868_s30 + $0x3840] sm:$0xff]  ;;  %v2128_v44 = vld [vmem:[%s17868_s30 + $0x3928] sm:$0xff] }
 0x40b   : > { %12481 = vmatprep.subr.bf16.mxu0 %v16691_v2  ;;  %13096 = vmatprep.subr.bf16.mxu1 %v16693_v3  ;;  %v2103_v0 = vld [vmem:[%s17868_s30 + $0x3860] sm:$0xff]  ;;  %v18989_v2 = vcombine.low %v18915_v32, %v18915_v32  ;;  %v2100_v3 = vld [vmem:[%s17868_s30 + $0x3848] sm:$0xff]  ;;  %v19000_v32 = vcombine.high %v18994_v7, %v18994_v7 }
 0x40c   : > { %v16730_v22 = vcombine.low %v2099_v63, %v2103_v0  ;;  %v16732_v54 = vcombine.low %v2100_v3, %v2104_v6 }
 0x40e   : > { %12482 = vmatpush1.bf16.msra.mxu0 %v16690_v11  ;;  %13097 = vmatpush1.bf16.msra.mxu1 %v16692_v12  ;;  %v16731_v11 = vcombine.high %v2099_v63, %v2103_v0  ;;  %v16733_v12 = vcombine.high %v2100_v3, %v2104_v6  ;;  %v2132_v63 = vld [vmem:[%s17868_s30 + $0x3948] sm:$0xff]  ;;  %v16756_v6 = vcombine.low %v2124_v43, %v2128_v44 }
 0x40f   : > { %12483 = vmatprep.subr.bf16.mxu0 %v16699_v14  ;;  %13098 = vmatprep.subr.bf16.mxu1 %v16701_v15  ;;  %v2107_v14 = vld [vmem:[%s17868_s30 + $0x3880] sm:$0xff]  ;;  %v2136_v0 = vld [vmem:[%s17868_s30 + $0x3968] sm:$0xff] }
 0x410   : > { %v2111_v15 = vld [vmem:[%s17868_s30 + $0x38a0] sm:$0xff] }
 0x411   : > { %v16738_v35 = vcombine.low %v2107_v14, %v2111_v15 }
 0x412   : > { %12484 = vmatpush1.bf16.msra.mxu0 %v16698_v27  ;;  %13099 = vmatpush1.bf16.msra.mxu1 %v16700_v28  ;;  %v16739_v27 = vcombine.high %v2107_v14, %v2111_v15  ;;  %v16741_v28 = vcombine.high %v2108_v18, %v2112_v19  ;;  %v2140_v14 = vld [vmem:[%s17868_s30 + $0x3988] sm:$0xff]  ;;  %v16764_v19 = vcombine.low %v2132_v63, %v2136_v0 }
 0x413   : > { %12485 = vmatprep.subr.bf16.mxu0 %v16707_v30  ;;  %13100 = vmatprep.subr.bf16.mxu1 %v16709_v31  ;;  %v2115_v30 = vld [vmem:[%s17868_s30 + $0x38c0] sm:$0xff]  ;;  %v2144_v15 = vld [vmem:[%s17868_s30 + $0x39a8] sm:$0xff] }
 0x414   : > { %v2119_v31 = vld [vmem:[%s17868_s30 + $0x38e0] sm:$0xff] }
 0x415   : > { %v16746_v46 = vcombine.low %v2115_v30, %v2119_v31 }
 0x416   : > { %12486 = vmatpush1.bf16.msra.mxu0 %v16706_v38  ;;  %13101 = vmatpush1.bf16.msra.mxu1 %v16708_v39  ;;  %v16747_v38 = vcombine.high %v2115_v30, %v2119_v31  ;;  %v16749_v39 = vcombine.high %v2116_v33, %v2120_v34  ;;  %v2148_v30 = vld [vmem:[%s17868_s30 + $0x39c8] sm:$0xff]  ;;  %v16772_v34 = vcombine.low %v2140_v14, %v2144_v15 }
 0x417   : > { %12487 = vmatprep.subr.bf16.mxu0 %v16715_v41  ;;  %13102 = vmatprep.subr.bf16.mxu1 %v16717_v42  ;;  %v2123_v41 = vld [vmem:[%s17868_s30 + $0x3900] sm:$0xff]  ;;  %v2152_v31 = vld [vmem:[%s17868_s30 + $0x39e8] sm:$0xff] }
 0x418   : > { %v2127_v42 = vld [vmem:[%s17868_s30 + $0x3920] sm:$0xff] }
 0x419   : > { %v16754_v3 = vcombine.low %v2123_v41, %v2127_v42 }
 0x41a   : > { %12488 = vmatpush1.bf16.msra.mxu0 %v16714_v53  ;;  %13103 = vmatpush1.bf16.msra.mxu1 %v16716_v57  ;;  %v16755_v53 = vcombine.high %v2123_v41, %v2127_v42  ;;  %v16757_v57 = vcombine.high %v2124_v43, %v2128_v44  ;;  %v2156_v41 = vld [vmem:[%s17868_s30 + $0x3a08] sm:$0xff]  ;;  %v16780_v44 = vcombine.low %v2148_v30, %v2152_v31 }
 0x41b   : > { %12498 = vmatprep.subr.bf16.mxu0 %v16723_v61  ;;  %13113 = vmatprep.subr.bf16.mxu1 %v16725_v62  ;;  %v2131_v61 = vld [vmem:[%s17868_s30 + $0x3940] sm:$0xff]  ;;  %v2160_v42 = vld [vmem:[%s17868_s30 + $0x3a28] sm:$0xff] }
 0x41c   : > { %v2135_v62 = vld [vmem:[%s17868_s30 + $0x3960] sm:$0xff] }
 0x41d   : > { %12490 = vmatmul.mubr.bf16.vlgmr.msra.gmra.mrb[0].mxu0 %v18989_v2  ;;  %13105 = vmatmul.mubr.bf16.vlgmr.msra.gmra.mrb[0].mxu1 %v18989_v2  ;;  %v16762_v18 = vcombine.low %v2131_v61, %v2135_v62 }
 0x41e   : > { %12499 = vmatpush1.bf16.msra.mxu0 %v16722_v9  ;;  %13114 = vmatpush1.bf16.msra.mxu1 %v16724_v10  ;;  %v16763_v9 = vcombine.high %v2131_v61, %v2135_v62  ;;  %v16765_v10 = vcombine.high %v2132_v63, %v2136_v0  ;;  %v2164_v61 = vld [vmem:[%s17868_s30 + $0x3a48] sm:$0xff]  ;;  %v16788_v0 = vcombine.low %v2156_v41, %v2160_v42 }
 0x41f   : > { %12500 = vmatprep.subr.bf16.mxu0 %v16731_v11  ;;  %13115 = vmatprep.subr.bf16.mxu1 %v16733_v12  ;;  %v2139_v11 = vld [vmem:[%s17868_s30 + $0x3980] sm:$0xff]  ;;  %v2168_v62 = vld [vmem:[%s17868_s30 + $0x3a68] sm:$0xff] }
 0x420   : > { %12530 = vmatprep.mubr.bf16.mxu0 %v19000_v32  ;;  %13145 = vmatprep.mubr.bf16.mxu1 %v19000_v32  ;;  %v2143_v12 = vld [vmem:[%s17868_s30 + $0x39a0] sm:$0xff] }
 0x421   : > { %v16770_v33 = vcombine.low %v2139_v11, %v2143_v12 }
 0x422   : > { %12501 = vmatpush1.bf16.msra.mxu0 %v16730_v22  ;;  %13116 = vmatpush1.bf16.msra.mxu1 %v16732_v54  ;;  %v16771_v22 = vcombine.high %v2139_v11, %v2143_v12  ;;  %v16773_v54 = vcombine.high %v2140_v14, %v2144_v15  ;;  %v2172_v11 = vld [vmem:[%s17868_s30 + $0x3a88] sm:$0xff]  ;;  %v16796_v15 = vcombine.low %v2164_v61, %v2168_v62 }
 0x423   : > { %12502 = vmatprep.subr.bf16.mxu0 %v16739_v27  ;;  %13117 = vmatprep.subr.bf16.mxu1 %v16741_v28  ;;  %v2147_v27 = vld [vmem:[%s17868_s30 + $0x39c0] sm:$0xff]  ;;  %v2176_v12 = vld [vmem:[%s17868_s30 + $0x3aa8] sm:$0xff] }
 0x424   : > { %v2151_v28 = vld [vmem:[%s17868_s30 + $0x39e0] sm:$0xff] }
 0x425   : > { %v16778_v43 = vcombine.low %v2147_v27, %v2151_v28 }
 0x426   : > { %12503 = vmatpush1.bf16.msra.mxu0 %v16738_v35  ;;  %13118 = vmatpush1.bf16.msra.mxu1 %v16740_v36  ;;  %v16779_v35 = vcombine.high %v2147_v27, %v2151_v28  ;;  %v16781_v36 = vcombine.high %v2148_v30, %v2152_v31  ;;  %v2180_v27 = vld [vmem:[%s17868_s30 + $0x3ac8] sm:$0xff]  ;;  %v16804_v31 = vcombine.low %v2172_v11, %v2176_v12 }
 0x427   : > { %12504 = vmatprep.subr.bf16.mxu0 %v16747_v38  ;;  %13119 = vmatprep.subr.bf16.mxu1 %v16749_v39  ;;  %v2155_v38 = vld [vmem:[%s17868_s30 + $0x3a00] sm:$0xff]  ;;  %v2184_v28 = vld [vmem:[%s17868_s30 + $0x3ae8] sm:$0xff] }
 0x428   : > { %v2159_v39 = vld [vmem:[%s17868_s30 + $0x3a20] sm:$0xff] }
 0x429   : > { %v16786_v63 = vcombine.low %v2155_v38, %v2159_v39 }
 0x42a   : > { %12505 = vmatpush1.bf16.msra.mxu0 %v16746_v46  ;;  %13120 = vmatpush1.bf16.msra.mxu1 %v16748_v48  ;;  %v16787_v46 = vcombine.high %v2155_v38, %v2159_v39  ;;  %v16789_v48 = vcombine.high %v2156_v41, %v2160_v42  ;;  %v2188_v38 = vld [vmem:[%s17868_s30 + $0x3b08] sm:$0xff]  ;;  %v16812_v42 = vcombine.low %v2180_v27, %v2184_v28 }
 0x42b   : > { %12506 = vmatprep.subr.bf16.mxu0 %v16755_v53  ;;  %13121 = vmatprep.subr.bf16.mxu1 %v16757_v57  ;;  %v2163_v53 = vld [vmem:[%s17868_s30 + $0x3a40] sm:$0xff]  ;;  %v2192_v39 = vld [vmem:[%s17868_s30 + $0x3b28] sm:$0xff] }
 0x42c   : > { %v2167_v57 = vld [vmem:[%s17868_s30 + $0x3a60] sm:$0xff] }
 0x42d   : > { %v16794_v14 = vcombine.low %v2163_v53, %v2167_v57 }
 0x42e   : > { %12507 = vmatpush1.bf16.msra.mxu0 %v16754_v3  ;;  %13122 = vmatpush1.bf16.msra.mxu1 %v16756_v6  ;;  %v16795_v3 = vcombine.high %v2163_v53, %v2167_v57  ;;  %v16797_v6 = vcombine.high %v2164_v61, %v2168_v62  ;;  %v2196_v53 = vld [vmem:[%s17868_s30 + $0x3b48] sm:$0xff]  ;;  %v16820_v62 = vcombine.low %v2188_v38, %v2192_v39 }
 0x42f   : > { %12508 = vmatprep.subr.bf16.mxu0 %v16763_v9  ;;  %13123 = vmatprep.subr.bf16.mxu1 %v16765_v10  ;;  %v2171_v9 = vld [vmem:[%s17868_s30 + $0x3a80] sm:$0xff]  ;;  %v2200_v57 = vld [vmem:[%s17868_s30 + $0x3b68] sm:$0xff] }
 0x430   : > { %v2175_v10 = vld [vmem:[%s17868_s30 + $0x3aa0] sm:$0xff] }
 0x431   : > { %v16802_v30 = vcombine.low %v2171_v9, %v2175_v10 }
 0x432   : > { %12509 = vmatpush1.bf16.msra.mxu0 %v16762_v18  ;;  %13124 = vmatpush1.bf16.msra.mxu1 %v16764_v19  ;;  %v16803_v18 = vcombine.high %v2171_v9, %v2175_v10  ;;  %v16805_v19 = vcombine.high %v2172_v11, %v2176_v12  ;;  %v2204_v9 = vld [vmem:[%s17868_s30 + $0x3b88] sm:$0xff]  ;;  %v16828_v12 = vcombine.low %v2196_v53, %v2200_v57 }
 0x433   : > { %12510 = vmatprep.subr.bf16.mxu0 %v16771_v22  ;;  %13125 = vmatprep.subr.bf16.mxu1 %v16773_v54  ;;  %v2179_v22 = vld [vmem:[%s17868_s30 + $0x3ac0] sm:$0xff]  ;;  %v2208_v10 = vld [vmem:[%s17868_s30 + $0x3ba8] sm:$0xff] }
 0x434   : > { %v2183_v54 = vld [vmem:[%s17868_s30 + $0x3ae0] sm:$0xff] }
 0x435   : > { %v16810_v41 = vcombine.low %v2179_v22, %v2183_v54 }
 0x436   : > { %12511 = vmatpush1.bf16.msra.mxu0 %v16770_v33  ;;  %13126 = vmatpush1.bf16.msra.mxu1 %v16772_v34  ;;  %v16811_v33 = vcombine.high %v2179_v22, %v2183_v54  ;;  %v16813_v34 = vcombine.high %v2180_v27, %v2184_v28  ;;  %v2212_v22 = vld [vmem:[%s17868_s30 + $0x3bc8] sm:$0xff]  ;;  %v16836_v28 = vcombine.low %v2204_v9, %v2208_v10 }
 0x437   : > { %12512 = vmatprep.subr.bf16.mxu0 %v16779_v35  ;;  %13127 = vmatprep.subr.bf16.mxu1 %v16781_v36  ;;  %v2187_v35 = vld [vmem:[%s17868_s30 + $0x3b00] sm:$0xff]  ;;  %v2216_v54 = vld [vmem:[%s17868_s30 + $0x3be8] sm:$0xff] }
 0x438   : > { %v2191_v36 = vld [vmem:[%s17868_s30 + $0x3b20] sm:$0xff] }
 0x439   : > { %v16818_v61 = vcombine.low %v2187_v35, %v2191_v36 }
 0x43a   : > { %12513 = vmatpush1.bf16.msra.mxu0 %v16778_v43  ;;  %13128 = vmatpush1.bf16.msra.mxu1 %v16780_v44  ;;  %v16819_v43 = vcombine.high %v2187_v35, %v2191_v36  ;;  %v16821_v44 = vcombine.high %v2188_v38, %v2192_v39  ;;  %v302_v35 = vld [vmem:[%s17868_s30 + $0x18] sm:$0xff]  ;;  %v16844_v39 = vcombine.low %v2212_v22, %v2216_v54 }
 0x43b   : > { %12514 = vmatprep.subr.bf16.mxu0 %v16787_v46  ;;  %13129 = vmatprep.subr.bf16.mxu1 %v16789_v48  ;;  %v2195_v46 = vld [vmem:[%s17868_s30 + $0x3b40] sm:$0xff]  ;;  %v306_v36 = vld [vmem:[%s17868_s30 + $0x38] sm:$0xff] }
 0x43c   : > { %v2199_v48 = vld [vmem:[%s17868_s30 + $0x3b60] sm:$0xff] }
 0x43d   : > { %v16826_v11 = vcombine.low %v2195_v46, %v2199_v48 }
 0x43e   : > { %12515 = vmatpush1.bf16.msra.mxu0 %v16786_v63  ;;  %13130 = vmatpush1.bf16.msra.mxu1 %v16788_v0  ;;  %v16827_v63 = vcombine.high %v2195_v46, %v2199_v48  ;;  %v16829_v0 = vcombine.high %v2196_v53, %v2200_v57  ;;  %v19068_v46 = vcombine.low %v18994_v7, %v18994_v7  ;;  %v310_v48 = vld [vmem:[%s17868_s30 + $0x58] sm:$0xff] }
 0x43f   : > { %12516 = vmatprep.subr.bf16.mxu0 %v16795_v3  ;;  %13131 = vmatprep.subr.bf16.mxu1 %v16797_v6  ;;  %v2203_v3 = vld [vmem:[%s17868_s30 + $0x3b80] sm:$0xff]  ;;  %v314_v53 = vld [vmem:[%s17868_s30 + $0x78] sm:$0xff] }
 0x440   : > { %v2207_v6 = vld [vmem:[%s17868_s30 + $0x3ba0] sm:$0xff]  ;;  %v318_v7 = vld [vmem:[%s17868_s30 + $0x98] sm:$0xff] }
 0x441   : > { %v16834_v27 = vcombine.low %v2203_v3, %v2207_v6 }
 0x442   : > { %12517 = vmatpush1.bf16.msra.mxu0 %v16794_v14  ;;  %13132 = vmatpush1.bf16.msra.mxu1 %v16796_v15  ;;  %v16835_v14 = vcombine.high %v2203_v3, %v2207_v6  ;;  %v16837_v15 = vcombine.high %v2204_v9, %v2208_v10  ;;  %v321_v3 = vld [vmem:[%s17868_s30 + $0xb0] sm:$0xff]  ;;  %v322_v6 = vld [vmem:[%s17868_s30 + $0xb8] sm:$0xff]  ;;  %v14944_v10 = vcombine.low %v310_v48, %v314_v53 }
 0x443   : > { %12518 = vmatprep.subr.bf16.mxu0 %v16803_v18  ;;  %13133 = vmatprep.subr.bf16.mxu1 %v16805_v19  ;;  %v2211_v18 = vld [vmem:[%s17868_s30 + $0x3bc0] sm:$0xff] }
 0x444   : > { %v2215_v19 = vld [vmem:[%s17868_s30 + $0x3be0] sm:$0xff] }
 0x445   : > { %v16842_v38 = vcombine.low %v2211_v18, %v2215_v19 }
 0x446   : > { %12519 = vmatpush1.bf16.msra.mxu0 %v16802_v30  ;;  %13134 = vmatpush1.bf16.msra.mxu1 %v16804_v31  ;;  %v16843_v30 = vcombine.high %v2211_v18, %v2215_v19  ;;  %v16845_v31 = vcombine.high %v2212_v22, %v2216_v54  ;;  %v326_v18 = vld [vmem:[%s17868_s30 + $0xd8] sm:$0xff]  ;;  %v14952_v54 = vcombine.low %v318_v7, %v322_v6 }
 0x447   : > { %12520 = vmatprep.subr.bf16.mxu0 %v16811_v33  ;;  %13135 = vmatprep.subr.bf16.mxu1 %v16813_v34  ;;  %v301_v33 = vld [vmem:[%s17868_s30 + $0x10] sm:$0xff]  ;;  %v330_v19 = vld [vmem:[%s17868_s30 + $0xf8] sm:$0xff] }
 0x448   : > { %v305_v34 = vld [vmem:[%s17868_s30 + $0x30] sm:$0xff] }
 0x449   : > { %v14934_v57 = vcombine.low %v301_v33, %v305_v34 }
 0x44a   : > { %12521 = vmatpush1.bf16.msra.mxu0 %v16810_v41  ;;  %13136 = vmatpush1.bf16.msra.mxu1 %v16812_v42  ;;  %v14935_v41 = vcombine.high %v301_v33, %v305_v34  ;;  %v14937_v42 = vcombine.high %v302_v35, %v306_v36  ;;  %v334_v33 = vld [vmem:[%s17868_s30 + $0x118] sm:$0xff] }
 0x44b   : > { %12522 = vmatprep.subr.bf16.mxu0 %v16819_v43  ;;  %13137 = vmatprep.subr.bf16.mxu1 %v16821_v44  ;;  %v309_v43 = vld [vmem:[%s17868_s30 + $0x50] sm:$0xff]  ;;  %v338_v34 = vld [vmem:[%s17868_s30 + $0x138] sm:$0xff] }
 0x44c   : > { %v313_v44 = vld [vmem:[%s17868_s30 + $0x70] sm:$0xff] }
 0x44d   : > { %v14942_v9 = vcombine.low %v309_v43, %v313_v44 }
 0x44e   : > { %12523 = vmatpush1.bf16.msra.mxu0 %v16818_v61  ;;  %13138 = vmatpush1.bf16.msra.mxu1 %v16820_v62  ;;  %v14936_v61 = vcombine.low %v302_v35, %v306_v36  ;;  %v14943_v62 = vcombine.high %v309_v43, %v313_v44  ;;  %v346_v43 = vld [vmem:[%s17868_s30 + $0x178] sm:$0xff] }
 0x44f   : > { %12524 = vmatprep.subr.bf16.mxu0 %v16827_v63  ;;  %13139 = vmatprep.subr.bf16.mxu1 %v16829_v0  ;;  %v14945_v63 = vcombine.high %v310_v48, %v314_v53  ;;  %v317_v0 = vld [vmem:[%s17868_s30 + $0x90] sm:$0xff]  ;;  %v14968_v48 = vcombine.low %v334_v33, %v338_v34 }
 0x450   : > { %v14950_v22 = vcombine.low %v317_v0, %v321_v3 }
 0x452   : > { %12525 = vmatpush1.bf16.msra.mxu0 %v16826_v11  ;;  %13140 = vmatpush1.bf16.msra.mxu1 %v16828_v12  ;;  %v14951_v11 = vcombine.high %v317_v0, %v321_v3  ;;  %v14953_v12 = vcombine.high %v318_v7, %v322_v6  ;;  %v354_v0 = vld [vmem:[%s17868_s30 + $0x1b8] sm:$0xff] }
 0x453   : > { %12526 = vmatprep.subr.bf16.mxu0 %v16835_v14  ;;  %13141 = vmatprep.subr.bf16.mxu1 %v16837_v15  ;;  %v325_v14 = vld [vmem:[%s17868_s30 + $0xd0] sm:$0xff] }
 0x454   : > { %v329_v15 = vld [vmem:[%s17868_s30 + $0xf0] sm:$0xff] }
 0x455   : > { %v14958_v35 = vcombine.low %v325_v14, %v329_v15 }
 0x456   : > { %12527 = vmatpush1.bf16.msra.mxu0 %v16834_v27  ;;  %13142 = vmatpush1.bf16.msra.mxu1 %v16836_v28  ;;  %v14959_v27 = vcombine.high %v325_v14, %v329_v15  ;;  %v14961_v28 = vcombine.high %v326_v18, %v330_v19  ;;  %v362_v14 = vld [vmem:[%s17868_s30 + $0x1f8] sm:$0xff] }
 0x457   : > { %12528 = vmatprep.subr.bf16.mxu0 %v16843_v30  ;;  %13143 = vmatprep.subr.bf16.mxu1 %v16845_v31  ;;  %v333_v30 = vld [vmem:[%s17868_s30 + $0x110] sm:$0xff] }
 0x458   : > { %v337_v31 = vld [vmem:[%s17868_s30 + $0x130] sm:$0xff] }
 0x459   : > { %v14967_v36 = vcombine.high %v333_v30, %v337_v31  ;;  %v14966_v44 = vcombine.low %v333_v30, %v337_v31  ;;  %v370_v30 = vld [vmem:[%s17868_s30 + $0x238] sm:$0xff] }
 0x45a   : > { %12529 = vmatpush1.bf16.msra.mxu0 %v16842_v38  ;;  %13144 = vmatpush1.bf16.msra.mxu1 %v16844_v39  ;;  %v14969_v38 = vcombine.high %v334_v33, %v338_v34  ;;  %v341_v39 = vld [vmem:[%s17868_s30 + $0x150] sm:$0xff] }
 0x45b   : > { %13154 = vmatprep.subr.bf16.mxu0 %v14935_v41  ;;  %13769 = vmatprep.subr.bf16.mxu1 %v14937_v42  ;;  %v345_v41 = vld [vmem:[%s17868_s30 + $0x170] sm:$0xff]  ;;  %v342_v42 = vld [vmem:[%s17868_s30 + $0x158] sm:$0xff] }
 0x45c   : > { %v14975_v53 = vcombine.high %v341_v39, %v345_v41  ;;  %v14974_v3 = vcombine.low %v341_v39, %v345_v41  ;;  %v14976_v7 = vcombine.low %v342_v42, %v346_v43  ;;  %v378_v39 = vld [vmem:[%s17868_s30 + $0x278] sm:$0xff] }
 0x45d   : > { %12531 = vmatmul.mubr.bf16.vlgmr.msra.gmra.mrb[0].mxu0 %v19068_v46  ;;  %13146 = vmatmul.mubr.bf16.vlgmr.msra.gmra.mrb[0].mxu1 %v19068_v46 }
 0x45e   : > { %13155 = vmatpush1.bf16.msra.mxu0 %v14934_v57  ;;  %13770 = vmatpush1.bf16.msra.mxu1 %v14936_v61  ;;  %v14977_v57 = vcombine.high %v342_v42, %v346_v43  ;;  %v349_v61 = vld [vmem:[%s17868_s30 + $0x190] sm:$0xff] }
 0x45f   : > { %13156 = vmatprep.subr.bf16.mxu0 %v14943_v62  ;;  %13771 = vmatprep.subr.bf16.mxu1 %v14945_v63  ;;  %v353_v62 = vld [vmem:[%s17868_s30 + $0x1b0] sm:$0xff]  ;;  %v350_v63 = vld [vmem:[%s17868_s30 + $0x198] sm:$0xff] }
 0x460   : > { %13186 = vmatprep.mubr.bf16.mxu0 %v17916_v58  ;;  %13801 = vmatprep.mubr.bf16.mxu1 %v17916_v58  ;;  %v14960_v58 = vcombine.low %v326_v18, %v330_v19  ;;  %v14983_v6 = vcombine.high %v349_v61, %v353_v62  ;;  %v14982_v15 = vcombine.low %v349_v61, %v353_v62  ;;  %v386_v61 = vld [vmem:[%s17868_s30 + $0x2b8] sm:$0xff] }
 0x461   : > { %v14984_v18 = vcombine.low %v350_v63, %v354_v0 }
 0x462   : > { %13157 = vmatpush1.bf16.msra.mxu0 %v14942_v9  ;;  %13772 = vmatpush1.bf16.msra.mxu1 %v14944_v10  ;;  %v14985_v9 = vcombine.high %v350_v63, %v354_v0  ;;  %v357_v10 = vld [vmem:[%s17868_s30 + $0x1d0] sm:$0xff] }
 0x463   : > { %13158 = vmatprep.subr.bf16.mxu0 %v14951_v11  ;;  %13773 = vmatprep.subr.bf16.mxu1 %v14953_v12  ;;  %v361_v11 = vld [vmem:[%s17868_s30 + $0x1f0] sm:$0xff]  ;;  %v358_v12 = vld [vmem:[%s17868_s30 + $0x1d8] sm:$0xff] }
 0x464   : > { %v14991_v19 = vcombine.high %v357_v10, %v361_v11  ;;  %v14990_v31 = vcombine.low %v357_v10, %v361_v11  ;;  %v14992_v33 = vcombine.low %v358_v12, %v362_v14  ;;  %v394_v10 = vld [vmem:[%s17868_s30 + $0x2f8] sm:$0xff] }
 0x466   : > { %13159 = vmatpush1.bf16.msra.mxu0 %v14950_v22  ;;  %13774 = vmatpush1.bf16.msra.mxu1 %v14952_v54  ;;  %v14993_v22 = vcombine.high %v358_v12, %v362_v14  ;;  %v365_v54 = vld [vmem:[%s17868_s30 + $0x210] sm:$0xff] }
 0x467   : > { %13160 = vmatprep.subr.bf16.mxu0 %v14959_v27  ;;  %13775 = vmatprep.subr.bf16.mxu1 %v14961_v28  ;;  %v369_v27 = vld [vmem:[%s17868_s30 + $0x230] sm:$0xff]  ;;  %v366_v28 = vld [vmem:[%s17868_s30 + $0x218] sm:$0xff] }
 0x468   : > { %v14999_v34 = vcombine.high %v365_v54, %v369_v27  ;;  %v14998_v41 = vcombine.low %v365_v54, %v369_v27  ;;  %v15000_v42 = vcombine.low %v366_v28, %v370_v30  ;;  %v402_v54 = vld [vmem:[%s17868_s30 + $0x338] sm:$0xff] }
 0x46a   : > { %13161 = vmatpush1.bf16.msra.mxu0 %v14958_v35  ;;  %13776 = vmatpush1.bf16.msra.mxu1 %v14960_v58  ;;  %v15001_v35 = vcombine.high %v366_v28, %v370_v30  ;;  %v373_v58 = vld [vmem:[%s17868_s30 + $0x250] sm:$0xff] }
 0x46b   : > { %13162 = vmatprep.subr.bf16.mxu0 %v14967_v36  ;;  %13777 = vmatprep.subr.bf16.mxu1 %v14969_v38  ;;  %v377_v36 = vld [vmem:[%s17868_s30 + $0x270] sm:$0xff]  ;;  %v374_v38 = vld [vmem:[%s17868_s30 + $0x258] sm:$0xff] }
 0x46c   : > { %v15007_v43 = vcombine.high %v373_v58, %v377_v36  ;;  %v15006_v62 = vcombine.low %v373_v58, %v377_v36  ;;  %v15008_v63 = vcombine.low %v374_v38, %v378_v39  ;;  %v410_v58 = vld [vmem:[%s17868_s30 + $0x378] sm:$0xff] }
 0x46e   : > { %13163 = vmatpush1.bf16.msra.mxu0 %v14966_v44  ;;  %13778 = vmatpush1.bf16.msra.mxu1 %v14968_v48  ;;  %v15009_v44 = vcombine.high %v374_v38, %v378_v39  ;;  %v381_v48 = vld [vmem:[%s17868_s30 + $0x290] sm:$0xff] }
 0x46f   : > { %13164 = vmatprep.subr.bf16.mxu0 %v14975_v53  ;;  %13779 = vmatprep.subr.bf16.mxu1 %v14977_v57  ;;  %v385_v53 = vld [vmem:[%s17868_s30 + $0x2b0] sm:$0xff]  ;;  %v382_v57 = vld [vmem:[%s17868_s30 + $0x298] sm:$0xff] }
 0x470   : > { %v15015_v0 = vcombine.high %v381_v48, %v385_v53  ;;  %v15014_v11 = vcombine.low %v381_v48, %v385_v53  ;;  %v15016_v12 = vcombine.low %v382_v57, %v386_v61  ;;  %v418_v48 = vld [vmem:[%s17868_s30 + $0x3b8] sm:$0xff] }
 0x472   : > { %13165 = vmatpush1.bf16.msra.mxu0 %v14974_v3  ;;  %13780 = vmatpush1.bf16.msra.mxu1 %v14976_v7  ;;  %v15017_v3 = vcombine.high %v382_v57, %v386_v61  ;;  %v389_v7 = vld [vmem:[%s17868_s30 + $0x2d0] sm:$0xff] }
 0x473   : > { %13166 = vmatprep.subr.bf16.mxu0 %v14983_v6  ;;  %13781 = vmatprep.subr.bf16.mxu1 %v14985_v9  ;;  %v393_v6 = vld [vmem:[%s17868_s30 + $0x2f0] sm:$0xff]  ;;  %v390_v9 = vld [vmem:[%s17868_s30 + $0x2d8] sm:$0xff] }
 0x474   : > { %v15023_v14 = vcombine.high %v389_v7, %v393_v6  ;;  %v15022_v27 = vcombine.low %v389_v7, %v393_v6  ;;  %v15024_v28 = vcombine.low %v390_v9, %v394_v10  ;;  %v426_v7 = vld [vmem:[%s17868_s30 + $0x3f8] sm:$0xff] }
 0x476   : > { %13167 = vmatpush1.bf16.msra.mxu0 %v14982_v15  ;;  %13782 = vmatpush1.bf16.msra.mxu1 %v14984_v18  ;;  %v15025_v15 = vcombine.high %v390_v9, %v394_v10  ;;  %v397_v18 = vld [vmem:[%s17868_s30 + $0x310] sm:$0xff] }
 0x477   : > { %13168 = vmatprep.subr.bf16.mxu0 %v14991_v19  ;;  %13783 = vmatprep.subr.bf16.mxu1 %v14993_v22  ;;  %v401_v19 = vld [vmem:[%s17868_s30 + $0x330] sm:$0xff]  ;;  %v398_v22 = vld [vmem:[%s17868_s30 + $0x318] sm:$0xff] }
 0x478   : > { %v15031_v30 = vcombine.high %v397_v18, %v401_v19  ;;  %v15030_v36 = vcombine.low %v397_v18, %v401_v19  ;;  %v15032_v38 = vcombine.low %v398_v22, %v402_v54  ;;  %v434_v18 = vld [vmem:[%s17868_s30 + $0x438] sm:$0xff] }
 0x47a   : > { %13169 = vmatpush1.bf16.msra.mxu0 %v14990_v31  ;;  %13784 = vmatpush1.bf16.msra.mxu1 %v14992_v33  ;;  %v15033_v31 = vcombine.high %v398_v22, %v402_v54  ;;  %v405_v33 = vld [vmem:[%s17868_s30 + $0x350] sm:$0xff] }
 0x47b   : > { %13170 = vmatprep.subr.bf16.mxu0 %v14999_v34  ;;  %13785 = vmatprep.subr.bf16.mxu1 %v15001_v35  ;;  %v409_v34 = vld [vmem:[%s17868_s30 + $0x370] sm:$0xff]  ;;  %v406_v35 = vld [vmem:[%s17868_s30 + $0x358] sm:$0xff] }
 0x47c   : > { %v15039_v39 = vcombine.high %v405_v33, %v409_v34  ;;  %v15038_v53 = vcombine.low %v405_v33, %v409_v34  ;;  %v15040_v57 = vcombine.low %v406_v35, %v410_v58  ;;  %v442_v33 = vld [vmem:[%s17868_s30 + $0x478] sm:$0xff] }
 0x47e   : > { %13171 = vmatpush1.bf16.msra.mxu0 %v14998_v41  ;;  %13786 = vmatpush1.bf16.msra.mxu1 %v15000_v42  ;;  %v15041_v41 = vcombine.high %v406_v35, %v410_v58  ;;  %v413_v42 = vld [vmem:[%s17868_s30 + $0x390] sm:$0xff] }
 0x47f   : > { %13172 = vmatprep.subr.bf16.mxu0 %v15007_v43  ;;  %13787 = vmatprep.subr.bf16.mxu1 %v15009_v44  ;;  %v417_v43 = vld [vmem:[%s17868_s30 + $0x3b0] sm:$0xff]  ;;  %v414_v44 = vld [vmem:[%s17868_s30 + $0x398] sm:$0xff] }
 0x480   : > { %v15047_v61 = vcombine.high %v413_v42, %v417_v43  ;;  %v15046_v6 = vcombine.low %v413_v42, %v417_v43  ;;  %v15048_v9 = vcombine.low %v414_v44, %v418_v48  ;;  %v450_v42 = vld [vmem:[%s17868_s30 + $0x4b8] sm:$0xff] }
 0x482   : > { %13173 = vmatpush1.bf16.msra.mxu0 %v15006_v62  ;;  %13788 = vmatpush1.bf16.msra.mxu1 %v15008_v63  ;;  %v15049_v62 = vcombine.high %v414_v44, %v418_v48  ;;  %v421_v63 = vld [vmem:[%s17868_s30 + $0x3d0] sm:$0xff] }
 0x483   : > { %13174 = vmatprep.subr.bf16.mxu0 %v15015_v0  ;;  %13789 = vmatprep.subr.bf16.mxu1 %v15017_v3  ;;  %v425_v0 = vld [vmem:[%s17868_s30 + $0x3f0] sm:$0xff]  ;;  %v422_v3 = vld [vmem:[%s17868_s30 + $0x3d8] sm:$0xff] }
 0x484   : > { %v15055_v10 = vcombine.high %v421_v63, %v425_v0  ;;  %v15054_v19 = vcombine.low %v421_v63, %v425_v0  ;;  %v15056_v22 = vcombine.low %v422_v3, %v426_v7  ;;  %v458_v63 = vld [vmem:[%s17868_s30 + $0x4f8] sm:$0xff] }
 0x486   : > { %13175 = vmatpush1.bf16.msra.mxu0 %v15014_v11  ;;  %13790 = vmatpush1.bf16.msra.mxu1 %v15016_v12  ;;  %v15057_v11 = vcombine.high %v422_v3, %v426_v7  ;;  %v429_v12 = vld [vmem:[%s17868_s30 + $0x410] sm:$0xff] }
 0x487   : > { %13176 = vmatprep.subr.bf16.mxu0 %v15023_v14  ;;  %13791 = vmatprep.subr.bf16.mxu1 %v15025_v15  ;;  %v433_v14 = vld [vmem:[%s17868_s30 + $0x430] sm:$0xff]  ;;  %v430_v15 = vld [vmem:[%s17868_s30 + $0x418] sm:$0xff] }
 0x488   : > { %v15063_v54 = vcombine.high %v429_v12, %v433_v14  ;;  %v15062_v34 = vcombine.low %v429_v12, %v433_v14  ;;  %v15064_v35 = vcombine.low %v430_v15, %v434_v18 }
 0x48a   : > { %13177 = vmatpush1.bf16.msra.mxu0 %v15022_v27  ;;  %13792 = vmatpush1.bf16.msra.mxu1 %v15024_v28  ;;  %v15065_v27 = vcombine.high %v430_v15, %v434_v18  ;;  %v437_v28 = vld [vmem:[%s17868_s30 + $0x450] sm:$0xff] }
 0x48b   : > { %13178 = vmatprep.subr.bf16.mxu0 %v15031_v30  ;;  %13793 = vmatprep.subr.bf16.mxu1 %v15033_v31  ;;  %v441_v30 = vld [vmem:[%s17868_s30 + $0x470] sm:$0xff]  ;;  %v438_v31 = vld [vmem:[%s17868_s30 + $0x458] sm:$0xff] }
 0x48c   : > { %v15071_v58 = vcombine.high %v437_v28, %v441_v30  ;;  %v15070_v43 = vcombine.low %v437_v28, %v441_v30  ;;  %v15072_v44 = vcombine.low %v438_v31, %v442_v33  ;;  %v469_v18 = vld [vmem:[%s17868_s30 + $0x550] sm:$0xff] }
 0x48e   : > { %13179 = vmatpush1.bf16.msra.mxu0 %v15030_v36  ;;  %13794 = vmatpush1.bf16.msra.mxu1 %v15032_v38  ;;  %v15073_v36 = vcombine.high %v438_v31, %v442_v33  ;;  %v445_v38 = vld [vmem:[%s17868_s30 + $0x490] sm:$0xff] }
 0x48f   : > { %13180 = vmatprep.subr.bf16.mxu0 %v15039_v39  ;;  %13795 = vmatprep.subr.bf16.mxu1 %v15041_v41  ;;  %v449_v39 = vld [vmem:[%s17868_s30 + $0x4b0] sm:$0xff]  ;;  %v446_v41 = vld [vmem:[%s17868_s30 + $0x498] sm:$0xff] }
 0x490   : > { %v15079_v48 = vcombine.high %v445_v38, %v449_v39  ;;  %v15080_v0 = vcombine.low %v446_v41, %v450_v42  ;;  %v477_v33 = vld [vmem:[%s17868_s30 + $0x590] sm:$0xff] }
 0x492   : > { %13181 = vmatpush1.bf16.msra.mxu0 %v15038_v53  ;;  %13796 = vmatpush1.bf16.msra.mxu1 %v15040_v57  ;;  %v15081_v53 = vcombine.high %v446_v41, %v450_v42  ;;  %v453_v57 = vld [vmem:[%s17868_s30 + $0x4d0] sm:$0xff] }
 0x493   : > { %13182 = vmatprep.subr.bf16.mxu0 %v15047_v61  ;;  %13797 = vmatprep.subr.bf16.mxu1 %v15049_v62  ;;  %v457_v61 = vld [vmem:[%s17868_s30 + $0x4f0] sm:$0xff]  ;;  %v454_v62 = vld [vmem:[%s17868_s30 + $0x4d8] sm:$0xff] }
 0x494   : > { %v15087_v3 = vcombine.high %v453_v57, %v457_v61  ;;  %v15089_v7 = vcombine.high %v454_v62, %v458_v63  ;;  %v15086_v12 = vcombine.low %v453_v57, %v457_v61  ;;  %v485_v42 = vld [vmem:[%s17868_s30 + $0x5d0] sm:$0xff] }
 0x496   : > { %13183 = vmatpush1.bf16.msra.mxu0 %v15046_v6  ;;  %13798 = vmatpush1.bf16.msra.mxu1 %v15048_v9  ;;  %v461_v6 = vld [vmem:[%s17868_s30 + $0x510] sm:$0xff] }
 0x497   : > { %13184 = vmatprep.subr.bf16.mxu0 %v15055_v10  ;;  %13799 = vmatprep.subr.bf16.mxu1 %v15057_v11  ;;  %v465_v9 = vld [vmem:[%s17868_s30 + $0x530] sm:$0xff]  ;;  %v462_v10 = vld [vmem:[%s17868_s30 + $0x518] sm:$0xff] }
 0x498   : > { %v466_v11 = vld [vmem:[%s17868_s30 + $0x538] sm:$0xff]  ;;  %v15095_v14 = vcombine.high %v461_v6, %v465_v9 }
 0x499   : > { %v15097_v15 = vcombine.high %v462_v10, %v466_v11  ;;  %v15096_v28 = vcombine.low %v462_v10, %v466_v11  ;;  %v501_v11 = vld [vmem:[%s17868_s30 + $0x650] sm:$0xff] }
 0x49a   : > { %13185 = vmatpush1.bf16.msra.mxu0 %v15054_v19  ;;  %13800 = vmatpush1.bf16.msra.mxu1 %v15056_v22  ;;  %v473_v19 = vld [vmem:[%s17868_s30 + $0x570] sm:$0xff]  ;;  %v470_v22 = vld [vmem:[%s17868_s30 + $0x558] sm:$0xff] }
 0x49b   : > { %13195 = vmatprep.subr.bf16.mxu0 %v15063_v54  ;;  %13810 = vmatprep.subr.bf16.mxu1 %v15065_v27  ;;  %v474_v54 = vld [vmem:[%s17868_s30 + $0x578] sm:$0xff]  ;;  %v15094_v27 = vcombine.low %v461_v6, %v465_v9  ;;  %v15103_v30 = vcombine.high %v469_v18, %v473_v19 }
 0x49c   : > { %v15105_v31 = vcombine.high %v470_v22, %v474_v54 }
 0x49d   : > { %13187 = vmatmul.mubr.bf16.vlgmr.msra.gmra.mrb[4].mxu0 %v17962_v13  ;;  %13802 = vmatmul.mubr.bf16.vlgmr.msra.gmra.mrb[4].mxu1 %v17962_v13  ;;  %v15078_v13 = vcombine.low %v445_v38, %v449_v39  ;;  %v15104_v38 = vcombine.low %v470_v22, %v474_v54  ;;  %v509_v54 = vld [vmem:[%s17868_s30 + $0x690] sm:$0xff] }
 0x49e   : > { %13196 = vmatpush1.bf16.msra.mxu0 %v15062_v34  ;;  %13811 = vmatpush1.bf16.msra.mxu1 %v15064_v35  ;;  %v481_v34 = vld [vmem:[%s17868_s30 + $0x5b0] sm:$0xff]  ;;  %v478_v35 = vld [vmem:[%s17868_s30 + $0x598] sm:$0xff] }
 0x49f   : > { %13197 = vmatprep.subr.bf16.mxu0 %v15071_v58  ;;  %13812 = vmatprep.subr.bf16.mxu1 %v15073_v36  ;;  %v482_v58 = vld [vmem:[%s17868_s30 + $0x5b8] sm:$0xff]  ;;  %v15102_v36 = vcombine.low %v469_v18, %v473_v19  ;;  %v15111_v39 = vcombine.high %v477_v33, %v481_v34 }
 0x4a0   : > { %13227 = vmatprep.mubr.bf16.mxu0 %v17975_v24  ;;  %13842 = vmatprep.mubr.bf16.mxu1 %v17975_v24  ;;  %v15088_v24 = vcombine.low %v454_v62, %v458_v63  ;;  %v15113_v41 = vcombine.high %v478_v35, %v482_v58  ;;  %v15112_v57 = vcombine.low %v478_v35, %v482_v58  ;;  %v493_v63 = vld [vmem:[%s17868_s30 + $0x610] sm:$0xff] }
 0x4a1   : > { %v517_v58 = vld [vmem:[%s17868_s30 + $0x6d0] sm:$0xff] }
 0x4a2   : > { %13198 = vmatpush1.bf16.msra.mxu0 %v15070_v43  ;;  %13813 = vmatpush1.bf16.msra.mxu1 %v15072_v44  ;;  %v489_v43 = vld [vmem:[%s17868_s30 + $0x5f0] sm:$0xff]  ;;  %v486_v44 = vld [vmem:[%s17868_s30 + $0x5d8] sm:$0xff] }
 0x4a3   : > { %13199 = vmatprep.subr.bf16.mxu0 %v15079_v48  ;;  %13814 = vmatprep.subr.bf16.mxu1 %v15081_v53  ;;  %v490_v48 = vld [vmem:[%s17868_s30 + $0x5f8] sm:$0xff]  ;;  %v15110_v53 = vcombine.low %v477_v33, %v481_v34  ;;  %v15119_v61 = vcombine.high %v485_v42, %v489_v43 }
 0x4a4   : > { %v15121_v62 = vcombine.high %v486_v44, %v490_v48  ;;  %v15120_v6 = vcombine.low %v486_v44, %v490_v48  ;;  %v525_v48 = vld [vmem:[%s17868_s30 + $0x710] sm:$0xff] }
 0x4a6   : > { %13200 = vmatpush1.bf16.msra.mxu0 %v15078_v13  ;;  %13815 = vmatpush1.bf16.msra.mxu1 %v15080_v0  ;;  %v497_v13 = vld [vmem:[%s17868_s30 + $0x630] sm:$0xff]  ;;  %v494_v0 = vld [vmem:[%s17868_s30 + $0x618] sm:$0xff] }
 0x4a7   : > { %13201 = vmatprep.subr.bf16.mxu0 %v15087_v3  ;;  %13816 = vmatprep.subr.bf16.mxu1 %v15089_v7  ;;  %v498_v3 = vld [vmem:[%s17868_s30 + $0x638] sm:$0xff]  ;;  %v15118_v7 = vcombine.low %v485_v42, %v489_v43  ;;  %v15127_v9 = vcombine.high %v493_v63, %v497_v13 }
 0x4a8   : > { %v15129_v10 = vcombine.high %v494_v0, %v498_v3  ;;  %v15128_v18 = vcombine.low %v494_v0, %v498_v3  ;;  %v533_v3 = vld [vmem:[%s17868_s30 + $0x750] sm:$0xff] }
 0x4aa   : > { %13202 = vmatpush1.bf16.msra.mxu0 %v15086_v12  ;;  %13817 = vmatpush1.bf16.msra.mxu1 %v15088_v24  ;;  %v505_v12 = vld [vmem:[%s17868_s30 + $0x670] sm:$0xff]  ;;  %v502_v24 = vld [vmem:[%s17868_s30 + $0x658] sm:$0xff] }
 0x4ab   : > { %13203 = vmatprep.subr.bf16.mxu0 %v15095_v14  ;;  %13818 = vmatprep.subr.bf16.mxu1 %v15097_v15  ;;  %v506_v14 = vld [vmem:[%s17868_s30 + $0x678] sm:$0xff]  ;;  %v15126_v15 = vcombine.low %v493_v63, %v497_v13  ;;  %v15135_v19 = vcombine.high %v501_v11, %v505_v12 }
 0x4ac   : > { %v15137_v22 = vcombine.high %v502_v24, %v506_v14  ;;  %v15136_v33 = vcombine.low %v502_v24, %v506_v14  ;;  %v541_v14 = vld [vmem:[%s17868_s30 + $0x790] sm:$0xff] }
 0x4ae   : > { %13204 = vmatpush1.bf16.msra.mxu0 %v15094_v27  ;;  %13819 = vmatpush1.bf16.msra.mxu1 %v15096_v28  ;;  %v513_v27 = vld [vmem:[%s17868_s30 + $0x6b0] sm:$0xff]  ;;  %v510_v28 = vld [vmem:[%s17868_s30 + $0x698] sm:$0xff] }
 0x4af   : > { %13205 = vmatprep.subr.bf16.mxu0 %v15103_v30  ;;  %13820 = vmatprep.subr.bf16.mxu1 %v15105_v31  ;;  %v514_v30 = vld [vmem:[%s17868_s30 + $0x6b8] sm:$0xff]  ;;  %v15134_v31 = vcombine.low %v501_v11, %v505_v12  ;;  %v15143_v34 = vcombine.high %v509_v54, %v513_v27 }
 0x4b0   : > { %v15145_v35 = vcombine.high %v510_v28, %v514_v30  ;;  %v15144_v42 = vcombine.low %v510_v28, %v514_v30  ;;  %v549_v30 = vld [vmem:[%s17868_s30 + $0x7d0] sm:$0xff] }
 0x4b2   : > { %13206 = vmatpush1.bf16.msra.mxu0 %v15102_v36  ;;  %13821 = vmatpush1.bf16.msra.mxu1 %v15104_v38  ;;  %v521_v36 = vld [vmem:[%s17868_s30 + $0x6f0] sm:$0xff]  ;;  %v518_v38 = vld [vmem:[%s17868_s30 + $0x6d8] sm:$0xff] }
 0x4b3   : > { %13207 = vmatprep.subr.bf16.mxu0 %v15111_v39  ;;  %13822 = vmatprep.subr.bf16.mxu1 %v15113_v41  ;;  %v522_v39 = vld [vmem:[%s17868_s30 + $0x6f8] sm:$0xff]  ;;  %v15142_v41 = vcombine.low %v509_v54, %v513_v27  ;;  %v15151_v43 = vcombine.high %v517_v58, %v521_v36 }
 0x4b4   : > { %v15153_v44 = vcombine.high %v518_v38, %v522_v39  ;;  %v15152_v63 = vcombine.low %v518_v38, %v522_v39  ;;  %v557_v39 = vld [vmem:[%s17868_s30 + $0x810] sm:$0xff] }
 0x4b6   : > { %13208 = vmatpush1.bf16.msra.mxu0 %v15110_v53  ;;  %13823 = vmatpush1.bf16.msra.mxu1 %v15112_v57  ;;  %v529_v53 = vld [vmem:[%s17868_s30 + $0x730] sm:$0xff]  ;;  %v526_v57 = vld [vmem:[%s17868_s30 + $0x718] sm:$0xff] }
 0x4b7   : > { %13209 = vmatprep.subr.bf16.mxu0 %v15119_v61  ;;  %13824 = vmatprep.subr.bf16.mxu1 %v15121_v62  ;;  %v530_v61 = vld [vmem:[%s17868_s30 + $0x738] sm:$0xff]  ;;  %v15150_v62 = vcombine.low %v517_v58, %v521_v36  ;;  %v15159_v13 = vcombine.high %v525_v48, %v529_v53 }
 0x4b8   : > { %v15161_v0 = vcombine.high %v526_v57, %v530_v61  ;;  %v15160_v11 = vcombine.low %v526_v57, %v530_v61  ;;  %v565_v61 = vld [vmem:[%s17868_s30 + $0x850] sm:$0xff] }
 0x4ba   : > { %13210 = vmatpush1.bf16.msra.mxu0 %v15118_v7  ;;  %13825 = vmatpush1.bf16.msra.mxu1 %v15120_v6  ;;  %v537_v7 = vld [vmem:[%s17868_s30 + $0x770] sm:$0xff]  ;;  %v534_v6 = vld [vmem:[%s17868_s30 + $0x758] sm:$0xff] }
 0x4bb   : > { %13211 = vmatprep.subr.bf16.mxu0 %v15127_v9  ;;  %13826 = vmatprep.subr.bf16.mxu1 %v15129_v10  ;;  %v538_v9 = vld [vmem:[%s17868_s30 + $0x778] sm:$0xff]  ;;  %v15158_v10 = vcombine.low %v525_v48, %v529_v53  ;;  %v15167_v12 = vcombine.high %v533_v3, %v537_v7 }
 0x4bc   : > { %v15169_v24 = vcombine.high %v534_v6, %v538_v9  ;;  %v15168_v54 = vcombine.low %v534_v6, %v538_v9  ;;  %v573_v9 = vld [vmem:[%s17868_s30 + $0x890] sm:$0xff] }
 0x4be   : > { %13212 = vmatpush1.bf16.msra.mxu0 %v15126_v15  ;;  %13827 = vmatpush1.bf16.msra.mxu1 %v15128_v18  ;;  %v545_v15 = vld [vmem:[%s17868_s30 + $0x7b0] sm:$0xff]  ;;  %v542_v18 = vld [vmem:[%s17868_s30 + $0x798] sm:$0xff] }
 0x4bf   : > { %13213 = vmatprep.subr.bf16.mxu0 %v15135_v19  ;;  %13828 = vmatprep.subr.bf16.mxu1 %v15137_v22  ;;  %v546_v19 = vld [vmem:[%s17868_s30 + $0x7b8] sm:$0xff]  ;;  %v15166_v22 = vcombine.low %v533_v3, %v537_v7  ;;  %v15175_v27 = vcombine.high %v541_v14, %v545_v15 }
 0x4c0   : > { %v15177_v28 = vcombine.high %v542_v18, %v546_v19  ;;  %v15176_v58 = vcombine.low %v542_v18, %v546_v19  ;;  %v581_v19 = vld [vmem:[%s17868_s30 + $0x8d0] sm:$0xff] }
 0x4c2   : > { %13214 = vmatpush1.bf16.msra.mxu0 %v15134_v31  ;;  %13829 = vmatpush1.bf16.msra.mxu1 %v15136_v33  ;;  %v553_v31 = vld [vmem:[%s17868_s30 + $0x7f0] sm:$0xff]  ;;  %v550_v33 = vld [vmem:[%s17868_s30 + $0x7d8] sm:$0xff] }
 0x4c3   : > { %13215 = vmatprep.subr.bf16.mxu0 %v15143_v34  ;;  %13830 = vmatprep.subr.bf16.mxu1 %v15145_v35  ;;  %v554_v34 = vld [vmem:[%s17868_s30 + $0x7f8] sm:$0xff]  ;;  %v15174_v35 = vcombine.low %v541_v14, %v545_v15  ;;  %v15183_v36 = vcombine.high %v549_v30, %v553_v31 }
 0x4c4   : > { %v15185_v38 = vcombine.high %v550_v33, %v554_v34  ;;  %v15184_v48 = vcombine.low %v550_v33, %v554_v34  ;;  %v589_v33 = vld [vmem:[%s17868_s30 + $0x910] sm:$0xff] }
 0x4c5   : > { %v593_v34 = vld [vmem:[%s17868_s30 + $0x930] sm:$0xff] }
 0x4c6   : > { %13216 = vmatpush1.bf16.msra.mxu0 %v15142_v41  ;;  %13831 = vmatpush1.bf16.msra.mxu1 %v15144_v42  ;;  %v561_v41 = vld [vmem:[%s17868_s30 + $0x830] sm:$0xff]  ;;  %v558_v42 = vld [vmem:[%s17868_s30 + $0x818] sm:$0xff] }
 0x4c7   : > { %13217 = vmatprep.subr.bf16.mxu0 %v15151_v43  ;;  %13832 = vmatprep.subr.bf16.mxu1 %v15153_v44  ;;  %v562_v43 = vld [vmem:[%s17868_s30 + $0x838] sm:$0xff]  ;;  %v15182_v44 = vcombine.low %v549_v30, %v553_v31  ;;  %v15191_v53 = vcombine.high %v557_v39, %v561_v41 }
 0x4c8   : > { %v15193_v57 = vcombine.high %v558_v42, %v562_v43  ;;  %v15192_v3 = vcombine.low %v558_v42, %v562_v43  ;;  %v601_v42 = vld [vmem:[%s17868_s30 + $0x970] sm:$0xff]  ;;  %v598_v43 = vld [vmem:[%s17868_s30 + $0x958] sm:$0xff] }
 0x4ca   : > { %13218 = vmatpush1.bf16.msra.mxu0 %v15150_v62  ;;  %13833 = vmatpush1.bf16.msra.mxu1 %v15152_v63  ;;  %v569_v62 = vld [vmem:[%s17868_s30 + $0x870] sm:$0xff]  ;;  %v566_v63 = vld [vmem:[%s17868_s30 + $0x858] sm:$0xff] }
 0x4cb   : > { %13219 = vmatprep.subr.bf16.mxu0 %v15159_v13  ;;  %13834 = vmatprep.subr.bf16.mxu1 %v15161_v0  ;;  %v570_v13 = vld [vmem:[%s17868_s30 + $0x878] sm:$0xff]  ;;  %v15190_v0 = vcombine.low %v557_v39, %v561_v41  ;;  %v15199_v7 = vcombine.high %v565_v61, %v569_v62  ;;  %v597_v41 = vld [vmem:[%s17868_s30 + $0x950] sm:$0xff] }
 0x4cc   : > { %v15201_v6 = vcombine.high %v566_v63, %v570_v13  ;;  %v15200_v14 = vcombine.low %v566_v63, %v570_v13  ;;  %v609_v63 = vld [vmem:[%s17868_s30 + $0x9b0] sm:$0xff]  ;;  %v606_v13 = vld [vmem:[%s17868_s30 + $0x998] sm:$0xff] }
 0x4ce   : > { %13220 = vmatpush1.bf16.msra.mxu0 %v15158_v10  ;;  %13835 = vmatpush1.bf16.msra.mxu1 %v15160_v11  ;;  %v577_v10 = vld [vmem:[%s17868_s30 + $0x8b0] sm:$0xff]  ;;  %v574_v11 = vld [vmem:[%s17868_s30 + $0x898] sm:$0xff] }
 0x4cf   : > { %13221 = vmatprep.subr.bf16.mxu0 %v15167_v12  ;;  %13836 = vmatprep.subr.bf16.mxu1 %v15169_v24  ;;  %v578_v12 = vld [vmem:[%s17868_s30 + $0x8b8] sm:$0xff]  ;;  %v15198_v24 = vcombine.low %v565_v61, %v569_v62  ;;  %v15207_v15 = vcombine.high %v573_v9, %v577_v10  ;;  %v605_v62 = vld [vmem:[%s17868_s30 + $0x990] sm:$0xff] }
 0x4d0   : > { %v15209_v18 = vcombine.high %v574_v11, %v578_v12 }
 0x4d2   : > { %13222 = vmatpush1.bf16.msra.mxu0 %v15166_v22  ;;  %13837 = vmatpush1.bf16.msra.mxu1 %v15168_v54  ;;  %v585_v22 = vld [vmem:[%s17868_s30 + $0x8f0] sm:$0xff]  ;;  %v582_v54 = vld [vmem:[%s17868_s30 + $0x8d8] sm:$0xff] }
 0x4d3   : > { %13223 = vmatprep.subr.bf16.mxu0 %v15175_v27  ;;  %13838 = vmatprep.subr.bf16.mxu1 %v15177_v28  ;;  %v586_v27 = vld [vmem:[%s17868_s30 + $0x8f8] sm:$0xff]  ;;  %v15208_v28 = vcombine.low %v574_v11, %v578_v12  ;;  %v15215_v30 = vcombine.high %v581_v19, %v585_v22  ;;  %v617_v11 = vld [vmem:[%s17868_s30 + $0x9f0] sm:$0xff] }
 0x4d4   : > { %v15217_v31 = vcombine.high %v582_v54, %v586_v27  ;;  %v614_v12 = vld [vmem:[%s17868_s30 + $0x9d8] sm:$0xff] }
 0x4d6   : > { %13224 = vmatpush1.bf16.msra.mxu0 %v15174_v35  ;;  %13839 = vmatpush1.bf16.msra.mxu1 %v15176_v58  ;;  %v590_v35 = vld [vmem:[%s17868_s30 + $0x918] sm:$0xff] }
 0x4d7   : > { %13225 = vmatprep.subr.bf16.mxu0 %v15183_v36  ;;  %13840 = vmatprep.subr.bf16.mxu1 %v15185_v38  ;;  %v594_v58 = vld [vmem:[%s17868_s30 + $0x938] sm:$0xff]  ;;  %v15214_v36 = vcombine.low %v581_v19, %v585_v22  ;;  %v15223_v38 = vcombine.high %v589_v33, %v593_v34  ;;  %v621_v22 = vld [vmem:[%s17868_s30 + $0xa10] sm:$0xff] }
 0x4d8   : > { %v15225_v39 = vcombine.high %v590_v35, %v594_v58 }
 0x4da   : > { %13226 = vmatpush1.bf16.msra.mxu0 %v15182_v44  ;;  %13841 = vmatpush1.bf16.msra.mxu1 %v15184_v48  ;;  %v602_v44 = vld [vmem:[%s17868_s30 + $0x978] sm:$0xff]  ;;  %v15222_v48 = vcombine.low %v589_v33, %v593_v34  ;;  %v629_v34 = vld [vmem:[%s17868_s30 + $0xa50] sm:$0xff] }
 0x4db   : > { %13236 = vmatprep.subr.bf16.mxu0 %v15191_v53  ;;  %13851 = vmatprep.subr.bf16.mxu1 %v15193_v57  ;;  %v15224_v53 = vcombine.low %v590_v35, %v594_v58  ;;  %v15231_v57 = vcombine.high %v597_v41, %v601_v42  ;;  %v15233_v61 = vcombine.high %v598_v43, %v602_v44  ;;  %v633_v35 = vld [vmem:[%s17868_s30 + $0xa70] sm:$0xff]  ;;  %v630_v58 = vld [vmem:[%s17868_s30 + $0xa58] sm:$0xff] }
 0x4dd   : > { %13228 = vmatmul.mubr.bf16.vlgmr.msra.gmra.mrb[4].mxu0 %v18041_v23  ;;  %13843 = vmatmul.mubr.bf16.vlgmr.msra.gmra.mrb[4].mxu1 %v18041_v23  ;;  %v15206_v23 = vcombine.low %v573_v9, %v577_v10  ;;  %v613_v10 = vld [vmem:[%s17868_s30 + $0x9d0] sm:$0xff] }
 0x4de   : > { %13237 = vmatpush1.bf16.msra.mxu0 %v15190_v0  ;;  %13852 = vmatpush1.bf16.msra.mxu1 %v15192_v3  ;;  %v610_v0 = vld [vmem:[%s17868_s30 + $0x9b8] sm:$0xff]  ;;  %v15230_v3 = vcombine.low %v597_v41, %v601_v42  ;;  %v637_v42 = vld [vmem:[%s17868_s30 + $0xa90] sm:$0xff] }
 0x4df   : > { %13238 = vmatprep.subr.bf16.mxu0 %v15199_v7  ;;  %13853 = vmatprep.subr.bf16.mxu1 %v15201_v6  ;;  %v15232_v7 = vcombine.low %v598_v43, %v602_v44  ;;  %v15239_v6 = vcombine.high %v605_v62, %v609_v63  ;;  %v15241_v9 = vcombine.high %v606_v13, %v610_v0  ;;  %v641_v43 = vld [vmem:[%s17868_s30 + $0xab0] sm:$0xff]  ;;  %v638_v44 = vld [vmem:[%s17868_s30 + $0xa98] sm:$0xff] }
 0x4e0   : > { %13268 = vmatprep.mubr.bf16.mxu0 %v18052_v16  ;;  %13883 = vmatprep.mubr.bf16.mxu1 %v18052_v16  ;;  %v15216_v16 = vcombine.low %v582_v54, %v586_v27  ;;  %v625_v54 = vld [vmem:[%s17868_s30 + $0xa30] sm:$0xff]  ;;  %v622_v27 = vld [vmem:[%s17868_s30 + $0xa18] sm:$0xff] }
 0x4e2   : > { %13239 = vmatpush1.bf16.msra.mxu0 %v15198_v24  ;;  %13854 = vmatpush1.bf16.msra.mxu1 %v15200_v14  ;;  %v618_v24 = vld [vmem:[%s17868_s30 + $0x9f8] sm:$0xff]  ;;  %v15238_v14 = vcombine.low %v605_v62, %v609_v63  ;;  %v645_v63 = vld [vmem:[%s17868_s30 + $0xad0] sm:$0xff] }
 0x4e3   : > { %13240 = vmatprep.subr.bf16.mxu0 %v15207_v15  ;;  %13855 = vmatprep.subr.bf16.mxu1 %v15209_v18  ;;  %v15240_v15 = vcombine.low %v606_v13, %v610_v0  ;;  %v15247_v18 = vcombine.high %v613_v10, %v617_v11  ;;  %v15249_v19 = vcombine.high %v614_v12, %v618_v24  ;;  %v649_v13 = vld [vmem:[%s17868_s30 + $0xaf0] sm:$0xff]  ;;  %v646_v0 = vld [vmem:[%s17868_s30 + $0xad8] sm:$0xff] }
 0x4e6   : > { %13241 = vmatpush1.bf16.msra.mxu0 %v15206_v23  ;;  %13856 = vmatpush1.bf16.msra.mxu1 %v15208_v28  ;;  %v626_v23 = vld [vmem:[%s17868_s30 + $0xa38] sm:$0xff]  ;;  %v15246_v28 = vcombine.low %v613_v10, %v617_v11  ;;  %v653_v11 = vld [vmem:[%s17868_s30 + $0xb10] sm:$0xff] }
 0x4e7   : > { %13242 = vmatprep.subr.bf16.mxu0 %v15215_v30  ;;  %13857 = vmatprep.subr.bf16.mxu1 %v15217_v31  ;;  %v15248_v30 = vcombine.low %v614_v12, %v618_v24  ;;  %v15255_v31 = vcombine.high %v621_v22, %v625_v54  ;;  %v15257_v33 = vcombine.high %v622_v27, %v626_v23  ;;  %v657_v12 = vld [vmem:[%s17868_s30 + $0xb30] sm:$0xff]  ;;  %v654_v24 = vld [vmem:[%s17868_s30 + $0xb18] sm:$0xff] }
 0x4ea   : > { %13243 = vmatpush1.bf16.msra.mxu0 %v15214_v36  ;;  %13858 = vmatpush1.bf16.msra.mxu1 %v15216_v16  ;;  %v634_v36 = vld [vmem:[%s17868_s30 + $0xa78] sm:$0xff]  ;;  %v15254_v16 = vcombine.low %v621_v22, %v625_v54  ;;  %v661_v54 = vld [vmem:[%s17868_s30 + $0xb50] sm:$0xff] }
 0x4eb   : > { %13244 = vmatprep.subr.bf16.mxu0 %v15223_v38  ;;  %13859 = vmatprep.subr.bf16.mxu1 %v15225_v39  ;;  %v15256_v38 = vcombine.low %v622_v27, %v626_v23  ;;  %v15263_v39 = vcombine.high %v629_v34, %v633_v35  ;;  %v15265_v41 = vcombine.high %v630_v58, %v634_v36  ;;  %v665_v27 = vld [vmem:[%s17868_s30 + $0xb70] sm:$0xff]  ;;  %v662_v23 = vld [vmem:[%s17868_s30 + $0xb58] sm:$0xff] }
 0x4ee   : > { %13245 = vmatpush1.bf16.msra.mxu0 %v15222_v48  ;;  %13860 = vmatpush1.bf16.msra.mxu1 %v15224_v53  ;;  %v642_v48 = vld [vmem:[%s17868_s30 + $0xab8] sm:$0xff]  ;;  %v15262_v53 = vcombine.low %v629_v34, %v633_v35  ;;  %v669_v35 = vld [vmem:[%s17868_s30 + $0xb90] sm:$0xff] }
 0x4ef   : > { %13246 = vmatprep.subr.bf16.mxu0 %v15231_v57  ;;  %13861 = vmatprep.subr.bf16.mxu1 %v15233_v61  ;;  %v15264_v57 = vcombine.low %v630_v58, %v634_v36  ;;  %v15271_v61 = vcombine.high %v637_v42, %v641_v43  ;;  %v15273_v62 = vcombine.high %v638_v44, %v642_v48  ;;  %v673_v58 = vld [vmem:[%s17868_s30 + $0xbb0] sm:$0xff]  ;;  %v670_v36 = vld [vmem:[%s17868_s30 + $0xb98] sm:$0xff] }
 0x4f2   : > { %13247 = vmatpush1.bf16.msra.mxu0 %v15230_v3  ;;  %13862 = vmatpush1.bf16.msra.mxu1 %v15232_v7  ;;  %v650_v3 = vld [vmem:[%s17868_s30 + $0xaf8] sm:$0xff]  ;;  %v15270_v7 = vcombine.low %v637_v42, %v641_v43  ;;  %v677_v43 = vld [vmem:[%s17868_s30 + $0xbd0] sm:$0xff] }
 0x4f3   : > { %13248 = vmatprep.subr.bf16.mxu0 %v15239_v6  ;;  %13863 = vmatprep.subr.bf16.mxu1 %v15241_v9  ;;  %v15272_v6 = vcombine.low %v638_v44, %v642_v48  ;;  %v15279_v9 = vcombine.high %v645_v63, %v649_v13  ;;  %v15281_v10 = vcombine.high %v646_v0, %v650_v3  ;;  %v681_v44 = vld [vmem:[%s17868_s30 + $0xbf0] sm:$0xff]  ;;  %v678_v48 = vld [vmem:[%s17868_s30 + $0xbd8] sm:$0xff] }
 0x4f6   : > { %13249 = vmatpush1.bf16.msra.mxu0 %v15238_v14  ;;  %13864 = vmatpush1.bf16.msra.mxu1 %v15240_v15  ;;  %v658_v14 = vld [vmem:[%s17868_s30 + $0xb38] sm:$0xff]  ;;  %v15278_v15 = vcombine.low %v645_v63, %v649_v13  ;;  %v685_v13 = vld [vmem:[%s17868_s30 + $0xc10] sm:$0xff] }
 0x4f7   : > { %13250 = vmatprep.subr.bf16.mxu0 %v15247_v18  ;;  %13865 = vmatprep.subr.bf16.mxu1 %v15249_v19  ;;  %v15280_v18 = vcombine.low %v646_v0, %v650_v3  ;;  %v15287_v19 = vcombine.high %v653_v11, %v657_v12  ;;  %v15289_v22 = vcombine.high %v654_v24, %v658_v14  ;;  %v689_v0 = vld [vmem:[%s17868_s30 + $0xc30] sm:$0xff]  ;;  %v686_v3 = vld [vmem:[%s17868_s30 + $0xc18] sm:$0xff] }
 0x4fa   : > { %13251 = vmatpush1.bf16.msra.mxu0 %v15246_v28  ;;  %13866 = vmatpush1.bf16.msra.mxu1 %v15248_v30  ;;  %v666_v28 = vld [vmem:[%s17868_s30 + $0xb78] sm:$0xff]  ;;  %v15286_v30 = vcombine.low %v653_v11, %v657_v12  ;;  %v693_v12 = vld [vmem:[%s17868_s30 + $0xc50] sm:$0xff] }
 0x4fb   : > { %13252 = vmatprep.subr.bf16.mxu0 %v15255_v31  ;;  %13867 = vmatprep.subr.bf16.mxu1 %v15257_v33  ;;  %v15288_v31 = vcombine.low %v654_v24, %v658_v14  ;;  %v15295_v33 = vcombine.high %v661_v54, %v665_v27  ;;  %v15297_v34 = vcombine.high %v662_v23, %v666_v28  ;;  %v697_v24 = vld [vmem:[%s17868_s30 + $0xc70] sm:$0xff]  ;;  %v694_v14 = vld [vmem:[%s17868_s30 + $0xc58] sm:$0xff] }
 0x4fe   : > { %13253 = vmatpush1.bf16.msra.mxu0 %v15254_v16  ;;  %13868 = vmatpush1.bf16.msra.mxu1 %v15256_v38  ;;  %v674_v16 = vld [vmem:[%s17868_s30 + $0xbb8] sm:$0xff]  ;;  %v15294_v38 = vcombine.low %v661_v54, %v665_v27  ;;  %v701_v27 = vld [vmem:[%s17868_s30 + $0xc90] sm:$0xff] }
 0x4ff   : > { %13254 = vmatprep.subr.bf16.mxu0 %v15263_v39  ;;  %13869 = vmatprep.subr.bf16.mxu1 %v15265_v41  ;;  %v15296_v39 = vcombine.low %v662_v23, %v666_v28  ;;  %v15303_v41 = vcombine.high %v669_v35, %v673_v58  ;;  %v15305_v42 = vcombine.high %v670_v36, %v674_v16  ;;  %v705_v23 = vld [vmem:[%s17868_s30 + $0xcb0] sm:$0xff]  ;;  %v702_v28 = vld [vmem:[%s17868_s30 + $0xc98] sm:$0xff] }
 0x502   : > { %13255 = vmatpush1.bf16.msra.mxu0 %v15262_v53  ;;  %13870 = vmatpush1.bf16.msra.mxu1 %v15264_v57  ;;  %v682_v53 = vld [vmem:[%s17868_s30 + $0xbf8] sm:$0xff]  ;;  %v15302_v57 = vcombine.low %v669_v35, %v673_v58  ;;  %v709_v58 = vld [vmem:[%s17868_s30 + $0xcd0] sm:$0xff] }
 0x503   : > { %13256 = vmatprep.subr.bf16.mxu0 %v15271_v61  ;;  %13871 = vmatprep.subr.bf16.mxu1 %v15273_v62  ;;  %v15304_v61 = vcombine.low %v670_v36, %v674_v16  ;;  %v15311_v62 = vcombine.high %v677_v43, %v681_v44  ;;  %v15313_v63 = vcombine.high %v678_v48, %v682_v53  ;;  %v713_v36 = vld [vmem:[%s17868_s30 + $0xcf0] sm:$0xff]  ;;  %v710_v16 = vld [vmem:[%s17868_s30 + $0xcd8] sm:$0xff] }
 0x506   : > { %13257 = vmatpush1.bf16.msra.mxu0 %v15270_v7  ;;  %13872 = vmatpush1.bf16.msra.mxu1 %v15272_v6  ;;  %v690_v7 = vld [vmem:[%s17868_s30 + $0xc38] sm:$0xff]  ;;  %v15310_v6 = vcombine.low %v677_v43, %v681_v44  ;;  %v717_v43 = vld [vmem:[%s17868_s30 + $0xd10] sm:$0xff] }
 0x507   : > { %13258 = vmatprep.subr.bf16.mxu0 %v15279_v9  ;;  %13873 = vmatprep.subr.bf16.mxu1 %v15281_v10  ;;  %v15312_v9 = vcombine.low %v678_v48, %v682_v53  ;;  %v15319_v10 = vcombine.high %v685_v13, %v689_v0  ;;  %v15321_v11 = vcombine.high %v686_v3, %v690_v7  ;;  %v721_v44 = vld [vmem:[%s17868_s30 + $0xd30] sm:$0xff]  ;;  %v718_v48 = vld [vmem:[%s17868_s30 + $0xd18] sm:$0xff] }
 0x508   : > { %v722_v53 = vld [vmem:[%s17868_s30 + $0xd38] sm:$0xff] }
 0x50a   : > { %13259 = vmatpush1.bf16.msra.mxu0 %v15278_v15  ;;  %13874 = vmatpush1.bf16.msra.mxu1 %v15280_v18  ;;  %v698_v15 = vld [vmem:[%s17868_s30 + $0xc78] sm:$0xff]  ;;  %v15318_v18 = vcombine.low %v685_v13, %v689_v0  ;;  %v729_v13 = vld [vmem:[%s17868_s30 + $0xd70] sm:$0xff] }
 0x50b   : > { %13260 = vmatprep.subr.bf16.mxu0 %v15287_v19  ;;  %13875 = vmatprep.subr.bf16.mxu1 %v15289_v22  ;;  %v15320_v19 = vcombine.low %v686_v3, %v690_v7  ;;  %v15327_v22 = vcombine.high %v693_v12, %v697_v24  ;;  %v15329_v54 = vcombine.high %v694_v14, %v698_v15  ;;  %v726_v0 = vld [vmem:[%s17868_s30 + $0xd58] sm:$0xff] }
 0x50c   : > { %v730_v3 = vld [vmem:[%s17868_s30 + $0xd78] sm:$0xff]  ;;  %v15350_v7 = vcombine.low %v717_v43, %v721_v44 }
 0x50e   : > { %13261 = vmatpush1.bf16.msra.mxu0 %v15286_v30  ;;  %13876 = vmatpush1.bf16.msra.mxu1 %v15288_v31  ;;  %v706_v30 = vld [vmem:[%s17868_s30 + $0xcb8] sm:$0xff]  ;;  %v15326_v31 = vcombine.low %v693_v12, %v697_v24  ;;  %v737_v12 = vld [vmem:[%s17868_s30 + $0xdb0] sm:$0xff] }
 0x50f   : > { %13262 = vmatprep.subr.bf16.mxu0 %v15295_v33  ;;  %13877 = vmatprep.subr.bf16.mxu1 %v15297_v34  ;;  %v15328_v33 = vcombine.low %v694_v14, %v698_v15  ;;  %v15335_v34 = vcombine.high %v701_v27, %v705_v23  ;;  %v15337_v35 = vcombine.high %v702_v28, %v706_v30  ;;  %v734_v24 = vld [vmem:[%s17868_s30 + $0xd98] sm:$0xff] }
 0x510   : > { %v738_v14 = vld [vmem:[%s17868_s30 + $0xdb8] sm:$0xff] }
 0x512   : > { %13263 = vmatpush1.bf16.msra.mxu0 %v15294_v38  ;;  %13878 = vmatpush1.bf16.msra.mxu1 %v15296_v39  ;;  %v714_v38 = vld [vmem:[%s17868_s30 + $0xcf8] sm:$0xff]  ;;  %v15336_v39 = vcombine.low %v702_v28, %v706_v30 }
 0x513   : > { %13264 = vmatprep.subr.bf16.mxu0 %v15303_v41  ;;  %13879 = vmatprep.subr.bf16.mxu1 %v15305_v42  ;;  %v15343_v41 = vcombine.high %v709_v58, %v713_v36  ;;  %v15345_v42 = vcombine.high %v710_v16, %v714_v38 }
 0x516   : > { %13265 = vmatpush1.bf16.msra.mxu0 %v15302_v57  ;;  %13880 = vmatpush1.bf16.msra.mxu1 %v15304_v61  ;;  %v15342_v57 = vcombine.low %v709_v58, %v713_v36  ;;  %v15351_v61 = vcombine.high %v717_v43, %v721_v44  ;;  %v753_v43 = vld [vmem:[%s17868_s30 + $0xe30] sm:$0xff]  ;;  %v750_v44 = vld [vmem:[%s17868_s30 + $0xe18] sm:$0xff] }
 0x517   : > { %13266 = vmatprep.subr.bf16.mxu0 %v15311_v62  ;;  %13881 = vmatprep.subr.bf16.mxu1 %v15313_v63  ;;  %v15353_v62 = vcombine.high %v718_v48, %v722_v53  ;;  %v725_v63 = vld [vmem:[%s17868_s30 + $0xd50] sm:$0xff] }
 0x518   : > { %v15358_v15 = vcombine.low %v725_v63, %v729_v13 }
 0x51a   : > { %13267 = vmatpush1.bf16.msra.mxu0 %v15310_v6  ;;  %13882 = vmatpush1.bf16.msra.mxu1 %v15312_v9  ;;  %v15352_v6 = vcombine.low %v718_v48, %v722_v53  ;;  %v15359_v9 = vcombine.high %v725_v63, %v729_v13  ;;  %v754_v48 = vld [vmem:[%s17868_s30 + $0xe38] sm:$0xff]  ;;  %v761_v63 = vld [vmem:[%s17868_s30 + $0xe70] sm:$0xff] }
 0x51b   : > { %13277 = vmatprep.subr.bf16.mxu0 %v15319_v10  ;;  %13892 = vmatprep.subr.bf16.mxu1 %v15321_v11  ;;  %v15361_v10 = vcombine.high %v726_v0, %v730_v3  ;;  %v733_v11 = vld [vmem:[%s17868_s30 + $0xd90] sm:$0xff]  ;;  %v758_v13 = vld [vmem:[%s17868_s30 + $0xe58] sm:$0xff] }
 0x51c   : > { %v15366_v58 = vcombine.low %v733_v11, %v737_v12 }
 0x51d   : > { %13269 = vmatmul.mubr.bf16.vlgmr.msra.gmra.mrb[4].mxu0 %v18120_v37  ;;  %13884 = vmatmul.mubr.bf16.vlgmr.msra.gmra.mrb[4].mxu1 %v18120_v37  ;;  %v15334_v37 = vcombine.low %v701_v27, %v705_v23  ;;  %v741_v27 = vld [vmem:[%s17868_s30 + $0xdd0] sm:$0xff] }
 0x51e   : > { %13278 = vmatpush1.bf16.msra.mxu0 %v15318_v18  ;;  %13893 = vmatpush1.bf16.msra.mxu1 %v15320_v19  ;;  %v15360_v18 = vcombine.low %v726_v0, %v730_v3  ;;  %v15367_v19 = vcombine.high %v733_v11, %v737_v12  ;;  %v745_v23 = vld [vmem:[%s17868_s30 + $0xdf0] sm:$0xff]  ;;  %v762_v0 = vld [vmem:[%s17868_s30 + $0xe78] sm:$0xff] }
 0x51f   : > { %13279 = vmatprep.subr.bf16.mxu0 %v15327_v22  ;;  %13894 = vmatprep.subr.bf16.mxu1 %v15329_v54  ;;  %v15369_v54 = vcombine.high %v734_v24, %v738_v14  ;;  %v15374_v53 = vcombine.low %v741_v27, %v745_v23  ;;  %v769_v11 = vld [vmem:[%s17868_s30 + $0xeb0] sm:$0xff]  ;;  %v766_v12 = vld [vmem:[%s17868_s30 + $0xe98] sm:$0xff] }
 0x520   : > { %13309 = vmatprep.mubr.bf16.mxu0 %v18131_v26  ;;  %13924 = vmatprep.mubr.bf16.mxu1 %v18131_v26  ;;  %v15344_v26 = vcombine.low %v710_v16, %v714_v38  ;;  %v15368_v38 = vcombine.low %v734_v24, %v738_v14  ;;  %v770_v24 = vld [vmem:[%s17868_s30 + $0xeb8] sm:$0xff] }
 0x522   : > { %13280 = vmatpush1.bf16.msra.mxu0 %v15326_v31  ;;  %13895 = vmatpush1.bf16.msra.mxu1 %v15328_v33  ;;  %v742_v31 = vld [vmem:[%s17868_s30 + $0xdd8] sm:$0xff] }
 0x523   : > { %13281 = vmatprep.subr.bf16.mxu0 %v15335_v34  ;;  %13896 = vmatprep.subr.bf16.mxu1 %v15337_v35  ;;  %v746_v33 = vld [vmem:[%s17868_s30 + $0xdf8] sm:$0xff] }
 0x526   : > { %13282 = vmatpush1.bf16.msra.mxu0 %v15334_v37  ;;  %13897 = vmatpush1.bf16.msra.mxu1 %v15336_v39  ;;  %v15375_v37 = vcombine.high %v741_v27, %v745_v23  ;;  %v777_v27 = vld [vmem:[%s17868_s30 + $0xef0] sm:$0xff]  ;;  %v774_v23 = vld [vmem:[%s17868_s30 + $0xed8] sm:$0xff] }
 0x527   : > { %13283 = vmatprep.subr.bf16.mxu0 %v15343_v41  ;;  %13898 = vmatprep.subr.bf16.mxu1 %v15345_v42  ;;  %v15377_v41 = vcombine.high %v742_v31, %v746_v33  ;;  %v749_v42 = vld [vmem:[%s17868_s30 + $0xe10] sm:$0xff] }
 0x528   : > { %v15382_v3 = vcombine.low %v749_v42, %v753_v43 }
 0x52a   : > { %13284 = vmatpush1.bf16.msra.mxu0 %v15342_v57  ;;  %13899 = vmatpush1.bf16.msra.mxu1 %v15344_v26  ;;  %v15376_v57 = vcombine.low %v742_v31, %v746_v33  ;;  %v15383_v26 = vcombine.high %v749_v42, %v753_v43  ;;  %v778_v31 = vld [vmem:[%s17868_s30 + $0xef8] sm:$0xff] }
 0x52b   : > { %13285 = vmatprep.subr.bf16.mxu0 %v15351_v61  ;;  %13900 = vmatprep.subr.bf16.mxu1 %v15353_v62  ;;  %v15385_v61 = vcombine.high %v750_v44, %v754_v48  ;;  %v757_v62 = vld [vmem:[%s17868_s30 + $0xe50] sm:$0xff]  ;;  %v15408_v42 = vcombine.low %v774_v23, %v778_v31 }
 0x52c   : > { %v15390_v14 = vcombine.low %v757_v62, %v761_v63 }
 0x52e   : > { %13286 = vmatpush1.bf16.msra.mxu0 %v15350_v7  ;;  %13901 = vmatpush1.bf16.msra.mxu1 %v15352_v6  ;;  %v15384_v7 = vcombine.low %v750_v44, %v754_v48  ;;  %v15391_v6 = vcombine.high %v757_v62, %v761_v63  ;;  %v789_v48 = vld [vmem:[%s17868_s30 + $0xf50] sm:$0xff] }
 0x52f   : > { %13287 = vmatprep.subr.bf16.mxu0 %v15359_v9  ;;  %13902 = vmatprep.subr.bf16.mxu1 %v15361_v10  ;;  %v15393_v9 = vcombine.high %v758_v13, %v762_v0  ;;  %v765_v10 = vld [vmem:[%s17868_s30 + $0xe90] sm:$0xff] }
 0x530   : > { %v19300_v22 = vpop.f32.mrb[0].mxu0  ;;  %v19304_v28 = vpop.f32.mrb[0].mxu1  ;;  %v15398_v33 = vcombine.low %v765_v10, %v769_v11 }
 0x531   : > { %v19306_v30 = vpop.f32.mrb[1].mxu0  ;;  %v19310_v34 = vpop.f32.mrb[1].mxu1 }
 0x532   : > { %v12536_v35 = vpop.f32.mrb[2].mxu0  ;;  %13288 = vmatpush1.bf16.msra.mxu0 %v15358_v15  ;;  %v13151_v36 = vpop.f32.mrb[2].mxu1  ;;  %13903 = vmatpush1.bf16.msra.mxu1 %v15360_v18  ;;  %v15392_v15 = vcombine.low %v758_v13, %v762_v0  ;;  %v15399_v18 = vcombine.high %v765_v10, %v769_v11  ;;  %v797_v0 = vld [vmem:[%s17868_s30 + $0xf90] sm:$0xff] }
 0x533   : > { %v12537_v16 = vpop.f32.mrb[3].mxu0  ;;  %13289 = vmatprep.subr.bf16.mxu0 %v15367_v19  ;;  %v13152_v39 = vpop.f32.mrb[3].mxu1  ;;  %13904 = vmatprep.subr.bf16.mxu1 %v15369_v54  ;;  %v15401_v19 = vcombine.high %v766_v12, %v770_v24  ;;  %v773_v54 = vld [vmem:[%s17868_s30 + $0xed0] sm:$0xff]  ;;  %v15400_v35 = vcombine.low %v766_v12, %v770_v24  ;;  %v15409_v36 = vcombine.high %v774_v23, %v778_v31 }
 0x534   : > { %v781_v16 = vld [vmem:[%s17868_s30 + $0xf10] sm:$0xff]  ;;  %v786_v39 = vld [vmem:[%s17868_s30 + $0xf38] sm:$0xff] }
 0x535   : > { %v805_v24 = vld [vmem:[%s17868_s30 + $0xfd0] sm:$0xff] }
 0x536   : > { %13290 = vmatpush1.bf16.msra.mxu0 %v15366_v58  ;;  %13905 = vmatpush1.bf16.msra.mxu1 %v15368_v38  ;;  %v15407_v58 = vcombine.high %v773_v54, %v777_v27  ;;  %v785_v38 = vld [vmem:[%s17868_s30 + $0xf30] sm:$0xff] }
 0x537   : > { %13291 = vmatprep.subr.bf16.mxu0 %v15375_v37  ;;  %13906 = vmatprep.subr.bf16.mxu1 %v15377_v41  ;;  %v782_v37 = vld [vmem:[%s17868_s30 + $0xf18] sm:$0xff]  ;;  %v15406_v41 = vcombine.low %v773_v54, %v777_v27  ;;  %v15415_v43 = vcombine.high %v781_v16, %v785_v38  ;;  %v813_v31 = vld [vmem:[%s17868_s30 + $0x1010] sm:$0xff] }
 0x538   : > { %v15417_v44 = vcombine.high %v782_v37, %v786_v39  ;;  %v15416_v62 = vcombine.low %v782_v37, %v786_v39  ;;  %v821_v39 = vld [vmem:[%s17868_s30 + $0x1050] sm:$0xff] }
 0x53a   : > { %13292 = vmatpush1.bf16.msra.mxu0 %v15374_v53  ;;  %13907 = vmatpush1.bf16.msra.mxu1 %v15376_v57  ;;  %v793_v53 = vld [vmem:[%s17868_s30 + $0xf70] sm:$0xff]  ;;  %v790_v57 = vld [vmem:[%s17868_s30 + $0xf58] sm:$0xff] }
 0x53b   : > { %13293 = vmatprep.subr.bf16.mxu0 %v15383_v26  ;;  %13908 = vmatprep.subr.bf16.mxu1 %v15385_v61  ;;  %v794_v26 = vld [vmem:[%s17868_s30 + $0xf78] sm:$0xff]  ;;  %v15414_v61 = vcombine.low %v781_v16, %v785_v38  ;;  %v15423_v63 = vcombine.high %v789_v48, %v793_v53 }
 0x53c   : > { %v15425_v13 = vcombine.high %v790_v57, %v794_v26  ;;  %v15424_v10 = vcombine.low %v790_v57, %v794_v26  ;;  %v829_v26 = vld [vmem:[%s17868_s30 + $0x1090] sm:$0xff] }
 0x53e   : > { %13294 = vmatpush1.bf16.msra.mxu0 %v15382_v3  ;;  %13909 = vmatpush1.bf16.msra.mxu1 %v15384_v7  ;;  %v801_v3 = vld [vmem:[%s17868_s30 + $0xfb0] sm:$0xff]  ;;  %v798_v7 = vld [vmem:[%s17868_s30 + $0xf98] sm:$0xff] }
 0x53f   : > { %13295 = vmatprep.subr.bf16.mxu0 %v15391_v6  ;;  %13910 = vmatprep.subr.bf16.mxu1 %v15393_v9  ;;  %v802_v6 = vld [vmem:[%s17868_s30 + $0xfb8] sm:$0xff]  ;;  %v15422_v9 = vcombine.low %v789_v48, %v793_v53  ;;  %v15431_v11 = vcombine.high %v797_v0, %v801_v3 }
 0x540   : > { %v15433_v12 = vcombine.high %v798_v7, %v802_v6  ;;  %v15432_v54 = vcombine.low %v798_v7, %v802_v6  ;;  %v837_v6 = vld [vmem:[%s17868_s30 + $0x10d0] sm:$0xff] }
 0x542   : > { %13296 = vmatpush1.bf16.msra.mxu0 %v15390_v14  ;;  %13911 = vmatpush1.bf16.msra.mxu1 %v15392_v15  ;;  %v809_v14 = vld [vmem:[%s17868_s30 + $0xff0] sm:$0xff]  ;;  %v806_v15 = vld [vmem:[%s17868_s30 + $0xfd8] sm:$0xff] }
 0x543   : > { %13297 = vmatprep.subr.bf16.mxu0 %v15399_v18  ;;  %13912 = vmatprep.subr.bf16.mxu1 %v15401_v19  ;;  %v810_v18 = vld [vmem:[%s17868_s30 + $0xff8] sm:$0xff]  ;;  %v15430_v19 = vcombine.low %v797_v0, %v801_v3  ;;  %v15439_v27 = vcombine.high %v805_v24, %v809_v14 }
 0x544   : > { %v15441_v23 = vcombine.high %v806_v15, %v810_v18  ;;  %v15440_v16 = vcombine.low %v806_v15, %v810_v18  ;;  %v845_v15 = vld [vmem:[%s17868_s30 + $0x1110] sm:$0xff] }
 0x545   : > { %v849_v18 = vld [vmem:[%s17868_s30 + $0x1130] sm:$0xff] }
 0x546   : > { %13298 = vmatpush1.bf16.msra.mxu0 %v15398_v33  ;;  %13913 = vmatpush1.bf16.msra.mxu1 %v15400_v35  ;;  %v817_v33 = vld [vmem:[%s17868_s30 + $0x1030] sm:$0xff]  ;;  %v814_v35 = vld [vmem:[%s17868_s30 + $0x1018] sm:$0xff] }
 0x547   : > { %13299 = vmatprep.subr.bf16.mxu0 %v15407_v58  ;;  %13914 = vmatprep.subr.bf16.mxu1 %v15409_v36  ;;  %v818_v58 = vld [vmem:[%s17868_s30 + $0x1038] sm:$0xff]  ;;  %v15438_v36 = vcombine.low %v805_v24, %v809_v14  ;;  %v15447_v38 = vcombine.high %v813_v31, %v817_v33 }
 0x548   : > { %v15449_v37 = vcombine.high %v814_v35, %v818_v58  ;;  %v15448_v48 = vcombine.low %v814_v35, %v818_v58  ;;  %v857_v35 = vld [vmem:[%s17868_s30 + $0x1170] sm:$0xff]  ;;  %v854_v58 = vld [vmem:[%s17868_s30 + $0x1158] sm:$0xff] }
 0x54a   : > { %13300 = vmatpush1.bf16.msra.mxu0 %v15406_v41  ;;  %13915 = vmatpush1.bf16.msra.mxu1 %v15408_v42  ;;  %v825_v41 = vld [vmem:[%s17868_s30 + $0x1070] sm:$0xff]  ;;  %v822_v42 = vld [vmem:[%s17868_s30 + $0x1058] sm:$0xff] }
 0x54b   : > { %13301 = vmatprep.subr.bf16.mxu0 %v15415_v43  ;;  %13916 = vmatprep.subr.bf16.mxu1 %v15417_v44  ;;  %v826_v43 = vld [vmem:[%s17868_s30 + $0x1078] sm:$0xff]  ;;  %v15446_v44 = vcombine.low %v813_v31, %v817_v33  ;;  %v15455_v53 = vcombine.high %v821_v39, %v825_v41  ;;  %v853_v33 = vld [vmem:[%s17868_s30 + $0x1150] sm:$0xff] }
 0x54c   : > { %v15457_v57 = vcombine.high %v822_v42, %v826_v43  ;;  %v15456_v0 = vcombine.low %v822_v42, %v826_v43  ;;  %v865_v42 = vld [vmem:[%s17868_s30 + $0x11b0] sm:$0xff]  ;;  %v862_v43 = vld [vmem:[%s17868_s30 + $0x1198] sm:$0xff] }
 0x54e   : > { %13302 = vmatpush1.bf16.msra.mxu0 %v15414_v61  ;;  %13917 = vmatpush1.bf16.msra.mxu1 %v15416_v62  ;;  %v833_v61 = vld [vmem:[%s17868_s30 + $0x10b0] sm:$0xff]  ;;  %v830_v62 = vld [vmem:[%s17868_s30 + $0x1098] sm:$0xff] }
 0x54f   : > { %13303 = vmatprep.subr.bf16.mxu0 %v15423_v63  ;;  %13918 = vmatprep.subr.bf16.mxu1 %v15425_v13  ;;  %v834_v63 = vld [vmem:[%s17868_s30 + $0x10b8] sm:$0xff]  ;;  %v15454_v13 = vcombine.low %v821_v39, %v825_v41  ;;  %v15463_v3 = vcombine.high %v829_v26, %v833_v61  ;;  %v861_v41 = vld [vmem:[%s17868_s30 + $0x1190] sm:$0xff] }
 0x550   : > { %v15465_v7 = vcombine.high %v830_v62, %v834_v63 }
 0x552   : > { %13304 = vmatpush1.bf16.msra.mxu0 %v15422_v9  ;;  %13919 = vmatpush1.bf16.msra.mxu1 %v15424_v10  ;;  %v841_v9 = vld [vmem:[%s17868_s30 + $0x10f0] sm:$0xff]  ;;  %v838_v10 = vld [vmem:[%s17868_s30 + $0x10d8] sm:$0xff] }
 0x553   : > { %13305 = vmatprep.subr.bf16.mxu0 %v15431_v11  ;;  %13920 = vmatprep.subr.bf16.mxu1 %v15433_v12  ;;  %v842_v11 = vld [vmem:[%s17868_s30 + $0x10f8] sm:$0xff]  ;;  %v15464_v12 = vcombine.low %v830_v62, %v834_v63  ;;  %v15471_v24 = vcombine.high %v837_v6, %v841_v9  ;;  %v873_v62 = vld [vmem:[%s17868_s30 + $0x11f0] sm:$0xff] }
 0x554   : > { %v15473_v14 = vcombine.high %v838_v10, %v842_v11  ;;  %v870_v63 = vld [vmem:[%s17868_s30 + $0x11d8] sm:$0xff] }
 0x556   : > { %13306 = vmatpush1.bf16.msra.mxu0 %v15430_v19  ;;  %13921 = vmatpush1.bf16.msra.mxu1 %v15432_v54  ;;  %v846_v19 = vld [vmem:[%s17868_s30 + $0x1118] sm:$0xff] }
 0x557   : > { %13307 = vmatprep.subr.bf16.mxu0 %v15439_v27  ;;  %13922 = vmatprep.subr.bf16.mxu1 %v15441_v23  ;;  %v850_v54 = vld [vmem:[%s17868_s30 + $0x1138] sm:$0xff]  ;;  %v15470_v27 = vcombine.low %v837_v6, %v841_v9  ;;  %v15479_v23 = vcombine.high %v845_v15, %v849_v18  ;;  %v877_v9 = vld [vmem:[%s17868_s30 + $0x1210] sm:$0xff] }
 0x558   : > { %v15481_v31 = vcombine.high %v846_v19, %v850_v54 }
 0x55a   : > { %13308 = vmatpush1.bf16.msra.mxu0 %v15438_v36  ;;  %13923 = vmatpush1.bf16.msra.mxu1 %v15440_v16  ;;  %v858_v36 = vld [vmem:[%s17868_s30 + $0x1178] sm:$0xff]  ;;  %v15478_v16 = vcombine.low %v845_v15, %v849_v18  ;;  %v885_v18 = vld [vmem:[%s17868_s30 + $0x1250] sm:$0xff] }
 0x55b   : > { %13318 = vmatprep.subr.bf16.mxu0 %v15447_v38  ;;  %13933 = vmatprep.subr.bf16.mxu1 %v15449_v37  ;;  %v15480_v38 = vcombine.low %v846_v19, %v850_v54  ;;  %v15487_v37 = vcombine.high %v853_v33, %v857_v35  ;;  %v15489_v39 = vcombine.high %v854_v58, %v858_v36  ;;  %v889_v19 = vld [vmem:[%s17868_s30 + $0x1270] sm:$0xff]  ;;  %v886_v54 = vld [vmem:[%s17868_s30 + $0x1258] sm:$0xff] }
 0x55d   : > { %13310 = vmatmul.mubr.bf16.vlgmr.msra.gmra.mrb[4].mxu0 %v18199_v56  ;;  %13925 = vmatmul.mubr.bf16.vlgmr.msra.gmra.mrb[4].mxu1 %v18199_v56  ;;  %v15462_v56 = vcombine.low %v829_v26, %v833_v61  ;;  %v869_v61 = vld [vmem:[%s17868_s30 + $0x11d0] sm:$0xff] }
 0x55e   : > { %13319 = vmatpush1.bf16.msra.mxu0 %v15446_v44  ;;  %13934 = vmatpush1.bf16.msra.mxu1 %v15448_v48  ;;  %v866_v44 = vld [vmem:[%s17868_s30 + $0x11b8] sm:$0xff]  ;;  %v15486_v48 = vcombine.low %v853_v33, %v857_v35  ;;  %v893_v35 = vld [vmem:[%s17868_s30 + $0x1290] sm:$0xff] }
 0x55f   : > { %13320 = vmatprep.subr.bf16.mxu0 %v15455_v53  ;;  %13935 = vmatprep.subr.bf16.mxu1 %v15457_v57  ;;  %v15488_v53 = vcombine.low %v854_v58, %v858_v36  ;;  %v15495_v57 = vcombine.high %v861_v41, %v865_v42  ;;  %v15497_v26 = vcombine.high %v862_v43, %v866_v44  ;;  %v897_v58 = vld [vmem:[%s17868_s30 + $0x12b0] sm:$0xff]  ;;  %v894_v36 = vld [vmem:[%s17868_s30 + $0x1298] sm:$0xff] }
 0x560   : > { %13350 = vmatprep.mubr.bf16.mxu0 %v18210_v40  ;;  %13965 = vmatprep.mubr.bf16.mxu1 %v18210_v40  ;;  %v15472_v40 = vcombine.low %v838_v10, %v842_v11  ;;  %v881_v10 = vld [vmem:[%s17868_s30 + $0x1230] sm:$0xff]  ;;  %v878_v11 = vld [vmem:[%s17868_s30 + $0x1218] sm:$0xff] }
 0x562   : > { %13321 = vmatpush1.bf16.msra.mxu0 %v15454_v13  ;;  %13936 = vmatpush1.bf16.msra.mxu1 %v15456_v0  ;;  %v874_v13 = vld [vmem:[%s17868_s30 + $0x11f8] sm:$0xff]  ;;  %v15494_v0 = vcombine.low %v861_v41, %v865_v42  ;;  %v901_v42 = vld [vmem:[%s17868_s30 + $0x12d0] sm:$0xff] }
 0x563   : > { %13322 = vmatprep.subr.bf16.mxu0 %v15463_v3  ;;  %13937 = vmatprep.subr.bf16.mxu1 %v15465_v7  ;;  %v15496_v3 = vcombine.low %v862_v43, %v866_v44  ;;  %v15503_v7 = vcombine.high %v869_v61, %v873_v62  ;;  %v15505_v6 = vcombine.high %v870_v63, %v874_v13  ;;  %v905_v43 = vld [vmem:[%s17868_s30 + $0x12f0] sm:$0xff]  ;;  %v902_v44 = vld [vmem:[%s17868_s30 + $0x12d8] sm:$0xff] }
 0x566   : > { %13323 = vmatpush1.bf16.msra.mxu0 %v15462_v56  ;;  %13938 = vmatpush1.bf16.msra.mxu1 %v15464_v12  ;;  %v882_v56 = vld [vmem:[%s17868_s30 + $0x1238] sm:$0xff]  ;;  %v15502_v12 = vcombine.low %v869_v61, %v873_v62  ;;  %v909_v62 = vld [vmem:[%s17868_s30 + $0x1310] sm:$0xff] }
 0x567   : > { %13324 = vmatprep.subr.bf16.mxu0 %v15471_v24  ;;  %13939 = vmatprep.subr.bf16.mxu1 %v15473_v14  ;;  %v15504_v24 = vcombine.low %v870_v63, %v874_v13  ;;  %v15511_v14 = vcombine.high %v877_v9, %v881_v10  ;;  %v15513_v15 = vcombine.high %v878_v11, %v882_v56  ;;  %v913_v63 = vld [vmem:[%s17868_s30 + $0x1330] sm:$0xff]  ;;  %v910_v13 = vld [vmem:[%s17868_s30 + $0x1318] sm:$0xff] }
 0x56a   : > { %13325 = vmatpush1.bf16.msra.mxu0 %v15470_v27  ;;  %13940 = vmatpush1.bf16.msra.mxu1 %v15472_v40  ;;  %v890_v27 = vld [vmem:[%s17868_s30 + $0x1278] sm:$0xff]  ;;  %v15510_v40 = vcombine.low %v877_v9, %v881_v10  ;;  %v917_v10 = vld [vmem:[%s17868_s30 + $0x1350] sm:$0xff] }
 0x56b   : > { %13326 = vmatprep.subr.bf16.mxu0 %v15479_v23  ;;  %13941 = vmatprep.subr.bf16.mxu1 %v15481_v31  ;;  %v15512_v23 = vcombine.low %v878_v11, %v882_v56  ;;  %v15519_v31 = vcombine.high %v885_v18, %v889_v19  ;;  %v15521_v33 = vcombine.high %v886_v54, %v890_v27  ;;  %v921_v11 = vld [vmem:[%s17868_s30 + $0x1370] sm:$0xff]  ;;  %v918_v56 = vld [vmem:[%s17868_s30 + $0x1358] sm:$0xff] }
 0x56e   : > { %13327 = vmatpush1.bf16.msra.mxu0 %v15478_v16  ;;  %13942 = vmatpush1.bf16.msra.mxu1 %v15480_v38  ;;  %v898_v16 = vld [vmem:[%s17868_s30 + $0x12b8] sm:$0xff]  ;;  %v15518_v38 = vcombine.low %v885_v18, %v889_v19  ;;  %v925_v19 = vld [vmem:[%s17868_s30 + $0x1390] sm:$0xff] }
 0x56f   : > { %13328 = vmatprep.subr.bf16.mxu0 %v15487_v37  ;;  %13943 = vmatprep.subr.bf16.mxu1 %v15489_v39  ;;  %v15520_v37 = vcombine.low %v886_v54, %v890_v27  ;;  %v15527_v39 = vcombine.high %v893_v35, %v897_v58  ;;  %v15529_v41 = vcombine.high %v894_v36, %v898_v16  ;;  %v929_v54 = vld [vmem:[%s17868_s30 + $0x13b0] sm:$0xff]  ;;  %v926_v27 = vld [vmem:[%s17868_s30 + $0x1398] sm:$0xff] }
 0x572   : > { %13329 = vmatpush1.bf16.msra.mxu0 %v15486_v48  ;;  %13944 = vmatpush1.bf16.msra.mxu1 %v15488_v53  ;;  %v906_v48 = vld [vmem:[%s17868_s30 + $0x12f8] sm:$0xff]  ;;  %v15526_v53 = vcombine.low %v893_v35, %v897_v58  ;;  %v933_v58 = vld [vmem:[%s17868_s30 + $0x13d0] sm:$0xff] }
 0x573   : > { %13330 = vmatprep.subr.bf16.mxu0 %v15495_v57  ;;  %13945 = vmatprep.subr.bf16.mxu1 %v15497_v26  ;;  %v15528_v57 = vcombine.low %v894_v36, %v898_v16  ;;  %v15535_v26 = vcombine.high %v901_v42, %v905_v43  ;;  %v15537_v61 = vcombine.high %v902_v44, %v906_v48  ;;  %v937_v36 = vld [vmem:[%s17868_s30 + $0x13f0] sm:$0xff]  ;;  %v934_v16 = vld [vmem:[%s17868_s30 + $0x13d8] sm:$0xff] }
 0x576   : > { %13331 = vmatpush1.bf16.msra.mxu0 %v15494_v0  ;;  %13946 = vmatpush1.bf16.msra.mxu1 %v15496_v3  ;;  %v914_v0 = vld [vmem:[%s17868_s30 + $0x1338] sm:$0xff]  ;;  %v15534_v3 = vcombine.low %v901_v42, %v905_v43  ;;  %v941_v43 = vld [vmem:[%s17868_s30 + $0x1410] sm:$0xff] }
 0x577   : > { %13332 = vmatprep.subr.bf16.mxu0 %v15503_v7  ;;  %13947 = vmatprep.subr.bf16.mxu1 %v15505_v6  ;;  %v15536_v7 = vcombine.low %v902_v44, %v906_v48  ;;  %v15543_v6 = vcombine.high %v909_v62, %v913_v63  ;;  %v15545_v9 = vcombine.high %v910_v13, %v914_v0  ;;  %v945_v44 = vld [vmem:[%s17868_s30 + $0x1430] sm:$0xff]  ;;  %v942_v48 = vld [vmem:[%s17868_s30 + $0x1418] sm:$0xff] }
 0x57a   : > { %13333 = vmatpush1.bf16.msra.mxu0 %v15502_v12  ;;  %13948 = vmatpush1.bf16.msra.mxu1 %v15504_v24  ;;  %v922_v12 = vld [vmem:[%s17868_s30 + $0x1378] sm:$0xff]  ;;  %v15542_v24 = vcombine.low %v909_v62, %v913_v63  ;;  %v949_v63 = vld [vmem:[%s17868_s30 + $0x1450] sm:$0xff] }
 0x57b   : > { %13334 = vmatprep.subr.bf16.mxu0 %v15511_v14  ;;  %13949 = vmatprep.subr.bf16.mxu1 %v15513_v15  ;;  %v15544_v14 = vcombine.low %v910_v13, %v914_v0  ;;  %v15551_v15 = vcombine.high %v917_v10, %v921_v11  ;;  %v15553_v18 = vcombine.high %v918_v56, %v922_v12  ;;  %v953_v13 = vld [vmem:[%s17868_s30 + $0x1470] sm:$0xff]  ;;  %v950_v0 = vld [vmem:[%s17868_s30 + $0x1458] sm:$0xff] }
 0x57e   : > { %13335 = vmatpush1.bf16.msra.mxu0 %v15510_v40  ;;  %13950 = vmatpush1.bf16.msra.mxu1 %v15512_v23  ;;  %v930_v40 = vld [vmem:[%s17868_s30 + $0x13b8] sm:$0xff]  ;;  %v15550_v23 = vcombine.low %v917_v10, %v921_v11  ;;  %v957_v11 = vld [vmem:[%s17868_s30 + $0x1490] sm:$0xff] }
 0x57f   : > { %13336 = vmatprep.subr.bf16.mxu0 %v15519_v31  ;;  %13951 = vmatprep.subr.bf16.mxu1 %v15521_v33  ;;  %v15552_v31 = vcombine.low %v918_v56, %v922_v12  ;;  %v15559_v33 = vcombine.high %v925_v19, %v929_v54  ;;  %v15561_v35 = vcombine.high %v926_v27, %v930_v40  ;;  %v961_v56 = vld [vmem:[%s17868_s30 + $0x14b0] sm:$0xff]  ;;  %v958_v12 = vld [vmem:[%s17868_s30 + $0x1498] sm:$0xff] }
 0x582   : > { %13337 = vmatpush1.bf16.msra.mxu0 %v15518_v38  ;;  %13952 = vmatpush1.bf16.msra.mxu1 %v15520_v37  ;;  %v938_v38 = vld [vmem:[%s17868_s30 + $0x13f8] sm:$0xff]  ;;  %v15558_v37 = vcombine.low %v925_v19, %v929_v54  ;;  %v965_v54 = vld [vmem:[%s17868_s30 + $0x14d0] sm:$0xff] }
 0x583   : > { %13338 = vmatprep.subr.bf16.mxu0 %v15527_v39  ;;  %13953 = vmatprep.subr.bf16.mxu1 %v15529_v41  ;;  %v15560_v39 = vcombine.low %v926_v27, %v930_v40  ;;  %v15567_v41 = vcombine.high %v933_v58, %v937_v36  ;;  %v15569_v42 = vcombine.high %v934_v16, %v938_v38  ;;  %v969_v27 = vld [vmem:[%s17868_s30 + $0x14f0] sm:$0xff]  ;;  %v966_v40 = vld [vmem:[%s17868_s30 + $0x14d8] sm:$0xff] }
 0x586   : > { %13339 = vmatpush1.bf16.msra.mxu0 %v15526_v53  ;;  %13954 = vmatpush1.bf16.msra.mxu1 %v15528_v57  ;;  %v946_v53 = vld [vmem:[%s17868_s30 + $0x1438] sm:$0xff]  ;;  %v15566_v57 = vcombine.low %v933_v58, %v937_v36  ;;  %v973_v58 = vld [vmem:[%s17868_s30 + $0x1510] sm:$0xff] }
 0x587   : > { %13340 = vmatprep.subr.bf16.mxu0 %v15535_v26  ;;  %13955 = vmatprep.subr.bf16.mxu1 %v15537_v61  ;;  %v15568_v26 = vcombine.low %v934_v16, %v938_v38  ;;  %v15575_v61 = vcombine.high %v941_v43, %v945_v44  ;;  %v15577_v62 = vcombine.high %v942_v48, %v946_v53  ;;  %v977_v36 = vld [vmem:[%s17868_s30 + $0x1530] sm:$0xff]  ;;  %v974_v16 = vld [vmem:[%s17868_s30 + $0x1518] sm:$0xff] }
 0x588   : > { %v978_v38 = vld [vmem:[%s17868_s30 + $0x1538] sm:$0xff] }
 0x58a   : > { %13341 = vmatpush1.bf16.msra.mxu0 %v15534_v3  ;;  %13956 = vmatpush1.bf16.msra.mxu1 %v15536_v7  ;;  %v954_v3 = vld [vmem:[%s17868_s30 + $0x1478] sm:$0xff]  ;;  %v15574_v7 = vcombine.low %v941_v43, %v945_v44  ;;  %v985_v43 = vld [vmem:[%s17868_s30 + $0x1570] sm:$0xff] }
 0x58b   : > { %13342 = vmatprep.subr.bf16.mxu0 %v15543_v6  ;;  %13957 = vmatprep.subr.bf16.mxu1 %v15545_v9  ;;  %v15576_v6 = vcombine.low %v942_v48, %v946_v53  ;;  %v15583_v9 = vcombine.high %v949_v63, %v953_v13  ;;  %v15585_v10 = vcombine.high %v950_v0, %v954_v3  ;;  %v982_v44 = vld [vmem:[%s17868_s30 + $0x1558] sm:$0xff] }
 0x58c   : > { %v986_v48 = vld [vmem:[%s17868_s30 + $0x1578] sm:$0xff]  ;;  %v15606_v53 = vcombine.low %v973_v58, %v977_v36 }
 0x58e   : > { %13343 = vmatpush1.bf16.msra.mxu0 %v15542_v24  ;;  %13958 = vmatpush1.bf16.msra.mxu1 %v15544_v14  ;;  %v962_v24 = vld [vmem:[%s17868_s30 + $0x14b8] sm:$0xff]  ;;  %v15582_v14 = vcombine.low %v949_v63, %v953_v13  ;;  %v993_v63 = vld [vmem:[%s17868_s30 + $0x15b0] sm:$0xff] }
 0x58f   : > { %13344 = vmatprep.subr.bf16.mxu0 %v15551_v15  ;;  %13959 = vmatprep.subr.bf16.mxu1 %v15553_v18  ;;  %v15584_v15 = vcombine.low %v950_v0, %v954_v3  ;;  %v15591_v18 = vcombine.high %v957_v11, %v961_v56  ;;  %v15593_v19 = vcombine.high %v958_v12, %v962_v24  ;;  %v990_v13 = vld [vmem:[%s17868_s30 + $0x1598] sm:$0xff] }
 0x590   : > { %v994_v0 = vld [vmem:[%s17868_s30 + $0x15b8] sm:$0xff] }
 0x592   : > { %13345 = vmatpush1.bf16.msra.mxu0 %v15550_v23  ;;  %13960 = vmatpush1.bf16.msra.mxu1 %v15552_v31  ;;  %v970_v23 = vld [vmem:[%s17868_s30 + $0x14f8] sm:$0xff]  ;;  %v15592_v31 = vcombine.low %v958_v12, %v962_v24 }
 0x593   : > { %13346 = vmatprep.subr.bf16.mxu0 %v15559_v33  ;;  %13961 = vmatprep.subr.bf16.mxu1 %v15561_v35  ;;  %v15599_v33 = vcombine.high %v965_v54, %v969_v27  ;;  %v15601_v35 = vcombine.high %v966_v40, %v970_v23  ;;  %v1002_v12 = vld [vmem:[%s17868_s30 + $0x15f8] sm:$0xff] }
 0x596   : > { %13347 = vmatpush1.bf16.msra.mxu0 %v15558_v37  ;;  %13962 = vmatpush1.bf16.msra.mxu1 %v15560_v39  ;;  %v15598_v37 = vcombine.low %v965_v54, %v969_v27  ;;  %v15607_v39 = vcombine.high %v973_v58, %v977_v36  ;;  %v1009_v54 = vld [vmem:[%s17868_s30 + $0x1630] sm:$0xff]  ;;  %v1006_v27 = vld [vmem:[%s17868_s30 + $0x1618] sm:$0xff] }
 0x597   : > { %13348 = vmatprep.subr.bf16.mxu0 %v15567_v41  ;;  %13963 = vmatprep.subr.bf16.mxu1 %v15569_v42  ;;  %v15609_v41 = vcombine.high %v974_v16, %v978_v38  ;;  %v981_v42 = vld [vmem:[%s17868_s30 + $0x1550] sm:$0xff]  ;;  %v1014_v36 = vld [vmem:[%s17868_s30 + $0x1658] sm:$0xff] }
 0x598   : > { %v15614_v3 = vcombine.low %v981_v42, %v985_v43  ;;  %v1017_v58 = vld [vmem:[%s17868_s30 + $0x1670] sm:$0xff] }
 0x59a   : > { %13349 = vmatpush1.bf16.msra.mxu0 %v15566_v57  ;;  %13964 = vmatpush1.bf16.msra.mxu1 %v15568_v26  ;;  %v15608_v57 = vcombine.low %v974_v16, %v978_v38  ;;  %v15615_v26 = vcombine.high %v981_v42, %v985_v43  ;;  %v1018_v16 = vld [vmem:[%s17868_s30 + $0x1678] sm:$0xff]  ;;  %v1025_v42 = vld [vmem:[%s17868_s30 + $0x16b0] sm:$0xff] }
 0x59b   : > { %13359 = vmatprep.subr.bf16.mxu0 %v15575_v61  ;;  %13974 = vmatprep.subr.bf16.mxu1 %v15577_v62  ;;  %v15617_v61 = vcombine.high %v982_v44, %v986_v48  ;;  %v989_v62 = vld [vmem:[%s17868_s30 + $0x1590] sm:$0xff]  ;;  %v1022_v43 = vld [vmem:[%s17868_s30 + $0x1698] sm:$0xff] }
 0x59c   : > { %v15622_v24 = vcombine.low %v989_v62, %v993_v63 }
 0x59d   : > { %13351 = vmatmul.mubr.bf16.vlgmr.msra.gmra.mrb[4].mxu0 %v18278_v17  ;;  %13966 = vmatmul.mubr.bf16.vlgmr.msra.gmra.mrb[4].mxu1 %v18278_v17  ;;  %v15590_v17 = vcombine.low %v957_v11, %v961_v56  ;;  %v1001_v11 = vld [vmem:[%s17868_s30 + $0x15f0] sm:$0xff]  ;;  %v998_v56 = vld [vmem:[%s17868_s30 + $0x15d8] sm:$0xff] }
 0x59e   : > { %13360 = vmatpush1.bf16.msra.mxu0 %v15574_v7  ;;  %13975 = vmatpush1.bf16.msra.mxu1 %v15576_v6  ;;  %v15616_v7 = vcombine.low %v982_v44, %v986_v48  ;;  %v15623_v6 = vcombine.high %v989_v62, %v993_v63  ;;  %v1026_v44 = vld [vmem:[%s17868_s30 + $0x16b8] sm:$0xff]  ;;  %v1033_v62 = vld [vmem:[%s17868_s30 + $0x16f0] sm:$0xff] }
 0x59f   : > { %13361 = vmatprep.subr.bf16.mxu0 %v15583_v9  ;;  %13976 = vmatprep.subr.bf16.mxu1 %v15585_v10  ;;  %v15625_v9 = vcombine.high %v990_v13, %v994_v0  ;;  %v997_v10 = vld [vmem:[%s17868_s30 + $0x15d0] sm:$0xff]  ;;  %v1030_v63 = vld [vmem:[%s17868_s30 + $0x16d8] sm:$0xff] }
 0x5a0   : > { %13391 = vmatprep.mubr.bf16.mxu0 %v18289_v60  ;;  %14006 = vmatprep.mubr.bf16.mxu1 %v18289_v60  ;;  %v15600_v60 = vcombine.low %v966_v40, %v970_v23  ;;  %v1010_v40 = vld [vmem:[%s17868_s30 + $0x1638] sm:$0xff]  ;;  %v15630_v23 = vcombine.low %v997_v10, %v1001_v11 }
 0x5a2   : > { %13362 = vmatpush1.bf16.msra.mxu0 %v15582_v14  ;;  %13977 = vmatpush1.bf16.msra.mxu1 %v15584_v15  ;;  %v15624_v14 = vcombine.low %v990_v13, %v994_v0  ;;  %v15631_v15 = vcombine.high %v997_v10, %v1001_v11  ;;  %v1034_v13 = vld [vmem:[%s17868_s30 + $0x16f8] sm:$0xff]  ;;  %v1041_v10 = vld [vmem:[%s17868_s30 + $0x1730] sm:$0xff] }
 0x5a3   : > { %13363 = vmatprep.subr.bf16.mxu0 %v15591_v18  ;;  %13978 = vmatprep.subr.bf16.mxu1 %v15593_v19  ;;  %v15633_v18 = vcombine.high %v998_v56, %v1002_v12  ;;  %v1005_v19 = vld [vmem:[%s17868_s30 + $0x1610] sm:$0xff]  ;;  %v1038_v11 = vld [vmem:[%s17868_s30 + $0x1718] sm:$0xff] }
 0x5a4   : > { %v15638_v38 = vcombine.low %v1005_v19, %v1009_v54 }
 0x5a6   : > { %13364 = vmatpush1.bf16.msra.mxu0 %v15590_v17  ;;  %13979 = vmatpush1.bf16.msra.mxu1 %v15592_v31  ;;  %v15632_v17 = vcombine.low %v998_v56, %v1002_v12  ;;  %v15639_v31 = vcombine.high %v1005_v19, %v1009_v54  ;;  %v1042_v56 = vld [vmem:[%s17868_s30 + $0x1738] sm:$0xff]  ;;  %v1049_v19 = vld [vmem:[%s17868_s30 + $0x1770] sm:$0xff] }
 0x5a7   : > { %13365 = vmatprep.subr.bf16.mxu0 %v15599_v33  ;;  %13980 = vmatprep.subr.bf16.mxu1 %v15601_v35  ;;  %v15641_v33 = vcombine.high %v1006_v27, %v1010_v40  ;;  %v1013_v35 = vld [vmem:[%s17868_s30 + $0x1650] sm:$0xff]  ;;  %v1046_v54 = vld [vmem:[%s17868_s30 + $0x1758] sm:$0xff] }
 0x5a8   : > { %v15646_v48 = vcombine.low %v1013_v35, %v1017_v58 }
 0x5aa   : > { %13366 = vmatpush1.bf16.msra.mxu0 %v15598_v37  ;;  %13981 = vmatpush1.bf16.msra.mxu1 %v15600_v60  ;;  %v15640_v37 = vcombine.low %v1006_v27, %v1010_v40  ;;  %v15647_v60 = vcombine.high %v1013_v35, %v1017_v58  ;;  %v1050_v27 = vld [vmem:[%s17868_s30 + $0x1778] sm:$0xff]  ;;  %v1057_v35 = vld [vmem:[%s17868_s30 + $0x17b0] sm:$0xff] }
 0x5ab   : > { %13367 = vmatprep.subr.bf16.mxu0 %v15607_v39  ;;  %13982 = vmatprep.subr.bf16.mxu1 %v15609_v41  ;;  %v15649_v39 = vcombine.high %v1014_v36, %v1018_v16  ;;  %v1021_v41 = vld [vmem:[%s17868_s30 + $0x1690] sm:$0xff]  ;;  %v1054_v58 = vld [vmem:[%s17868_s30 + $0x1798] sm:$0xff] }
 0x5ac   : > { %v15654_v0 = vcombine.low %v1021_v41, %v1025_v42 }
 0x5ae   : > { %13368 = vmatpush1.bf16.msra.mxu0 %v15606_v53  ;;  %13983 = vmatpush1.bf16.msra.mxu1 %v15608_v57  ;;  %v15648_v53 = vcombine.low %v1014_v36, %v1018_v16  ;;  %v15655_v57 = vcombine.high %v1021_v41, %v1025_v42  ;;  %v1058_v36 = vld [vmem:[%s17868_s30 + $0x17b8] sm:$0xff]  ;;  %v1065_v41 = vld [vmem:[%s17868_s30 + $0x17f0] sm:$0xff] }
 0x5af   : > { %13369 = vmatprep.subr.bf16.mxu0 %v15615_v26  ;;  %13984 = vmatprep.subr.bf16.mxu1 %v15617_v61  ;;  %v15657_v26 = vcombine.high %v1022_v43, %v1026_v44  ;;  %v1029_v61 = vld [vmem:[%s17868_s30 + $0x16d0] sm:$0xff]  ;;  %v1062_v42 = vld [vmem:[%s17868_s30 + $0x17d8] sm:$0xff] }
 0x5b0   : > { %v15662_v12 = vcombine.low %v1029_v61, %v1033_v62 }
 0x5b2   : > { %13370 = vmatpush1.bf16.msra.mxu0 %v15614_v3  ;;  %13985 = vmatpush1.bf16.msra.mxu1 %v15616_v7  ;;  %v15656_v3 = vcombine.low %v1022_v43, %v1026_v44  ;;  %v15663_v7 = vcombine.high %v1029_v61, %v1033_v62  ;;  %v1066_v43 = vld [vmem:[%s17868_s30 + $0x17f8] sm:$0xff]  ;;  %v1073_v61 = vld [vmem:[%s17868_s30 + $0x1830] sm:$0xff] }
 0x5b3   : > { %13371 = vmatprep.subr.bf16.mxu0 %v15623_v6  ;;  %13986 = vmatprep.subr.bf16.mxu1 %v15625_v9  ;;  %v15665_v6 = vcombine.high %v1030_v63, %v1034_v13  ;;  %v1037_v9 = vld [vmem:[%s17868_s30 + $0x1710] sm:$0xff]  ;;  %v1070_v62 = vld [vmem:[%s17868_s30 + $0x1818] sm:$0xff] }
 0x5b4   : > { %v15670_v40 = vcombine.low %v1037_v9, %v1041_v10 }
 0x5b6   : > { %13372 = vmatpush1.bf16.msra.mxu0 %v15622_v24  ;;  %13987 = vmatpush1.bf16.msra.mxu1 %v15624_v14  ;;  %v15664_v24 = vcombine.low %v1030_v63, %v1034_v13  ;;  %v15671_v14 = vcombine.high %v1037_v9, %v1041_v10  ;;  %v1074_v63 = vld [vmem:[%s17868_s30 + $0x1838] sm:$0xff]  ;;  %v1081_v9 = vld [vmem:[%s17868_s30 + $0x1870] sm:$0xff] }
 0x5b7   : > { %13373 = vmatprep.subr.bf16.mxu0 %v15631_v15  ;;  %13988 = vmatprep.subr.bf16.mxu1 %v15633_v18  ;;  %v15673_v15 = vcombine.high %v1038_v11, %v1042_v56  ;;  %v1045_v18 = vld [vmem:[%s17868_s30 + $0x1750] sm:$0xff]  ;;  %v1078_v10 = vld [vmem:[%s17868_s30 + $0x1858] sm:$0xff] }
 0x5b8   : > { %v15678_v16 = vcombine.low %v1045_v18, %v1049_v19 }
 0x5ba   : > { %13374 = vmatpush1.bf16.msra.mxu0 %v15630_v23  ;;  %13989 = vmatpush1.bf16.msra.mxu1 %v15632_v17  ;;  %v15672_v23 = vcombine.low %v1038_v11, %v1042_v56  ;;  %v15679_v17 = vcombine.high %v1045_v18, %v1049_v19  ;;  %v1082_v11 = vld [vmem:[%s17868_s30 + $0x1878] sm:$0xff]  ;;  %v1089_v18 = vld [vmem:[%s17868_s30 + $0x18b0] sm:$0xff] }
 0x5bb   : > { %13375 = vmatprep.subr.bf16.mxu0 %v15639_v31  ;;  %13990 = vmatprep.subr.bf16.mxu1 %v15641_v33  ;;  %v15681_v31 = vcombine.high %v1046_v54, %v1050_v27  ;;  %v1053_v33 = vld [vmem:[%s17868_s30 + $0x1790] sm:$0xff]  ;;  %v1086_v19 = vld [vmem:[%s17868_s30 + $0x1898] sm:$0xff] }
 0x5bc   : > { %v15686_v44 = vcombine.low %v1053_v33, %v1057_v35 }
 0x5be   : > { %13376 = vmatpush1.bf16.msra.mxu0 %v15638_v38  ;;  %13991 = vmatpush1.bf16.msra.mxu1 %v15640_v37  ;;  %v15680_v38 = vcombine.low %v1046_v54, %v1050_v27  ;;  %v15687_v37 = vcombine.high %v1053_v33, %v1057_v35  ;;  %v1090_v54 = vld [vmem:[%s17868_s30 + $0x18b8] sm:$0xff]  ;;  %v1097_v33 = vld [vmem:[%s17868_s30 + $0x18f0] sm:$0xff] }
 0x5bf   : > { %13377 = vmatprep.subr.bf16.mxu0 %v15647_v60  ;;  %13992 = vmatprep.subr.bf16.mxu1 %v15649_v39  ;;  %v15689_v60 = vcombine.high %v1054_v58, %v1058_v36  ;;  %v1061_v39 = vld [vmem:[%s17868_s30 + $0x17d0] sm:$0xff]  ;;  %v1094_v35 = vld [vmem:[%s17868_s30 + $0x18d8] sm:$0xff] }
 0x5c0   : > { %v15694_v13 = vcombine.low %v1061_v39, %v1065_v41 }
 0x5c2   : > { %13378 = vmatpush1.bf16.msra.mxu0 %v15646_v48  ;;  %13993 = vmatpush1.bf16.msra.mxu1 %v15648_v53  ;;  %v15688_v48 = vcombine.low %v1054_v58, %v1058_v36  ;;  %v15695_v53 = vcombine.high %v1061_v39, %v1065_v41  ;;  %v1098_v58 = vld [vmem:[%s17868_s30 + $0x18f8] sm:$0xff]  ;;  %v15720_v36 = vcombine.low %v1086_v19, %v1090_v54 }
 0x5c3   : > { %13379 = vmatprep.subr.bf16.mxu0 %v15655_v57  ;;  %13994 = vmatprep.subr.bf16.mxu1 %v15657_v26  ;;  %v15697_v57 = vcombine.high %v1062_v42, %v1066_v43  ;;  %v1069_v26 = vld [vmem:[%s17868_s30 + $0x1810] sm:$0xff]  ;;  %v1102_v39 = vld [vmem:[%s17868_s30 + $0x1918] sm:$0xff] }
 0x5c4   : > { %v15702_v56 = vcombine.low %v1069_v26, %v1073_v61  ;;  %v1106_v41 = vld [vmem:[%s17868_s30 + $0x1938] sm:$0xff] }
 0x5c6   : > { %13380 = vmatpush1.bf16.msra.mxu0 %v15654_v0  ;;  %13995 = vmatpush1.bf16.msra.mxu1 %v15656_v3  ;;  %v15696_v0 = vcombine.low %v1062_v42, %v1066_v43  ;;  %v15703_v3 = vcombine.high %v1069_v26, %v1073_v61  ;;  %v1114_v26 = vld [vmem:[%s17868_s30 + $0x1978] sm:$0xff] }
 0x5c7   : > { %13381 = vmatprep.subr.bf16.mxu0 %v15663_v7  ;;  %13996 = vmatprep.subr.bf16.mxu1 %v15665_v6  ;;  %v15705_v7 = vcombine.high %v1070_v62, %v1074_v63  ;;  %v1077_v6 = vld [vmem:[%s17868_s30 + $0x1850] sm:$0xff] }
 0x5c8   : > { %v15710_v27 = vcombine.low %v1077_v6, %v1081_v9 }
 0x5ca   : > { %13382 = vmatpush1.bf16.msra.mxu0 %v15662_v12  ;;  %13997 = vmatpush1.bf16.msra.mxu1 %v15664_v24  ;;  %v15704_v12 = vcombine.low %v1070_v62, %v1074_v63  ;;  %v15711_v24 = vcombine.high %v1077_v6, %v1081_v9  ;;  %v15736_v62 = vcombine.low %v1102_v39, %v1106_v41  ;;  %v1122_v6 = vld [vmem:[%s17868_s30 + $0x19b8] sm:$0xff] }
 0x5cb   : > { %13383 = vmatprep.subr.bf16.mxu0 %v15671_v14  ;;  %13998 = vmatprep.subr.bf16.mxu1 %v15673_v15  ;;  %v15713_v14 = vcombine.high %v1078_v10, %v1082_v11  ;;  %v1085_v15 = vld [vmem:[%s17868_s30 + $0x1890] sm:$0xff] }
 0x5ce   : > { %13384 = vmatpush1.bf16.msra.mxu0 %v15670_v40  ;;  %13999 = vmatpush1.bf16.msra.mxu1 %v15672_v23  ;;  %v15712_v40 = vcombine.low %v1078_v10, %v1082_v11  ;;  %v15719_v23 = vcombine.high %v1085_v15, %v1089_v18 }
 0x5cf   : > { %13385 = vmatprep.subr.bf16.mxu0 %v15679_v17  ;;  %14000 = vmatprep.subr.bf16.mxu1 %v15681_v31  ;;  %v15721_v17 = vcombine.high %v1086_v19, %v1090_v54  ;;  %v1093_v31 = vld [vmem:[%s17868_s30 + $0x18d0] sm:$0xff] }
 0x5d0   : > { %v15726_v42 = vcombine.low %v1093_v31, %v1097_v33 }
 0x5d2   : > { %13386 = vmatpush1.bf16.msra.mxu0 %v15678_v16  ;;  %14001 = vmatpush1.bf16.msra.mxu1 %v15680_v38  ;;  %v15727_v16 = vcombine.high %v1093_v31, %v1097_v33  ;;  %v15729_v38 = vcombine.high %v1094_v35, %v1098_v58  ;;  %v1138_v31 = vld [vmem:[%s17868_s30 + $0x1a38] sm:$0xff] }
 0x5d3   : > { %13387 = vmatprep.subr.bf16.mxu0 %v15687_v37  ;;  %14002 = vmatprep.subr.bf16.mxu1 %v15689_v60  ;;  %v1101_v37 = vld [vmem:[%s17868_s30 + $0x1910] sm:$0xff] }
 0x5d4   : > { %v1105_v60 = vld [vmem:[%s17868_s30 + $0x1930] sm:$0xff] }
 0x5d5   : > { %v15735_v43 = vcombine.high %v1101_v37, %v1105_v60  ;;  %v15734_v61 = vcombine.low %v1101_v37, %v1105_v60  ;;  %v1146_v37 = vld [vmem:[%s17868_s30 + $0x1a78] sm:$0xff] }
 0x5d6   : > { %13388 = vmatpush1.bf16.msra.mxu0 %v15686_v44  ;;  %14003 = vmatpush1.bf16.msra.mxu1 %v15688_v48  ;;  %v15737_v44 = vcombine.high %v1102_v39, %v1106_v41  ;;  %v1109_v48 = vld [vmem:[%s17868_s30 + $0x1950] sm:$0xff] }
 0x5d7   : > { %13389 = vmatprep.subr.bf16.mxu0 %v15695_v53  ;;  %14004 = vmatprep.subr.bf16.mxu1 %v15697_v57  ;;  %v1113_v53 = vld [vmem:[%s17868_s30 + $0x1970] sm:$0xff]  ;;  %v1110_v57 = vld [vmem:[%s17868_s30 + $0x1958] sm:$0xff] }
 0x5d8   : > { %v15743_v63 = vcombine.high %v1109_v48, %v1113_v53  ;;  %v15742_v9 = vcombine.low %v1109_v48, %v1113_v53  ;;  %v15744_v10 = vcombine.low %v1110_v57, %v1114_v26  ;;  %v1154_v48 = vld [vmem:[%s17868_s30 + $0x1ab8] sm:$0xff] }
 0x5da   : > { %13390 = vmatpush1.bf16.msra.mxu0 %v15694_v13  ;;  %14005 = vmatpush1.bf16.msra.mxu1 %v15696_v0  ;;  %v15745_v13 = vcombine.high %v1110_v57, %v1114_v26  ;;  %v1117_v0 = vld [vmem:[%s17868_s30 + $0x1990] sm:$0xff] }
 0x5db   : > { %13400 = vmatprep.subr.bf16.mxu0 %v15703_v3  ;;  %14015 = vmatprep.subr.bf16.mxu1 %v15705_v7  ;;  %v1121_v3 = vld [vmem:[%s17868_s30 + $0x19b0] sm:$0xff]  ;;  %v1118_v7 = vld [vmem:[%s17868_s30 + $0x1998] sm:$0xff] }
 0x5dc   : > { %v15751_v11 = vcombine.high %v1117_v0, %v1121_v3  ;;  %v15752_v19 = vcombine.low %v1118_v7, %v1122_v6 }
 0x5dd   : > { %13392 = vmatmul.mubr.bf16.vlgmr.msra.gmra.mrb[4].mxu0 %v18357_v47  ;;  %14007 = vmatmul.mubr.bf16.vlgmr.msra.gmra.mrb[4].mxu1 %v18357_v47  ;;  %v15718_v47 = vcombine.low %v1085_v15, %v1089_v18  ;;  %v1130_v15 = vld [vmem:[%s17868_s30 + $0x19f8] sm:$0xff]  ;;  %v15750_v18 = vcombine.low %v1117_v0, %v1121_v3 }
 0x5de   : > { %13401 = vmatpush1.bf16.msra.mxu0 %v15702_v56  ;;  %14016 = vmatpush1.bf16.msra.mxu1 %v15704_v12  ;;  %v15753_v56 = vcombine.high %v1118_v7, %v1122_v6  ;;  %v1125_v12 = vld [vmem:[%s17868_s30 + $0x19d0] sm:$0xff]  ;;  %v1162_v0 = vld [vmem:[%s17868_s30 + $0x1af8] sm:$0xff] }
 0x5df   : > { %13402 = vmatprep.subr.bf16.mxu0 %v15711_v24  ;;  %14017 = vmatprep.subr.bf16.mxu1 %v15713_v14  ;;  %v1129_v24 = vld [vmem:[%s17868_s30 + $0x19f0] sm:$0xff]  ;;  %v1126_v14 = vld [vmem:[%s17868_s30 + $0x19d8] sm:$0xff] }
 0x5e0   : > { %13432 = vmatprep.mubr.bf16.mxu0 %v18368_v20  ;;  %14047 = vmatprep.mubr.bf16.mxu1 %v18368_v20  ;;  %v15728_v20 = vcombine.low %v1094_v35, %v1098_v58  ;;  %v15759_v54 = vcombine.high %v1125_v12, %v1129_v24  ;;  %v15758_v33 = vcombine.low %v1125_v12, %v1129_v24  ;;  %v1170_v12 = vld [vmem:[%s17868_s30 + $0x1b38] sm:$0xff] }
 0x5e1   : > { %v15760_v35 = vcombine.low %v1126_v14, %v1130_v15 }
 0x5e2   : > { %13403 = vmatpush1.bf16.msra.mxu0 %v15710_v27  ;;  %14018 = vmatpush1.bf16.msra.mxu1 %v15712_v40  ;;  %v15761_v27 = vcombine.high %v1126_v14, %v1130_v15  ;;  %v1133_v40 = vld [vmem:[%s17868_s30 + $0x1a10] sm:$0xff] }
 0x5e3   : > { %13404 = vmatprep.subr.bf16.mxu0 %v15719_v23  ;;  %14019 = vmatprep.subr.bf16.mxu1 %v15721_v17  ;;  %v1137_v23 = vld [vmem:[%s17868_s30 + $0x1a30] sm:$0xff]  ;;  %v1134_v17 = vld [vmem:[%s17868_s30 + $0x1a18] sm:$0xff] }
 0x5e4   : > { %v15767_v58 = vcombine.high %v1133_v40, %v1137_v23  ;;  %v15766_v60 = vcombine.low %v1133_v40, %v1137_v23  ;;  %v15768_v39 = vcombine.low %v1134_v17, %v1138_v31  ;;  %v1178_v40 = vld [vmem:[%s17868_s30 + $0x1b78] sm:$0xff] }
 0x5e6   : > { %13405 = vmatpush1.bf16.msra.mxu0 %v15718_v47  ;;  %14020 = vmatpush1.bf16.msra.mxu1 %v15720_v36  ;;  %v15769_v47 = vcombine.high %v1134_v17, %v1138_v31  ;;  %v1141_v36 = vld [vmem:[%s17868_s30 + $0x1a50] sm:$0xff] }
 0x5e7   : > { %13406 = vmatprep.subr.bf16.mxu0 %v15727_v16  ;;  %14021 = vmatprep.subr.bf16.mxu1 %v15729_v38  ;;  %v1145_v16 = vld [vmem:[%s17868_s30 + $0x1a70] sm:$0xff]  ;;  %v1142_v38 = vld [vmem:[%s17868_s30 + $0x1a58] sm:$0xff] }
 0x5e8   : > { %v15775_v41 = vcombine.high %v1141_v36, %v1145_v16  ;;  %v15774_v53 = vcombine.low %v1141_v36, %v1145_v16  ;;  %v15776_v57 = vcombine.low %v1142_v38, %v1146_v37  ;;  %v1186_v36 = vld [vmem:[%s17868_s30 + $0x1bb8] sm:$0xff] }
 0x5ea   : > { %13407 = vmatpush1.bf16.msra.mxu0 %v15726_v42  ;;  %14022 = vmatpush1.bf16.msra.mxu1 %v15728_v20  ;;  %v15777_v42 = vcombine.high %v1142_v38, %v1146_v37  ;;  %v1149_v20 = vld [vmem:[%s17868_s30 + $0x1a90] sm:$0xff] }
 0x5eb   : > { %13408 = vmatprep.subr.bf16.mxu0 %v15735_v43  ;;  %14023 = vmatprep.subr.bf16.mxu1 %v15737_v44  ;;  %v1153_v43 = vld [vmem:[%s17868_s30 + $0x1ab0] sm:$0xff]  ;;  %v1150_v44 = vld [vmem:[%s17868_s30 + $0x1a98] sm:$0xff] }
 0x5ec   : > { %v15783_v26 = vcombine.high %v1149_v20, %v1153_v43  ;;  %v15782_v3 = vcombine.low %v1149_v20, %v1153_v43  ;;  %v15784_v7 = vcombine.low %v1150_v44, %v1154_v48  ;;  %v1194_v20 = vld [vmem:[%s17868_s30 + $0x1bf8] sm:$0xff] }
 0x5ee   : > { %13409 = vmatpush1.bf16.msra.mxu0 %v15734_v61  ;;  %14024 = vmatpush1.bf16.msra.mxu1 %v15736_v62  ;;  %v15785_v61 = vcombine.high %v1150_v44, %v1154_v48  ;;  %v1157_v62 = vld [vmem:[%s17868_s30 + $0x1ad0] sm:$0xff] }
 0x5ef   : > { %13410 = vmatprep.subr.bf16.mxu0 %v15743_v63  ;;  %14025 = vmatprep.subr.bf16.mxu1 %v15745_v13  ;;  %v1161_v63 = vld [vmem:[%s17868_s30 + $0x1af0] sm:$0xff]  ;;  %v1158_v13 = vld [vmem:[%s17868_s30 + $0x1ad8] sm:$0xff] }
 0x5f0   : > { %v15791_v6 = vcombine.high %v1157_v62, %v1161_v63  ;;  %v15790_v24 = vcombine.low %v1157_v62, %v1161_v63  ;;  %v15792_v14 = vcombine.low %v1158_v13, %v1162_v0  ;;  %v1202_v62 = vld [vmem:[%s17868_s30 + $0x1c38] sm:$0xff] }
 0x5f2   : > { %13411 = vmatpush1.bf16.msra.mxu0 %v15742_v9  ;;  %14026 = vmatpush1.bf16.msra.mxu1 %v15744_v10  ;;  %v15793_v9 = vcombine.high %v1158_v13, %v1162_v0  ;;  %v1165_v10 = vld [vmem:[%s17868_s30 + $0x1b10] sm:$0xff] }
 0x5f3   : > { %13412 = vmatprep.subr.bf16.mxu0 %v15751_v11  ;;  %14027 = vmatprep.subr.bf16.mxu1 %v15753_v56  ;;  %v1169_v11 = vld [vmem:[%s17868_s30 + $0x1b30] sm:$0xff]  ;;  %v1166_v56 = vld [vmem:[%s17868_s30 + $0x1b18] sm:$0xff] }
 0x5f4   : > { %v15799_v15 = vcombine.high %v1165_v10, %v1169_v11  ;;  %v15798_v23 = vcombine.low %v1165_v10, %v1169_v11  ;;  %v15800_v17 = vcombine.low %v1166_v56, %v1170_v12  ;;  %v1210_v10 = vld [vmem:[%s17868_s30 + $0x1c78] sm:$0xff] }
 0x5f6   : > { %13413 = vmatpush1.bf16.msra.mxu0 %v15750_v18  ;;  %14028 = vmatpush1.bf16.msra.mxu1 %v15752_v19  ;;  %v15801_v18 = vcombine.high %v1166_v56, %v1170_v12  ;;  %v1173_v19 = vld [vmem:[%s17868_s30 + $0x1b50] sm:$0xff] }
 0x5f7   : > { %13414 = vmatprep.subr.bf16.mxu0 %v15759_v54  ;;  %14029 = vmatprep.subr.bf16.mxu1 %v15761_v27  ;;  %v1177_v54 = vld [vmem:[%s17868_s30 + $0x1b70] sm:$0xff]  ;;  %v1174_v27 = vld [vmem:[%s17868_s30 + $0x1b58] sm:$0xff] }
 0x5f8   : > { %v15807_v31 = vcombine.high %v1173_v19, %v1177_v54  ;;  %v15806_v16 = vcombine.low %v1173_v19, %v1177_v54  ;;  %v15808_v38 = vcombine.low %v1174_v27, %v1178_v40  ;;  %v1218_v19 = vld [vmem:[%s17868_s30 + $0x1cb8] sm:$0xff] }
 0x5fa   : > { %13415 = vmatpush1.bf16.msra.mxu0 %v15758_v33  ;;  %14030 = vmatpush1.bf16.msra.mxu1 %v15760_v35  ;;  %v15809_v33 = vcombine.high %v1174_v27, %v1178_v40  ;;  %v1181_v35 = vld [vmem:[%s17868_s30 + $0x1b90] sm:$0xff] }
 0x5fb   : > { %13416 = vmatprep.subr.bf16.mxu0 %v15767_v58  ;;  %14031 = vmatprep.subr.bf16.mxu1 %v15769_v47  ;;  %v1185_v58 = vld [vmem:[%s17868_s30 + $0x1bb0] sm:$0xff]  ;;  %v1182_v47 = vld [vmem:[%s17868_s30 + $0x1b98] sm:$0xff] }
 0x5fc   : > { %v15815_v37 = vcombine.high %v1181_v35, %v1185_v58  ;;  %v15814_v43 = vcombine.low %v1181_v35, %v1185_v58  ;;  %v15816_v44 = vcombine.low %v1182_v47, %v1186_v36  ;;  %v1226_v35 = vld [vmem:[%s17868_s30 + $0x1cf8] sm:$0xff] }
 0x5fe   : > { %13417 = vmatpush1.bf16.msra.mxu0 %v15766_v60  ;;  %14032 = vmatpush1.bf16.msra.mxu1 %v15768_v39  ;;  %v15817_v60 = vcombine.high %v1182_v47, %v1186_v36  ;;  %v1189_v39 = vld [vmem:[%s17868_s30 + $0x1bd0] sm:$0xff] }
 0x5ff   : > { %13418 = vmatprep.subr.bf16.mxu0 %v15775_v41  ;;  %14033 = vmatprep.subr.bf16.mxu1 %v15777_v42  ;;  %v1193_v41 = vld [vmem:[%s17868_s30 + $0x1bf0] sm:$0xff]  ;;  %v1190_v42 = vld [vmem:[%s17868_s30 + $0x1bd8] sm:$0xff] }
 0x600   : > { %v15823_v48 = vcombine.high %v1189_v39, %v1193_v41  ;;  %v15822_v63 = vcombine.low %v1189_v39, %v1193_v41  ;;  %v15824_v13 = vcombine.low %v1190_v42, %v1194_v20 }
 0x602   : > { %13419 = vmatpush1.bf16.msra.mxu0 %v15774_v53  ;;  %14034 = vmatpush1.bf16.msra.mxu1 %v15776_v57  ;;  %v15825_v53 = vcombine.high %v1190_v42, %v1194_v20  ;;  %v1197_v57 = vld [vmem:[%s17868_s30 + $0x1c10] sm:$0xff] }
 0x603   : > { %13420 = vmatprep.subr.bf16.mxu0 %v15783_v26  ;;  %14035 = vmatprep.subr.bf16.mxu1 %v15785_v61  ;;  %v1201_v26 = vld [vmem:[%s17868_s30 + $0x1c30] sm:$0xff]  ;;  %v1198_v61 = vld [vmem:[%s17868_s30 + $0x1c18] sm:$0xff] }
 0x604   : > { %v15831_v0 = vcombine.high %v1197_v57, %v1201_v26  ;;  %v15830_v11 = vcombine.low %v1197_v57, %v1201_v26  ;;  %v15832_v56 = vcombine.low %v1198_v61, %v1202_v62  ;;  %v1237_v20 = vld [vmem:[%s17868_s30 + $0x1d50] sm:$0xff] }
 0x606   : > { %13421 = vmatpush1.bf16.msra.mxu0 %v15782_v3  ;;  %14036 = vmatpush1.bf16.msra.mxu1 %v15784_v7  ;;  %v15833_v3 = vcombine.high %v1198_v61, %v1202_v62  ;;  %v1205_v7 = vld [vmem:[%s17868_s30 + $0x1c50] sm:$0xff] }
 0x607   : > { %13422 = vmatprep.subr.bf16.mxu0 %v15791_v6  ;;  %14037 = vmatprep.subr.bf16.mxu1 %v15793_v9  ;;  %v1209_v6 = vld [vmem:[%s17868_s30 + $0x1c70] sm:$0xff]  ;;  %v1206_v9 = vld [vmem:[%s17868_s30 + $0x1c58] sm:$0xff] }
 0x608   : > { %v15839_v12 = vcombine.high %v1205_v7, %v1209_v6  ;;  %v15838_v54 = vcombine.low %v1205_v7, %v1209_v6  ;;  %v15840_v27 = vcombine.low %v1206_v9, %v1210_v10  ;;  %v1245_v62 = vld [vmem:[%s17868_s30 + $0x1d90] sm:$0xff] }
 0x60a   : > { %13423 = vmatpush1.bf16.msra.mxu0 %v15790_v24  ;;  %14038 = vmatpush1.bf16.msra.mxu1 %v15792_v14  ;;  %v15841_v24 = vcombine.high %v1206_v9, %v1210_v10  ;;  %v1213_v14 = vld [vmem:[%s17868_s30 + $0x1c90] sm:$0xff] }
 0x60b   : > { %13424 = vmatprep.subr.bf16.mxu0 %v15799_v15  ;;  %14039 = vmatprep.subr.bf16.mxu1 %v15801_v18  ;;  %v1217_v15 = vld [vmem:[%s17868_s30 + $0x1cb0] sm:$0xff]  ;;  %v1214_v18 = vld [vmem:[%s17868_s30 + $0x1c98] sm:$0xff] }
 0x60c   : > { %v15847_v40 = vcombine.high %v1213_v14, %v1217_v15  ;;  %v15848_v58 = vcombine.low %v1214_v18, %v1218_v19  ;;  %v1253_v10 = vld [vmem:[%s17868_s30 + $0x1dd0] sm:$0xff] }
 0x60e   : > { %13425 = vmatpush1.bf16.msra.mxu0 %v15798_v23  ;;  %14040 = vmatpush1.bf16.msra.mxu1 %v15800_v17  ;;  %v15849_v23 = vcombine.high %v1214_v18, %v1218_v19  ;;  %v1221_v17 = vld [vmem:[%s17868_s30 + $0x1cd0] sm:$0xff] }
 0x60f   : > { %13426 = vmatprep.subr.bf16.mxu0 %v15807_v31  ;;  %14041 = vmatprep.subr.bf16.mxu1 %v15809_v33  ;;  %v1225_v31 = vld [vmem:[%s17868_s30 + $0x1cf0] sm:$0xff]  ;;  %v1222_v33 = vld [vmem:[%s17868_s30 + $0x1cd8] sm:$0xff] }
 0x610   : > { %v15855_v47 = vcombine.high %v1221_v17, %v1225_v31  ;;  %v15857_v36 = vcombine.high %v1222_v33, %v1226_v35  ;;  %v15854_v39 = vcombine.low %v1221_v17, %v1225_v31  ;;  %v1261_v19 = vld [vmem:[%s17868_s30 + $0x1e10] sm:$0xff] }
 0x612   : > { %13427 = vmatpush1.bf16.msra.mxu0 %v15806_v16  ;;  %14042 = vmatpush1.bf16.msra.mxu1 %v15808_v38  ;;  %v1229_v16 = vld [vmem:[%s17868_s30 + $0x1d10] sm:$0xff] }
 0x613   : > { %13428 = vmatprep.subr.bf16.mxu0 %v15815_v37  ;;  %14043 = vmatprep.subr.bf16.mxu1 %v15817_v60  ;;  %v1233_v38 = vld [vmem:[%s17868_s30 + $0x1d30] sm:$0xff]  ;;  %v1230_v37 = vld [vmem:[%s17868_s30 + $0x1d18] sm:$0xff] }
 0x614   : > { %v1234_v60 = vld [vmem:[%s17868_s30 + $0x1d38] sm:$0xff]  ;;  %v15863_v41 = vcombine.high %v1229_v16, %v1233_v38 }
 0x615   : > { %v15865_v42 = vcombine.high %v1230_v37, %v1234_v60  ;;  %v15864_v57 = vcombine.low %v1230_v37, %v1234_v60  ;;  %v1277_v60 = vld [vmem:[%s17868_s30 + $0x1e90] sm:$0xff] }
 0x616   : > { %13429 = vmatpush1.bf16.msra.mxu0 %v15814_v43  ;;  %14044 = vmatpush1.bf16.msra.mxu1 %v15816_v44  ;;  %v1241_v43 = vld [vmem:[%s17868_s30 + $0x1d70] sm:$0xff]  ;;  %v1238_v44 = vld [vmem:[%s17868_s30 + $0x1d58] sm:$0xff] }
 0x617   : > { %13430 = vmatprep.subr.bf16.mxu0 %v15823_v48  ;;  %14045 = vmatprep.subr.bf16.mxu1 %v15825_v53  ;;  %v1242_v48 = vld [vmem:[%s17868_s30 + $0x1d78] sm:$0xff]  ;;  %v15862_v53 = vcombine.low %v1229_v16, %v1233_v38  ;;  %v15871_v26 = vcombine.high %v1237_v20, %v1241_v43 }
 0x618   : > { %v15873_v61 = vcombine.high %v1238_v44, %v1242_v48  ;;  %v15872_v7 = vcombine.low %v1238_v44, %v1242_v48  ;;  %v1285_v48 = vld [vmem:[%s17868_s30 + $0x1ed0] sm:$0xff] }
 0x61a   : > { %13431 = vmatpush1.bf16.msra.mxu0 %v15822_v63  ;;  %14046 = vmatpush1.bf16.msra.mxu1 %v15824_v13  ;;  %v1249_v63 = vld [vmem:[%s17868_s30 + $0x1db0] sm:$0xff]  ;;  %v1246_v13 = vld [vmem:[%s17868_s30 + $0x1d98] sm:$0xff] }
 0x61b   : > { %13441 = vmatprep.subr.bf16.mxu0 %v15831_v0  ;;  %14056 = vmatprep.subr.bf16.mxu1 %v15833_v3  ;;  %v1250_v0 = vld [vmem:[%s17868_s30 + $0x1db8] sm:$0xff]  ;;  %v15870_v3 = vcombine.low %v1237_v20, %v1241_v43  ;;  %v15879_v6 = vcombine.high %v1245_v62, %v1249_v63 }
 0x61c   : > { %v15881_v9 = vcombine.high %v1246_v13, %v1250_v0 }
 0x61d   : > { %13433 = vmatmul.mubr.bf16.vlgmr.msra.gmra.mrb[4].mxu0 %v18436_v21  ;;  %14048 = vmatmul.mubr.bf16.vlgmr.msra.gmra.mrb[4].mxu1 %v18436_v21  ;;  %v15846_v21 = vcombine.low %v1213_v14, %v1217_v15  ;;  %v15880_v14 = vcombine.low %v1246_v13, %v1250_v0  ;;  %v1293_v0 = vld [vmem:[%s17868_s30 + $0x1f10] sm:$0xff] }
 0x61e   : > { %13442 = vmatpush1.bf16.msra.mxu0 %v15830_v11  ;;  %14057 = vmatpush1.bf16.msra.mxu1 %v15832_v56  ;;  %v1257_v11 = vld [vmem:[%s17868_s30 + $0x1df0] sm:$0xff]  ;;  %v1254_v56 = vld [vmem:[%s17868_s30 + $0x1dd8] sm:$0xff] }
 0x61f   : > { %13443 = vmatprep.subr.bf16.mxu0 %v15839_v12  ;;  %14058 = vmatprep.subr.bf16.mxu1 %v15841_v24  ;;  %v1258_v12 = vld [vmem:[%s17868_s30 + $0x1df8] sm:$0xff]  ;;  %v15878_v24 = vcombine.low %v1245_v62, %v1249_v63  ;;  %v15887_v15 = vcombine.high %v1253_v10, %v1257_v11 }
 0x620   : > { %13473 = vmatprep.mubr.bf16.mxu0 %v18447_v50  ;;  %14088 = vmatprep.mubr.bf16.mxu1 %v18447_v50  ;;  %v15856_v50 = vcombine.low %v1222_v33, %v1226_v35  ;;  %v15889_v18 = vcombine.high %v1254_v56, %v1258_v12  ;;  %v15888_v17 = vcombine.low %v1254_v56, %v1258_v12  ;;  %v1269_v35 = vld [vmem:[%s17868_s30 + $0x1e50] sm:$0xff] }
 0x621   : > { %v1301_v12 = vld [vmem:[%s17868_s30 + $0x1f50] sm:$0xff] }
 0x622   : > { %13444 = vmatpush1.bf16.msra.mxu0 %v15838_v54  ;;  %14059 = vmatpush1.bf16.msra.mxu1 %v15840_v27  ;;  %v1265_v54 = vld [vmem:[%s17868_s30 + $0x1e30] sm:$0xff]  ;;  %v1262_v27 = vld [vmem:[%s17868_s30 + $0x1e18] sm:$0xff] }
 0x623   : > { %13445 = vmatprep.subr.bf16.mxu0 %v15847_v40  ;;  %14060 = vmatprep.subr.bf16.mxu1 %v15849_v23  ;;  %v1266_v40 = vld [vmem:[%s17868_s30 + $0x1e38] sm:$0xff]  ;;  %v15886_v23 = vcombine.low %v1253_v10, %v1257_v11  ;;  %v15895_v31 = vcombine.high %v1261_v19, %v1265_v54 }
 0x624   : > { %v15897_v33 = vcombine.high %v1262_v27, %v1266_v40  ;;  %v15896_v16 = vcombine.low %v1262_v27, %v1266_v40  ;;  %v1309_v40 = vld [vmem:[%s17868_s30 + $0x1f90] sm:$0xff] }
 0x626   : > { %13446 = vmatpush1.bf16.msra.mxu0 %v15846_v21  ;;  %14061 = vmatpush1.bf16.msra.mxu1 %v15848_v58  ;;  %v1273_v21 = vld [vmem:[%s17868_s30 + $0x1e70] sm:$0xff]  ;;  %v1270_v58 = vld [vmem:[%s17868_s30 + $0x1e58] sm:$0xff] }
 0x627   : > { %13447 = vmatprep.subr.bf16.mxu0 %v15855_v47  ;;  %14062 = vmatprep.subr.bf16.mxu1 %v15857_v36  ;;  %v1274_v47 = vld [vmem:[%s17868_s30 + $0x1e78] sm:$0xff]  ;;  %v15894_v36 = vcombine.low %v1261_v19, %v1265_v54  ;;  %v15903_v38 = vcombine.high %v1269_v35, %v1273_v21 }
 0x628   : > { %v15905_v37 = vcombine.high %v1270_v58, %v1274_v47  ;;  %v15904_v20 = vcombine.low %v1270_v58, %v1274_v47  ;;  %v1317_v47 = vld [vmem:[%s17868_s30 + $0x1fd0] sm:$0xff] }
 0x62a   : > { %13448 = vmatpush1.bf16.msra.mxu0 %v15854_v39  ;;  %14063 = vmatpush1.bf16.msra.mxu1 %v15856_v50  ;;  %v1281_v39 = vld [vmem:[%s17868_s30 + $0x1eb0] sm:$0xff]  ;;  %v1278_v50 = vld [vmem:[%s17868_s30 + $0x1e98] sm:$0xff] }
 0x62b   : > { %13449 = vmatprep.subr.bf16.mxu0 %v15863_v41  ;;  %14064 = vmatprep.subr.bf16.mxu1 %v15865_v42  ;;  %v1282_v41 = vld [vmem:[%s17868_s30 + $0x1eb8] sm:$0xff]  ;;  %v15902_v42 = vcombine.low %v1269_v35, %v1273_v21  ;;  %v15911_v43 = vcombine.high %v1277_v60, %v1281_v39 }
 0x62c   : > { %v15913_v44 = vcombine.high %v1278_v50, %v1282_v41  ;;  %v15912_v62 = vcombine.low %v1278_v50, %v1282_v41  ;;  %v1325_v41 = vld [vmem:[%s17868_s30 + $0x2010] sm:$0xff] }
 0x62e   : > { %13450 = vmatpush1.bf16.msra.mxu0 %v15862_v53  ;;  %14065 = vmatpush1.bf16.msra.mxu1 %v15864_v57  ;;  %v1289_v53 = vld [vmem:[%s17868_s30 + $0x1ef0] sm:$0xff]  ;;  %v1286_v57 = vld [vmem:[%s17868_s30 + $0x1ed8] sm:$0xff] }
 0x62f   : > { %13451 = vmatprep.subr.bf16.mxu0 %v15871_v26  ;;  %14066 = vmatprep.subr.bf16.mxu1 %v15873_v61  ;;  %v1290_v26 = vld [vmem:[%s17868_s30 + $0x1ef8] sm:$0xff]  ;;  %v15910_v61 = vcombine.low %v1277_v60, %v1281_v39  ;;  %v15919_v63 = vcombine.high %v1285_v48, %v1289_v53 }
 0x630   : > { %v15921_v13 = vcombine.high %v1286_v57, %v1290_v26  ;;  %v15920_v10 = vcombine.low %v1286_v57, %v1290_v26  ;;  %v1333_v26 = vld [vmem:[%s17868_s30 + $0x2050] sm:$0xff] }
 0x632   : > { %13452 = vmatpush1.bf16.msra.mxu0 %v15870_v3  ;;  %14067 = vmatpush1.bf16.msra.mxu1 %v15872_v7  ;;  %v1297_v3 = vld [vmem:[%s17868_s30 + $0x1f30] sm:$0xff]  ;;  %v1294_v7 = vld [vmem:[%s17868_s30 + $0x1f18] sm:$0xff] }
 0x633   : > { %13453 = vmatprep.subr.bf16.mxu0 %v15879_v6  ;;  %14068 = vmatprep.subr.bf16.mxu1 %v15881_v9  ;;  %v1298_v6 = vld [vmem:[%s17868_s30 + $0x1f38] sm:$0xff]  ;;  %v15918_v9 = vcombine.low %v1285_v48, %v1289_v53  ;;  %v15927_v11 = vcombine.high %v1293_v0, %v1297_v3 }
 0x634   : > { %v15929_v56 = vcombine.high %v1294_v7, %v1298_v6  ;;  %v15928_v19 = vcombine.low %v1294_v7, %v1298_v6  ;;  %v1341_v6 = vld [vmem:[%s17868_s30 + $0x2090] sm:$0xff] }
 0x636   : > { %13454 = vmatpush1.bf16.msra.mxu0 %v15878_v24  ;;  %14069 = vmatpush1.bf16.msra.mxu1 %v15880_v14  ;;  %v1305_v24 = vld [vmem:[%s17868_s30 + $0x1f70] sm:$0xff]  ;;  %v1302_v14 = vld [vmem:[%s17868_s30 + $0x1f58] sm:$0xff] }
 0x637   : > { %13455 = vmatprep.subr.bf16.mxu0 %v15887_v15  ;;  %14070 = vmatprep.subr.bf16.mxu1 %v15889_v18  ;;  %v1306_v15 = vld [vmem:[%s17868_s30 + $0x1f78] sm:$0xff]  ;;  %v15926_v18 = vcombine.low %v1293_v0, %v1297_v3  ;;  %v15935_v54 = vcombine.high %v1301_v12, %v1305_v24 }
 0x638   : > { %v15937_v27 = vcombine.high %v1302_v14, %v1306_v15  ;;  %v15936_v35 = vcombine.low %v1302_v14, %v1306_v15  ;;  %v1349_v15 = vld [vmem:[%s17868_s30 + $0x20d0] sm:$0xff] }
 0x63a   : > { %13456 = vmatpush1.bf16.msra.mxu0 %v15886_v23  ;;  %14071 = vmatpush1.bf16.msra.mxu1 %v15888_v17  ;;  %v1313_v23 = vld [vmem:[%s17868_s30 + $0x1fb0] sm:$0xff]  ;;  %v1310_v17 = vld [vmem:[%s17868_s30 + $0x1f98] sm:$0xff] }
 0x63b   : > { %13457 = vmatprep.subr.bf16.mxu0 %v15895_v31  ;;  %14072 = vmatprep.subr.bf16.mxu1 %v15897_v33  ;;  %v1314_v31 = vld [vmem:[%s17868_s30 + $0x1fb8] sm:$0xff]  ;;  %v15934_v33 = vcombine.low %v1301_v12, %v1305_v24  ;;  %v15943_v21 = vcombine.high %v1309_v40, %v1313_v23 }
 0x63c   : > { %v15945_v58 = vcombine.high %v1310_v17, %v1314_v31  ;;  %v15944_v60 = vcombine.low %v1310_v17, %v1314_v31  ;;  %v1357_v17 = vld [vmem:[%s17868_s30 + $0x2110] sm:$0xff] }
 0x63d   : > { %v1361_v31 = vld [vmem:[%s17868_s30 + $0x2130] sm:$0xff] }
 0x63e   : > { %13458 = vmatpush1.bf16.msra.mxu0 %v15894_v36  ;;  %14073 = vmatpush1.bf16.msra.mxu1 %v15896_v16  ;;  %v1321_v36 = vld [vmem:[%s17868_s30 + $0x1ff0] sm:$0xff]  ;;  %v1318_v16 = vld [vmem:[%s17868_s30 + $0x1fd8] sm:$0xff] }
 0x63f   : > { %13459 = vmatprep.subr.bf16.mxu0 %v15903_v38  ;;  %14074 = vmatprep.subr.bf16.mxu1 %v15905_v37  ;;  %v1322_v38 = vld [vmem:[%s17868_s30 + $0x1ff8] sm:$0xff]  ;;  %v15942_v37 = vcombine.low %v1309_v40, %v1313_v23  ;;  %v15951_v39 = vcombine.high %v1317_v47, %v1321_v36 }
 0x640   : > { %v15953_v50 = vcombine.high %v1318_v16, %v1322_v38  ;;  %v15952_v48 = vcombine.low %v1318_v16, %v1322_v38  ;;  %v1369_v16 = vld [vmem:[%s17868_s30 + $0x2170] sm:$0xff]  ;;  %v1366_v38 = vld [vmem:[%s17868_s30 + $0x2158] sm:$0xff] }
 0x642   : > { %13460 = vmatpush1.bf16.msra.mxu0 %v15902_v42  ;;  %14075 = vmatpush1.bf16.msra.mxu1 %v15904_v20  ;;  %v1329_v42 = vld [vmem:[%s17868_s30 + $0x2030] sm:$0xff]  ;;  %v1326_v20 = vld [vmem:[%s17868_s30 + $0x2018] sm:$0xff] }
 0x643   : > { %13461 = vmatprep.subr.bf16.mxu0 %v15911_v43  ;;  %14076 = vmatprep.subr.bf16.mxu1 %v15913_v44  ;;  %v1330_v43 = vld [vmem:[%s17868_s30 + $0x2038] sm:$0xff]  ;;  %v15950_v44 = vcombine.low %v1317_v47, %v1321_v36  ;;  %v15959_v53 = vcombine.high %v1325_v41, %v1329_v42  ;;  %v1365_v36 = vld [vmem:[%s17868_s30 + $0x2150] sm:$0xff] }
 0x644   : > { %v15961_v57 = vcombine.high %v1326_v20, %v1330_v43  ;;  %v15960_v0 = vcombine.low %v1326_v20, %v1330_v43  ;;  %v1377_v20 = vld [vmem:[%s17868_s30 + $0x21b0] sm:$0xff]  ;;  %v1374_v43 = vld [vmem:[%s17868_s30 + $0x2198] sm:$0xff] }
 0x646   : > { %13462 = vmatpush1.bf16.msra.mxu0 %v15910_v61  ;;  %14077 = vmatpush1.bf16.msra.mxu1 %v15912_v62  ;;  %v1337_v61 = vld [vmem:[%s17868_s30 + $0x2070] sm:$0xff]  ;;  %v1334_v62 = vld [vmem:[%s17868_s30 + $0x2058] sm:$0xff] }
 0x647   : > { %13463 = vmatprep.subr.bf16.mxu0 %v15919_v63  ;;  %14078 = vmatprep.subr.bf16.mxu1 %v15921_v13  ;;  %v1338_v63 = vld [vmem:[%s17868_s30 + $0x2078] sm:$0xff]  ;;  %v15958_v13 = vcombine.low %v1325_v41, %v1329_v42  ;;  %v15967_v3 = vcombine.high %v1333_v26, %v1337_v61  ;;  %v1373_v42 = vld [vmem:[%s17868_s30 + $0x2190] sm:$0xff] }
 0x648   : > { %v15969_v7 = vcombine.high %v1334_v62, %v1338_v63  ;;  %v15968_v12 = vcombine.low %v1334_v62, %v1338_v63  ;;  %v1385_v62 = vld [vmem:[%s17868_s30 + $0x21f0] sm:$0xff]  ;;  %v1382_v63 = vld [vmem:[%s17868_s30 + $0x21d8] sm:$0xff] }
 0x64a   : > { %13464 = vmatpush1.bf16.msra.mxu0 %v15918_v9  ;;  %14079 = vmatpush1.bf16.msra.mxu1 %v15920_v10  ;;  %v1345_v9 = vld [vmem:[%s17868_s30 + $0x20b0] sm:$0xff]  ;;  %v1342_v10 = vld [vmem:[%s17868_s30 + $0x2098] sm:$0xff] }
 0x64b   : > { %13465 = vmatprep.subr.bf16.mxu0 %v15927_v11  ;;  %14080 = vmatprep.subr.bf16.mxu1 %v15929_v56  ;;  %v1346_v11 = vld [vmem:[%s17868_s30 + $0x20b8] sm:$0xff]  ;;  %v15966_v56 = vcombine.low %v1333_v26, %v1337_v61  ;;  %v15975_v24 = vcombine.high %v1341_v6, %v1345_v9  ;;  %v1381_v61 = vld [vmem:[%s17868_s30 + $0x21d0] sm:$0xff] }
 0x64c   : > { %v15977_v14 = vcombine.high %v1342_v10, %v1346_v11 }
 0x64e   : > { %13466 = vmatpush1.bf16.msra.mxu0 %v15926_v18  ;;  %14081 = vmatpush1.bf16.msra.mxu1 %v15928_v19  ;;  %v1353_v18 = vld [vmem:[%s17868_s30 + $0x20f0] sm:$0xff]  ;;  %v1350_v19 = vld [vmem:[%s17868_s30 + $0x20d8] sm:$0xff] }
 0x64f   : > { %13467 = vmatprep.subr.bf16.mxu0 %v15935_v54  ;;  %14082 = vmatprep.subr.bf16.mxu1 %v15937_v27  ;;  %v1354_v54 = vld [vmem:[%s17868_s30 + $0x20f8] sm:$0xff]  ;;  %v15976_v27 = vcombine.low %v1342_v10, %v1346_v11  ;;  %v15983_v40 = vcombine.high %v1349_v15, %v1353_v18  ;;  %v1393_v10 = vld [vmem:[%s17868_s30 + $0x2230] sm:$0xff] }
 0x650   : > { %v15985_v23 = vcombine.high %v1350_v19, %v1354_v54  ;;  %v1390_v11 = vld [vmem:[%s17868_s30 + $0x2218] sm:$0xff] }
 0x652   : > { %13468 = vmatpush1.bf16.msra.mxu0 %v15934_v33  ;;  %14083 = vmatpush1.bf16.msra.mxu1 %v15936_v35  ;;  %v1358_v33 = vld [vmem:[%s17868_s30 + $0x2118] sm:$0xff] }
 0x653   : > { %13469 = vmatprep.subr.bf16.mxu0 %v15943_v21  ;;  %14084 = vmatprep.subr.bf16.mxu1 %v15945_v58  ;;  %v1362_v35 = vld [vmem:[%s17868_s30 + $0x2138] sm:$0xff]  ;;  %v15982_v21 = vcombine.low %v1349_v15, %v1353_v18  ;;  %v15991_v58 = vcombine.high %v1357_v17, %v1361_v31  ;;  %v1397_v18 = vld [vmem:[%s17868_s30 + $0x2250] sm:$0xff] }
 0x654   : > { %v15993_v47 = vcombine.high %v1358_v33, %v1362_v35 }
 0x656   : > { %13470 = vmatpush1.bf16.msra.mxu0 %v15942_v37  ;;  %14085 = vmatpush1.bf16.msra.mxu1 %v15944_v60  ;;  %v1370_v37 = vld [vmem:[%s17868_s30 + $0x2178] sm:$0xff]  ;;  %v15990_v60 = vcombine.low %v1357_v17, %v1361_v31  ;;  %v1405_v31 = vld [vmem:[%s17868_s30 + $0x2290] sm:$0xff] }
 0x657   : > { %13471 = vmatprep.subr.bf16.mxu0 %v15951_v39  ;;  %14086 = vmatprep.subr.bf16.mxu1 %v15953_v50  ;;  %v15992_v39 = vcombine.low %v1358_v33, %v1362_v35  ;;  %v15999_v50 = vcombine.high %v1365_v36, %v1369_v16  ;;  %v16001_v41 = vcombine.high %v1366_v38, %v1370_v37  ;;  %v1409_v33 = vld [vmem:[%s17868_s30 + $0x22b0] sm:$0xff]  ;;  %v1406_v35 = vld [vmem:[%s17868_s30 + $0x2298] sm:$0xff] }
 0x65a   : > { %13472 = vmatpush1.bf16.msra.mxu0 %v15950_v44  ;;  %14087 = vmatpush1.bf16.msra.mxu1 %v15952_v48  ;;  %v1378_v44 = vld [vmem:[%s17868_s30 + $0x21b8] sm:$0xff]  ;;  %v15998_v48 = vcombine.low %v1365_v36, %v1369_v16  ;;  %v1413_v16 = vld [vmem:[%s17868_s30 + $0x22d0] sm:$0xff] }
 0x65b   : > { %13482 = vmatprep.subr.bf16.mxu0 %v15959_v53  ;;  %14097 = vmatprep.subr.bf16.mxu1 %v15961_v57  ;;  %v16000_v53 = vcombine.low %v1366_v38, %v1370_v37  ;;  %v16007_v57 = vcombine.high %v1373_v42, %v1377_v20  ;;  %v16009_v26 = vcombine.high %v1374_v43, %v1378_v44  ;;  %v1417_v38 = vld [vmem:[%s17868_s30 + $0x22f0] sm:$0xff]  ;;  %v1414_v37 = vld [vmem:[%s17868_s30 + $0x22d8] sm:$0xff] }
 0x65d   : > { %13474 = vmatmul.mubr.bf16.vlgmr.msra.gmra.mrb[4].mxu0 %v18515_v1  ;;  %14089 = vmatmul.mubr.bf16.vlgmr.msra.gmra.mrb[4].mxu1 %v18515_v1  ;;  %v15974_v1 = vcombine.low %v1341_v6, %v1345_v9  ;;  %v1389_v9 = vld [vmem:[%s17868_s30 + $0x2210] sm:$0xff] }
 0x65e   : > { %13483 = vmatpush1.bf16.msra.mxu0 %v15958_v13  ;;  %14098 = vmatpush1.bf16.msra.mxu1 %v15960_v0  ;;  %v1386_v13 = vld [vmem:[%s17868_s30 + $0x21f8] sm:$0xff]  ;;  %v16006_v0 = vcombine.low %v1373_v42, %v1377_v20  ;;  %v1421_v20 = vld [vmem:[%s17868_s30 + $0x2310] sm:$0xff] }
 0x65f   : > { %13484 = vmatprep.subr.bf16.mxu0 %v15967_v3  ;;  %14099 = vmatprep.subr.bf16.mxu1 %v15969_v7  ;;  %v16008_v3 = vcombine.low %v1374_v43, %v1378_v44  ;;  %v16015_v7 = vcombine.high %v1381_v61, %v1385_v62  ;;  %v16017_v6 = vcombine.high %v1382_v63, %v1386_v13  ;;  %v1425_v43 = vld [vmem:[%s17868_s30 + $0x2330] sm:$0xff]  ;;  %v1422_v44 = vld [vmem:[%s17868_s30 + $0x2318] sm:$0xff] }
 0x660   : > { %13514 = vmatprep.mubr.bf16.mxu0 %v18526_v25  ;;  %14129 = vmatprep.mubr.bf16.mxu1 %v18526_v25  ;;  %v15984_v25 = vcombine.low %v1350_v19, %v1354_v54  ;;  %v1401_v19 = vld [vmem:[%s17868_s30 + $0x2270] sm:$0xff]  ;;  %v1398_v54 = vld [vmem:[%s17868_s30 + $0x2258] sm:$0xff] }
 0x662   : > { %13485 = vmatpush1.bf16.msra.mxu0 %v15966_v56  ;;  %14100 = vmatpush1.bf16.msra.mxu1 %v15968_v12  ;;  %v1394_v56 = vld [vmem:[%s17868_s30 + $0x2238] sm:$0xff]  ;;  %v16014_v12 = vcombine.low %v1381_v61, %v1385_v62  ;;  %v1429_v62 = vld [vmem:[%s17868_s30 + $0x2350] sm:$0xff] }
 0x663   : > { %13486 = vmatprep.subr.bf16.mxu0 %v15975_v24  ;;  %14101 = vmatprep.subr.bf16.mxu1 %v15977_v14  ;;  %v16016_v24 = vcombine.low %v1382_v63, %v1386_v13  ;;  %v16023_v14 = vcombine.high %v1389_v9, %v1393_v10  ;;  %v16025_v15 = vcombine.high %v1390_v11, %v1394_v56  ;;  %v1433_v63 = vld [vmem:[%s17868_s30 + $0x2370] sm:$0xff]  ;;  %v1430_v13 = vld [vmem:[%s17868_s30 + $0x2358] sm:$0xff] }
 0x666   : > { %13487 = vmatpush1.bf16.msra.mxu0 %v15974_v1  ;;  %14102 = vmatpush1.bf16.msra.mxu1 %v15976_v27  ;;  %v1402_v1 = vld [vmem:[%s17868_s30 + $0x2278] sm:$0xff]  ;;  %v16022_v27 = vcombine.low %v1389_v9, %v1393_v10  ;;  %v1437_v10 = vld [vmem:[%s17868_s30 + $0x2390] sm:$0xff] }
 0x667   : > { %13488 = vmatprep.subr.bf16.mxu0 %v15983_v40  ;;  %14103 = vmatprep.subr.bf16.mxu1 %v15985_v23  ;;  %v16024_v40 = vcombine.low %v1390_v11, %v1394_v56  ;;  %v16031_v23 = vcombine.high %v1397_v18, %v1401_v19  ;;  %v16033_v17 = vcombine.high %v1398_v54, %v1402_v1  ;;  %v1441_v11 = vld [vmem:[%s17868_s30 + $0x23b0] sm:$0xff]  ;;  %v1438_v56 = vld [vmem:[%s17868_s30 + $0x2398] sm:$0xff] }
 0x66a   : > { %13489 = vmatpush1.bf16.msra.mxu0 %v15982_v21  ;;  %14104 = vmatpush1.bf16.msra.mxu1 %v15984_v25  ;;  %v1410_v21 = vld [vmem:[%s17868_s30 + $0x22b8] sm:$0xff]  ;;  %v16030_v25 = vcombine.low %v1397_v18, %v1401_v19  ;;  %v1445_v19 = vld [vmem:[%s17868_s30 + $0x23d0] sm:$0xff] }
 0x66b   : > { %13490 = vmatprep.subr.bf16.mxu0 %v15991_v58  ;;  %14105 = vmatprep.subr.bf16.mxu1 %v15993_v47  ;;  %v16032_v58 = vcombine.low %v1398_v54, %v1402_v1  ;;  %v16039_v47 = vcombine.high %v1405_v31, %v1409_v33  ;;  %v16041_v36 = vcombine.high %v1406_v35, %v1410_v21  ;;  %v1449_v54 = vld [vmem:[%s17868_s30 + $0x23f0] sm:$0xff]  ;;  %v1446_v1 = vld [vmem:[%s17868_s30 + $0x23d8] sm:$0xff] }
 0x66e   : > { %13491 = vmatpush1.bf16.msra.mxu0 %v15990_v60  ;;  %14106 = vmatpush1.bf16.msra.mxu1 %v15992_v39  ;;  %v1418_v60 = vld [vmem:[%s17868_s30 + $0x22f8] sm:$0xff]  ;;  %v16038_v39 = vcombine.low %v1405_v31, %v1409_v33  ;;  %v1453_v33 = vld [vmem:[%s17868_s30 + $0x2410] sm:$0xff] }
 0x66f   : > { %13492 = vmatprep.subr.bf16.mxu0 %v15999_v50  ;;  %14107 = vmatprep.subr.bf16.mxu1 %v16001_v41  ;;  %v16040_v50 = vcombine.low %v1406_v35, %v1410_v21  ;;  %v16047_v41 = vcombine.high %v1413_v16, %v1417_v38  ;;  %v16049_v42 = vcombine.high %v1414_v37, %v1418_v60  ;;  %v1457_v35 = vld [vmem:[%s17868_s30 + $0x2430] sm:$0xff]  ;;  %v1454_v21 = vld [vmem:[%s17868_s30 + $0x2418] sm:$0xff] }
 0x672   : > { %13493 = vmatpush1.bf16.msra.mxu0 %v15998_v48  ;;  %14108 = vmatpush1.bf16.msra.mxu1 %v16000_v53  ;;  %v1426_v48 = vld [vmem:[%s17868_s30 + $0x2338] sm:$0xff]  ;;  %v16046_v53 = vcombine.low %v1413_v16, %v1417_v38  ;;  %v1461_v38 = vld [vmem:[%s17868_s30 + $0x2450] sm:$0xff] }
 0x673   : > { %13494 = vmatprep.subr.bf16.mxu0 %v16007_v57  ;;  %14109 = vmatprep.subr.bf16.mxu1 %v16009_v26  ;;  %v16048_v57 = vcombine.low %v1414_v37, %v1418_v60  ;;  %v16055_v26 = vcombine.high %v1421_v20, %v1425_v43  ;;  %v16057_v61 = vcombine.high %v1422_v44, %v1426_v48  ;;  %v1465_v37 = vld [vmem:[%s17868_s30 + $0x2470] sm:$0xff]  ;;  %v1462_v60 = vld [vmem:[%s17868_s30 + $0x2458] sm:$0xff] }
 0x676   : > { %13495 = vmatpush1.bf16.msra.mxu0 %v16006_v0  ;;  %14110 = vmatpush1.bf16.msra.mxu1 %v16008_v3  ;;  %v1434_v0 = vld [vmem:[%s17868_s30 + $0x2378] sm:$0xff]  ;;  %v16054_v3 = vcombine.low %v1421_v20, %v1425_v43  ;;  %v1469_v43 = vld [vmem:[%s17868_s30 + $0x2490] sm:$0xff] }
 0x677   : > { %13496 = vmatprep.subr.bf16.mxu0 %v16015_v7  ;;  %14111 = vmatprep.subr.bf16.mxu1 %v16017_v6  ;;  %v16056_v7 = vcombine.low %v1422_v44, %v1426_v48  ;;  %v16063_v6 = vcombine.high %v1429_v62, %v1433_v63  ;;  %v16065_v9 = vcombine.high %v1430_v13, %v1434_v0  ;;  %v1473_v44 = vld [vmem:[%s17868_s30 + $0x24b0] sm:$0xff]  ;;  %v1470_v48 = vld [vmem:[%s17868_s30 + $0x2498] sm:$0xff] }
 0x67a   : > { %13497 = vmatpush1.bf16.msra.mxu0 %v16014_v12  ;;  %14112 = vmatpush1.bf16.msra.mxu1 %v16016_v24  ;;  %v1442_v12 = vld [vmem:[%s17868_s30 + $0x23b8] sm:$0xff]  ;;  %v16062_v24 = vcombine.low %v1429_v62, %v1433_v63  ;;  %v1477_v63 = vld [vmem:[%s17868_s30 + $0x24d0] sm:$0xff] }
 0x67b   : > { %13498 = vmatprep.subr.bf16.mxu0 %v16023_v14  ;;  %14113 = vmatprep.subr.bf16.mxu1 %v16025_v15  ;;  %v16064_v14 = vcombine.low %v1430_v13, %v1434_v0  ;;  %v16071_v15 = vcombine.high %v1437_v10, %v1441_v11  ;;  %v16073_v18 = vcombine.high %v1438_v56, %v1442_v12  ;;  %v1481_v13 = vld [vmem:[%s17868_s30 + $0x24f0] sm:$0xff]  ;;  %v1478_v0 = vld [vmem:[%s17868_s30 + $0x24d8] sm:$0xff] }
 0x67e   : > { %13499 = vmatpush1.bf16.msra.mxu0 %v16022_v27  ;;  %14114 = vmatpush1.bf16.msra.mxu1 %v16024_v40  ;;  %v1450_v27 = vld [vmem:[%s17868_s30 + $0x23f8] sm:$0xff]  ;;  %v16070_v40 = vcombine.low %v1437_v10, %v1441_v11  ;;  %v1485_v10 = vld [vmem:[%s17868_s30 + $0x2510] sm:$0xff] }
 0x67f   : > { %13500 = vmatprep.subr.bf16.mxu0 %v16031_v23  ;;  %14115 = vmatprep.subr.bf16.mxu1 %v16033_v17  ;;  %v16072_v23 = vcombine.low %v1438_v56, %v1442_v12  ;;  %v16079_v17 = vcombine.high %v1445_v19, %v1449_v54  ;;  %v16081_v31 = vcombine.high %v1446_v1, %v1450_v27  ;;  %v1489_v11 = vld [vmem:[%s17868_s30 + $0x2530] sm:$0xff]  ;;  %v1486_v56 = vld [vmem:[%s17868_s30 + $0x2518] sm:$0xff] }
 0x680   : > { %v1490_v12 = vld [vmem:[%s17868_s30 + $0x2538] sm:$0xff] }
 0x682   : > { %13501 = vmatpush1.bf16.msra.mxu0 %v16030_v25  ;;  %14116 = vmatpush1.bf16.msra.mxu1 %v16032_v58  ;;  %v1458_v25 = vld [vmem:[%s17868_s30 + $0x2438] sm:$0xff]  ;;  %v16078_v58 = vcombine.low %v1445_v19, %v1449_v54  ;;  %v1497_v19 = vld [vmem:[%s17868_s30 + $0x2570] sm:$0xff] }
 0x683   : > { %13502 = vmatprep.subr.bf16.mxu0 %v16039_v47  ;;  %14117 = vmatprep.subr.bf16.mxu1 %v16041_v36  ;;  %v16080_v47 = vcombine.low %v1446_v1, %v1450_v27  ;;  %v16087_v36 = vcombine.high %v1453_v33, %v1457_v35  ;;  %v16089_v16 = vcombine.high %v1454_v21, %v1458_v25  ;;  %v1494_v54 = vld [vmem:[%s17868_s30 + $0x2558] sm:$0xff] }
 0x684   : > { %v1498_v1 = vld [vmem:[%s17868_s30 + $0x2578] sm:$0xff]  ;;  %v16118_v27 = vcombine.low %v1485_v10, %v1489_v11 }
 0x686   : > { %13503 = vmatpush1.bf16.msra.mxu0 %v16038_v39  ;;  %14118 = vmatpush1.bf16.msra.mxu1 %v16040_v50  ;;  %v1466_v39 = vld [vmem:[%s17868_s30 + $0x2478] sm:$0xff]  ;;  %v16086_v50 = vcombine.low %v1453_v33, %v1457_v35  ;;  %v1505_v33 = vld [vmem:[%s17868_s30 + $0x25b0] sm:$0xff] }
 0x687   : > { %13504 = vmatprep.subr.bf16.mxu0 %v16047_v41  ;;  %14119 = vmatprep.subr.bf16.mxu1 %v16049_v42  ;;  %v16088_v41 = vcombine.low %v1454_v21, %v1458_v25  ;;  %v16095_v42 = vcombine.high %v1461_v38, %v1465_v37  ;;  %v16097_v20 = vcombine.high %v1462_v60, %v1466_v39  ;;  %v1502_v35 = vld [vmem:[%s17868_s30 + $0x2598] sm:$0xff] }
 0x688   : > { %v1506_v21 = vld [vmem:[%s17868_s30 + $0x25b8] sm:$0xff] }
 0x68a   : > { %13505 = vmatpush1.bf16.msra.mxu0 %v16046_v53  ;;  %14120 = vmatpush1.bf16.msra.mxu1 %v16048_v57  ;;  %v1474_v53 = vld [vmem:[%s17868_s30 + $0x24b8] sm:$0xff]  ;;  %v16094_v57 = vcombine.low %v1461_v38, %v1465_v37  ;;  %v1513_v38 = vld [vmem:[%s17868_s30 + $0x25f0] sm:$0xff] }
 0x68b   : > { %13506 = vmatprep.subr.bf16.mxu0 %v16055_v26  ;;  %14121 = vmatprep.subr.bf16.mxu1 %v16057_v61  ;;  %v16096_v26 = vcombine.low %v1462_v60, %v1466_v39  ;;  %v16103_v61 = vcombine.high %v1469_v43, %v1473_v44  ;;  %v16105_v62 = vcombine.high %v1470_v48, %v1474_v53  ;;  %v1510_v37 = vld [vmem:[%s17868_s30 + $0x25d8] sm:$0xff] }
 0x68c   : > { %v1514_v60 = vld [vmem:[%s17868_s30 + $0x25f8] sm:$0xff] }
 0x68e   : > { %13507 = vmatpush1.bf16.msra.mxu0 %v16054_v3  ;;  %14122 = vmatpush1.bf16.msra.mxu1 %v16056_v7  ;;  %v1482_v3 = vld [vmem:[%s17868_s30 + $0x24f8] sm:$0xff]  ;;  %v16104_v7 = vcombine.low %v1470_v48, %v1474_v53 }
 0x68f   : > { %13508 = vmatprep.subr.bf16.mxu0 %v16063_v6  ;;  %14123 = vmatprep.subr.bf16.mxu1 %v16065_v9  ;;  %v16111_v6 = vcombine.high %v1477_v63, %v1481_v13  ;;  %v16113_v9 = vcombine.high %v1478_v0, %v1482_v3  ;;  %v1522_v48 = vld [vmem:[%s17868_s30 + $0x2638] sm:$0xff] }
 0x692   : > { %13509 = vmatpush1.bf16.msra.mxu0 %v16062_v24  ;;  %14124 = vmatpush1.bf16.msra.mxu1 %v16064_v14  ;;  %v16110_v24 = vcombine.low %v1477_v63, %v1481_v13  ;;  %v16119_v14 = vcombine.high %v1485_v10, %v1489_v11  ;;  %v1529_v63 = vld [vmem:[%s17868_s30 + $0x2670] sm:$0xff]  ;;  %v1526_v13 = vld [vmem:[%s17868_s30 + $0x2658] sm:$0xff] }
 0x693   : > { %13510 = vmatprep.subr.bf16.mxu0 %v16071_v15  ;;  %14125 = vmatprep.subr.bf16.mxu1 %v16073_v18  ;;  %v16121_v15 = vcombine.high %v1486_v56, %v1490_v12  ;;  %v1493_v18 = vld [vmem:[%s17868_s30 + $0x2550] sm:$0xff]  ;;  %v1534_v11 = vld [vmem:[%s17868_s30 + $0x2698] sm:$0xff] }
 0x694   : > { %v16126_v25 = vcombine.low %v1493_v18, %v1497_v19  ;;  %v1537_v10 = vld [vmem:[%s17868_s30 + $0x26b0] sm:$0xff] }
 0x696   : > { %13511 = vmatpush1.bf16.msra.mxu0 %v16070_v40  ;;  %14126 = vmatpush1.bf16.msra.mxu1 %v16072_v23  ;;  %v16120_v40 = vcombine.low %v1486_v56, %v1490_v12  ;;  %v16127_v23 = vcombine.high %v1493_v18, %v1497_v19  ;;  %v1538_v56 = vld [vmem:[%s17868_s30 + $0x26b8] sm:$0xff]  ;;  %v1545_v18 = vld [vmem:[%s17868_s30 + $0x26f0] sm:$0xff] }
 0x697   : > { %13512 = vmatprep.subr.bf16.mxu0 %v16079_v17  ;;  %14127 = vmatprep.subr.bf16.mxu1 %v16081_v31  ;;  %v16129_v17 = vcombine.high %v1494_v54, %v1498_v1  ;;  %v1501_v31 = vld [vmem:[%s17868_s30 + $0x2590] sm:$0xff]  ;;  %v1542_v19 = vld [vmem:[%s17868_s30 + $0x26d8] sm:$0xff] }
 0x698   : > { %v16134_v39 = vcombine.low %v1501_v31, %v1505_v33 }
 0x69a   : > { %13513 = vmatpush1.bf16.msra.mxu0 %v16078_v58  ;;  %14128 = vmatpush1.bf16.msra.mxu1 %v16080_v47  ;;  %v16128_v58 = vcombine.low %v1494_v54, %v1498_v1  ;;  %v16135_v47 = vcombine.high %v1501_v31, %v1505_v33  ;;  %v1546_v54 = vld [vmem:[%s17868_s30 + $0x26f8] sm:$0xff]  ;;  %v1553_v31 = vld [vmem:[%s17868_s30 + $0x2730] sm:$0xff] }
 0x69b   : > { %13523 = vmatprep.subr.bf16.mxu0 %v16087_v36  ;;  %14138 = vmatprep.subr.bf16.mxu1 %v16089_v16  ;;  %v16137_v36 = vcombine.high %v1502_v35, %v1506_v21  ;;  %v1509_v16 = vld [vmem:[%s17868_s30 + $0x25d0] sm:$0xff]  ;;  %v1550_v33 = vld [vmem:[%s17868_s30 + $0x2718] sm:$0xff] }
 0x69c   : > { %v16142_v53 = vcombine.low %v1509_v16, %v1513_v38 }
 0x69d   : > { %13515 = vmatmul.mubr.bf16.vlgmr.msra.gmra.mrb[4].mxu0 %v18594_v51  ;;  %14130 = vmatmul.mubr.bf16.vlgmr.msra.gmra.mrb[4].mxu1 %v18594_v51  ;;  %v16102_v51 = vcombine.low %v1469_v43, %v1473_v44  ;;  %v1521_v43 = vld [vmem:[%s17868_s30 + $0x2630] sm:$0xff]  ;;  %v1518_v44 = vld [vmem:[%s17868_s30 + $0x2618] sm:$0xff] }
 0x69e   : > { %13524 = vmatpush1.bf16.msra.mxu0 %v16086_v50  ;;  %14139 = vmatpush1.bf16.msra.mxu1 %v16088_v41  ;;  %v16136_v50 = vcombine.low %v1502_v35, %v1506_v21  ;;  %v16143_v41 = vcombine.high %v1509_v16, %v1513_v38  ;;  %v1554_v35 = vld [vmem:[%s17868_s30 + $0x2738] sm:$0xff]  ;;  %v1561_v16 = vld [vmem:[%s17868_s30 + $0x2770] sm:$0xff] }
 0x69f   : > { %13525 = vmatprep.subr.bf16.mxu0 %v16095_v42  ;;  %14140 = vmatprep.subr.bf16.mxu1 %v16097_v20  ;;  %v16145_v42 = vcombine.high %v1510_v37, %v1514_v60  ;;  %v1517_v20 = vld [vmem:[%s17868_s30 + $0x2610] sm:$0xff]  ;;  %v1558_v38 = vld [vmem:[%s17868_s30 + $0x2758] sm:$0xff] }
 0x6a0   : > { %13555 = vmatprep.mubr.bf16.mxu0 %v18605_v4  ;;  %14170 = vmatprep.mubr.bf16.mxu1 %v18605_v4  ;;  %v16112_v4 = vcombine.low %v1478_v0, %v1482_v3  ;;  %v1530_v0 = vld [vmem:[%s17868_s30 + $0x2678] sm:$0xff]  ;;  %v16150_v3 = vcombine.low %v1517_v20, %v1521_v43 }
 0x6a2   : > { %13526 = vmatpush1.bf16.msra.mxu0 %v16094_v57  ;;  %14141 = vmatpush1.bf16.msra.mxu1 %v16096_v26  ;;  %v16144_v57 = vcombine.low %v1510_v37, %v1514_v60  ;;  %v16151_v26 = vcombine.high %v1517_v20, %v1521_v43  ;;  %v1562_v37 = vld [vmem:[%s17868_s30 + $0x2778] sm:$0xff]  ;;  %v1569_v20 = vld [vmem:[%s17868_s30 + $0x27b0] sm:$0xff] }
 0x6a3   : > { %13527 = vmatprep.subr.bf16.mxu0 %v16103_v61  ;;  %14142 = vmatprep.subr.bf16.mxu1 %v16105_v62  ;;  %v16153_v61 = vcombine.high %v1518_v44, %v1522_v48  ;;  %v1525_v62 = vld [vmem:[%s17868_s30 + $0x2650] sm:$0xff]  ;;  %v1566_v43 = vld [vmem:[%s17868_s30 + $0x2798] sm:$0xff] }
 0x6a4   : > { %v16158_v12 = vcombine.low %v1525_v62, %v1529_v63 }
 0x6a6   : > { %13528 = vmatpush1.bf16.msra.mxu0 %v16102_v51  ;;  %14143 = vmatpush1.bf16.msra.mxu1 %v16104_v7  ;;  %v16152_v51 = vcombine.low %v1518_v44, %v1522_v48  ;;  %v16159_v7 = vcombine.high %v1525_v62, %v1529_v63  ;;  %v1570_v44 = vld [vmem:[%s17868_s30 + $0x27b8] sm:$0xff]  ;;  %v1577_v62 = vld [vmem:[%s17868_s30 + $0x27f0] sm:$0xff] }
 0x6a7   : > { %13529 = vmatprep.subr.bf16.mxu0 %v16111_v6  ;;  %14144 = vmatprep.subr.bf16.mxu1 %v16113_v9  ;;  %v16161_v6 = vcombine.high %v1526_v13, %v1530_v0  ;;  %v1533_v9 = vld [vmem:[%s17868_s30 + $0x2690] sm:$0xff]  ;;  %v1574_v63 = vld [vmem:[%s17868_s30 + $0x27d8] sm:$0xff] }
 0x6a8   : > { %v16166_v1 = vcombine.low %v1533_v9, %v1537_v10 }
 0x6aa   : > { %13530 = vmatpush1.bf16.msra.mxu0 %v16110_v24  ;;  %14145 = vmatpush1.bf16.msra.mxu1 %v16112_v4  ;;  %v16160_v24 = vcombine.low %v1526_v13, %v1530_v0  ;;  %v16167_v4 = vcombine.high %v1533_v9, %v1537_v10  ;;  %v1578_v13 = vld [vmem:[%s17868_s30 + $0x27f8] sm:$0xff]  ;;  %v1585_v9 = vld [vmem:[%s17868_s30 + $0x2830] sm:$0xff] }
 0x6ab   : > { %13531 = vmatprep.subr.bf16.mxu0 %v16119_v14  ;;  %14146 = vmatprep.subr.bf16.mxu1 %v16121_v15  ;;  %v16169_v14 = vcombine.high %v1534_v11, %v1538_v56  ;;  %v1541_v15 = vld [vmem:[%s17868_s30 + $0x26d0] sm:$0xff]  ;;  %v1582_v10 = vld [vmem:[%s17868_s30 + $0x2818] sm:$0xff] }
 0x6ac   : > { %v16174_v21 = vcombine.low %v1541_v15, %v1545_v18 }
 0x6ae   : > { %13532 = vmatpush1.bf16.msra.mxu0 %v16118_v27  ;;  %14147 = vmatpush1.bf16.msra.mxu1 %v16120_v40  ;;  %v16168_v27 = vcombine.low %v1534_v11, %v1538_v56  ;;  %v16175_v40 = vcombine.high %v1541_v15, %v1545_v18  ;;  %v1586_v11 = vld [vmem:[%s17868_s30 + $0x2838] sm:$0xff]  ;;  %v1593_v15 = vld [vmem:[%s17868_s30 + $0x2870] sm:$0xff] }
 0x6af   : > { %13533 = vmatprep.subr.bf16.mxu0 %v16127_v23  ;;  %14148 = vmatprep.subr.bf16.mxu1 %v16129_v17  ;;  %v16177_v23 = vcombine.high %v1542_v19, %v1546_v54  ;;  %v1549_v17 = vld [vmem:[%s17868_s30 + $0x2710] sm:$0xff]  ;;  %v1590_v18 = vld [vmem:[%s17868_s30 + $0x2858] sm:$0xff] }
 0x6b0   : > { %v16182_v60 = vcombine.low %v1549_v17, %v1553_v31 }
 0x6b2   : > { %13534 = vmatpush1.bf16.msra.mxu0 %v16126_v25  ;;  %14149 = vmatpush1.bf16.msra.mxu1 %v16128_v58  ;;  %v16176_v25 = vcombine.low %v1542_v19, %v1546_v54  ;;  %v16183_v58 = vcombine.high %v1549_v17, %v1553_v31  ;;  %v1594_v19 = vld [vmem:[%s17868_s30 + $0x2878] sm:$0xff]  ;;  %v1601_v17 = vld [vmem:[%s17868_s30 + $0x28b0] sm:$0xff] }
 0x6b3   : > { %13535 = vmatprep.subr.bf16.mxu0 %v16135_v47  ;;  %14150 = vmatprep.subr.bf16.mxu1 %v16137_v36  ;;  %v16185_v47 = vcombine.high %v1550_v33, %v1554_v35  ;;  %v1557_v36 = vld [vmem:[%s17868_s30 + $0x2750] sm:$0xff]  ;;  %v1598_v31 = vld [vmem:[%s17868_s30 + $0x2898] sm:$0xff] }
 0x6b4   : > { %v16190_v48 = vcombine.low %v1557_v36, %v1561_v16 }
 0x6b6   : > { %13536 = vmatpush1.bf16.msra.mxu0 %v16134_v39  ;;  %14151 = vmatpush1.bf16.msra.mxu1 %v16136_v50  ;;  %v16184_v39 = vcombine.low %v1550_v33, %v1554_v35  ;;  %v16191_v50 = vcombine.high %v1557_v36, %v1561_v16  ;;  %v1602_v33 = vld [vmem:[%s17868_s30 + $0x28b8] sm:$0xff]  ;;  %v1609_v36 = vld [vmem:[%s17868_s30 + $0x28f0] sm:$0xff] }
 0x6b7   : > { %13537 = vmatprep.subr.bf16.mxu0 %v16143_v41  ;;  %14152 = vmatprep.subr.bf16.mxu1 %v16145_v42  ;;  %v16193_v41 = vcombine.high %v1558_v38, %v1562_v37  ;;  %v1565_v42 = vld [vmem:[%s17868_s30 + $0x2790] sm:$0xff]  ;;  %v1606_v16 = vld [vmem:[%s17868_s30 + $0x28d8] sm:$0xff] }
 0x6b8   : > { %v16198_v0 = vcombine.low %v1565_v42, %v1569_v20 }
 0x6ba   : > { %13538 = vmatpush1.bf16.msra.mxu0 %v16142_v53  ;;  %14153 = vmatpush1.bf16.msra.mxu1 %v16144_v57  ;;  %v16192_v53 = vcombine.low %v1558_v38, %v1562_v37  ;;  %v16199_v57 = vcombine.high %v1565_v42, %v1569_v20  ;;  %v1610_v38 = vld [vmem:[%s17868_s30 + $0x28f8] sm:$0xff]  ;;  %v16232_v37 = vcombine.low %v1598_v31, %v1602_v33 }
 0x6bb   : > { %13539 = vmatprep.subr.bf16.mxu0 %v16151_v26  ;;  %14154 = vmatprep.subr.bf16.mxu1 %v16153_v61  ;;  %v16201_v26 = vcombine.high %v1566_v43, %v1570_v44  ;;  %v1573_v61 = vld [vmem:[%s17868_s30 + $0x27d0] sm:$0xff]  ;;  %v1614_v42 = vld [vmem:[%s17868_s30 + $0x2918] sm:$0xff] }
 0x6bc   : > { %v16206_v56 = vcombine.low %v1573_v61, %v1577_v62  ;;  %v1618_v20 = vld [vmem:[%s17868_s30 + $0x2938] sm:$0xff] }
 0x6be   : > { %13540 = vmatpush1.bf16.msra.mxu0 %v16150_v3  ;;  %14155 = vmatpush1.bf16.msra.mxu1 %v16152_v51  ;;  %v16200_v3 = vcombine.low %v1566_v43, %v1570_v44  ;;  %v16207_v51 = vcombine.high %v1573_v61, %v1577_v62  ;;  %v1626_v61 = vld [vmem:[%s17868_s30 + $0x2978] sm:$0xff] }
 0x6bf   : > { %13541 = vmatprep.subr.bf16.mxu0 %v16159_v7  ;;  %14156 = vmatprep.subr.bf16.mxu1 %v16161_v6  ;;  %v16209_v7 = vcombine.high %v1574_v63, %v1578_v13  ;;  %v1581_v6 = vld [vmem:[%s17868_s30 + $0x2810] sm:$0xff] }
 0x6c0   : > { %v16214_v54 = vcombine.low %v1581_v6, %v1585_v9 }
 0x6c2   : > { %13542 = vmatpush1.bf16.msra.mxu0 %v16158_v12  ;;  %14157 = vmatpush1.bf16.msra.mxu1 %v16160_v24  ;;  %v16208_v12 = vcombine.low %v1574_v63, %v1578_v13  ;;  %v16215_v24 = vcombine.high %v1581_v6, %v1585_v9  ;;  %v16248_v63 = vcombine.low %v1614_v42, %v1618_v20  ;;  %v1634_v6 = vld [vmem:[%s17868_s30 + $0x29b8] sm:$0xff] }
 0x6c3   : > { %13543 = vmatprep.subr.bf16.mxu0 %v16167_v4  ;;  %14158 = vmatprep.subr.bf16.mxu1 %v16169_v14  ;;  %v16217_v4 = vcombine.high %v1582_v10, %v1586_v11  ;;  %v1589_v14 = vld [vmem:[%s17868_s30 + $0x2850] sm:$0xff] }
 0x6c4   : > { %v16222_v35 = vcombine.low %v1589_v14, %v1593_v15 }
 0x6c6   : > { %13544 = vmatpush1.bf16.msra.mxu0 %v16166_v1  ;;  %14159 = vmatpush1.bf16.msra.mxu1 %v16168_v27  ;;  %v16216_v1 = vcombine.low %v1582_v10, %v1586_v11  ;;  %v16223_v27 = vcombine.high %v1589_v14, %v1593_v15  ;;  %v1642_v14 = vld [vmem:[%s17868_s30 + $0x29f8] sm:$0xff] }
 0x6c7   : > { %13545 = vmatprep.subr.bf16.mxu0 %v16175_v40  ;;  %14160 = vmatprep.subr.bf16.mxu1 %v16177_v23  ;;  %v16225_v40 = vcombine.high %v1590_v18, %v1594_v19  ;;  %v1597_v23 = vld [vmem:[%s17868_s30 + $0x2890] sm:$0xff] }
 0x6ca   : > { %13546 = vmatpush1.bf16.msra.mxu0 %v16174_v21  ;;  %14161 = vmatpush1.bf16.msra.mxu1 %v16176_v25  ;;  %v16224_v21 = vcombine.low %v1590_v18, %v1594_v19  ;;  %v16231_v25 = vcombine.high %v1597_v23, %v1601_v17 }
 0x6cb   : > { %13547 = vmatprep.subr.bf16.mxu0 %v16183_v58  ;;  %14162 = vmatprep.subr.bf16.mxu1 %v16185_v47  ;;  %v16233_v58 = vcombine.high %v1598_v31, %v1602_v33  ;;  %v1605_v47 = vld [vmem:[%s17868_s30 + $0x28d0] sm:$0xff] }
 0x6cc   : > { %v16238_v43 = vcombine.low %v1605_v47, %v1609_v36 }
 0x6ce   : > { %13548 = vmatpush1.bf16.msra.mxu0 %v16182_v60  ;;  %14163 = vmatpush1.bf16.msra.mxu1 %v16184_v39  ;;  %v16239_v60 = vcombine.high %v1605_v47, %v1609_v36  ;;  %v16241_v39 = vcombine.high %v1606_v16, %v1610_v38  ;;  %v1658_v47 = vld [vmem:[%s17868_s30 + $0x2a78] sm:$0xff] }
 0x6cf   : > { %13549 = vmatprep.subr.bf16.mxu0 %v16191_v50  ;;  %14164 = vmatprep.subr.bf16.mxu1 %v16193_v41  ;;  %v1613_v50 = vld [vmem:[%s17868_s30 + $0x2910] sm:$0xff] }
 0x6d0   : > { %v1617_v41 = vld [vmem:[%s17868_s30 + $0x2930] sm:$0xff] }
 0x6d1   : > { %v16247_v44 = vcombine.high %v1613_v50, %v1617_v41  ;;  %v16246_v62 = vcombine.low %v1613_v50, %v1617_v41  ;;  %v1666_v50 = vld [vmem:[%s17868_s30 + $0x2ab8] sm:$0xff] }
 0x6d2   : > { %13550 = vmatpush1.bf16.msra.mxu0 %v16190_v48  ;;  %14165 = vmatpush1.bf16.msra.mxu1 %v16192_v53  ;;  %v16249_v48 = vcombine.high %v1614_v42, %v1618_v20  ;;  %v1621_v53 = vld [vmem:[%s17868_s30 + $0x2950] sm:$0xff] }
 0x6d3   : > { %13551 = vmatprep.subr.bf16.mxu0 %v16199_v57  ;;  %14166 = vmatprep.subr.bf16.mxu1 %v16201_v26  ;;  %v1625_v57 = vld [vmem:[%s17868_s30 + $0x2970] sm:$0xff]  ;;  %v1622_v26 = vld [vmem:[%s17868_s30 + $0x2958] sm:$0xff] }
 0x6d4   : > { %v16255_v13 = vcombine.high %v1621_v53, %v1625_v57  ;;  %v16254_v9 = vcombine.low %v1621_v53, %v1625_v57  ;;  %v16256_v10 = vcombine.low %v1622_v26, %v1626_v61  ;;  %v1674_v53 = vld [vmem:[%s17868_s30 + $0x2af8] sm:$0xff] }
 0x6d6   : > { %13552 = vmatpush1.bf16.msra.mxu0 %v16198_v0  ;;  %14167 = vmatpush1.bf16.msra.mxu1 %v16200_v3  ;;  %v16257_v0 = vcombine.high %v1622_v26, %v1626_v61  ;;  %v1629_v3 = vld [vmem:[%s17868_s30 + $0x2990] sm:$0xff] }
 0x6d7   : > { %13553 = vmatprep.subr.bf16.mxu0 %v16207_v51  ;;  %14168 = vmatprep.subr.bf16.mxu1 %v16209_v7  ;;  %v1633_v51 = vld [vmem:[%s17868_s30 + $0x29b0] sm:$0xff]  ;;  %v1630_v7 = vld [vmem:[%s17868_s30 + $0x2998] sm:$0xff] }
 0x6d8   : > { %v16263_v11 = vcombine.high %v1629_v3, %v1633_v51  ;;  %v16262_v15 = vcombine.low %v1629_v3, %v1633_v51  ;;  %v16264_v18 = vcombine.low %v1630_v7, %v1634_v6  ;;  %v1682_v3 = vld [vmem:[%s17868_s30 + $0x2b38] sm:$0xff] }
 0x6da   : > { %13554 = vmatpush1.bf16.msra.mxu0 %v16206_v56  ;;  %14169 = vmatpush1.bf16.msra.mxu1 %v16208_v12  ;;  %v16265_v56 = vcombine.high %v1630_v7, %v1634_v6  ;;  %v1637_v12 = vld [vmem:[%s17868_s30 + $0x29d0] sm:$0xff] }
 0x6db   : > { %13564 = vmatprep.subr.bf16.mxu0 %v16215_v24  ;;  %14179 = vmatprep.subr.bf16.mxu1 %v16217_v4  ;;  %v1641_v24 = vld [vmem:[%s17868_s30 + $0x29f0] sm:$0xff]  ;;  %v1638_v4 = vld [vmem:[%s17868_s30 + $0x29d8] sm:$0xff] }
 0x6dc   : > { %v16271_v19 = vcombine.high %v1637_v12, %v1641_v24  ;;  %v16272_v31 = vcombine.low %v1638_v4, %v1642_v14 }
 0x6dd   : > { %13556 = vmatmul.mubr.bf16.vlgmr.msra.gmra.mrb[4].mxu0 %v18673_v45  ;;  %14171 = vmatmul.mubr.bf16.vlgmr.msra.gmra.mrb[4].mxu1 %v18673_v45  ;;  %v16230_v45 = vcombine.low %v1597_v23, %v1601_v17  ;;  %v1650_v23 = vld [vmem:[%s17868_s30 + $0x2a38] sm:$0xff]  ;;  %v16270_v17 = vcombine.low %v1637_v12, %v1641_v24 }
 0x6de   : > { %13565 = vmatpush1.bf16.msra.mxu0 %v16214_v54  ;;  %14180 = vmatpush1.bf16.msra.mxu1 %v16216_v1  ;;  %v16273_v54 = vcombine.high %v1638_v4, %v1642_v14  ;;  %v1645_v1 = vld [vmem:[%s17868_s30 + $0x2a10] sm:$0xff]  ;;  %v1690_v12 = vld [vmem:[%s17868_s30 + $0x2b78] sm:$0xff] }
 0x6df   : > { %13566 = vmatprep.subr.bf16.mxu0 %v16223_v27  ;;  %14181 = vmatprep.subr.bf16.mxu1 %v16225_v40  ;;  %v1649_v27 = vld [vmem:[%s17868_s30 + $0x2a30] sm:$0xff]  ;;  %v1646_v40 = vld [vmem:[%s17868_s30 + $0x2a18] sm:$0xff] }
 0x6e0   : > { %13596 = vmatprep.mubr.bf16.mxu0 %v18684_v55  ;;  %14211 = vmatprep.mubr.bf16.mxu1 %v18684_v55  ;;  %v16240_v55 = vcombine.low %v1606_v16, %v1610_v38  ;;  %v16279_v33 = vcombine.high %v1645_v1, %v1649_v27  ;;  %v16278_v36 = vcombine.low %v1645_v1, %v1649_v27  ;;  %v1698_v1 = vld [vmem:[%s17868_s30 + $0x2bb8] sm:$0xff] }
 0x6e1   : > { %v16280_v16 = vcombine.low %v1646_v40, %v1650_v23 }
 0x6e2   : > { %13567 = vmatpush1.bf16.msra.mxu0 %v16222_v35  ;;  %14182 = vmatpush1.bf16.msra.mxu1 %v16224_v21  ;;  %v16281_v35 = vcombine.high %v1646_v40, %v1650_v23  ;;  %v1653_v21 = vld [vmem:[%s17868_s30 + $0x2a50] sm:$0xff] }
 0x6e3   : > { %13568 = vmatprep.subr.bf16.mxu0 %v16231_v25  ;;  %14183 = vmatprep.subr.bf16.mxu1 %v16233_v58  ;;  %v1657_v25 = vld [vmem:[%s17868_s30 + $0x2a70] sm:$0xff]  ;;  %v1654_v58 = vld [vmem:[%s17868_s30 + $0x2a58] sm:$0xff] }
 0x6e4   : > { %v16287_v38 = vcombine.high %v1653_v21, %v1657_v25  ;;  %v16286_v41 = vcombine.low %v1653_v21, %v1657_v25  ;;  %v16288_v42 = vcombine.low %v1654_v58, %v1658_v47  ;;  %v1706_v21 = vld [vmem:[%s17868_s30 + $0x2bf8] sm:$0xff] }
 0x6e6   : > { %13569 = vmatpush1.bf16.msra.mxu0 %v16230_v45  ;;  %14184 = vmatpush1.bf16.msra.mxu1 %v16232_v37  ;;  %v16289_v45 = vcombine.high %v1654_v58, %v1658_v47  ;;  %v1661_v37 = vld [vmem:[%s17868_s30 + $0x2a90] sm:$0xff] }
 0x6e7   : > { %13570 = vmatprep.subr.bf16.mxu0 %v16239_v60  ;;  %14185 = vmatprep.subr.bf16.mxu1 %v16241_v39  ;;  %v1665_v60 = vld [vmem:[%s17868_s30 + $0x2ab0] sm:$0xff]  ;;  %v1662_v39 = vld [vmem:[%s17868_s30 + $0x2a98] sm:$0xff] }
 0x6e8   : > { %v16295_v20 = vcombine.high %v1661_v37, %v1665_v60  ;;  %v16294_v57 = vcombine.low %v1661_v37, %v1665_v60  ;;  %v16296_v26 = vcombine.low %v1662_v39, %v1666_v50  ;;  %v1714_v37 = vld [vmem:[%s17868_s30 + $0x2c38] sm:$0xff] }
 0x6ea   : > { %13571 = vmatpush1.bf16.msra.mxu0 %v16238_v43  ;;  %14186 = vmatpush1.bf16.msra.mxu1 %v16240_v55  ;;  %v16297_v43 = vcombine.high %v1662_v39, %v1666_v50  ;;  %v1669_v55 = vld [vmem:[%s17868_s30 + $0x2ad0] sm:$0xff] }
 0x6eb   : > { %13572 = vmatprep.subr.bf16.mxu0 %v16247_v44  ;;  %14187 = vmatprep.subr.bf16.mxu1 %v16249_v48  ;;  %v1673_v44 = vld [vmem:[%s17868_s30 + $0x2af0] sm:$0xff]  ;;  %v1670_v48 = vld [vmem:[%s17868_s30 + $0x2ad8] sm:$0xff] }
 0x6ec   : > { %v16303_v61 = vcombine.high %v1669_v55, %v1673_v44  ;;  %v16302_v51 = vcombine.low %v1669_v55, %v1673_v44  ;;  %v16304_v7 = vcombine.low %v1670_v48, %v1674_v53  ;;  %v1722_v55 = vld [vmem:[%s17868_s30 + $0x2c78] sm:$0xff] }
 0x6ee   : > { %13573 = vmatpush1.bf16.msra.mxu0 %v16246_v62  ;;  %14188 = vmatpush1.bf16.msra.mxu1 %v16248_v63  ;;  %v16305_v62 = vcombine.high %v1670_v48, %v1674_v53  ;;  %v1677_v63 = vld [vmem:[%s17868_s30 + $0x2b10] sm:$0xff] }
 0x6ef   : > { %13574 = vmatprep.subr.bf16.mxu0 %v16255_v13  ;;  %14189 = vmatprep.subr.bf16.mxu1 %v16257_v0  ;;  %v1681_v13 = vld [vmem:[%s17868_s30 + $0x2b30] sm:$0xff]  ;;  %v1678_v0 = vld [vmem:[%s17868_s30 + $0x2b18] sm:$0xff] }
 0x6f0   : > { %v16311_v6 = vcombine.high %v1677_v63, %v1681_v13  ;;  %v16310_v24 = vcombine.low %v1677_v63, %v1681_v13  ;;  %v16312_v4 = vcombine.low %v1678_v0, %v1682_v3  ;;  %v1730_v63 = vld [vmem:[%s17868_s30 + $0x2cb8] sm:$0xff] }
 0x6f2   : > { %13575 = vmatpush1.bf16.msra.mxu0 %v16254_v9  ;;  %14190 = vmatpush1.bf16.msra.mxu1 %v16256_v10  ;;  %v16313_v9 = vcombine.high %v1678_v0, %v1682_v3  ;;  %v1685_v10 = vld [vmem:[%s17868_s30 + $0x2b50] sm:$0xff] }
 0x6f3   : > { %13576 = vmatprep.subr.bf16.mxu0 %v16263_v11  ;;  %14191 = vmatprep.subr.bf16.mxu1 %v16265_v56  ;;  %v1689_v11 = vld [vmem:[%s17868_s30 + $0x2b70] sm:$0xff]  ;;  %v1686_v56 = vld [vmem:[%s17868_s30 + $0x2b58] sm:$0xff] }
 0x6f4   : > { %v16319_v14 = vcombine.high %v1685_v10, %v1689_v11  ;;  %v16318_v27 = vcombine.low %v1685_v10, %v1689_v11  ;;  %v16320_v40 = vcombine.low %v1686_v56, %v1690_v12  ;;  %v1738_v10 = vld [vmem:[%s17868_s30 + $0x2cf8] sm:$0xff] }
 0x6f6   : > { %13577 = vmatpush1.bf16.msra.mxu0 %v16262_v15  ;;  %14192 = vmatpush1.bf16.msra.mxu1 %v16264_v18  ;;  %v16321_v15 = vcombine.high %v1686_v56, %v1690_v12  ;;  %v1693_v18 = vld [vmem:[%s17868_s30 + $0x2b90] sm:$0xff] }
 0x6f7   : > { %13578 = vmatprep.subr.bf16.mxu0 %v16271_v19  ;;  %14193 = vmatprep.subr.bf16.mxu1 %v16273_v54  ;;  %v1697_v19 = vld [vmem:[%s17868_s30 + $0x2bb0] sm:$0xff]  ;;  %v1694_v54 = vld [vmem:[%s17868_s30 + $0x2b98] sm:$0xff] }
 0x6f8   : > { %v16327_v23 = vcombine.high %v1693_v18, %v1697_v19  ;;  %v16326_v25 = vcombine.low %v1693_v18, %v1697_v19  ;;  %v16328_v58 = vcombine.low %v1694_v54, %v1698_v1 }
 0x6fa   : > { %13579 = vmatpush1.bf16.msra.mxu0 %v16270_v17  ;;  %14194 = vmatpush1.bf16.msra.mxu1 %v16272_v31  ;;  %v16329_v17 = vcombine.high %v1694_v54, %v1698_v1  ;;  %v1701_v31 = vld [vmem:[%s17868_s30 + $0x2bd0] sm:$0xff] }
 0x6fb   : > { %13580 = vmatprep.subr.bf16.mxu0 %v16279_v33  ;;  %14195 = vmatprep.subr.bf16.mxu1 %v16281_v35  ;;  %v1705_v33 = vld [vmem:[%s17868_s30 + $0x2bf0] sm:$0xff]  ;;  %v1702_v35 = vld [vmem:[%s17868_s30 + $0x2bd8] sm:$0xff] }
 0x6fc   : > { %v16335_v47 = vcombine.high %v1701_v31, %v1705_v33  ;;  %v16334_v60 = vcombine.low %v1701_v31, %v1705_v33  ;;  %v16336_v39 = vcombine.low %v1702_v35, %v1706_v21  ;;  %v1749_v1 = vld [vmem:[%s17868_s30 + $0x2d50] sm:$0xff] }
 0x6fe   : > { %13581 = vmatpush1.bf16.msra.mxu0 %v16278_v36  ;;  %14196 = vmatpush1.bf16.msra.mxu1 %v16280_v16  ;;  %v16337_v36 = vcombine.high %v1702_v35, %v1706_v21  ;;  %v1709_v16 = vld [vmem:[%s17868_s30 + $0x2c10] sm:$0xff] }
 0x6ff   : > { %13582 = vmatprep.subr.bf16.mxu0 %v16287_v38  ;;  %14197 = vmatprep.subr.bf16.mxu1 %v16289_v45  ;;  %v1713_v38 = vld [vmem:[%s17868_s30 + $0x2c30] sm:$0xff]  ;;  %v1710_v45 = vld [vmem:[%s17868_s30 + $0x2c18] sm:$0xff] }
 0x700   : > { %v16343_v50 = vcombine.high %v1709_v16, %v1713_v38  ;;  %v16342_v44 = vcombine.low %v1709_v16, %v1713_v38  ;;  %v16344_v48 = vcombine.low %v1710_v45, %v1714_v37  ;;  %v1757_v21 = vld [vmem:[%s17868_s30 + $0x2d90] sm:$0xff] }
 0x702   : > { %13583 = vmatpush1.bf16.msra.mxu0 %v16286_v41  ;;  %14198 = vmatpush1.bf16.msra.mxu1 %v16288_v42  ;;  %v16345_v41 = vcombine.high %v1710_v45, %v1714_v37  ;;  %v1717_v42 = vld [vmem:[%s17868_s30 + $0x2c50] sm:$0xff] }
 0x703   : > { %13584 = vmatprep.subr.bf16.mxu0 %v16295_v20  ;;  %14199 = vmatprep.subr.bf16.mxu1 %v16297_v43  ;;  %v1721_v20 = vld [vmem:[%s17868_s30 + $0x2c70] sm:$0xff]  ;;  %v1718_v43 = vld [vmem:[%s17868_s30 + $0x2c58] sm:$0xff] }
 0x704   : > { %v16351_v53 = vcombine.high %v1717_v42, %v1721_v20  ;;  %v16350_v13 = vcombine.low %v1717_v42, %v1721_v20  ;;  %v16352_v0 = vcombine.low %v1718_v43, %v1722_v55  ;;  %v1765_v37 = vld [vmem:[%s17868_s30 + $0x2dd0] sm:$0xff] }
 0x706   : > { %13585 = vmatpush1.bf16.msra.mxu0 %v16294_v57  ;;  %14200 = vmatpush1.bf16.msra.mxu1 %v16296_v26  ;;  %v16353_v57 = vcombine.high %v1718_v43, %v1722_v55  ;;  %v1725_v26 = vld [vmem:[%s17868_s30 + $0x2c90] sm:$0xff] }
 0x707   : > { %13586 = vmatprep.subr.bf16.mxu0 %v16303_v61  ;;  %14201 = vmatprep.subr.bf16.mxu1 %v16305_v62  ;;  %v1729_v61 = vld [vmem:[%s17868_s30 + $0x2cb0] sm:$0xff]  ;;  %v1726_v62 = vld [vmem:[%s17868_s30 + $0x2c98] sm:$0xff] }
 0x708   : > { %v16359_v3 = vcombine.high %v1725_v26, %v1729_v61  ;;  %v16360_v11 = vcombine.low %v1726_v62, %v1730_v63  ;;  %v1773_v55 = vld [vmem:[%s17868_s30 + $0x2e10] sm:$0xff] }
 0x70a   : > { %13587 = vmatpush1.bf16.msra.mxu0 %v16302_v51  ;;  %14202 = vmatpush1.bf16.msra.mxu1 %v16304_v7  ;;  %v16361_v51 = vcombine.high %v1726_v62, %v1730_v63  ;;  %v1733_v7 = vld [vmem:[%s17868_s30 + $0x2cd0] sm:$0xff] }
 0x70b   : > { %13588 = vmatprep.subr.bf16.mxu0 %v16311_v6  ;;  %14203 = vmatprep.subr.bf16.mxu1 %v16313_v9  ;;  %v1737_v6 = vld [vmem:[%s17868_s30 + $0x2cf0] sm:$0xff]  ;;  %v1734_v9 = vld [vmem:[%s17868_s30 + $0x2cd8] sm:$0xff] }
 0x70c   : > { %v16367_v56 = vcombine.high %v1733_v7, %v1737_v6  ;;  %v16369_v12 = vcombine.high %v1734_v9, %v1738_v10  ;;  %v16366_v18 = vcombine.low %v1733_v7, %v1737_v6  ;;  %v1781_v63 = vld [vmem:[%s17868_s30 + $0x2e50] sm:$0xff] }
 0x70e   : > { %13589 = vmatpush1.bf16.msra.mxu0 %v16310_v24  ;;  %14204 = vmatpush1.bf16.msra.mxu1 %v16312_v4  ;;  %v1741_v24 = vld [vmem:[%s17868_s30 + $0x2d10] sm:$0xff] }
 0x70f   : > { %13590 = vmatprep.subr.bf16.mxu0 %v16319_v14  ;;  %14205 = vmatprep.subr.bf16.mxu1 %v16321_v15  ;;  %v1745_v4 = vld [vmem:[%s17868_s30 + $0x2d30] sm:$0xff]  ;;  %v1742_v14 = vld [vmem:[%s17868_s30 + $0x2d18] sm:$0xff] }
 0x710   : > { %v1746_v15 = vld [vmem:[%s17868_s30 + $0x2d38] sm:$0xff]  ;;  %v16375_v19 = vcombine.high %v1741_v24, %v1745_v4 }
 0x711   : > { %v16377_v54 = vcombine.high %v1742_v14, %v1746_v15  ;;  %v16376_v31 = vcombine.low %v1742_v14, %v1746_v15  ;;  %v1797_v15 = vld [vmem:[%s17868_s30 + $0x2ed0] sm:$0xff] }
 0x712   : > { %13591 = vmatpush1.bf16.msra.mxu0 %v16318_v27  ;;  %14206 = vmatpush1.bf16.msra.mxu1 %v16320_v40  ;;  %v1753_v27 = vld [vmem:[%s17868_s30 + $0x2d70] sm:$0xff]  ;;  %v1750_v40 = vld [vmem:[%s17868_s30 + $0x2d58] sm:$0xff] }
 0x713   : > { %13592 = vmatprep.subr.bf16.mxu0 %v16327_v23  ;;  %14207 = vmatprep.subr.bf16.mxu1 %v16329_v17  ;;  %v1754_v23 = vld [vmem:[%s17868_s30 + $0x2d78] sm:$0xff]  ;;  %v16374_v17 = vcombine.low %v1741_v24, %v1745_v4  ;;  %v16383_v33 = vcombine.high %v1749_v1, %v1753_v27 }
 0x714   : > { %v16385_v35 = vcombine.high %v1750_v40, %v1754_v23  ;;  %v16384_v16 = vcombine.low %v1750_v40, %v1754_v23  ;;  %v1805_v23 = vld [vmem:[%s17868_s30 + $0x2f10] sm:$0xff] }
 0x716   : > { %13593 = vmatpush1.bf16.msra.mxu0 %v16326_v25  ;;  %14208 = vmatpush1.bf16.msra.mxu1 %v16328_v58  ;;  %v1761_v25 = vld [vmem:[%s17868_s30 + $0x2db0] sm:$0xff]  ;;  %v1758_v58 = vld [vmem:[%s17868_s30 + $0x2d98] sm:$0xff] }
 0x717   : > { %13594 = vmatprep.subr.bf16.mxu0 %v16335_v47  ;;  %14209 = vmatprep.subr.bf16.mxu1 %v16337_v36  ;;  %v1762_v47 = vld [vmem:[%s17868_s30 + $0x2db8] sm:$0xff]  ;;  %v16382_v36 = vcombine.low %v1749_v1, %v1753_v27  ;;  %v16391_v38 = vcombine.high %v1757_v21, %v1761_v25 }
 0x718   : > { %v16393_v45 = vcombine.high %v1758_v58, %v1762_v47  ;;  %v16392_v42 = vcombine.low %v1758_v58, %v1762_v47  ;;  %v1813_v47 = vld [vmem:[%s17868_s30 + $0x2f50] sm:$0xff] }
 0x71a   : > { %13595 = vmatpush1.bf16.msra.mxu0 %v16334_v60  ;;  %14210 = vmatpush1.bf16.msra.mxu1 %v16336_v39  ;;  %v1769_v60 = vld [vmem:[%s17868_s30 + $0x2df0] sm:$0xff]  ;;  %v1766_v39 = vld [vmem:[%s17868_s30 + $0x2dd8] sm:$0xff] }
 0x71b   : > { %13605 = vmatprep.subr.bf16.mxu0 %v16343_v50  ;;  %14220 = vmatprep.subr.bf16.mxu1 %v16345_v41  ;;  %v1770_v50 = vld [vmem:[%s17868_s30 + $0x2df8] sm:$0xff]  ;;  %v16390_v41 = vcombine.low %v1757_v21, %v1761_v25  ;;  %v16399_v20 = vcombine.high %v1765_v37, %v1769_v60 }
 0x71c   : > { %v16401_v43 = vcombine.high %v1766_v39, %v1770_v50 }
 0x71d   : > { %13597 = vmatmul.mubr.bf16.vlgmr.msra.gmra.mrb[4].mxu0 %v18752_v52  ;;  %14212 = vmatmul.mubr.bf16.vlgmr.msra.gmra.mrb[4].mxu1 %v18752_v52  ;;  %v16358_v52 = vcombine.low %v1725_v26, %v1729_v61  ;;  %v16400_v26 = vcombine.low %v1766_v39, %v1770_v50  ;;  %v1821_v50 = vld [vmem:[%s17868_s30 + $0x2f90] sm:$0xff] }
 0x71e   : > { %13606 = vmatpush1.bf16.msra.mxu0 %v16342_v44  ;;  %14221 = vmatpush1.bf16.msra.mxu1 %v16344_v48  ;;  %v1777_v44 = vld [vmem:[%s17868_s30 + $0x2e30] sm:$0xff]  ;;  %v1774_v48 = vld [vmem:[%s17868_s30 + $0x2e18] sm:$0xff] }
 0x71f   : > { %13607 = vmatprep.subr.bf16.mxu0 %v16351_v53  ;;  %14222 = vmatprep.subr.bf16.mxu1 %v16353_v57  ;;  %v1778_v53 = vld [vmem:[%s17868_s30 + $0x2e38] sm:$0xff]  ;;  %v16398_v57 = vcombine.low %v1765_v37, %v1769_v60  ;;  %v16407_v61 = vcombine.high %v1773_v55, %v1777_v44 }
 0x720   : > { %13637 = vmatprep.mubr.bf16.mxu0 %v18763_v49  ;;  %14252 = vmatprep.mubr.bf16.mxu1 %v18763_v49  ;;  %v16368_v49 = vcombine.low %v1734_v9, %v1738_v10  ;;  %v16409_v62 = vcombine.high %v1774_v48, %v1778_v53  ;;  %v16408_v7 = vcombine.low %v1774_v48, %v1778_v53  ;;  %v1789_v10 = vld [vmem:[%s17868_s30 + $0x2e90] sm:$0xff] }
 0x721   : > { %v1829_v53 = vld [vmem:[%s17868_s30 + $0x2fd0] sm:$0xff] }
 0x722   : > { %13608 = vmatpush1.bf16.msra.mxu0 %v16350_v13  ;;  %14223 = vmatpush1.bf16.msra.mxu1 %v16352_v0  ;;  %v1785_v13 = vld [vmem:[%s17868_s30 + $0x2e70] sm:$0xff]  ;;  %v1782_v0 = vld [vmem:[%s17868_s30 + $0x2e58] sm:$0xff] }
 0x723   : > { %13609 = vmatprep.subr.bf16.mxu0 %v16359_v3  ;;  %14224 = vmatprep.subr.bf16.mxu1 %v16361_v51  ;;  %v1786_v3 = vld [vmem:[%s17868_s30 + $0x2e78] sm:$0xff]  ;;  %v16406_v51 = vcombine.low %v1773_v55, %v1777_v44  ;;  %v16415_v6 = vcombine.high %v1781_v63, %v1785_v13 }
 0x724   : > { %v16417_v9 = vcombine.high %v1782_v0, %v1786_v3  ;;  %v16416_v24 = vcombine.low %v1782_v0, %v1786_v3  ;;  %v1837_v3 = vld [vmem:[%s17868_s30 + $0x3010] sm:$0xff] }
 0x726   : > { %13610 = vmatpush1.bf16.msra.mxu0 %v16358_v52  ;;  %14225 = vmatpush1.bf16.msra.mxu1 %v16360_v11  ;;  %v1793_v52 = vld [vmem:[%s17868_s30 + $0x2eb0] sm:$0xff]  ;;  %v1790_v11 = vld [vmem:[%s17868_s30 + $0x2e98] sm:$0xff] }
 0x727   : > { %13611 = vmatprep.subr.bf16.mxu0 %v16367_v56  ;;  %14226 = vmatprep.subr.bf16.mxu1 %v16369_v12  ;;  %v1794_v56 = vld [vmem:[%s17868_s30 + $0x2eb8] sm:$0xff]  ;;  %v16414_v12 = vcombine.low %v1781_v63, %v1785_v13  ;;  %v16423_v4 = vcombine.high %v1789_v10, %v1793_v52 }
 0x728   : > { %v16425_v14 = vcombine.high %v1790_v11, %v1794_v56  ;;  %v16424_v1 = vcombine.low %v1790_v11, %v1794_v56  ;;  %v1845_v56 = vld [vmem:[%s17868_s30 + $0x3050] sm:$0xff] }
 0x72a   : > { %13612 = vmatpush1.bf16.msra.mxu0 %v16366_v18  ;;  %14227 = vmatpush1.bf16.msra.mxu1 %v16368_v49  ;;  %v1801_v18 = vld [vmem:[%s17868_s30 + $0x2ef0] sm:$0xff]  ;;  %v1798_v49 = vld [vmem:[%s17868_s30 + $0x2ed8] sm:$0xff] }
 0x72b   : > { %13613 = vmatprep.subr.bf16.mxu0 %v16375_v19  ;;  %14228 = vmatprep.subr.bf16.mxu1 %v16377_v54  ;;  %v1802_v19 = vld [vmem:[%s17868_s30 + $0x2ef8] sm:$0xff]  ;;  %v16422_v54 = vcombine.low %v1789_v10, %v1793_v52  ;;  %v16431_v27 = vcombine.high %v1797_v15, %v1801_v18 }
 0x72c   : > { %v16433_v40 = vcombine.high %v1798_v49, %v1802_v19  ;;  %v16432_v21 = vcombine.low %v1798_v49, %v1802_v19  ;;  %v1853_v19 = vld [vmem:[%s17868_s30 + $0x3090] sm:$0xff] }
 0x72e   : > { %13614 = vmatpush1.bf16.msra.mxu0 %v16374_v17  ;;  %14229 = vmatpush1.bf16.msra.mxu1 %v16376_v31  ;;  %v1809_v17 = vld [vmem:[%s17868_s30 + $0x2f30] sm:$0xff]  ;;  %v1806_v31 = vld [vmem:[%s17868_s30 + $0x2f18] sm:$0xff] }
 0x72f   : > { %13615 = vmatprep.subr.bf16.mxu0 %v16383_v33  ;;  %14230 = vmatprep.subr.bf16.mxu1 %v16385_v35  ;;  %v1810_v33 = vld [vmem:[%s17868_s30 + $0x2f38] sm:$0xff]  ;;  %v16430_v35 = vcombine.low %v1797_v15, %v1801_v18  ;;  %v16439_v25 = vcombine.high %v1805_v23, %v1809_v17 }
 0x730   : > { %v16441_v58 = vcombine.high %v1806_v31, %v1810_v33  ;;  %v16440_v37 = vcombine.low %v1806_v31, %v1810_v33  ;;  %v1861_v33 = vld [vmem:[%s17868_s30 + $0x30d0] sm:$0xff] }
 0x732   : > { %13616 = vmatpush1.bf16.msra.mxu0 %v16382_v36  ;;  %14231 = vmatpush1.bf16.msra.mxu1 %v16384_v16  ;;  %v1817_v36 = vld [vmem:[%s17868_s30 + $0x2f70] sm:$0xff]  ;;  %v1814_v16 = vld [vmem:[%s17868_s30 + $0x2f58] sm:$0xff] }
 0x733   : > { %13617 = vmatprep.subr.bf16.mxu0 %v16391_v38  ;;  %14232 = vmatprep.subr.bf16.mxu1 %v16393_v45  ;;  %v1818_v38 = vld [vmem:[%s17868_s30 + $0x2f78] sm:$0xff]  ;;  %v16438_v45 = vcombine.low %v1805_v23, %v1809_v17  ;;  %v16447_v60 = vcombine.high %v1813_v47, %v1817_v36 }
 0x734   : > { %v16449_v39 = vcombine.high %v1814_v16, %v1818_v38  ;;  %v16448_v55 = vcombine.low %v1814_v16, %v1818_v38  ;;  %v1869_v16 = vld [vmem:[%s17868_s30 + $0x3110] sm:$0xff] }
 0x735   : > { %v1873_v38 = vld [vmem:[%s17868_s30 + $0x3130] sm:$0xff] }
 0x736   : > { %13618 = vmatpush1.bf16.msra.mxu0 %v16390_v41  ;;  %14233 = vmatpush1.bf16.msra.mxu1 %v16392_v42  ;;  %v1825_v41 = vld [vmem:[%s17868_s30 + $0x2fb0] sm:$0xff]  ;;  %v1822_v42 = vld [vmem:[%s17868_s30 + $0x2f98] sm:$0xff] }
 0x737   : > { %13619 = vmatprep.subr.bf16.mxu0 %v16399_v20  ;;  %14234 = vmatprep.subr.bf16.mxu1 %v16401_v43  ;;  %v1826_v20 = vld [vmem:[%s17868_s30 + $0x2fb8] sm:$0xff]  ;;  %v16446_v43 = vcombine.low %v1813_v47, %v1817_v36  ;;  %v16455_v44 = vcombine.high %v1821_v50, %v1825_v41 }
 0x738   : > { %v16457_v48 = vcombine.high %v1822_v42, %v1826_v20  ;;  %v16456_v63 = vcombine.low %v1822_v42, %v1826_v20  ;;  %v1881_v42 = vld [vmem:[%s17868_s30 + $0x3170] sm:$0xff]  ;;  %v1878_v20 = vld [vmem:[%s17868_s30 + $0x3158] sm:$0xff] }
 0x73a   : > { %13620 = vmatpush1.bf16.msra.mxu0 %v16398_v57  ;;  %14235 = vmatpush1.bf16.msra.mxu1 %v16400_v26  ;;  %v1833_v57 = vld [vmem:[%s17868_s30 + $0x2ff0] sm:$0xff]  ;;  %v1830_v26 = vld [vmem:[%s17868_s30 + $0x2fd8] sm:$0xff] }
 0x73b   : > { %13621 = vmatprep.subr.bf16.mxu0 %v16407_v61  ;;  %14236 = vmatprep.subr.bf16.mxu1 %v16409_v62  ;;  %v1834_v61 = vld [vmem:[%s17868_s30 + $0x2ff8] sm:$0xff]  ;;  %v16454_v62 = vcombine.low %v1821_v50, %v1825_v41  ;;  %v16463_v13 = vcombine.high %v1829_v53, %v1833_v57  ;;  %v1877_v41 = vld [vmem:[%s17868_s30 + $0x3150] sm:$0xff] }
 0x73c   : > { %v16465_v0 = vcombine.high %v1830_v26, %v1834_v61  ;;  %v16464_v10 = vcombine.low %v1830_v26, %v1834_v61  ;;  %v1889_v26 = vld [vmem:[%s17868_s30 + $0x31b0] sm:$0xff]  ;;  %v1886_v61 = vld [vmem:[%s17868_s30 + $0x3198] sm:$0xff] }
 0x73e   : > { %13622 = vmatpush1.bf16.msra.mxu0 %v16406_v51  ;;  %14237 = vmatpush1.bf16.msra.mxu1 %v16408_v7  ;;  %v1841_v51 = vld [vmem:[%s17868_s30 + $0x3030] sm:$0xff]  ;;  %v1838_v7 = vld [vmem:[%s17868_s30 + $0x3018] sm:$0xff] }
 0x73f   : > { %13623 = vmatprep.subr.bf16.mxu0 %v16415_v6  ;;  %14238 = vmatprep.subr.bf16.mxu1 %v16417_v9  ;;  %v1842_v6 = vld [vmem:[%s17868_s30 + $0x3038] sm:$0xff]  ;;  %v16462_v9 = vcombine.low %v1829_v53, %v1833_v57  ;;  %v16471_v52 = vcombine.high %v1837_v3, %v1841_v51  ;;  %v1885_v57 = vld [vmem:[%s17868_s30 + $0x3190] sm:$0xff] }
 0x740   : > { %v16473_v11 = vcombine.high %v1838_v7, %v1842_v6  ;;  %v16472_v15 = vcombine.low %v1838_v7, %v1842_v6  ;;  %v1897_v7 = vld [vmem:[%s17868_s30 + $0x31f0] sm:$0xff]  ;;  %v1894_v6 = vld [vmem:[%s17868_s30 + $0x31d8] sm:$0xff] }
 0x742   : > { %13624 = vmatpush1.bf16.msra.mxu0 %v16414_v12  ;;  %14239 = vmatpush1.bf16.msra.mxu1 %v16416_v24  ;;  %v1849_v12 = vld [vmem:[%s17868_s30 + $0x3070] sm:$0xff]  ;;  %v1846_v24 = vld [vmem:[%s17868_s30 + $0x3058] sm:$0xff] }
 0x743   : > { %13625 = vmatprep.subr.bf16.mxu0 %v16423_v4  ;;  %14240 = vmatprep.subr.bf16.mxu1 %v16425_v14  ;;  %v1850_v4 = vld [vmem:[%s17868_s30 + $0x3078] sm:$0xff]  ;;  %v16470_v14 = vcombine.low %v1837_v3, %v1841_v51  ;;  %v16479_v18 = vcombine.high %v1845_v56, %v1849_v12  ;;  %v1893_v51 = vld [vmem:[%s17868_s30 + $0x31d0] sm:$0xff] }
 0x744   : > { %v16481_v49 = vcombine.high %v1846_v24, %v1850_v4  ;;  %v16480_v23 = vcombine.low %v1846_v24, %v1850_v4  ;;  %v1905_v24 = vld [vmem:[%s17868_s30 + $0x3230] sm:$0xff]  ;;  %v1902_v4 = vld [vmem:[%s17868_s30 + $0x3218] sm:$0xff] }
 0x746   : > { %13626 = vmatpush1.bf16.msra.mxu0 %v16422_v54  ;;  %14241 = vmatpush1.bf16.msra.mxu1 %v16424_v1  ;;  %v1857_v54 = vld [vmem:[%s17868_s30 + $0x30b0] sm:$0xff]  ;;  %v1854_v1 = vld [vmem:[%s17868_s30 + $0x3098] sm:$0xff] }
 0x747   : > { %13627 = vmatprep.subr.bf16.mxu0 %v16431_v27  ;;  %14242 = vmatprep.subr.bf16.mxu1 %v16433_v40  ;;  %v1858_v27 = vld [vmem:[%s17868_s30 + $0x30b8] sm:$0xff]  ;;  %v16478_v40 = vcombine.low %v1845_v56, %v1849_v12  ;;  %v16487_v17 = vcombine.high %v1853_v19, %v1857_v54  ;;  %v1901_v12 = vld [vmem:[%s17868_s30 + $0x3210] sm:$0xff] }
 0x748   : > { %v16489_v31 = vcombine.high %v1854_v1, %v1858_v27 }
 0x74a   : > { %13628 = vmatpush1.bf16.msra.mxu0 %v16430_v35  ;;  %14243 = vmatpush1.bf16.msra.mxu1 %v16432_v21  ;;  %v1865_v35 = vld [vmem:[%s17868_s30 + $0x30f0] sm:$0xff]  ;;  %v1862_v21 = vld [vmem:[%s17868_s30 + $0x30d8] sm:$0xff] }
 0x74b   : > { %13629 = vmatprep.subr.bf16.mxu0 %v16439_v25  ;;  %14244 = vmatprep.subr.bf16.mxu1 %v16441_v58  ;;  %v1866_v25 = vld [vmem:[%s17868_s30 + $0x30f8] sm:$0xff]  ;;  %v16488_v58 = vcombine.low %v1854_v1, %v1858_v27  ;;  %v16495_v47 = vcombine.high %v1861_v33, %v1865_v35  ;;  %v1913_v1 = vld [vmem:[%s17868_s30 + $0x3270] sm:$0xff] }
 0x74c   : > { %v16497_v36 = vcombine.high %v1862_v21, %v1866_v25  ;;  %v1910_v27 = vld [vmem:[%s17868_s30 + $0x3258] sm:$0xff] }
 0x74e   : > { %13630 = vmatpush1.bf16.msra.mxu0 %v16438_v45  ;;  %14245 = vmatpush1.bf16.msra.mxu1 %v16440_v37  ;;  %v1870_v45 = vld [vmem:[%s17868_s30 + $0x3118] sm:$0xff] }
 0x74f   : > { %13631 = vmatprep.subr.bf16.mxu0 %v16447_v60  ;;  %14246 = vmatprep.subr.bf16.mxu1 %v16449_v39  ;;  %v1874_v37 = vld [vmem:[%s17868_s30 + $0x3138] sm:$0xff]  ;;  %v16494_v60 = vcombine.low %v1861_v33, %v1865_v35  ;;  %v16503_v39 = vcombine.high %v1869_v16, %v1873_v38  ;;  %v1917_v35 = vld [vmem:[%s17868_s30 + $0x3290] sm:$0xff] }
 0x750   : > { %v16505_v50 = vcombine.high %v1870_v45, %v1874_v37 }
 0x752   : > { %13632 = vmatpush1.bf16.msra.mxu0 %v16446_v43  ;;  %14247 = vmatpush1.bf16.msra.mxu1 %v16448_v55  ;;  %v1882_v43 = vld [vmem:[%s17868_s30 + $0x3178] sm:$0xff]  ;;  %v16502_v55 = vcombine.low %v1869_v16, %v1873_v38  ;;  %v1925_v38 = vld [vmem:[%s17868_s30 + $0x32d0] sm:$0xff] }
 0x753   : > { %13633 = vmatprep.subr.bf16.mxu0 %v16455_v44  ;;  %14248 = vmatprep.subr.bf16.mxu1 %v16457_v48  ;;  %v16504_v44 = vcombine.low %v1870_v45, %v1874_v37  ;;  %v16511_v48 = vcombine.high %v1877_v41, %v1881_v42  ;;  %v16513_v53 = vcombine.high %v1878_v20, %v1882_v43  ;;  %v1929_v45 = vld [vmem:[%s17868_s30 + $0x32f0] sm:$0xff]  ;;  %v1926_v37 = vld [vmem:[%s17868_s30 + $0x32d8] sm:$0xff] }
 0x756   : > { %13634 = vmatpush1.bf16.msra.mxu0 %v16454_v62  ;;  %14249 = vmatpush1.bf16.msra.mxu1 %v16456_v63  ;;  %v1890_v62 = vld [vmem:[%s17868_s30 + $0x31b8] sm:$0xff]  ;;  %v16510_v63 = vcombine.low %v1877_v41, %v1881_v42  ;;  %v1933_v42 = vld [vmem:[%s17868_s30 + $0x3310] sm:$0xff] }
 0x757   : > { %13635 = vmatprep.subr.bf16.mxu0 %v16463_v13  ;;  %14250 = vmatprep.subr.bf16.mxu1 %v16465_v0  ;;  %v16512_v13 = vcombine.low %v1878_v20, %v1882_v43  ;;  %v16519_v0 = vcombine.high %v1885_v57, %v1889_v26  ;;  %v16521_v3 = vcombine.high %v1886_v61, %v1890_v62  ;;  %v1937_v20 = vld [vmem:[%s17868_s30 + $0x3330] sm:$0xff]  ;;  %v1934_v43 = vld [vmem:[%s17868_s30 + $0x3318] sm:$0xff] }
 0x75a   : > { %13636 = vmatpush1.bf16.msra.mxu0 %v16462_v9  ;;  %14251 = vmatpush1.bf16.msra.mxu1 %v16464_v10  ;;  %v1898_v9 = vld [vmem:[%s17868_s30 + $0x31f8] sm:$0xff]  ;;  %v16518_v10 = vcombine.low %v1885_v57, %v1889_v26  ;;  %v1941_v26 = vld [vmem:[%s17868_s30 + $0x3350] sm:$0xff] }
 0x75b   : > { %13646 = vmatprep.subr.bf16.mxu0 %v16471_v52  ;;  %14261 = vmatprep.subr.bf16.mxu1 %v16473_v11  ;;  %v16520_v52 = vcombine.low %v1886_v61, %v1890_v62  ;;  %v16527_v11 = vcombine.high %v1893_v51, %v1897_v7  ;;  %v16529_v56 = vcombine.high %v1894_v6, %v1898_v9  ;;  %v1945_v61 = vld [vmem:[%s17868_s30 + $0x3370] sm:$0xff]  ;;  %v1942_v62 = vld [vmem:[%s17868_s30 + $0x3358] sm:$0xff] }
 0x75d   : > { %13638 = vmatmul.mubr.bf16.vlgmr.msra.gmra.mrb[4].mxu0 %v18831_v5  ;;  %14253 = vmatmul.mubr.bf16.vlgmr.msra.gmra.mrb[4].mxu1 %v18831_v5  ;;  %v16486_v5 = vcombine.low %v1853_v19, %v1857_v54  ;;  %v1909_v54 = vld [vmem:[%s17868_s30 + $0x3250] sm:$0xff] }
 0x75e   : > { %13647 = vmatpush1.bf16.msra.mxu0 %v16470_v14  ;;  %14262 = vmatpush1.bf16.msra.mxu1 %v16472_v15  ;;  %v1906_v14 = vld [vmem:[%s17868_s30 + $0x3238] sm:$0xff]  ;;  %v16526_v15 = vcombine.low %v1893_v51, %v1897_v7  ;;  %v1949_v7 = vld [vmem:[%s17868_s30 + $0x3390] sm:$0xff] }
 0x75f   : > { %13648 = vmatprep.subr.bf16.mxu0 %v16479_v18  ;;  %14263 = vmatprep.subr.bf16.mxu1 %v16481_v49  ;;  %v16528_v18 = vcombine.low %v1894_v6, %v1898_v9  ;;  %v16535_v49 = vcombine.high %v1901_v12, %v1905_v24  ;;  %v16537_v19 = vcombine.high %v1902_v4, %v1906_v14  ;;  %v1953_v6 = vld [vmem:[%s17868_s30 + $0x33b0] sm:$0xff]  ;;  %v1950_v9 = vld [vmem:[%s17868_s30 + $0x3398] sm:$0xff] }
 0x760   : > { %13678 = vmatprep.mubr.bf16.mxu0 %v18842_v59  ;;  %14293 = vmatprep.mubr.bf16.mxu1 %v18842_v59  ;;  %v16496_v59 = vcombine.low %v1862_v21, %v1866_v25  ;;  %v1921_v21 = vld [vmem:[%s17868_s30 + $0x32b0] sm:$0xff]  ;;  %v1918_v25 = vld [vmem:[%s17868_s30 + $0x3298] sm:$0xff] }
 0x762   : > { %13649 = vmatpush1.bf16.msra.mxu0 %v16478_v40  ;;  %14264 = vmatpush1.bf16.msra.mxu1 %v16480_v23  ;;  %v1914_v40 = vld [vmem:[%s17868_s30 + $0x3278] sm:$0xff]  ;;  %v16534_v23 = vcombine.low %v1901_v12, %v1905_v24  ;;  %v1957_v24 = vld [vmem:[%s17868_s30 + $0x33d0] sm:$0xff] }
 0x763   : > { %13650 = vmatprep.subr.bf16.mxu0 %v16487_v17  ;;  %14265 = vmatprep.subr.bf16.mxu1 %v16489_v31  ;;  %v16536_v17 = vcombine.low %v1902_v4, %v1906_v14  ;;  %v16543_v31 = vcombine.high %v1909_v54, %v1913_v1  ;;  %v16545_v33 = vcombine.high %v1910_v27, %v1914_v40  ;;  %v1961_v4 = vld [vmem:[%s17868_s30 + $0x33f0] sm:$0xff]  ;;  %v1958_v14 = vld [vmem:[%s17868_s30 + $0x33d8] sm:$0xff] }
 0x766   : > { %13651 = vmatpush1.bf16.msra.mxu0 %v16486_v5  ;;  %14266 = vmatpush1.bf16.msra.mxu1 %v16488_v58  ;;  %v1922_v5 = vld [vmem:[%s17868_s30 + $0x32b8] sm:$0xff]  ;;  %v16542_v58 = vcombine.low %v1909_v54, %v1913_v1  ;;  %v1965_v1 = vld [vmem:[%s17868_s30 + $0x3410] sm:$0xff] }
 0x767   : > { %13652 = vmatprep.subr.bf16.mxu0 %v16495_v47  ;;  %14267 = vmatprep.subr.bf16.mxu1 %v16497_v36  ;;  %v16544_v47 = vcombine.low %v1910_v27, %v1914_v40  ;;  %v16551_v36 = vcombine.high %v1917_v35, %v1921_v21  ;;  %v16553_v16 = vcombine.high %v1918_v25, %v1922_v5  ;;  %v1969_v27 = vld [vmem:[%s17868_s30 + $0x3430] sm:$0xff]  ;;  %v1966_v40 = vld [vmem:[%s17868_s30 + $0x3418] sm:$0xff] }
 0x76a   : > { %13653 = vmatpush1.bf16.msra.mxu0 %v16494_v60  ;;  %14268 = vmatpush1.bf16.msra.mxu1 %v16496_v59  ;;  %v1930_v60 = vld [vmem:[%s17868_s30 + $0x32f8] sm:$0xff]  ;;  %v16550_v59 = vcombine.low %v1917_v35, %v1921_v21  ;;  %v1973_v21 = vld [vmem:[%s17868_s30 + $0x3450] sm:$0xff] }
 0x76b   : > { %13654 = vmatprep.subr.bf16.mxu0 %v16503_v39  ;;  %14269 = vmatprep.subr.bf16.mxu1 %v16505_v50  ;;  %v16552_v39 = vcombine.low %v1918_v25, %v1922_v5  ;;  %v16559_v50 = vcombine.high %v1925_v38, %v1929_v45  ;;  %v16561_v41 = vcombine.high %v1926_v37, %v1930_v60  ;;  %v1977_v25 = vld [vmem:[%s17868_s30 + $0x3470] sm:$0xff]  ;;  %v1974_v5 = vld [vmem:[%s17868_s30 + $0x3458] sm:$0xff] }
 0x76e   : > { %13655 = vmatpush1.bf16.msra.mxu0 %v16502_v55  ;;  %14270 = vmatpush1.bf16.msra.mxu1 %v16504_v44  ;;  %v1938_v55 = vld [vmem:[%s17868_s30 + $0x3338] sm:$0xff]  ;;  %v16558_v44 = vcombine.low %v1925_v38, %v1929_v45  ;;  %v1981_v45 = vld [vmem:[%s17868_s30 + $0x3490] sm:$0xff] }
 0x76f   : > { %13656 = vmatprep.subr.bf16.mxu0 %v16511_v48  ;;  %14271 = vmatprep.subr.bf16.mxu1 %v16513_v53  ;;  %v16560_v48 = vcombine.low %v1926_v37, %v1930_v60  ;;  %v16567_v53 = vcombine.high %v1933_v42, %v1937_v20  ;;  %v16569_v57 = vcombine.high %v1934_v43, %v1938_v55  ;;  %v1985_v37 = vld [vmem:[%s17868_s30 + $0x34b0] sm:$0xff]  ;;  %v1982_v60 = vld [vmem:[%s17868_s30 + $0x3498] sm:$0xff] }
 0x772   : > { %13657 = vmatpush1.bf16.msra.mxu0 %v16510_v63  ;;  %14272 = vmatpush1.bf16.msra.mxu1 %v16512_v13  ;;  %v1946_v63 = vld [vmem:[%s17868_s30 + $0x3378] sm:$0xff]  ;;  %v16566_v13 = vcombine.low %v1933_v42, %v1937_v20  ;;  %v1989_v20 = vld [vmem:[%s17868_s30 + $0x34d0] sm:$0xff] }
 0x773   : > { %13658 = vmatprep.subr.bf16.mxu0 %v16519_v0  ;;  %14273 = vmatprep.subr.bf16.mxu1 %v16521_v3  ;;  %v16568_v0 = vcombine.low %v1934_v43, %v1938_v55  ;;  %v16575_v3 = vcombine.high %v1941_v26, %v1945_v61  ;;  %v16577_v51 = vcombine.high %v1942_v62, %v1946_v63  ;;  %v1993_v43 = vld [vmem:[%s17868_s30 + $0x34f0] sm:$0xff]  ;;  %v1990_v55 = vld [vmem:[%s17868_s30 + $0x34d8] sm:$0xff] }
 0x776   : > { %13659 = vmatpush1.bf16.msra.mxu0 %v16518_v10  ;;  %14274 = vmatpush1.bf16.msra.mxu1 %v16520_v52  ;;  %v1954_v10 = vld [vmem:[%s17868_s30 + $0x33b8] sm:$0xff]  ;;  %v16574_v52 = vcombine.low %v1941_v26, %v1945_v61  ;;  %v1997_v26 = vld [vmem:[%s17868_s30 + $0x3510] sm:$0xff] }
 0x777   : > { %13660 = vmatprep.subr.bf16.mxu0 %v16527_v11  ;;  %14275 = vmatprep.subr.bf16.mxu1 %v16529_v56  ;;  %v16576_v11 = vcombine.low %v1942_v62, %v1946_v63  ;;  %v16583_v56 = vcombine.high %v1949_v7, %v1953_v6  ;;  %v16585_v12 = vcombine.high %v1950_v9, %v1954_v10  ;;  %v2001_v61 = vld [vmem:[%s17868_s30 + $0x3530] sm:$0xff]  ;;  %v1998_v62 = vld [vmem:[%s17868_s30 + $0x3518] sm:$0xff] }
 0x778   : > { %v2002_v63 = vld [vmem:[%s17868_s30 + $0x3538] sm:$0xff] }
 0x77a   : > { %13661 = vmatpush1.bf16.msra.mxu0 %v16526_v15  ;;  %14276 = vmatpush1.bf16.msra.mxu1 %v16528_v18  ;;  %v1962_v15 = vld [vmem:[%s17868_s30 + $0x33f8] sm:$0xff]  ;;  %v16582_v18 = vcombine.low %v1949_v7, %v1953_v6  ;;  %v2009_v7 = vld [vmem:[%s17868_s30 + $0x3570] sm:$0xff] }
 0x77b   : > { %13662 = vmatprep.subr.bf16.mxu0 %v16535_v49  ;;  %14277 = vmatprep.subr.bf16.mxu1 %v16537_v19  ;;  %v16584_v49 = vcombine.low %v1950_v9, %v1954_v10  ;;  %v16591_v19 = vcombine.high %v1957_v24, %v1961_v4  ;;  %v16593_v54 = vcombine.high %v1958_v14, %v1962_v15  ;;  %v2006_v6 = vld [vmem:[%s17868_s30 + $0x3558] sm:$0xff] }
 0x77c   : > { %v2010_v9 = vld [vmem:[%s17868_s30 + $0x3578] sm:$0xff]  ;;  %v16630_v10 = vcombine.low %v1997_v26, %v2001_v61 }
 0x77e   : > { %13663 = vmatpush1.bf16.msra.mxu0 %v16534_v23  ;;  %14278 = vmatpush1.bf16.msra.mxu1 %v16536_v17  ;;  %v1970_v23 = vld [vmem:[%s17868_s30 + $0x3438] sm:$0xff]  ;;  %v16590_v17 = vcombine.low %v1957_v24, %v1961_v4  ;;  %v2017_v24 = vld [vmem:[%s17868_s30 + $0x35b0] sm:$0xff] }
 0x77f   : > { %13664 = vmatprep.subr.bf16.mxu0 %v16543_v31  ;;  %14279 = vmatprep.subr.bf16.mxu1 %v16545_v33  ;;  %v16592_v31 = vcombine.low %v1958_v14, %v1962_v15  ;;  %v16599_v33 = vcombine.high %v1965_v1, %v1969_v27  ;;  %v16601_v35 = vcombine.high %v1966_v40, %v1970_v23  ;;  %v2014_v4 = vld [vmem:[%s17868_s30 + $0x3598] sm:$0xff] }
 0x780   : > { %v2018_v14 = vld [vmem:[%s17868_s30 + $0x35b8] sm:$0xff] }
 0x782   : > { %13665 = vmatpush1.bf16.msra.mxu0 %v16542_v58  ;;  %14280 = vmatpush1.bf16.msra.mxu1 %v16544_v47  ;;  %v1978_v58 = vld [vmem:[%s17868_s30 + $0x3478] sm:$0xff]  ;;  %v16598_v47 = vcombine.low %v1965_v1, %v1969_v27  ;;  %v2025_v1 = vld [vmem:[%s17868_s30 + $0x35f0] sm:$0xff] }
 0x783   : > { %13666 = vmatprep.subr.bf16.mxu0 %v16551_v36  ;;  %14281 = vmatprep.subr.bf16.mxu1 %v16553_v16  ;;  %v16600_v36 = vcombine.low %v1966_v40, %v1970_v23  ;;  %v16607_v16 = vcombine.high %v1973_v21, %v1977_v25  ;;  %v16609_v38 = vcombine.high %v1974_v5, %v1978_v58  ;;  %v2022_v27 = vld [vmem:[%s17868_s30 + $0x35d8] sm:$0xff] }
 0x784   : > { %v2026_v40 = vld [vmem:[%s17868_s30 + $0x35f8] sm:$0xff] }
 0x786   : > { %13667 = vmatpush1.bf16.msra.mxu0 %v16550_v59  ;;  %14282 = vmatpush1.bf16.msra.mxu1 %v16552_v39  ;;  %v1986_v59 = vld [vmem:[%s17868_s30 + $0x34b8] sm:$0xff]  ;;  %v16606_v39 = vcombine.low %v1973_v21, %v1977_v25  ;;  %v2033_v21 = vld [vmem:[%s17868_s30 + $0x3630] sm:$0xff] }
 0x787   : > { %13668 = vmatprep.subr.bf16.mxu0 %v16559_v50  ;;  %14283 = vmatprep.subr.bf16.mxu1 %v16561_v41  ;;  %v16608_v50 = vcombine.low %v1974_v5, %v1978_v58  ;;  %v16615_v41 = vcombine.high %v1981_v45, %v1985_v37  ;;  %v16617_v42 = vcombine.high %v1982_v60, %v1986_v59  ;;  %v2030_v25 = vld [vmem:[%s17868_s30 + $0x3618] sm:$0xff] }
 0x788   : > { %v2034_v5 = vld [vmem:[%s17868_s30 + $0x3638] sm:$0xff] }
 0x78a   : > { %13669 = vmatpush1.bf16.msra.mxu0 %v16558_v44  ;;  %14284 = vmatpush1.bf16.msra.mxu1 %v16560_v48  ;;  %v1994_v44 = vld [vmem:[%s17868_s30 + $0x34f8] sm:$0xff]  ;;  %v16616_v48 = vcombine.low %v1982_v60, %v1986_v59 }
 0x78b   : > { %13670 = vmatprep.subr.bf16.mxu0 %v16567_v53  ;;  %14285 = vmatprep.subr.bf16.mxu1 %v16569_v57  ;;  %v16623_v53 = vcombine.high %v1989_v20, %v1993_v43  ;;  %v16625_v57 = vcombine.high %v1990_v55, %v1994_v44  ;;  %v2042_v60 = vld [vmem:[%s17868_s30 + $0x3678] sm:$0xff] }
 0x78e   : > { %13671 = vmatpush1.bf16.msra.mxu0 %v16566_v13  ;;  %14286 = vmatpush1.bf16.msra.mxu1 %v16568_v0  ;;  %v16622_v13 = vcombine.low %v1989_v20, %v1993_v43  ;;  %v16631_v0 = vcombine.high %v1997_v26, %v2001_v61  ;;  %v2049_v20 = vld [vmem:[%s17868_s30 + $0x36b0] sm:$0xff]  ;;  %v2046_v43 = vld [vmem:[%s17868_s30 + $0x3698] sm:$0xff] }
 0x78f   : > { %13672 = vmatprep.subr.bf16.mxu0 %v16575_v3  ;;  %14287 = vmatprep.subr.bf16.mxu1 %v16577_v51  ;;  %v16633_v3 = vcombine.high %v1998_v62, %v2002_v63  ;;  %v2005_v51 = vld [vmem:[%s17868_s30 + $0x3550] sm:$0xff]  ;;  %v2054_v61 = vld [vmem:[%s17868_s30 + $0x36d8] sm:$0xff] }
 0x790   : > { %v16638_v15 = vcombine.low %v2005_v51, %v2009_v7  ;;  %v2057_v26 = vld [vmem:[%s17868_s30 + $0x36f0] sm:$0xff] }
 0x792   : > { %13673 = vmatpush1.bf16.msra.mxu0 %v16574_v52  ;;  %14288 = vmatpush1.bf16.msra.mxu1 %v16576_v11  ;;  %v16632_v52 = vcombine.low %v1998_v62, %v2002_v63  ;;  %v16639_v11 = vcombine.high %v2005_v51, %v2009_v7  ;;  %v2058_v62 = vld [vmem:[%s17868_s30 + $0x36f8] sm:$0xff]  ;;  %v2065_v51 = vld [vmem:[%s17868_s30 + $0x3730] sm:$0xff] }
 0x793   : > { %13674 = vmatprep.subr.bf16.mxu0 %v16583_v56  ;;  %14289 = vmatprep.subr.bf16.mxu1 %v16585_v12  ;;  %v16641_v56 = vcombine.high %v2006_v6, %v2010_v9  ;;  %v2013_v12 = vld [vmem:[%s17868_s30 + $0x3590] sm:$0xff]  ;;  %v2062_v7 = vld [vmem:[%s17868_s30 + $0x3718] sm:$0xff] }
 0x794   : > { %v16646_v23 = vcombine.low %v2013_v12, %v2017_v24 }
 0x796   : > { %13675 = vmatpush1.bf16.msra.mxu0 %v16582_v18  ;;  %14290 = vmatpush1.bf16.msra.mxu1 %v16584_v49  ;;  %v16640_v18 = vcombine.low %v2006_v6, %v2010_v9  ;;  %v16647_v49 = vcombine.high %v2013_v12, %v2017_v24  ;;  %v2066_v6 = vld [vmem:[%s17868_s30 + $0x3738] sm:$0xff]  ;;  %v2073_v12 = vld [vmem:[%s17868_s30 + $0x3770] sm:$0xff] }
 0x797   : > { %13676 = vmatprep.subr.bf16.mxu0 %v16591_v19  ;;  %14291 = vmatprep.subr.bf16.mxu1 %v16593_v54  ;;  %v16649_v19 = vcombine.high %v2014_v4, %v2018_v14  ;;  %v2021_v54 = vld [vmem:[%s17868_s30 + $0x35d0] sm:$0xff]  ;;  %v2070_v24 = vld [vmem:[%s17868_s30 + $0x3758] sm:$0xff] }
 0x798   : > { %v16654_v58 = vcombine.low %v2021_v54, %v2025_v1 }
 0x79a   : > { %13677 = vmatpush1.bf16.msra.mxu0 %v16590_v17  ;;  %14292 = vmatpush1.bf16.msra.mxu1 %v16592_v31  ;;  %v16648_v17 = vcombine.low %v2014_v4, %v2018_v14  ;;  %v16655_v31 = vcombine.high %v2021_v54, %v2025_v1  ;;  %v2074_v4 = vld [vmem:[%s17868_s30 + $0x3778] sm:$0xff]  ;;  %v2081_v54 = vld [vmem:[%s17868_s30 + $0x37b0] sm:$0xff] }
 0x79b   : > { %13687 = vmatprep.subr.bf16.mxu0 %v16599_v33  ;;  %14302 = vmatprep.subr.bf16.mxu1 %v16601_v35  ;;  %v16657_v33 = vcombine.high %v2022_v27, %v2026_v40  ;;  %v2029_v35 = vld [vmem:[%s17868_s30 + $0x3610] sm:$0xff]  ;;  %v2078_v1 = vld [vmem:[%s17868_s30 + $0x3798] sm:$0xff] }
 0x79c   : > { %v16662_v59 = vcombine.low %v2029_v35, %v2033_v21 }
 0x79d   : > { %13679 = vmatmul.mubr.bf16.vlgmr.msra.gmra.mrb[4].mxu0 %v18910_v29  ;;  %14294 = vmatmul.mubr.bf16.vlgmr.msra.gmra.mrb[4].mxu1 %v18910_v29  ;;  %v16614_v29 = vcombine.low %v1981_v45, %v1985_v37  ;;  %v2041_v45 = vld [vmem:[%s17868_s30 + $0x3670] sm:$0xff]  ;;  %v2038_v37 = vld [vmem:[%s17868_s30 + $0x3658] sm:$0xff] }
 0x79e   : > { %13688 = vmatpush1.bf16.msra.mxu0 %v16598_v47  ;;  %14303 = vmatpush1.bf16.msra.mxu1 %v16600_v36  ;;  %v16656_v47 = vcombine.low %v2022_v27, %v2026_v40  ;;  %v16663_v36 = vcombine.high %v2029_v35, %v2033_v21  ;;  %v2082_v27 = vld [vmem:[%s17868_s30 + $0x37b8] sm:$0xff]  ;;  %v2089_v35 = vld [vmem:[%s17868_s30 + $0x37f0] sm:$0xff] }
 0x79f   : > { %13689 = vmatprep.subr.bf16.mxu0 %v16607_v16  ;;  %14304 = vmatprep.subr.bf16.mxu1 %v16609_v38  ;;  %v16665_v16 = vcombine.high %v2030_v25, %v2034_v5  ;;  %v2037_v38 = vld [vmem:[%s17868_s30 + $0x3650] sm:$0xff]  ;;  %v2086_v21 = vld [vmem:[%s17868_s30 + $0x37d8] sm:$0xff] }
 0x7a0   : > { %13719 = vmatprep.mubr.bf16.mxu0 %v18921_v8  ;;  %14334 = vmatprep.mubr.bf16.mxu1 %v18921_v8  ;;  %v16624_v8 = vcombine.low %v1990_v55, %v1994_v44  ;;  %v2050_v55 = vld [vmem:[%s17868_s30 + $0x36b8] sm:$0xff]  ;;  %v16670_v44 = vcombine.low %v2037_v38, %v2041_v45 }
 0x7a2   : > { %13690 = vmatpush1.bf16.msra.mxu0 %v16606_v39  ;;  %14305 = vmatpush1.bf16.msra.mxu1 %v16608_v50  ;;  %v16664_v39 = vcombine.low %v2030_v25, %v2034_v5  ;;  %v16671_v50 = vcombine.high %v2037_v38, %v2041_v45  ;;  %v2090_v25 = vld [vmem:[%s17868_s30 + $0x37f8] sm:$0xff]  ;;  %v2097_v38 = vld [vmem:[%s17868_s30 + $0x3830] sm:$0xff] }
 0x7a3   : > { %13691 = vmatprep.subr.bf16.mxu0 %v16615_v41  ;;  %14306 = vmatprep.subr.bf16.mxu1 %v16617_v42  ;;  %v16673_v41 = vcombine.high %v2038_v37, %v2042_v60  ;;  %v2045_v42 = vld [vmem:[%s17868_s30 + $0x3690] sm:$0xff]  ;;  %v2094_v45 = vld [vmem:[%s17868_s30 + $0x3818] sm:$0xff] }
 0x7a4   : > { %v16678_v63 = vcombine.low %v2045_v42, %v2049_v20 }
 0x7a6   : > { %13692 = vmatpush1.bf16.msra.mxu0 %v16614_v29  ;;  %14307 = vmatpush1.bf16.msra.mxu1 %v16616_v48  ;;  %v16672_v29 = vcombine.low %v2038_v37, %v2042_v60  ;;  %v16679_v48 = vcombine.high %v2045_v42, %v2049_v20  ;;  %v2098_v37 = vld [vmem:[%s17868_s30 + $0x3838] sm:$0xff]  ;;  %v2105_v42 = vld [vmem:[%s17868_s30 + $0x3870] sm:$0xff] }
 0x7a7   : > { %13693 = vmatprep.subr.bf16.mxu0 %v16623_v53  ;;  %14308 = vmatprep.subr.bf16.mxu1 %v16625_v57  ;;  %v16681_v53 = vcombine.high %v2046_v43, %v2050_v55  ;;  %v2053_v57 = vld [vmem:[%s17868_s30 + $0x36d0] sm:$0xff]  ;;  %v2102_v20 = vld [vmem:[%s17868_s30 + $0x3858] sm:$0xff] }
 0x7a8   : > { %v16686_v9 = vcombine.low %v2053_v57, %v2057_v26 }
 0x7aa   : > { %13694 = vmatpush1.bf16.msra.mxu0 %v16622_v13  ;;  %14309 = vmatpush1.bf16.msra.mxu1 %v16624_v8  ;;  %v16680_v13 = vcombine.low %v2046_v43, %v2050_v55  ;;  %v16687_v8 = vcombine.high %v2053_v57, %v2057_v26  ;;  %v2106_v43 = vld [vmem:[%s17868_s30 + $0x3878] sm:$0xff]  ;;  %v2113_v57 = vld [vmem:[%s17868_s30 + $0x38b0] sm:$0xff] }
 0x7ab   : > { %13695 = vmatprep.subr.bf16.mxu0 %v16631_v0  ;;  %14310 = vmatprep.subr.bf16.mxu1 %v16633_v3  ;;  %v16689_v0 = vcombine.high %v2054_v61, %v2058_v62  ;;  %v2061_v3 = vld [vmem:[%s17868_s30 + $0x3710] sm:$0xff]  ;;  %v2110_v26 = vld [vmem:[%s17868_s30 + $0x3898] sm:$0xff] }
 0x7ac   : > { %v16694_v14 = vcombine.low %v2061_v3, %v2065_v51 }
 0x7ae   : > { %13696 = vmatpush1.bf16.msra.mxu0 %v16630_v10  ;;  %14311 = vmatpush1.bf16.msra.mxu1 %v16632_v52  ;;  %v16688_v10 = vcombine.low %v2054_v61, %v2058_v62  ;;  %v16695_v52 = vcombine.high %v2061_v3, %v2065_v51  ;;  %v2114_v61 = vld [vmem:[%s17868_s30 + $0x38b8] sm:$0xff]  ;;  %v2121_v3 = vld [vmem:[%s17868_s30 + $0x38f0] sm:$0xff] }
 0x7af   : > { %13697 = vmatprep.subr.bf16.mxu0 %v16639_v11  ;;  %14312 = vmatprep.subr.bf16.mxu1 %v16641_v56  ;;  %v16697_v11 = vcombine.high %v2062_v7, %v2066_v6  ;;  %v2069_v56 = vld [vmem:[%s17868_s30 + $0x3750] sm:$0xff]  ;;  %v2118_v51 = vld [vmem:[%s17868_s30 + $0x38d8] sm:$0xff] }
 0x7b0   : > { %v16702_v40 = vcombine.low %v2069_v56, %v2073_v12 }
 0x7b2   : > { %13698 = vmatpush1.bf16.msra.mxu0 %v16638_v15  ;;  %14313 = vmatpush1.bf16.msra.mxu1 %v16640_v18  ;;  %v16696_v15 = vcombine.low %v2062_v7, %v2066_v6  ;;  %v16703_v18 = vcombine.high %v2069_v56, %v2073_v12  ;;  %v2122_v7 = vld [vmem:[%s17868_s30 + $0x38f8] sm:$0xff]  ;;  %v16744_v6 = vcombine.low %v2110_v26, %v2114_v61 }
 0x7b3   : > { %13699 = vmatprep.subr.bf16.mxu0 %v16647_v49  ;;  %14314 = vmatprep.subr.bf16.mxu1 %v16649_v19  ;;  %v16705_v49 = vcombine.high %v2070_v24, %v2074_v4  ;;  %v2077_v19 = vld [vmem:[%s17868_s30 + $0x3790] sm:$0xff]  ;;  %v2126_v56 = vld [vmem:[%s17868_s30 + $0x3918] sm:$0xff] }
 0x7b4   : > { %v16710_v5 = vcombine.low %v2077_v19, %v2081_v54  ;;  %v2130_v12 = vld [vmem:[%s17868_s30 + $0x3938] sm:$0xff] }
 0x7b6   : > { %13700 = vmatpush1.bf16.msra.mxu0 %v16646_v23  ;;  %14315 = vmatpush1.bf16.msra.mxu1 %v16648_v17  ;;  %v16704_v23 = vcombine.low %v2070_v24, %v2074_v4  ;;  %v16711_v17 = vcombine.high %v2077_v19, %v2081_v54  ;;  %v2138_v19 = vld [vmem:[%s17868_s30 + $0x3978] sm:$0xff] }
 0x7b7   : > { %13701 = vmatprep.subr.bf16.mxu0 %v16655_v31  ;;  %14316 = vmatprep.subr.bf16.mxu1 %v16657_v33  ;;  %v16713_v31 = vcombine.high %v2078_v1, %v2082_v27  ;;  %v2085_v33 = vld [vmem:[%s17868_s30 + $0x37d0] sm:$0xff] }
 0x7b8   : > { %v16718_v60 = vcombine.low %v2085_v33, %v2089_v35 }
 0x7ba   : > { %13702 = vmatpush1.bf16.msra.mxu0 %v16654_v58  ;;  %14317 = vmatpush1.bf16.msra.mxu1 %v16656_v47  ;;  %v16712_v58 = vcombine.low %v2078_v1, %v2082_v27  ;;  %v16719_v47 = vcombine.high %v2085_v33, %v2089_v35  ;;  %v16760_v1 = vcombine.low %v2126_v56, %v2130_v12  ;;  %v2146_v33 = vld [vmem:[%s17868_s30 + $0x39b8] sm:$0xff] }
 0x7bb   : > { %13703 = vmatprep.subr.bf16.mxu0 %v16663_v36  ;;  %14318 = vmatprep.subr.bf16.mxu1 %v16665_v16  ;;  %v16721_v36 = vcombine.high %v2086_v21, %v2090_v25  ;;  %v2093_v16 = vld [vmem:[%s17868_s30 + $0x3810] sm:$0xff] }
 0x7bc   : > { %v16726_v55 = vcombine.low %v2093_v16, %v2097_v38 }
 0x7be   : > { %13704 = vmatpush1.bf16.msra.mxu0 %v16662_v59  ;;  %14319 = vmatpush1.bf16.msra.mxu1 %v16664_v39  ;;  %v16720_v59 = vcombine.low %v2086_v21, %v2090_v25  ;;  %v16727_v39 = vcombine.high %v2093_v16, %v2097_v38  ;;  %v2154_v16 = vld [vmem:[%s17868_s30 + $0x39f8] sm:$0xff] }
 0x7bf   : > { %13705 = vmatprep.subr.bf16.mxu0 %v16671_v50  ;;  %14320 = vmatprep.subr.bf16.mxu1 %v16673_v41  ;;  %v16729_v50 = vcombine.high %v2094_v45, %v2098_v37  ;;  %v2101_v41 = vld [vmem:[%s17868_s30 + $0x3850] sm:$0xff] }
 0x7c0   : > { %v16734_v62 = vcombine.low %v2101_v41, %v2105_v42 }
 0x7c2   : > { %13706 = vmatpush1.bf16.msra.mxu0 %v16670_v44  ;;  %14321 = vmatpush1.bf16.msra.mxu1 %v16672_v29  ;;  %v16728_v44 = vcombine.low %v2094_v45, %v2098_v37  ;;  %v16735_v29 = vcombine.high %v2101_v41, %v2105_v42  ;;  %v2162_v41 = vld [vmem:[%s17868_s30 + $0x3a38] sm:$0xff] }
 0x7c3   : > { %13707 = vmatprep.subr.bf16.mxu0 %v16679_v48  ;;  %14322 = vmatprep.subr.bf16.mxu1 %v16681_v53  ;;  %v16737_v48 = vcombine.high %v2102_v20, %v2106_v43  ;;  %v2109_v53 = vld [vmem:[%s17868_s30 + $0x3890] sm:$0xff] }
 0x7c6   : > { %13708 = vmatpush1.bf16.msra.mxu0 %v16678_v63  ;;  %14323 = vmatpush1.bf16.msra.mxu1 %v16680_v13  ;;  %v16736_v63 = vcombine.low %v2102_v20, %v2106_v43  ;;  %v16743_v13 = vcombine.high %v2109_v53, %v2113_v57 }
 0x7c7   : > { %13709 = vmatprep.subr.bf16.mxu0 %v16687_v8  ;;  %14324 = vmatprep.subr.bf16.mxu1 %v16689_v0  ;;  %v16745_v8 = vcombine.high %v2110_v26, %v2114_v61  ;;  %v2117_v0 = vld [vmem:[%s17868_s30 + $0x38d0] sm:$0xff] }
 0x7c8   : > { %v16750_v24 = vcombine.low %v2117_v0, %v2121_v3 }
 0x7ca   : > { %13710 = vmatpush1.bf16.msra.mxu0 %v16686_v9  ;;  %14325 = vmatpush1.bf16.msra.mxu1 %v16688_v10  ;;  %v16751_v9 = vcombine.high %v2117_v0, %v2121_v3  ;;  %v16753_v10 = vcombine.high %v2118_v51, %v2122_v7  ;;  %v2178_v0 = vld [vmem:[%s17868_s30 + $0x3ab8] sm:$0xff] }
 0x7cb   : > { %13711 = vmatprep.subr.bf16.mxu0 %v16695_v52  ;;  %14326 = vmatprep.subr.bf16.mxu1 %v16697_v11  ;;  %v2125_v52 = vld [vmem:[%s17868_s30 + $0x3910] sm:$0xff] }
 0x7cc   : > { %v2129_v11 = vld [vmem:[%s17868_s30 + $0x3930] sm:$0xff] }
 0x7cd   : > { %v16759_v4 = vcombine.high %v2125_v52, %v2129_v11  ;;  %v16758_v54 = vcombine.low %v2125_v52, %v2129_v11  ;;  %v2186_v52 = vld [vmem:[%s17868_s30 + $0x3af8] sm:$0xff] }
 0x7ce   : > { %13712 = vmatpush1.bf16.msra.mxu0 %v16694_v14  ;;  %14327 = vmatpush1.bf16.msra.mxu1 %v16696_v15  ;;  %v16761_v14 = vcombine.high %v2126_v56, %v2130_v12  ;;  %v2133_v15 = vld [vmem:[%s17868_s30 + $0x3950] sm:$0xff] }
 0x7cf   : > { %13713 = vmatprep.subr.bf16.mxu0 %v16703_v18  ;;  %14328 = vmatprep.subr.bf16.mxu1 %v16705_v49  ;;  %v2137_v18 = vld [vmem:[%s17868_s30 + $0x3970] sm:$0xff]  ;;  %v2134_v49 = vld [vmem:[%s17868_s30 + $0x3958] sm:$0xff] }
 0x7d0   : > { %v16767_v27 = vcombine.high %v2133_v15, %v2137_v18  ;;  %v16766_v35 = vcombine.low %v2133_v15, %v2137_v18  ;;  %v16768_v21 = vcombine.low %v2134_v49, %v2138_v19  ;;  %v2194_v15 = vld [vmem:[%s17868_s30 + $0x3b38] sm:$0xff] }
 0x7d2   : > { %13714 = vmatpush1.bf16.msra.mxu0 %v16702_v40  ;;  %14329 = vmatpush1.bf16.msra.mxu1 %v16704_v23  ;;  %v16769_v40 = vcombine.high %v2134_v49, %v2138_v19  ;;  %v2141_v23 = vld [vmem:[%s17868_s30 + $0x3990] sm:$0xff] }
 0x7d3   : > { %13715 = vmatprep.subr.bf16.mxu0 %v16711_v17  ;;  %14330 = vmatprep.subr.bf16.mxu1 %v16713_v31  ;;  %v2145_v17 = vld [vmem:[%s17868_s30 + $0x39b0] sm:$0xff]  ;;  %v2142_v31 = vld [vmem:[%s17868_s30 + $0x3998] sm:$0xff] }
 0x7d4   : > { %v16775_v25 = vcombine.high %v2141_v23, %v2145_v17  ;;  %v16774_v38 = vcombine.low %v2141_v23, %v2145_v17  ;;  %v16776_v45 = vcombine.low %v2142_v31, %v2146_v33  ;;  %v2202_v23 = vld [vmem:[%s17868_s30 + $0x3b78] sm:$0xff] }
 0x7d6   : > { %13716 = vmatpush1.bf16.msra.mxu0 %v16710_v5  ;;  %14331 = vmatpush1.bf16.msra.mxu1 %v16712_v58  ;;  %v16777_v5 = vcombine.high %v2142_v31, %v2146_v33  ;;  %v2149_v58 = vld [vmem:[%s17868_s30 + $0x39d0] sm:$0xff] }
 0x7d7   : > { %13717 = vmatprep.subr.bf16.mxu0 %v16719_v47  ;;  %14332 = vmatprep.subr.bf16.mxu1 %v16721_v36  ;;  %v2153_v47 = vld [vmem:[%s17868_s30 + $0x39f0] sm:$0xff]  ;;  %v2150_v36 = vld [vmem:[%s17868_s30 + $0x39d8] sm:$0xff] }
 0x7d8   : > { %v16783_v37 = vcombine.high %v2149_v58, %v2153_v47  ;;  %v16782_v42 = vcombine.low %v2149_v58, %v2153_v47  ;;  %v16784_v20 = vcombine.low %v2150_v36, %v2154_v16  ;;  %v2210_v58 = vld [vmem:[%s17868_s30 + $0x3bb8] sm:$0xff] }
 0x7da   : > { %13718 = vmatpush1.bf16.msra.mxu0 %v16718_v60  ;;  %14333 = vmatpush1.bf16.msra.mxu1 %v16720_v59  ;;  %v16785_v60 = vcombine.high %v2150_v36, %v2154_v16  ;;  %v2157_v59 = vld [vmem:[%s17868_s30 + $0x3a10] sm:$0xff] }
 0x7db   : > { %13728 = vmatprep.subr.bf16.mxu0 %v16727_v39  ;;  %14343 = vmatprep.subr.bf16.mxu1 %v16729_v50  ;;  %v2161_v39 = vld [vmem:[%s17868_s30 + $0x3a30] sm:$0xff]  ;;  %v2158_v50 = vld [vmem:[%s17868_s30 + $0x3a18] sm:$0xff] }
 0x7dc   : > { %v16791_v43 = vcombine.high %v2157_v59, %v2161_v39  ;;  %v16792_v26 = vcombine.low %v2158_v50, %v2162_v41 }
 0x7dd   : > { %13720 = vmatmul.mubr.bf16.vlgmr.msra.gmra.mrb[4].mxu0 %v18989_v2  ;;  %14335 = vmatmul.mubr.bf16.vlgmr.msra.gmra.mrb[4].mxu1 %v18989_v2  ;;  %v16742_v2 = vcombine.low %v2109_v53, %v2113_v57  ;;  %v2170_v53 = vld [vmem:[%s17868_s30 + $0x3a78] sm:$0xff]  ;;  %v16790_v57 = vcombine.low %v2157_v59, %v2161_v39 }
 0x7de   : > { %13729 = vmatpush1.bf16.msra.mxu0 %v16726_v55  ;;  %14344 = vmatpush1.bf16.msra.mxu1 %v16728_v44  ;;  %v16793_v55 = vcombine.high %v2158_v50, %v2162_v41  ;;  %v2165_v44 = vld [vmem:[%s17868_s30 + $0x3a50] sm:$0xff]  ;;  %v2218_v59 = vld [vmem:[%s17868_s30 + $0x3bf8] sm:$0xff] }
 0x7df   : > { %13730 = vmatprep.subr.bf16.mxu0 %v16735_v29  ;;  %14345 = vmatprep.subr.bf16.mxu1 %v16737_v48  ;;  %v2169_v29 = vld [vmem:[%s17868_s30 + $0x3a70] sm:$0xff]  ;;  %v2166_v48 = vld [vmem:[%s17868_s30 + $0x3a58] sm:$0xff] }
 0x7e0   : > { %13760 = vmatprep.mubr.bf16.mxu0 %v19000_v32  ;;  %14375 = vmatprep.mubr.bf16.mxu1 %v19000_v32  ;;  %v16752_v32 = vcombine.low %v2118_v51, %v2122_v7  ;;  %v16799_v61 = vcombine.high %v2165_v44, %v2169_v29  ;;  %v16798_v3 = vcombine.low %v2165_v44, %v2169_v29  ;;  %v17311_v44 = vld [vmem:[%s17875_s10 + $0xc0] sm:$0xff]  }
 0x7e1   : > { %v16800_v51 = vcombine.low %v2166_v48, %v2170_v53  ;;  %v17312_v29 = vld [vmem:[%s17875_s10] sm:$0xff]  }
 0x7e2   : > { %13731 = vmatpush1.bf16.msra.mxu0 %v16734_v62  ;;  %14346 = vmatpush1.bf16.msra.mxu1 %v16736_v63  ;;  %v16801_v62 = vcombine.high %v2166_v48, %v2170_v53  ;;  %v2173_v63 = vld [vmem:[%s17868_s30 + $0x3a90] sm:$0xff]  ;;  %v17313_v48 = vld [vmem:[%s17875_s10 + $0x80] sm:$0xff]   ;;  %v17314_v53 = vld [vmem:[%s17875_s10 + $0x48] sm:$0xff]  }
 0x7e3   : > { %13732 = vmatprep.subr.bf16.mxu0 %v16743_v13  ;;  %14347 = vmatprep.subr.bf16.mxu1 %v16745_v8  ;;  %v2177_v13 = vld [vmem:[%s17868_s30 + $0x3ab0] sm:$0xff]  ;;  %v2174_v8 = vld [vmem:[%s17868_s30 + $0x3a98] sm:$0xff] }
 0x7e4   : > { %v16807_v7 = vcombine.high %v2173_v63, %v2177_v13  ;;  %v16806_v11 = vcombine.low %v2173_v63, %v2177_v13  ;;  %v16808_v56 = vcombine.low %v2174_v8, %v2178_v0  ;;  %v17319_v63 = vld [vmem:[%s17875_s10 + $0xd0] sm:$0xff]  }
 0x7e5   : > { %v17320_v13 = vld [vmem:[%s17875_s10 + $0x10] sm:$0xff]  }
 0x7e6   : > { %13733 = vmatpush1.bf16.msra.mxu0 %v16742_v2  ;;  %14348 = vmatpush1.bf16.msra.mxu1 %v16744_v6  ;;  %v16809_v2 = vcombine.high %v2174_v8, %v2178_v0  ;;  %v2181_v6 = vld [vmem:[%s17868_s30 + $0x3ad0] sm:$0xff]  ;;  %v17323_v0 = vld [vmem:[%s17875_s10 + $0xd8] sm:$0xff]  }
 0x7e7   : > { %13734 = vmatprep.subr.bf16.mxu0 %v16751_v9  ;;  %14349 = vmatprep.subr.bf16.mxu1 %v16753_v10  ;;  %v2185_v9 = vld [vmem:[%s17868_s30 + $0x3af0] sm:$0xff]  ;;  %v2182_v10 = vld [vmem:[%s17868_s30 + $0x3ad8] sm:$0xff] }
 0x7e8   : > { %v16815_v12 = vcombine.high %v2181_v6, %v2185_v9  ;;  %v16814_v18 = vcombine.low %v2181_v6, %v2185_v9  ;;  %v16816_v49 = vcombine.low %v2182_v10, %v2186_v52  ;;  %v17321_v8 = vld [vmem:[%s17875_s10 + $0x90] sm:$0xff]   ;;  %v17328_v6 = vld [vmem:[%s17875_s10 + $0x20] sm:$0xff]  }
 0x7e9   : > { %v17329_v9 = vld [vmem:[%s17875_s10 + $0xa0] sm:$0xff]  }
 0x7ea   : > { %13735 = vmatpush1.bf16.msra.mxu0 %v16750_v24  ;;  %14350 = vmatpush1.bf16.msra.mxu1 %v16752_v32  ;;  %v16817_v24 = vcombine.high %v2182_v10, %v2186_v52  ;;  %v2189_v32 = vld [vmem:[%s17868_s30 + $0x3b10] sm:$0xff]  ;;  %v17330_v10 = vld [vmem:[%s17875_s10 + $0x68] sm:$0xff]  }
 0x7eb   : > { %13736 = vmatprep.subr.bf16.mxu0 %v16759_v4  ;;  %14351 = vmatprep.subr.bf16.mxu1 %v16761_v14  ;;  %v2193_v4 = vld [vmem:[%s17868_s30 + $0x3b30] sm:$0xff]  ;;  %v2190_v14 = vld [vmem:[%s17868_s30 + $0x3b18] sm:$0xff]  ;;  %v17331_v52 = vld [vmem:[%s17875_s10 + $0xe8] sm:$0xff]  }
 0x7ec   : > { %v16823_v19 = vcombine.high %v2189_v32, %v2193_v4  ;;  %v16822_v17 = vcombine.low %v2189_v32, %v2193_v4  ;;  %v16824_v31 = vcombine.low %v2190_v14, %v2194_v15  ;;  %v17336_v32 = vld [vmem:[%s17875_s10 + $0x30] sm:$0xff]  }
 0x7ed   : > { %v17337_v4 = vld [vmem:[%s17875_s10 + $0xb0] sm:$0xff]  }
 0x7ee   : > { %13737 = vmatpush1.bf16.msra.mxu0 %v16758_v54  ;;  %14352 = vmatpush1.bf16.msra.mxu1 %v16760_v1  ;;  %v16825_v54 = vcombine.high %v2190_v14, %v2194_v15  ;;  %v2197_v1 = vld [vmem:[%s17868_s30 + $0x3b50] sm:$0xff]  ;;  %v17338_v14 = vld [vmem:[%s17875_s10 + $0x78] sm:$0xff]  }
 0x7ef   : > { %13738 = vmatprep.subr.bf16.mxu0 %v16767_v27  ;;  %14353 = vmatprep.subr.bf16.mxu1 %v16769_v40  ;;  %v2201_v27 = vld [vmem:[%s17868_s30 + $0x3b70] sm:$0xff]  ;;  %v2198_v40 = vld [vmem:[%s17868_s30 + $0x3b58] sm:$0xff] }
 0x7f0   : > { %v16831_v33 = vcombine.high %v2197_v1, %v2201_v27  ;;  %v16830_v47 = vcombine.low %v2197_v1, %v2201_v27  ;;  %v16832_v36 = vcombine.low %v2198_v40, %v2202_v23  ;;  %v17339_v15 = vld [vmem:[%s17875_s10 + $0xf8] sm:$0xff]  }
 0x7f2   : > { %13739 = vmatpush1.bf16.msra.mxu0 %v16766_v35  ;;  %14354 = vmatpush1.bf16.msra.mxu1 %v16768_v21  ;;  %v16833_v35 = vcombine.high %v2198_v40, %v2202_v23  ;;  %v2205_v21 = vld [vmem:[%s17868_s30 + $0x3b90] sm:$0xff]  ;;  %v14386_v23 = vmul.f32 %v19304_v28, %v19304_v28 }
 0x7f3   : > { %13740 = vmatprep.subr.bf16.mxu0 %v16775_v25  ;;  %14355 = vmatprep.subr.bf16.mxu1 %v16777_v5  ;;  %v2209_v25 = vld [vmem:[%s17868_s30 + $0x3bb0] sm:$0xff]  ;;  %v2206_v5 = vld [vmem:[%s17868_s30 + $0x3b98] sm:$0xff] }
 0x7f4   : > { %v16839_v16 = vcombine.high %v2205_v21, %v2209_v25  ;;  %v16838_v39 = vcombine.low %v2205_v21, %v2209_v25  ;;  %v16840_v50 = vcombine.low %v2206_v5, %v2210_v58  ;;  %v14387_v25 = vmul.f32 %v19310_v34, %v19310_v34 }
 0x7f6   : > { %13741 = vmatpush1.bf16.msra.mxu0 %v16774_v38  ;;  %14356 = vmatpush1.bf16.msra.mxu1 %v16776_v45  ;;  %v16841_v38 = vcombine.high %v2206_v5, %v2210_v58  ;;  %v2213_v45 = vld [vmem:[%s17868_s30 + $0x3bd0] sm:$0xff] }
 0x7f7   : > { %13742 = vmatprep.subr.bf16.mxu0 %v16783_v37  ;;  %14357 = vmatprep.subr.bf16.mxu1 %v16785_v60  ;;  %v2217_v37 = vld [vmem:[%s17868_s30 + $0x3bf0] sm:$0xff]  ;;  %v2214_v60 = vld [vmem:[%s17868_s30 + $0x3bd8] sm:$0xff] }
 0x7f8   : > { %v16847_v41 = vcombine.high %v2213_v45, %v2217_v37 }
 0x7fa   : > { %13743 = vmatpush1.bf16.msra.mxu0 %v16782_v42  ;;  %14358 = vmatpush1.bf16.msra.mxu1 %v16784_v20  ;;  %v16849_v42 = vcombine.high %v2214_v60, %v2218_v59  ;;  %v16846_v20 = vcombine.low %v2213_v45, %v2217_v37 }
 0x7fb   : > { %13744 = vmatprep.subr.bf16.mxu0 %v16791_v43  ;;  %14359 = vmatprep.subr.bf16.mxu1 %v16793_v55  ;;  %v16848_v43 = vcombine.low %v2214_v60, %v2218_v59  ;;  %v17310_v55 = vld [vmem:[%s17875_s10 + $0x40] sm:$0xff]  }
 0x7fe   : > { %13745 = vmatpush1.bf16.msra.mxu0 %v16790_v57  ;;  %14360 = vmatpush1.bf16.msra.mxu1 %v16792_v26  ;;  %v17315_v57 = vld [vmem:[%s17875_s10 + $0xc8] sm:$0xff]  }
 0x7ff   : > { %13746 = vmatprep.subr.bf16.mxu0 %v16799_v61  ;;  %14361 = vmatprep.subr.bf16.mxu1 %v16801_v62  ;;  %v17316_v26 = vld [vmem:[%s17875_s10 + $0x8] sm:$0xff]   ;;  %v17318_v62 = vld [vmem:[%s17875_s10 + $0x50] sm:$0xff]  }
 0x800   : > { %v17317_v61 = vld [vmem:[%s17875_s10 + $0x88] sm:$0xff]  }
 0x802   : > { %13747 = vmatpush1.bf16.msra.mxu0 %v16798_v3  ;;  %14362 = vmatpush1.bf16.msra.mxu1 %v16800_v51  ;;  %v17324_v3 = vld [vmem:[%s17875_s10 + $0x18] sm:$0xff]  }
 0x803   : > { %13748 = vmatprep.subr.bf16.mxu0 %v16807_v7  ;;  %14363 = vmatprep.subr.bf16.mxu1 %v16809_v2  ;;  %v17325_v51 = vld [vmem:[%s17875_s10 + $0x98] sm:$0xff]   ;;  %v17326_v7 = vld [vmem:[%s17875_s10 + $0x60] sm:$0xff]  }
 0x804   : > { %v17327_v2 = vld [vmem:[%s17875_s10 + $0xe0] sm:$0xff]  }
 0x806   : > { %13749 = vmatpush1.bf16.msra.mxu0 %v16806_v11  ;;  %14364 = vmatpush1.bf16.msra.mxu1 %v16808_v56  ;;  %v17332_v11 = vld [vmem:[%s17875_s10 + $0x28] sm:$0xff]  }
 0x807   : > { %13750 = vmatprep.subr.bf16.mxu0 %v16815_v12  ;;  %14365 = vmatprep.subr.bf16.mxu1 %v16817_v24  ;;  %v17333_v56 = vld [vmem:[%s17875_s10 + $0xa8] sm:$0xff]   ;;  %v17334_v12 = vld [vmem:[%s17875_s10 + $0x70] sm:$0xff]  }
 0x808   : > { %v17335_v24 = vld [vmem:[%s17875_s10 + $0xf0] sm:$0xff]  }
 0x80a   : > { %13751 = vmatpush1.bf16.msra.mxu0 %v16814_v18  ;;  %14366 = vmatpush1.bf16.msra.mxu1 %v16816_v49  ;;  %v17340_v18 = vld [vmem:[%s17875_s10 + $0x38] sm:$0xff]  }
 0x80b   : > { %13752 = vmatprep.subr.bf16.mxu0 %v16823_v19  ;;  %14367 = vmatprep.subr.bf16.mxu1 %v16825_v54  ;;  %v17341_v49 = vld [vmem:[%s17875_s10 + $0xb8] sm:$0xff]   ;;  %v14384_v54 = vmul.f32 %v19300_v22, %v19300_v22 }
 0x80e   : > { %13753 = vmatpush1.bf16.msra.mxu0 %v16822_v17  ;;  %14368 = vmatpush1.bf16.msra.mxu1 %v16824_v31  ;;  %v14385_v17 = vmul.f32 %v19306_v30, %v19306_v30 }
 0x80f   : > { %13754 = vmatprep.subr.bf16.mxu0 %v16831_v33  ;;  %14369 = vmatprep.subr.bf16.mxu1 %v16833_v35 }
 0x812   : > { %13755 = vmatpush1.bf16.msra.mxu0 %v16830_v47  ;;  %14370 = vmatpush1.bf16.msra.mxu1 %v16832_v36 }
 0x813   : > { %13756 = vmatprep.subr.bf16.mxu0 %v16839_v16  ;;  %14371 = vmatprep.subr.bf16.mxu1 %v16841_v38 }
 0x816   : > { %13757 = vmatpush1.bf16.msra.mxu0 %v16838_v39  ;;  %14372 = vmatpush1.bf16.msra.mxu1 %v16840_v50 }
 0x817   : > { %13758 = vmatprep.subr.bf16.mxu0 %v16847_v41  ;;  %14373 = vmatprep.subr.bf16.mxu1 %v16849_v42 }
 0x81a   : > { %13759 = vmatpush1.bf16.msra.mxu0 %v16846_v20  ;;  %14374 = vmatpush1.bf16.msra.mxu1 %v16848_v43 }
 0x81b   : > { %16889 = vmatprep.subr.bf16.mxu0 %v17310_v55  ;;  %16911 = vmatprep.subr.bf16.mxu1 %v17311_v44  ;;  %v14400_v44 = vld [vmem:[%s17877_s5] sm:$0xff] }
 0x81d   : > { %13761 = vmatmul.mubr.bf16.vlgmr.msra.gmra.mrb[4].mxu0 %v19068_v46  ;;  %14376 = vmatmul.mubr.bf16.vlgmr.msra.gmra.mrb[4].mxu1 %v19068_v46  ;;  %v17322_v46 = vld [vmem:[%s17875_s10 + $0x58] sm:$0xff]  }
 0x81e   : > { %16890 = vmatpush3.bf16.msra.mxu0 %v17312_v29  ;;  %16912 = vmatpush3.bf16.msra.mxu1 %v17313_v48 }
 0x81f   : > { %16891 = vmatprep.subr.bf16.mxu0 %v17314_v53  ;;  %16913 = vmatprep.subr.bf16.mxu1 %v17315_v57 }
 0x822   : > { %16892 = vmatpush3.bf16.msra.mxu0 %v17316_v26  ;;  %16914 = vmatpush3.bf16.msra.mxu1 %v17317_v61 }
 0x823   : > { %16893 = vmatprep.subr.bf16.mxu0 %v17318_v62  ;;  %16915 = vmatprep.subr.bf16.mxu1 %v17319_v63 }
 0x826   : > { %16894 = vmatpush3.bf16.msra.mxu0 %v17320_v13  ;;  %16916 = vmatpush3.bf16.msra.mxu1 %v17321_v8 }
 0x827   : > { %16895 = vmatprep.subr.bf16.mxu0 %v17322_v46  ;;  %16917 = vmatprep.subr.bf16.mxu1 %v17323_v0 }
 0x82a   : > { %16896 = vmatpush3.bf16.msra.mxu0 %v17324_v3  ;;  %16918 = vmatpush3.bf16.msra.mxu1 %v17325_v51 }
 0x82b   : > { %16897 = vmatprep.subr.bf16.mxu0 %v17326_v7  ;;  %16919 = vmatprep.subr.bf16.mxu1 %v17327_v2 }
 0x82e   : > { %16898 = vmatpush3.bf16.msra.mxu0 %v17328_v6  ;;  %16920 = vmatpush3.bf16.msra.mxu1 %v17329_v9 }
 0x82f   : > { %16899 = vmatprep.subr.bf16.mxu0 %v17330_v10  ;;  %16921 = vmatprep.subr.bf16.mxu1 %v17331_v52 }
 0x832   : > { %16900 = vmatpush3.bf16.msra.mxu0 %v17332_v11  ;;  %16922 = vmatpush3.bf16.msra.mxu1 %v17333_v56 }
 0x833   : > { %16901 = vmatprep.subr.bf16.mxu0 %v17334_v12  ;;  %16923 = vmatprep.subr.bf16.mxu1 %v17335_v24 }
 0x836   : > { %16902 = vmatpush3.bf16.msra.mxu0 %v17336_v32  ;;  %16924 = vmatpush3.bf16.msra.mxu1 %v17337_v4 }
 0x837   : > { %16903 = vmatprep.subr.bf16.mxu0 %v17338_v14  ;;  %16925 = vmatprep.subr.bf16.mxu1 %v17339_v15 }
 0x83a   : > { %16904 = vmatpush3.bf16.msra.mxu0 %v17340_v18  ;;  %16926 = vmatpush3.bf16.msra.mxu1 %v17341_v49 }
 0x8f0   : > { %v13762_v19 = vpop.f32.mrb[4].mxu0  ;;  %v14377_v27 = vpop.f32.mrb[4].mxu1 }
 0x8f1   : > { %v14388_v1 = vmul.f32 %v13762_v19, %v13762_v19  ;;  %v13764_v40 = vpop.f32.mrb[5].mxu0  ;;  %v14390_v31 = vmul.f32 %v14377_v27, %v14377_v27  ;;  %v14379_v35 = vpop.f32.mrb[5].mxu1 }
 0x8f2   : > { %v14389_v33 = vmul.f32 %v13764_v40, %v13764_v40  ;;  %v13766_v21 = vpop.f32.mrb[6].mxu0  ;;  %v14391_v58 = vmul.f32 %v14379_v35, %v14379_v35  ;;  %v14381_v47 = vpop.f32.mrb[6].mxu1 }
 0x8f3   : > { %v14392_v5 = vadd.f32 %v14388_v1, %v14384_v54  ;;  %v13767_v22 = vpop.f32.mrb[7].mxu0  ;;  %v14394_v36 = vadd.f32 %v14390_v31, %v14386_v23  ;;  %v14382_v38 = vpop.f32.mrb[7].mxu1 }
 0x8f4   : > { %v14393_v16 = vadd.f32 %v14389_v33, %v14385_v17  ;;  %v14395_v45 = vadd.f32 %v14391_v58, %v14387_v25 }
 0x8f5   : > { %v14396_v28 = vpack.c.bf16 %v14392_v5, %v14392_v5  ;;  %v14398_v30 = vpack.c.bf16 %v14394_v36, %v14394_v36 }
 0x8f6   : > { %v14397_v37 = vpack.c.bf16 %v14393_v16, %v14393_v16  ;;  %v14399_v60 = vpack.c.bf16 %v14395_v45, %v14395_v45 }
 0x8f8   : > { %14689 = vmatprep.mubr.bf16.mxu0 %v14397_v37  ;;  %14729 = vmatprep.mubr.bf16.mxu1 %v14399_v60 }
 0x8f9   : > { %14690 = vmatmul.mubr.bf16.vlgmr.msra.gmra.mrb[8].mxu0 %v14396_v28  ;;  %14730 = vmatmul.mubr.bf16.vlgmr.msra.gmra.mrb[8].mxu1 %v14398_v30 }
 0x9cc   : > { %v16905_v59 = vpop.f32.mrb[8].mxu0  ;;  %v16927_v34 = vpop.f32.mrb[8].mxu1 }
 0x9cd   : > { %v16906_v39 = vpop.f32.mrb[9].mxu0  ;;  %v16928_v41 = vpop.f32.mrb[9].mxu1 }
 0x9ce   : > { %v16907_v50 = vadd.f32 %v16906_v39, %v16905_v59  ;;  %v16908_v42 = vpop.f32.mrb[10].mxu0  ;;  %v16929_v20 = vadd.f32 %v16928_v41, %v16927_v34  ;;  %v16930_v43 = vpop.f32.mrb[10].mxu1  ;;  %14742 = sbr.rel (%p16882_p6) target bundleno = 2540 (0x9ec), region = 52 }
 0x9cf   : > { %v16909_v55 = vpop.f32.mrb[11].mxu0  ;;  %v16931_v29 = vpop.f32.mrb[11].mxu1 }
 0x9d0   : > { %v14732_v48 = vadd.f32 %v16929_v20, %v16907_v50 }
 0x9d2   : > { %v14737_v53 = vadd.f32 %v14732_v48, %v14400_v44 }
 0x9d4   : > { %14738 = vst [vmem:[%s17877_s5] sm:$0xff] %v14737_v53 }
 0x9db   : > { %v14743_v57 = vld [vmem:[%s17877_s5] sm:$0xff] }
 0x9dc   : > { %v14744_v26 = vadd.f32 1e-05, %v14743_v57 }
 0x9de   : > { %17342 = vlog2.f32 %v14744_v26 }
 0x9e8   : > { %v17343_v61 = vpop.eup %17342 }
 0x9e9   : > { %v14746_v62 = vmul.f32 0.6931472, %v17343_v61 }
 0x9eb   : > { %14747 = vst [vmem:[%s17877_s5] sm:$0xff] %v14746_v62 }
 0x9ec PF: > { %s16884_s26 = sshll.u32 %s17548_s19, 7  ;;  %s20244_s12 = sld [smem:[#allocation21_spill]] }
 0x9ed   : > { %s14762_s18 = sshll.u32 %s17877_s5, 4  ;;  %s14749_s14 = scalar_lea.sflag [#allocation4], %s17856_s6  ;;  %s14763_s18 = int_to_ptr.vmem [resolvable:$true] %s14762_s18 }
 0x9ee   : > { %s17434_s8 = scalar_lea.vmem %s14763_s18, 128  ;;  %p20246_p8 = scmp.ne.s32.totalorder %s20233_s25, 0 }
 0x9ef   : > { %p17435_p3 = scmp.ne.s32.totalorder %s14763_s18, %s17434_s8  ;;  %s17571_s28 = smov [#allocation8]  }
 0x9f0   : > { %s17438_s17 = sshll.u32 %s17571_s28, 4  ;;  %s17439_s17 = int_to_ptr.vmem [resolvable:$false] %s17438_s17 }
 0x9f1   : > { %p17436_p13 = pnand %p17435_p3, %p20246_p8  ;;  %s17440_s23 = scalar_lea.vmem %s17439_s17, 256 }
 0x9f2   : > { %s20245_s29 = smov %s20244_s12  ;;  %s20143_s27 = scalar_lea.hbm %s20244_s12, %s16884_s26 }
 0x9f3   : > { %p17437_p9 = pneg %p17436_p13  ;;  %p17441_p12 = scmp.lt.s32.totalorder %s14763_s18, %s17439_s17 }
 0x9f4   : > { %p17442_p11 = scmp.lt.s32.totalorder %s17440_s23, %s17434_s8 }
 0x9f6   : > { %p17443_p2 = por %p17442_p11, %p17441_p12 }
 0x9f8   : > { %p17444_p1 = pnand %p17443_p2, %p17437_p9 }
 0x9fa   : > { %17447 = shalt.err (!%p17444_p1)
}
 0x9fb   : > { %s17448_s19 = scalar_lea.hbm %s20143_s27, 128  ;;  %s17452_s7 = scalar_lea.hbm %s20245_s29, 256 }
 0x9fc   : > { %p17449_p5 = scmp.ne.s32.totalorder %s20143_s27, %s17448_s19  ;;  %p17453_p4 = scmp.lt.u32.totalorder %s20143_s27, %s20245_s29 }
 0x9fd   : > { %p17454_p10 = scmp.lt.u32.totalorder %s17452_s7, %s17448_s19  ;;  %p17456_p3 = scmp.lt.u32.totalorder %s17448_s19, %s20143_s27 }
 0x9fe   : > { %p17450_p7 = pnand %p17449_p5, %p20246_p8 }
 0x9ff   : > { %p17455_p6 = por %p17454_p10, %p17453_p4 }
 0xa00   : > { %p17451_p0 = pneg %p17450_p7 }
 0xa01   : > { %p17457_p13 = por %p17456_p3, %p17455_p6 }
 0xa03   : > { %p17458_p9 = pnand %p17457_p13, %p17451_p0 }
 0xa05   : > { %17461 = shalt.err (!%p17458_p9)
}
 0xa06   : > { %17168 = dma.vmem_to_hbm [thread:$0]  (%p20246_p8), %s14763_s18, 128, %s20143_s27, %s14749_s14  }
 0xa07 PF: > { %s20247_s30 = sld [smem:[#allocation19_spill]]  ;;  %p17185_p12 = scmp.ge.s32.totalorder %s17560_s22, 2 }
 0xa08   : > { %s14774_s3 = sand.u32 1, %s17532_s15  }
 0xa09   : > { %s14775_s1 = scalar_lea.sflag [#allocation4], %s14774_s3 }
 0xa0d   : > { %p20248_p11 = scmp.ne.s32.totalorder %s20247_s30, 0 }
 0xa0f   : > { %p17181_p2 = pnand %p17185_p12, %p20248_p11 }
 0xa11   : > { %17515 = dma.done.wait (!%p17181_p2), %s14775_s1, 128  }
 0xa12   : > { %17517 = vsyncadd (!%p17181_p2), %s14775_s1, 4294967168  ;;  %s22_s22 = sadd.s32 1, %s17560_s22   ;;  %s20249_s10 = sld [smem:[#allocation12_spill]] }
 0xa13   : > { %p19_p1 = scmp.ge.s32.totalorder %s22_s22, 10   ;;  %s20250_s14 = sld [smem:[#allocation17_spill]] }
 0xa14   : > { %s20251_s25 = sld [smem:[#allocation13_spill]]  ;;  %s20252_s17 = sld [smem:[#allocation18_spill]] }
 0xa15   : > { %s20253_s19 = sld [smem:[#allocation14_spill]]  ;;  %s20254_s5 = sld [smem:[#allocation15_spill]] }
 0xa16   : > { %s20255_s21 = sld [smem:[#allocation16_spill]]  ;;  %s20256_s12 = smov %s17524_s13 }
 0xa17   : > { %s20258_s15 = smov %s17536_s16  ;;  %s20260_s18 = smov %s17552_s20 }
 0xa18   : > { %s20257_s13 = smov %s20249_s10  ;;  %21 = sbr.rel (!%p19_p1) target bundleno = 14 (0xe), region = 109 }
 0xa1a   : > { %s20259_s16 = smov %s20251_s25 }
 0xa1b   : > { %s20261_s20 = smov %s20254_s5 }
 0xa1f   :  { %14780 = vsyncpa [#allocation3], 1 }
 0xa20   :  { %14782 = vsyncpa [#allocation3 + $0x1], 1 }
 0xa21   :  { %14783 = vsyncpa [#allocation6], 1 }
 0xa22   :  { %14785 = vsyncpa [#allocation6 + $0x1], 1 }
 0xa23   :  { %14786 = vsyncpa [#allocation4], 1 }
 0xa24   :  { %14788 = vsyncpa [#allocation4 + $0x1], 1 }

</bundles_post_ra>
